<compile_context>
chip_gen: v6e
topology: v6e:2x2x1
jax: 0.10.0
libtpu: 0.0.40
codegen_flags: <defaults>
</compile_context>

<pallas_src>
import functools
import math

import jax
import jax.numpy as jnp
from jax.experimental import pallas as pl
from jax.experimental.pallas import tpu as pltpu


# ---------------- hyperparameters (hp.*) -- small synthetic values -----------------
class hp:
    mel_bands = 8
    decoder_prenet_affine_size = 32
    transformer_decoder_d_model = 32
    decoder_prenet_conv_width = 3
    decoder_prenet_layer_size = 2
    decoder_pre_dilation_base = 2
    decoder_postnet_layer_size = 2
    decoder_postnet_conv_width = 3
    decoder_post_dilation_base = 2
    transformer_num_head_decoder = 4
    transformer_decoder_dim_feedforward = 64
    charactor_embedding_size = 16
    transformer_decoder_layers = 2
    max_timestep = 64
    w_query = 1.0


# ---------------------------- static conv configuration -----------------------------
def _prenet_cfg():
    cfg = [(1, 1)]
    for i in range(hp.decoder_prenet_layer_size):
        cfg.append((hp.decoder_prenet_conv_width, hp.decoder_pre_dilation_base ** (i % 4)))
    cfg.append((1, 1))
    return tuple(cfg)


def _postnet_cfg():
    return tuple((hp.decoder_postnet_conv_width, hp.decoder_post_dilation_base ** (i % 4))
                 for i in range(hp.decoder_postnet_layer_size))


# ------------------------------ in-kernel building blocks ----------------------------
def _shift_down_mat(T, s):
    """(T, T) matrix M with M[t, t'] = 1 iff t' == t - s (causal shift, zero-fill)."""
    r = jax.lax.broadcasted_iota(jnp.int32, (T, T), 0)
    c = jax.lax.broadcasted_iota(jnp.int32, (T, T), 1)
    return (c == (r - s)).astype(jnp.float32)


def _glu_conv(x, w_ref, b_ref, K, dil):
    """Causal dilated Conv1d with fused GLU weights.
    x: (T, C_in) f32.  w_ref: (K, C_in, 2*C_out).  b_ref: (1, 2*C_out)."""
    T = x.shape[0]
    C2 = w_ref.shape[2]
    C_out = C2 // 2
    y = None
    for k in range(K):
        s = (K - 1 - k) * dil
        xk = x if s == 0 else jnp.dot(_shift_down_mat(T, s), x,
                                      preferred_element_type=jnp.float32)
        t = jnp.dot(xk, w_ref[k], preferred_element_type=jnp.float32)
        y = t if y is None else y + t
    y = y + b_ref[...]
    return y[:, :C_out] * jax.nn.sigmoid(y[:, C_out:])      # GLU gate


def _ln(x, g_ref, b_ref, eps=1e-5):
    mu = jnp.mean(x, axis=-1, keepdims=True)
    var = jnp.mean(jnp.square(x - mu), axis=-1, keepdims=True)
    return (x - mu) * jax.lax.rsqrt(var + eps) * g_ref[...] + b_ref[...]


def _mha(q, k, v, nhead, scale, mask_add=None, need_probs=False):
    """Multi-head attention on (T, D) tensors, heads handled via lane masks
    (no reshape / transpose / concat).  Returns (out (Tq, D), mean-head probs or None)."""
    Tq, D = q.shape
    Tk = k.shape[0]
    Dh = D // nhead
    lane = jax.lax.broadcasted_iota(jnp.int32, (1, D), 1)
    out = jnp.zeros((Tq, D), jnp.float32)
    p_acc = jnp.zeros((Tq, Tk), jnp.float32) if need_probs else None
    for h in range(nhead):
        mh = ((lane >= h * Dh) & (lane < (h + 1) * Dh)).astype(jnp.float32)   # (1, D)
        # zero every lane of q outside head h -> contraction over D only sees head h
        s = jax.lax.dot_general(q * mh, k, (((1,), (1,)), ((), ())),
                                preferred_element_type=jnp.float32) * scale
        if mask_add is not None:
            s = s + mask_add
        s = s - jnp.max(s, axis=-1, keepdims=True)
        e = jnp.exp(s)
        p = e / jnp.sum(e, axis=-1, keepdims=True)
        # (p @ v) is correct on head-h lanes; mask out the rest and accumulate.
        out = out + jnp.dot(p, v, preferred_element_type=jnp.float32) * mh
        if need_probs:
            p_acc = p_acc + p
    if need_probs:
        p_acc = p_acc * (1.0 / nhead)
    return out, p_acc


# ------------------------------ the fused decoder kernel -----------------------------
def _decoder_kernel(*refs, treedef, n_params, prenet_cfg, postnet_cfg, nhead, w_query):
    n_in = 4 + n_params
    inp_ref, keys_ref, vals_ref, pe_ref = refs[0], refs[1], refs[2], refs[3]
    param_refs = refs[4:n_in]
    x_ref, mel_ref, done_ref, attn_ref = refs[n_in:]
    p = jax.tree_util.tree_unflatten(treedef, param_refs)   # dict-of-refs

    x = inp_ref[0].astype(jnp.float32)        # (T, mel_bands)
    keys = keys_ref[0].astype(jnp.float32)    # (S, E)
    vals = vals_ref[0].astype(jnp.float32)    # (S, E)
    T = x.shape[0]

    # ---- prenet: GLU causal conv stack (k=1 -> dilated stack -> k=1) ----
    for (w_r, b_r), (K, dil) in zip(p["prenet"], prenet_cfg):
        x = _glu_conv(x, w_r, b_r, K, dil)

    # ---- positional encoding (scaled sinusoid, already offset by `timestep`) ----
    x = x + w_query * pe_ref[...].astype(jnp.float32)

    # ---- causal target mask, built in-kernel from iota ----
    r = jax.lax.broadcasted_iota(jnp.int32, (T, T), 0)
    c = jax.lax.broadcasted_iota(jnp.int32, (T, T), 1)
    tgt_mask = jnp.where(c > r, jnp.float32(-1e30), jnp.float32(0.0))

    D = x.shape[1]
    scale = 1.0 / math.sqrt(D // nhead)

    # ---- transformer decoder layers ----
    for li, lp in enumerate(p["layers"]):
        # self-attention (fused QKV projection, probs not computed)
        qkv = jnp.dot(x, lp["sa_wqkv"][...],
                      preferred_element_type=jnp.float32) + lp["sa_bqkv"][...]
        sa, _ = _mha(qkv[:, :D], qkv[:, D:2 * D], qkv[:, 2 * D:],
                     nhead, scale, mask_add=tgt_mask, need_probs=False)
        sa = jnp.dot(sa, lp["sa_wo"][...],
                     preferred_element_type=jnp.float32) + lp["sa_bo"][...]
        x = _ln(x + sa, lp["ln1_g"], lp["ln1_b"])

        # cross-attention (K from `keys`, V from `values`); head-mean probs emitted
        q = jnp.dot(x, lp["ca_wq"][...],
                    preferred_element_type=jnp.float32) + lp["ca_bq"][...]
        kk = jnp.dot(keys, lp["ca_wk"][...],
                     preferred_element_type=jnp.float32) + lp["ca_bk"][...]
        vv = jnp.dot(vals, lp["ca_wv"][...],
                     preferred_element_type=jnp.float32) + lp["ca_bv"][...]
        ca, probs = _mha(q, kk, vv, nhead, scale, mask_add=None, need_probs=True)
        ca = jnp.dot(ca, lp["ca_wo"][...],
                     preferred_element_type=jnp.float32) + lp["ca_bo"][...]
        x = _ln(x + ca, lp["ln2_g"], lp["ln2_b"])
        attn_ref[0, li] = probs.astype(attn_ref.dtype)

        # feed-forward
        h = jnp.dot(x, lp["ff_w1"][...],
                    preferred_element_type=jnp.float32) + lp["ff_b1"][...]
        h = jnp.maximum(h, 0.0)
        h = jnp.dot(h, lp["ff_w2"][...],
                    preferred_element_type=jnp.float32) + lp["ff_b2"][...]
        x = _ln(x + h, lp["ln3_g"], lp["ln3_b"])

    # ---- postnet (+ global residual) ----
    y = x
    for (w_r, b_r), (K, dil) in zip(p["postnet"], postnet_cfg):
        y = _glu_conv(y, w_r, b_r, K, dil)
    x = y + x

    # ---- heads ----
    mel = jax.nn.sigmoid(jnp.dot(x, p["mel_w"][...],
                                 preferred_element_type=jnp.float32) + p["mel_b"][...])
    done = jax.nn.sigmoid(jnp.dot(x, p["done_w"][...],
                                  preferred_element_type=jnp.float32) + p["done_b"][...])

    x_ref[0] = x.astype(x_ref.dtype)
    mel_ref[0] = mel.astype(mel_ref.dtype)
    done_ref[0] = done.astype(done_ref.dtype)


# ----------------------------- parameter setup ---------------------------------------
def _glorot(key, shape):
    fan_in, fan_out = shape[-2], shape[-1]
    lim = math.sqrt(6.0 / (fan_in + fan_out))
    return jax.random.uniform(key, shape, jnp.float32, -lim, lim)


def sinusoid_pe(max_len, d):
    pos = jnp.arange(max_len, dtype=jnp.float32)[:, None]
    i = jnp.arange(d)[None, :]
    angle = pos / jnp.power(10000.0, (2.0 * (i // 2)) / d)
    return jnp.where(i % 2 == 0, jnp.sin(angle), jnp.cos(angle)).astype(jnp.float32)


def init_params(key):
    keys = iter(jax.random.split(key, 256))
    nk = lambda: next(keys)
    D = hp.transformer_decoder_d_model
    A = hp.decoder_prenet_affine_size
    E = hp.charactor_embedding_size
    FF = hp.transformer_decoder_dim_feedforward
    M = hp.mel_bands
    zeros = lambda *s: jnp.zeros(s, jnp.float32)
    ones = lambda *s: jnp.ones(s, jnp.float32)

    def glu_conv(cin, cout, k):
        # fused GLU weight: [value half || gate half] along output channels
        return (_glorot(nk(), (k, cin, 2 * cout)), zeros(1, 2 * cout))

    prenet = [glu_conv(M, A, 1)]
    for _ in range(hp.decoder_prenet_layer_size):
        prenet.append(glu_conv(A, A, hp.decoder_prenet_conv_width))
    prenet.append(glu_conv(A, D, 1))

    layers = []
    for _ in range(hp.transformer_decoder_layers):
        layers.append(dict(
            sa_wqkv=_glorot(nk(), (D, 3 * D)), sa_bqkv=zeros(1, 3 * D),
            sa_wo=_glorot(nk(), (D, D)), sa_bo=zeros(1, D),
            ca_wq=_glorot(nk(), (D, D)), ca_bq=zeros(1, D),
            ca_wk=_glorot(nk(), (E, D)), ca_bk=zeros(1, D),
            ca_wv=_glorot(nk(), (E, D)), ca_bv=zeros(1, D),
            ca_wo=_glorot(nk(), (D, D)), ca_bo=zeros(1, D),
            ln1_g=ones(1, D), ln1_b=zeros(1, D),
            ln2_g=ones(1, D), ln2_b=zeros(1, D),
            ln3_g=ones(1, D), ln3_b=zeros(1, D),
            ff_w1=_glorot(nk(), (D, FF)), ff_b1=zeros(1, FF),
            ff_w2=_glorot(nk(), (FF, D)), ff_b2=zeros(1, D),
        ))

    postnet = [glu_conv(D, D, hp.decoder_postnet_conv_width)
               for _ in range(hp.decoder_postnet_layer_size)]

    return dict(
        prenet=prenet, layers=layers, postnet=postnet,
        mel_w=_glorot(nk(), (D, M)), mel_b=zeros(1, M),
        done_w=_glorot(nk(), (D, 1)), done_b=zeros(1, 1),
    )


# ----------------------------- forward pass (one fused pallas_call) ------------------
def transformer_decoder_forward(params, pe_table, inp, keys, values, timestep):
    """inp: (B, T, mel_bands); keys/values: (B, S, charactor_embedding_size)."""
    B, T, Cm = inp.shape
    S, E = keys.shape[1], keys.shape[2]
    D = hp.transformer_decoder_d_model
    L = hp.transformer_decoder_layers

    pe = jax.lax.dynamic_slice_in_dim(pe_table, timestep, T, axis=0)      # (T, D)

    leaves, treedef = jax.tree_util.tree_flatten(params)
    n_params = len(leaves)

    def bcast_spec(a):
        nd = a.ndim
        return pl.BlockSpec(a.shape, lambda b, _n=nd: (0,) * _n)

    in_specs = [
        pl.BlockSpec((1, T, Cm), lambda b: (b, 0, 0)),
        pl.BlockSpec((1, S, E), lambda b: (b, 0, 0)),
        pl.BlockSpec((1, S, E), lambda b: (b, 0, 0)),
        bcast_spec(pe),
    ] + [bcast_spec(a) for a in leaves]

    out_specs = (
        pl.BlockSpec((1, T, D), lambda b: (b, 0, 0)),
        pl.BlockSpec((1, T, hp.mel_bands), lambda b: (b, 0, 0)),
        pl.BlockSpec((1, T, 1), lambda b: (b, 0, 0)),
        pl.BlockSpec((1, L, T, S), lambda b: (b, 0, 0, 0)),
    )
    out_shape = (
        jax.ShapeDtypeStruct((B, T, D), inp.dtype),
        jax.ShapeDtypeStruct((B, T, hp.mel_bands), inp.dtype),
        jax.ShapeDtypeStruct((B, T, 1), inp.dtype),
        jax.ShapeDtypeStruct((B, L, T, S), jnp.float32),
    )

    kernel = functools.partial(
        _decoder_kernel,
        treedef=treedef, n_params=n_params,
        prenet_cfg=_prenet_cfg(), postnet_cfg=_postnet_cfg(),
        nhead=hp.transformer_num_head_decoder, w_query=hp.w_query)

    x_out, mel, done, attn = pl.pallas_call(
        kernel,
        grid=(B,),
        in_specs=in_specs,
        out_specs=out_specs,
        out_shape=out_shape,
        compiler_params=pltpu.CompilerParams(dimension_semantics=("parallel",)),
    )(inp, keys, values, pe, *leaves)

    attention_list = [attn[:, l] for l in range(L)]
    return done, mel, x_out, attention_list


# ----------------------------- main ---------------------------------------------------
if __name__ == "__main__":
    key = jax.random.PRNGKey(0)
    kp, ki, kk, kv = jax.random.split(key, 4)
    params = init_params(kp)
    pe_table = sinusoid_pe(hp.max_timestep, hp.transformer_decoder_d_model)

    B, T, S = 2, 8, 8
    inp = jax.random.normal(ki, (B, T, hp.mel_bands), jnp.float32)
    keys_ = jax.random.normal(kk, (B, S, hp.charactor_embedding_size), jnp.float32)
    vals = jax.random.normal(kv, (B, S, hp.charactor_embedding_size), jnp.float32)

    fwd = jax.jit(transformer_decoder_forward)
    done, mel, x, attn_list = fwd(params, pe_table, inp, keys_, vals, timestep=0)
    jax.block_until_ready((done, mel, x, attn_list))

    assert done.shape == (B, T, 1)
    assert mel.shape == (B, T, hp.mel_bands)
    assert x.shape == (B, T, hp.transformer_decoder_d_model)
    assert len(attn_list) == hp.transformer_decoder_layers
    assert attn_list[0].shape == (B, T, S)
    assert all(bool(jnp.all(jnp.isfinite(a))) for a in (done, mel, x))
    assert all(bool(jnp.all(jnp.isfinite(a))) for a in attn_list)

    print("KERNEL_OK")
</pallas_src>

<mosaic_0001>
module attributes {stable_mosaic.version = 11 : i64} {
  func.func @_decoder_kernel(%arg0: i32, %arg1: memref<1x8x8xf32, #tpu.memory_space<vmem>>, %arg2: memref<1x8x16xf32, #tpu.memory_space<vmem>>, %arg3: memref<1x8x16xf32, #tpu.memory_space<vmem>>, %arg4: memref<8x32xf32, #tpu.memory_space<vmem>>, %arg5: memref<1x1xf32, #tpu.memory_space<vmem>>, %arg6: memref<32x1xf32, #tpu.memory_space<vmem>>, %arg7: memref<1x32xf32, #tpu.memory_space<vmem>>, %arg8: memref<1x32xf32, #tpu.memory_space<vmem>>, %arg9: memref<1x32xf32, #tpu.memory_space<vmem>>, %arg10: memref<1x32xf32, #tpu.memory_space<vmem>>, %arg11: memref<16x32xf32, #tpu.memory_space<vmem>>, %arg12: memref<32x32xf32, #tpu.memory_space<vmem>>, %arg13: memref<32x32xf32, #tpu.memory_space<vmem>>, %arg14: memref<16x32xf32, #tpu.memory_space<vmem>>, %arg15: memref<1x64xf32, #tpu.memory_space<vmem>>, %arg16: memref<1x32xf32, #tpu.memory_space<vmem>>, %arg17: memref<32x64xf32, #tpu.memory_space<vmem>>, %arg18: memref<64x32xf32, #tpu.memory_space<vmem>>, %arg19: memref<1x32xf32, #tpu.memory_space<vmem>>, %arg20: memref<1x32xf32, #tpu.memory_space<vmem>>, %arg21: memref<1x32xf32, #tpu.memory_space<vmem>>, %arg22: memref<1x32xf32, #tpu.memory_space<vmem>>, %arg23: memref<1x32xf32, #tpu.memory_space<vmem>>, %arg24: memref<1x32xf32, #tpu.memory_space<vmem>>, %arg25: memref<1x32xf32, #tpu.memory_space<vmem>>, %arg26: memref<1x96xf32, #tpu.memory_space<vmem>>, %arg27: memref<32x32xf32, #tpu.memory_space<vmem>>, %arg28: memref<32x96xf32, #tpu.memory_space<vmem>>, %arg29: memref<1x32xf32, #tpu.memory_space<vmem>>, %arg30: memref<1x32xf32, #tpu.memory_space<vmem>>, %arg31: memref<1x32xf32, #tpu.memory_space<vmem>>, %arg32: memref<1x32xf32, #tpu.memory_space<vmem>>, %arg33: memref<16x32xf32, #tpu.memory_space<vmem>>, %arg34: memref<32x32xf32, #tpu.memory_space<vmem>>, %arg35: memref<32x32xf32, #tpu.memory_space<vmem>>, %arg36: memref<16x32xf32, #tpu.memory_space<vmem>>, %arg37: memref<1x64xf32, #tpu.memory_space<vmem>>, %arg38: memref<1x32xf32, #tpu.memory_space<vmem>>, %arg39: memref<32x64xf32, #tpu.memory_space<vmem>>, %arg40: memref<64x32xf32, #tpu.memory_space<vmem>>, %arg41: memref<1x32xf32, #tpu.memory_space<vmem>>, %arg42: memref<1x32xf32, #tpu.memory_space<vmem>>, %arg43: memref<1x32xf32, #tpu.memory_space<vmem>>, %arg44: memref<1x32xf32, #tpu.memory_space<vmem>>, %arg45: memref<1x32xf32, #tpu.memory_space<vmem>>, %arg46: memref<1x32xf32, #tpu.memory_space<vmem>>, %arg47: memref<1x32xf32, #tpu.memory_space<vmem>>, %arg48: memref<1x96xf32, #tpu.memory_space<vmem>>, %arg49: memref<32x32xf32, #tpu.memory_space<vmem>>, %arg50: memref<32x96xf32, #tpu.memory_space<vmem>>, %arg51: memref<1x8xf32, #tpu.memory_space<vmem>>, %arg52: memref<32x8xf32, #tpu.memory_space<vmem>>, %arg53: memref<3x32x64xf32, #tpu.memory_space<vmem>>, %arg54: memref<1x64xf32, #tpu.memory_space<vmem>>, %arg55: memref<3x32x64xf32, #tpu.memory_space<vmem>>, %arg56: memref<1x64xf32, #tpu.memory_space<vmem>>, %arg57: memref<1x8x64xf32, #tpu.memory_space<vmem>>, %arg58: memref<1x64xf32, #tpu.memory_space<vmem>>, %arg59: memref<3x32x64xf32, #tpu.memory_space<vmem>>, %arg60: memref<1x64xf32, #tpu.memory_space<vmem>>, %arg61: memref<3x32x64xf32, #tpu.memory_space<vmem>>, %arg62: memref<1x64xf32, #tpu.memory_space<vmem>>, %arg63: memref<1x32x64xf32, #tpu.memory_space<vmem>>, %arg64: memref<1x64xf32, #tpu.memory_space<vmem>>, %arg65: memref<1x8x32xf32, #tpu.memory_space<vmem>>, %arg66: memref<1x8x8xf32, #tpu.memory_space<vmem>>, %arg67: memref<1x8x1xf32, #tpu.memory_space<vmem>>, %arg68: memref<1x2x8x8xf32, #tpu.memory_space<vmem>>) attributes {dimension_semantics = [#tpu.dimension_semantics<parallel>], iteration_bounds = array<i64: 2>, scalar_prefetch = 0 : i64, scratch_operands = 0 : i64, tpu.core_type = #tpu.core_type<tc>, window_params = [{transform_indices = @transform_0, window_bounds = array<i64: 1, 8, 8>}, {transform_indices = @transform_1, window_bounds = array<i64: 1, 8, 16>}, {transform_indices = @transform_2, window_bounds = array<i64: 1, 8, 16>}, {pipeline_mode = #tpu.pipeline_mode<synchronous>, transform_indices = @transform_3, window_bounds = array<i64: 8, 32>}, {pipeline_mode = #tpu.pipeline_mode<synchronous>, transform_indices = @transform_4, window_bounds = array<i64: 1, 1>}, {pipeline_mode = #tpu.pipeline_mode<synchronous>, transform_indices = @transform_5, window_bounds = array<i64: 32, 1>}, {pipeline_mode = #tpu.pipeline_mode<synchronous>, transform_indices = @transform_6, window_bounds = array<i64: 1, 32>}, {pipeline_mode = #tpu.pipeline_mode<synchronous>, transform_indices = @transform_7, window_bounds = array<i64: 1, 32>}, {pipeline_mode = #tpu.pipeline_mode<synchronous>, transform_indices = @transform_8, window_bounds = array<i64: 1, 32>}, {pipeline_mode = #tpu.pipeline_mode<synchronous>, transform_indices = @transform_9, window_bounds = array<i64: 1, 32>}, {pipeline_mode = #tpu.pipeline_mode<synchronous>, transform_indices = @transform_10, window_bounds = array<i64: 16, 32>}, {pipeline_mode = #tpu.pipeline_mode<synchronous>, transform_indices = @transform_11, window_bounds = array<i64: 32, 32>}, {pipeline_mode = #tpu.pipeline_mode<synchronous>, transform_indices = @transform_12, window_bounds = array<i64: 32, 32>}, {pipeline_mode = #tpu.pipeline_mode<synchronous>, transform_indices = @transform_13, window_bounds = array<i64: 16, 32>}, {pipeline_mode = #tpu.pipeline_mode<synchronous>, transform_indices = @transform_14, window_bounds = array<i64: 1, 64>}, {pipeline_mode = #tpu.pipeline_mode<synchronous>, transform_indices = @transform_15, window_bounds = array<i64: 1, 32>}, {pipeline_mode = #tpu.pipeline_mode<synchronous>, transform_indices = @transform_16, window_bounds = array<i64: 32, 64>}, {pipeline_mode = #tpu.pipeline_mode<synchronous>, transform_indices = @transform_17, window_bounds = array<i64: 64, 32>}, {pipeline_mode = #tpu.pipeline_mode<synchronous>, transform_indices = @transform_18, window_bounds = array<i64: 1, 32>}, {pipeline_mode = #tpu.pipeline_mode<synchronous>, transform_indices = @transform_19, window_bounds = array<i64: 1, 32>}, {pipeline_mode = #tpu.pipeline_mode<synchronous>, transform_indices = @transform_20, window_bounds = array<i64: 1, 32>}, {pipeline_mode = #tpu.pipeline_mode<synchronous>, transform_indices = @transform_21, window_bounds = array<i64: 1, 32>}, {pipeline_mode = #tpu.pipeline_mode<synchronous>, transform_indices = @transform_22, window_bounds = array<i64: 1, 32>}, {pipeline_mode = #tpu.pipeline_mode<synchronous>, transform_indices = @transform_23, window_bounds = array<i64: 1, 32>}, {pipeline_mode = #tpu.pipeline_mode<synchronous>, transform_indices = @transform_24, window_bounds = array<i64: 1, 32>}, {pipeline_mode = #tpu.pipeline_mode<synchronous>, transform_indices = @transform_25, window_bounds = array<i64: 1, 96>}, {pipeline_mode = #tpu.pipeline_mode<synchronous>, transform_indices = @transform_26, window_bounds = array<i64: 32, 32>}, {pipeline_mode = #tpu.pipeline_mode<synchronous>, transform_indices = @transform_27, window_bounds = array<i64: 32, 96>}, {pipeline_mode = #tpu.pipeline_mode<synchronous>, transform_indices = @transform_28, window_bounds = array<i64: 1, 32>}, {pipeline_mode = #tpu.pipeline_mode<synchronous>, transform_indices = @transform_29, window_bounds = array<i64: 1, 32>}, {pipeline_mode = #tpu.pipeline_mode<synchronous>, transform_indices = @transform_30, window_bounds = array<i64: 1, 32>}, {pipeline_mode = #tpu.pipeline_mode<synchronous>, transform_indices = @transform_31, window_bounds = array<i64: 1, 32>}, {pipeline_mode = #tpu.pipeline_mode<synchronous>, transform_indices = @transform_32, window_bounds = array<i64: 16, 32>}, {pipeline_mode = #tpu.pipeline_mode<synchronous>, transform_indices = @transform_33, window_bounds = array<i64: 32, 32>}, {pipeline_mode = #tpu.pipeline_mode<synchronous>, transform_indices = @transform_34, window_bounds = array<i64: 32, 32>}, {pipeline_mode = #tpu.pipeline_mode<synchronous>, transform_indices = @transform_35, window_bounds = array<i64: 16, 32>}, {pipeline_mode = #tpu.pipeline_mode<synchronous>, transform_indices = @transform_36, window_bounds = array<i64: 1, 64>}, {pipeline_mode = #tpu.pipeline_mode<synchronous>, transform_indices = @transform_37, window_bounds = array<i64: 1, 32>}, {pipeline_mode = #tpu.pipeline_mode<synchronous>, transform_indices = @transform_38, window_bounds = array<i64: 32, 64>}, {pipeline_mode = #tpu.pipeline_mode<synchronous>, transform_indices = @transform_39, window_bounds = array<i64: 64, 32>}, {pipeline_mode = #tpu.pipeline_mode<synchronous>, transform_indices = @transform_40, window_bounds = array<i64: 1, 32>}, {pipeline_mode = #tpu.pipeline_mode<synchronous>, transform_indices = @transform_41, window_bounds = array<i64: 1, 32>}, {pipeline_mode = #tpu.pipeline_mode<synchronous>, transform_indices = @transform_42, window_bounds = array<i64: 1, 32>}, {pipeline_mode = #tpu.pipeline_mode<synchronous>, transform_indices = @transform_43, window_bounds = array<i64: 1, 32>}, {pipeline_mode = #tpu.pipeline_mode<synchronous>, transform_indices = @transform_44, window_bounds = array<i64: 1, 32>}, {pipeline_mode = #tpu.pipeline_mode<synchronous>, transform_indices = @transform_45, window_bounds = array<i64: 1, 32>}, {pipeline_mode = #tpu.pipeline_mode<synchronous>, transform_indices = @transform_46, window_bounds = array<i64: 1, 32>}, {pipeline_mode = #tpu.pipeline_mode<synchronous>, transform_indices = @transform_47, window_bounds = array<i64: 1, 96>}, {pipeline_mode = #tpu.pipeline_mode<synchronous>, transform_indices = @transform_48, window_bounds = array<i64: 32, 32>}, {pipeline_mode = #tpu.pipeline_mode<synchronous>, transform_indices = @transform_49, window_bounds = array<i64: 32, 96>}, {pipeline_mode = #tpu.pipeline_mode<synchronous>, transform_indices = @transform_50, window_bounds = array<i64: 1, 8>}, {pipeline_mode = #tpu.pipeline_mode<synchronous>, transform_indices = @transform_51, window_bounds = array<i64: 32, 8>}, {pipeline_mode = #tpu.pipeline_mode<synchronous>, transform_indices = @transform_52, window_bounds = array<i64: 3, 32, 64>}, {pipeline_mode = #tpu.pipeline_mode<synchronous>, transform_indices = @transform_53, window_bounds = array<i64: 1, 64>}, {pipeline_mode = #tpu.pipeline_mode<synchronous>, transform_indices = @transform_54, window_bounds = array<i64: 3, 32, 64>}, {pipeline_mode = #tpu.pipeline_mode<synchronous>, transform_indices = @transform_55, window_bounds = array<i64: 1, 64>}, {pipeline_mode = #tpu.pipeline_mode<synchronous>, transform_indices = @transform_56, window_bounds = array<i64: 1, 8, 64>}, {pipeline_mode = #tpu.pipeline_mode<synchronous>, transform_indices = @transform_57, window_bounds = array<i64: 1, 64>}, {pipeline_mode = #tpu.pipeline_mode<synchronous>, transform_indices = @transform_58, window_bounds = array<i64: 3, 32, 64>}, {pipeline_mode = #tpu.pipeline_mode<synchronous>, transform_indices = @transform_59, window_bounds = array<i64: 1, 64>}, {pipeline_mode = #tpu.pipeline_mode<synchronous>, transform_indices = @transform_60, window_bounds = array<i64: 3, 32, 64>}, {pipeline_mode = #tpu.pipeline_mode<synchronous>, transform_indices = @transform_61, window_bounds = array<i64: 1, 64>}, {pipeline_mode = #tpu.pipeline_mode<synchronous>, transform_indices = @transform_62, window_bounds = array<i64: 1, 32, 64>}, {pipeline_mode = #tpu.pipeline_mode<synchronous>, transform_indices = @transform_63, window_bounds = array<i64: 1, 64>}, {transform_indices = @transform_64, window_bounds = array<i64: 1, 8, 32>}, {transform_indices = @transform_65, window_bounds = array<i64: 1, 8, 8>}, {transform_indices = @transform_66, window_bounds = array<i64: 1, 8, 1>}, {transform_indices = @transform_67, window_bounds = array<i64: 1, 2, 8, 8>}]} {
    %c0 = arith.constant 0 : index
    %c0_0 = arith.constant 0 : index
    %c0_1 = arith.constant 0 : index
    %0 = vector.load %arg1[%c0, %c0_0, %c0_1] : memref<1x8x8xf32, #tpu.memory_space<vmem>>, vector<1x8x8xf32>
    %1 = vector.shape_cast %0 : vector<1x8x8xf32> to vector<8x8xf32>
    %c0_2 = arith.constant 0 : index
    %c0_3 = arith.constant 0 : index
    %c0_4 = arith.constant 0 : index
    %2 = vector.load %arg2[%c0_2, %c0_3, %c0_4] : memref<1x8x16xf32, #tpu.memory_space<vmem>>, vector<1x8x16xf32>
    %3 = vector.shape_cast %2 : vector<1x8x16xf32> to vector<8x16xf32>
    %c0_5 = arith.constant 0 : index
    %c0_6 = arith.constant 0 : index
    %c0_7 = arith.constant 0 : index
    %4 = vector.load %arg3[%c0_5, %c0_6, %c0_7] : memref<1x8x16xf32, #tpu.memory_space<vmem>>, vector<1x8x16xf32>
    %5 = vector.shape_cast %4 : vector<1x8x16xf32> to vector<8x16xf32>
    %c0_8 = arith.constant 0 : index
    %c0_9 = arith.constant 0 : index
    %c0_10 = arith.constant 0 : index
    %6 = vector.load %arg57[%c0_8, %c0_9, %c0_10] : memref<1x8x64xf32, #tpu.memory_space<vmem>>, vector<1x8x64xf32>
    %7 = vector.shape_cast %6 : vector<1x8x64xf32> to vector<8x64xf32>
    %cst = arith.constant dense<0.000000e+00> : vector<8x64xf32>
    %8 = tpu.matmul %1, %7, %cst {dimension_numbers = #tpu.dot_dimension_numbers<[1], [0], [0], [1], [0, 0, 1, 1], [], []>} : vector<8x8xf32>, vector<8x64xf32>, vector<8x64xf32> -> vector<8x64xf32>
    %c0_11 = arith.constant 0 : index
    %c0_12 = arith.constant 0 : index
    %9 = vector.load %arg58[%c0_11, %c0_12] : memref<1x64xf32, #tpu.memory_space<vmem>>, vector<1x64xf32>
    %10 = vector.broadcast %9 : vector<1x64xf32> to vector<8x64xf32>
    %11 = arith.addf %8, %10 : vector<8x64xf32>
    %12 = vector.extract_strided_slice %11 {offsets = [0, 0], sizes = [8, 32], strides = [1, 1]} : vector<8x64xf32> to vector<8x32xf32>
    %13 = vector.extract_strided_slice %11 {offsets = [0, 32], sizes = [8, 32], strides = [1, 1]} : vector<8x64xf32> to vector<8x32xf32>
    %14 = arith.negf %13 : vector<8x32xf32>
    %15 = math.exp %14 : vector<8x32xf32>
    %cst_13 = arith.constant 1.000000e+00 : f32
    %16 = vector.broadcast %cst_13 : f32 to vector<8x32xf32>
    %17 = arith.addf %16, %15 : vector<8x32xf32>
    %18 = arith.divf %16, %17 : vector<8x32xf32>
    %19 = arith.mulf %12, %18 : vector<8x32xf32>
    %20 = tpu.iota {dimensions = array<i32: 0>} : vector<8x8xi32>
    %21 = tpu.iota {dimensions = array<i32: 1>} : vector<8x8xi32>
    %c2_i32 = arith.constant 2 : i32
    %22 = vector.broadcast %c2_i32 : i32 to vector<8x8xi32>
    %23 = arith.subi %20, %22 : vector<8x8xi32>
    %24 = arith.cmpi eq, %21, %23 : vector<8x8xi32>
    %25 = arith.extui %24 : vector<8x8xi1> to vector<8x8xi32>
    %26 = arith.sitofp %25 : vector<8x8xi32> to vector<8x8xf32>
    %cst_14 = arith.constant dense<0.000000e+00> : vector<8x32xf32>
    %27 = tpu.matmul %26, %19, %cst_14 {dimension_numbers = #tpu.dot_dimension_numbers<[1], [0], [0], [1], [0, 0, 1, 1], [], []>} : vector<8x8xf32>, vector<8x32xf32>, vector<8x32xf32> -> vector<8x32xf32>
    %c0_15 = arith.constant 0 : index
    %c0_16 = arith.constant 0 : index
    %c0_17 = arith.constant 0 : index
    %28 = vector.load %arg59[%c0_15, %c0_16, %c0_17] : memref<3x32x64xf32, #tpu.memory_space<vmem>>, vector<1x32x64xf32>
    %29 = vector.shape_cast %28 : vector<1x32x64xf32> to vector<32x64xf32>
    %cst_18 = arith.constant dense<0.000000e+00> : vector<8x64xf32>
    %30 = tpu.matmul %27, %29, %cst_18 {dimension_numbers = #tpu.dot_dimension_numbers<[1], [0], [0], [1], [0, 0, 1, 1], [], []>} : vector<8x32xf32>, vector<32x64xf32>, vector<8x64xf32> -> vector<8x64xf32>
    %31 = tpu.iota {dimensions = array<i32: 0>} : vector<8x8xi32>
    %32 = tpu.iota {dimensions = array<i32: 1>} : vector<8x8xi32>
    %c1_i32 = arith.constant 1 : i32
    %33 = vector.broadcast %c1_i32 : i32 to vector<8x8xi32>
    %34 = arith.subi %31, %33 : vector<8x8xi32>
    %35 = arith.cmpi eq, %32, %34 : vector<8x8xi32>
    %36 = arith.extui %35 : vector<8x8xi1> to vector<8x8xi32>
    %37 = arith.sitofp %36 : vector<8x8xi32> to vector<8x8xf32>
    %cst_19 = arith.constant dense<0.000000e+00> : vector<8x32xf32>
    %38 = tpu.matmul %37, %19, %cst_19 {dimension_numbers = #tpu.dot_dimension_numbers<[1], [0], [0], [1], [0, 0, 1, 1], [], []>} : vector<8x8xf32>, vector<8x32xf32>, vector<8x32xf32> -> vector<8x32xf32>
    %c1 = arith.constant 1 : index
    %c0_20 = arith.constant 0 : index
    %c0_21 = arith.constant 0 : index
    %39 = vector.load %arg59[%c1, %c0_20, %c0_21] : memref<3x32x64xf32, #tpu.memory_space<vmem>>, vector<1x32x64xf32>
    %40 = vector.shape_cast %39 : vector<1x32x64xf32> to vector<32x64xf32>
    %cst_22 = arith.constant dense<0.000000e+00> : vector<8x64xf32>
    %41 = tpu.matmul %38, %40, %cst_22 {dimension_numbers = #tpu.dot_dimension_numbers<[1], [0], [0], [1], [0, 0, 1, 1], [], []>} : vector<8x32xf32>, vector<32x64xf32>, vector<8x64xf32> -> vector<8x64xf32>
    %42 = arith.addf %30, %41 : vector<8x64xf32>
    %c2 = arith.constant 2 : index
    %c0_23 = arith.constant 0 : index
    %c0_24 = arith.constant 0 : index
    %43 = vector.load %arg59[%c2, %c0_23, %c0_24] : memref<3x32x64xf32, #tpu.memory_space<vmem>>, vector<1x32x64xf32>
    %44 = vector.shape_cast %43 : vector<1x32x64xf32> to vector<32x64xf32>
    %cst_25 = arith.constant dense<0.000000e+00> : vector<8x64xf32>
    %45 = tpu.matmul %19, %44, %cst_25 {dimension_numbers = #tpu.dot_dimension_numbers<[1], [0], [0], [1], [0, 0, 1, 1], [], []>} : vector<8x32xf32>, vector<32x64xf32>, vector<8x64xf32> -> vector<8x64xf32>
    %46 = arith.addf %42, %45 : vector<8x64xf32>
    %c0_26 = arith.constant 0 : index
    %c0_27 = arith.constant 0 : index
    %47 = vector.load %arg60[%c0_26, %c0_27] : memref<1x64xf32, #tpu.memory_space<vmem>>, vector<1x64xf32>
    %48 = vector.broadcast %47 : vector<1x64xf32> to vector<8x64xf32>
    %49 = arith.addf %46, %48 : vector<8x64xf32>
    %50 = vector.extract_strided_slice %49 {offsets = [0, 0], sizes = [8, 32], strides = [1, 1]} : vector<8x64xf32> to vector<8x32xf32>
    %51 = vector.extract_strided_slice %49 {offsets = [0, 32], sizes = [8, 32], strides = [1, 1]} : vector<8x64xf32> to vector<8x32xf32>
    %52 = arith.negf %51 : vector<8x32xf32>
    %53 = math.exp %52 : vector<8x32xf32>
    %cst_28 = arith.constant 1.000000e+00 : f32
    %54 = vector.broadcast %cst_28 : f32 to vector<8x32xf32>
    %55 = arith.addf %54, %53 : vector<8x32xf32>
    %56 = arith.divf %54, %55 : vector<8x32xf32>
    %57 = arith.mulf %50, %56 : vector<8x32xf32>
    %58 = tpu.iota {dimensions = array<i32: 0>} : vector<8x8xi32>
    %59 = tpu.iota {dimensions = array<i32: 1>} : vector<8x8xi32>
    %c4_i32 = arith.constant 4 : i32
    %60 = vector.broadcast %c4_i32 : i32 to vector<8x8xi32>
    %61 = arith.subi %58, %60 : vector<8x8xi32>
    %62 = arith.cmpi eq, %59, %61 : vector<8x8xi32>
    %63 = arith.extui %62 : vector<8x8xi1> to vector<8x8xi32>
    %64 = arith.sitofp %63 : vector<8x8xi32> to vector<8x8xf32>
    %cst_29 = arith.constant dense<0.000000e+00> : vector<8x32xf32>
    %65 = tpu.matmul %64, %57, %cst_29 {dimension_numbers = #tpu.dot_dimension_numbers<[1], [0], [0], [1], [0, 0, 1, 1], [], []>} : vector<8x8xf32>, vector<8x32xf32>, vector<8x32xf32> -> vector<8x32xf32>
    %c0_30 = arith.constant 0 : index
    %c0_31 = arith.constant 0 : index
    %c0_32 = arith.constant 0 : index
    %66 = vector.load %arg61[%c0_30, %c0_31, %c0_32] : memref<3x32x64xf32, #tpu.memory_space<vmem>>, vector<1x32x64xf32>
    %67 = vector.shape_cast %66 : vector<1x32x64xf32> to vector<32x64xf32>
    %cst_33 = arith.constant dense<0.000000e+00> : vector<8x64xf32>
    %68 = tpu.matmul %65, %67, %cst_33 {dimension_numbers = #tpu.dot_dimension_numbers<[1], [0], [0], [1], [0, 0, 1, 1], [], []>} : vector<8x32xf32>, vector<32x64xf32>, vector<8x64xf32> -> vector<8x64xf32>
    %69 = tpu.iota {dimensions = array<i32: 0>} : vector<8x8xi32>
    %70 = tpu.iota {dimensions = array<i32: 1>} : vector<8x8xi32>
    %c2_i32_34 = arith.constant 2 : i32
    %71 = vector.broadcast %c2_i32_34 : i32 to vector<8x8xi32>
    %72 = arith.subi %69, %71 : vector<8x8xi32>
    %73 = arith.cmpi eq, %70, %72 : vector<8x8xi32>
    %74 = arith.extui %73 : vector<8x8xi1> to vector<8x8xi32>
    %75 = arith.sitofp %74 : vector<8x8xi32> to vector<8x8xf32>
    %cst_35 = arith.constant dense<0.000000e+00> : vector<8x32xf32>
    %76 = tpu.matmul %75, %57, %cst_35 {dimension_numbers = #tpu.dot_dimension_numbers<[1], [0], [0], [1], [0, 0, 1, 1], [], []>} : vector<8x8xf32>, vector<8x32xf32>, vector<8x32xf32> -> vector<8x32xf32>
    %c1_36 = arith.constant 1 : index
    %c0_37 = arith.constant 0 : index
    %c0_38 = arith.constant 0 : index
    %77 = vector.load %arg61[%c1_36, %c0_37, %c0_38] : memref<3x32x64xf32, #tpu.memory_space<vmem>>, vector<1x32x64xf32>
    %78 = vector.shape_cast %77 : vector<1x32x64xf32> to vector<32x64xf32>
    %cst_39 = arith.constant dense<0.000000e+00> : vector<8x64xf32>
    %79 = tpu.matmul %76, %78, %cst_39 {dimension_numbers = #tpu.dot_dimension_numbers<[1], [0], [0], [1], [0, 0, 1, 1], [], []>} : vector<8x32xf32>, vector<32x64xf32>, vector<8x64xf32> -> vector<8x64xf32>
    %80 = arith.addf %68, %79 : vector<8x64xf32>
    %c2_40 = arith.constant 2 : index
    %c0_41 = arith.constant 0 : index
    %c0_42 = arith.constant 0 : index
    %81 = vector.load %arg61[%c2_40, %c0_41, %c0_42] : memref<3x32x64xf32, #tpu.memory_space<vmem>>, vector<1x32x64xf32>
    %82 = vector.shape_cast %81 : vector<1x32x64xf32> to vector<32x64xf32>
    %cst_43 = arith.constant dense<0.000000e+00> : vector<8x64xf32>
    %83 = tpu.matmul %57, %82, %cst_43 {dimension_numbers = #tpu.dot_dimension_numbers<[1], [0], [0], [1], [0, 0, 1, 1], [], []>} : vector<8x32xf32>, vector<32x64xf32>, vector<8x64xf32> -> vector<8x64xf32>
    %84 = arith.addf %80, %83 : vector<8x64xf32>
    %c0_44 = arith.constant 0 : index
    %c0_45 = arith.constant 0 : index
    %85 = vector.load %arg62[%c0_44, %c0_45] : memref<1x64xf32, #tpu.memory_space<vmem>>, vector<1x64xf32>
    %86 = vector.broadcast %85 : vector<1x64xf32> to vector<8x64xf32>
    %87 = arith.addf %84, %86 : vector<8x64xf32>
    %88 = vector.extract_strided_slice %87 {offsets = [0, 0], sizes = [8, 32], strides = [1, 1]} : vector<8x64xf32> to vector<8x32xf32>
    %89 = vector.extract_strided_slice %87 {offsets = [0, 32], sizes = [8, 32], strides = [1, 1]} : vector<8x64xf32> to vector<8x32xf32>
    %90 = arith.negf %89 : vector<8x32xf32>
    %91 = math.exp %90 : vector<8x32xf32>
    %cst_46 = arith.constant 1.000000e+00 : f32
    %92 = vector.broadcast %cst_46 : f32 to vector<8x32xf32>
    %93 = arith.addf %92, %91 : vector<8x32xf32>
    %94 = arith.divf %92, %93 : vector<8x32xf32>
    %95 = arith.mulf %88, %94 : vector<8x32xf32>
    %c0_47 = arith.constant 0 : index
    %c0_48 = arith.constant 0 : index
    %c0_49 = arith.constant 0 : index
    %96 = vector.load %arg63[%c0_47, %c0_48, %c0_49] : memref<1x32x64xf32, #tpu.memory_space<vmem>>, vector<1x32x64xf32>
    %97 = vector.shape_cast %96 : vector<1x32x64xf32> to vector<32x64xf32>
    %cst_50 = arith.constant dense<0.000000e+00> : vector<8x64xf32>
    %98 = tpu.matmul %95, %97, %cst_50 {dimension_numbers = #tpu.dot_dimension_numbers<[1], [0], [0], [1], [0, 0, 1, 1], [], []>} : vector<8x32xf32>, vector<32x64xf32>, vector<8x64xf32> -> vector<8x64xf32>
    %c0_51 = arith.constant 0 : index
    %c0_52 = arith.constant 0 : index
    %99 = vector.load %arg64[%c0_51, %c0_52] : memref<1x64xf32, #tpu.memory_space<vmem>>, vector<1x64xf32>
    %100 = vector.broadcast %99 : vector<1x64xf32> to vector<8x64xf32>
    %101 = arith.addf %98, %100 : vector<8x64xf32>
    %102 = vector.extract_strided_slice %101 {offsets = [0, 0], sizes = [8, 32], strides = [1, 1]} : vector<8x64xf32> to vector<8x32xf32>
    %103 = vector.extract_strided_slice %101 {offsets = [0, 32], sizes = [8, 32], strides = [1, 1]} : vector<8x64xf32> to vector<8x32xf32>
    %104 = arith.negf %103 : vector<8x32xf32>
    %105 = math.exp %104 : vector<8x32xf32>
    %cst_53 = arith.constant 1.000000e+00 : f32
    %106 = vector.broadcast %cst_53 : f32 to vector<8x32xf32>
    %107 = arith.addf %106, %105 : vector<8x32xf32>
    %108 = arith.divf %106, %107 : vector<8x32xf32>
    %109 = arith.mulf %102, %108 : vector<8x32xf32>
    %c0_54 = arith.constant 0 : index
    %c0_55 = arith.constant 0 : index
    %110 = vector.load %arg4[%c0_54, %c0_55] : memref<8x32xf32, #tpu.memory_space<vmem>>, vector<8x32xf32>
    %cst_56 = arith.constant 1.000000e+00 : f32
    %111 = vector.broadcast %cst_56 : f32 to vector<8x32xf32>
    %112 = arith.mulf %111, %110 : vector<8x32xf32>
    %113 = arith.addf %109, %112 : vector<8x32xf32>
    %114 = tpu.iota {dimensions = array<i32: 0>} : vector<8x8xi32>
    %115 = tpu.iota {dimensions = array<i32: 1>} : vector<8x8xi32>
    %116 = arith.cmpi sgt, %115, %114 : vector<8x8xi32>
    %cst_57 = arith.constant -1.000000e+30 : f32
    %cst_58 = arith.constant 0.000000e+00 : f32
    %117 = vector.broadcast %cst_57 : f32 to vector<8x8xf32>
    %118 = vector.broadcast %cst_58 : f32 to vector<8x8xf32>
    %119 = arith.select %116, %117, %118 : vector<8x8xi1>, vector<8x8xf32>
    %c0_59 = arith.constant 0 : index
    %c0_60 = arith.constant 0 : index
    %120 = vector.load %arg28[%c0_59, %c0_60] : memref<32x96xf32, #tpu.memory_space<vmem>>, vector<32x96xf32>
    %cst_61 = arith.constant dense<0.000000e+00> : vector<8x96xf32>
    %121 = tpu.matmul %113, %120, %cst_61 {dimension_numbers = #tpu.dot_dimension_numbers<[1], [0], [0], [1], [0, 0, 1, 1], [], []>} : vector<8x32xf32>, vector<32x96xf32>, vector<8x96xf32> -> vector<8x96xf32>
    %c0_62 = arith.constant 0 : index
    %c0_63 = arith.constant 0 : index
    %122 = vector.load %arg26[%c0_62, %c0_63] : memref<1x96xf32, #tpu.memory_space<vmem>>, vector<1x96xf32>
    %123 = vector.broadcast %122 : vector<1x96xf32> to vector<8x96xf32>
    %124 = arith.addf %121, %123 : vector<8x96xf32>
    %125 = vector.extract_strided_slice %124 {offsets = [0, 0], sizes = [8, 32], strides = [1, 1]} : vector<8x96xf32> to vector<8x32xf32>
    %126 = vector.extract_strided_slice %124 {offsets = [0, 32], sizes = [8, 32], strides = [1, 1]} : vector<8x96xf32> to vector<8x32xf32>
    %127 = vector.extract_strided_slice %124 {offsets = [0, 64], sizes = [8, 32], strides = [1, 1]} : vector<8x96xf32> to vector<8x32xf32>
    %128 = tpu.iota {dimensions = array<i32: 1>} : vector<1x32xi32>
    %cst_64 = arith.constant 0.000000e+00 : f32
    %129 = vector.broadcast %cst_64 : f32 to vector<8x32xf32>
    %c0_i32 = arith.constant 0 : i32
    %130 = vector.broadcast %c0_i32 : i32 to vector<1x32xi32>
    %131 = arith.cmpi sge, %128, %130 : vector<1x32xi32>
    %c8_i32 = arith.constant 8 : i32
    %132 = vector.broadcast %c8_i32 : i32 to vector<1x32xi32>
    %133 = arith.cmpi slt, %128, %132 : vector<1x32xi32>
    %134 = arith.andi %131, %133 : vector<1x32xi1>
    %135 = arith.extui %134 : vector<1x32xi1> to vector<1x32xi32>
    %136 = arith.sitofp %135 : vector<1x32xi32> to vector<1x32xf32>
    %137 = vector.broadcast %136 : vector<1x32xf32> to vector<8x32xf32>
    %138 = arith.mulf %125, %137 : vector<8x32xf32>
    %cst_65 = arith.constant dense<0.000000e+00> : vector<8x8xf32>
    %139 = tpu.matmul %138, %126, %cst_65 {dimension_numbers = #tpu.dot_dimension_numbers<[1], [1], [0], [0], [0, 0, 1, 0], [], []>} : vector<8x32xf32>, vector<8x32xf32>, vector<8x8xf32> -> vector<8x8xf32>
    %cst_66 = arith.constant 0.353553385 : f32
    %140 = vector.broadcast %cst_66 : f32 to vector<8x8xf32>
    %141 = arith.mulf %139, %140 : vector<8x8xf32>
    %142 = arith.addf %141, %119 : vector<8x8xf32>
    %cst_67 = arith.constant dense<0xFF800000> : vector<8xf32>
    %143 = vector.multi_reduction <maximumf>, %142, %cst_67 [1] : vector<8x8xf32> to vector<8xf32>
    %144 = vector.shape_cast %143 : vector<8xf32> to vector<8x1xf32>
    %145 = vector.broadcast %144 : vector<8x1xf32> to vector<8x8xf32>
    %146 = arith.subf %142, %145 : vector<8x8xf32>
    %147 = math.exp %146 : vector<8x8xf32>
    %cst_68 = arith.constant dense<0.000000e+00> : vector<8xf32>
    %148 = vector.multi_reduction <add>, %147, %cst_68 [1] : vector<8x8xf32> to vector<8xf32>
    %149 = vector.shape_cast %148 : vector<8xf32> to vector<8x1xf32>
    %150 = vector.broadcast %149 : vector<8x1xf32> to vector<8x8xf32>
    %151 = arith.divf %147, %150 : vector<8x8xf32>
    %cst_69 = arith.constant dense<0.000000e+00> : vector<8x32xf32>
    %152 = tpu.matmul %151, %127, %cst_69 {dimension_numbers = #tpu.dot_dimension_numbers<[1], [0], [0], [1], [0, 0, 1, 1], [], []>} : vector<8x8xf32>, vector<8x32xf32>, vector<8x32xf32> -> vector<8x32xf32>
    %153 = vector.broadcast %136 : vector<1x32xf32> to vector<8x32xf32>
    %154 = arith.mulf %152, %153 : vector<8x32xf32>
    %155 = arith.addf %129, %154 : vector<8x32xf32>
    %c8_i32_70 = arith.constant 8 : i32
    %156 = vector.broadcast %c8_i32_70 : i32 to vector<1x32xi32>
    %157 = arith.cmpi sge, %128, %156 : vector<1x32xi32>
    %c16_i32 = arith.constant 16 : i32
    %158 = vector.broadcast %c16_i32 : i32 to vector<1x32xi32>
    %159 = arith.cmpi slt, %128, %158 : vector<1x32xi32>
    %160 = arith.andi %157, %159 : vector<1x32xi1>
    %161 = arith.extui %160 : vector<1x32xi1> to vector<1x32xi32>
    %162 = arith.sitofp %161 : vector<1x32xi32> to vector<1x32xf32>
    %163 = vector.broadcast %162 : vector<1x32xf32> to vector<8x32xf32>
    %164 = arith.mulf %125, %163 : vector<8x32xf32>
    %cst_71 = arith.constant dense<0.000000e+00> : vector<8x8xf32>
    %165 = tpu.matmul %164, %126, %cst_71 {dimension_numbers = #tpu.dot_dimension_numbers<[1], [1], [0], [0], [0, 0, 1, 0], [], []>} : vector<8x32xf32>, vector<8x32xf32>, vector<8x8xf32> -> vector<8x8xf32>
    %cst_72 = arith.constant 0.353553385 : f32
    %166 = vector.broadcast %cst_72 : f32 to vector<8x8xf32>
    %167 = arith.mulf %165, %166 : vector<8x8xf32>
    %168 = arith.addf %167, %119 : vector<8x8xf32>
    %cst_73 = arith.constant dense<0xFF800000> : vector<8xf32>
    %169 = vector.multi_reduction <maximumf>, %168, %cst_73 [1] : vector<8x8xf32> to vector<8xf32>
    %170 = vector.shape_cast %169 : vector<8xf32> to vector<8x1xf32>
    %171 = vector.broadcast %170 : vector<8x1xf32> to vector<8x8xf32>
    %172 = arith.subf %168, %171 : vector<8x8xf32>
    %173 = math.exp %172 : vector<8x8xf32>
    %cst_74 = arith.constant dense<0.000000e+00> : vector<8xf32>
    %174 = vector.multi_reduction <add>, %173, %cst_74 [1] : vector<8x8xf32> to vector<8xf32>
    %175 = vector.shape_cast %174 : vector<8xf32> to vector<8x1xf32>
    %176 = vector.broadcast %175 : vector<8x1xf32> to vector<8x8xf32>
    %177 = arith.divf %173, %176 : vector<8x8xf32>
    %cst_75 = arith.constant dense<0.000000e+00> : vector<8x32xf32>
    %178 = tpu.matmul %177, %127, %cst_75 {dimension_numbers = #tpu.dot_dimension_numbers<[1], [0], [0], [1], [0, 0, 1, 1], [], []>} : vector<8x8xf32>, vector<8x32xf32>, vector<8x32xf32> -> vector<8x32xf32>
    %179 = vector.broadcast %162 : vector<1x32xf32> to vector<8x32xf32>
    %180 = arith.mulf %178, %179 : vector<8x32xf32>
    %181 = arith.addf %155, %180 : vector<8x32xf32>
    %c16_i32_76 = arith.constant 16 : i32
    %182 = vector.broadcast %c16_i32_76 : i32 to vector<1x32xi32>
    %183 = arith.cmpi sge, %128, %182 : vector<1x32xi32>
    %c24_i32 = arith.constant 24 : i32
    %184 = vector.broadcast %c24_i32 : i32 to vector<1x32xi32>
    %185 = arith.cmpi slt, %128, %184 : vector<1x32xi32>
    %186 = arith.andi %183, %185 : vector<1x32xi1>
    %187 = arith.extui %186 : vector<1x32xi1> to vector<1x32xi32>
    %188 = arith.sitofp %187 : vector<1x32xi32> to vector<1x32xf32>
    %189 = vector.broadcast %188 : vector<1x32xf32> to vector<8x32xf32>
    %190 = arith.mulf %125, %189 : vector<8x32xf32>
    %cst_77 = arith.constant dense<0.000000e+00> : vector<8x8xf32>
    %191 = tpu.matmul %190, %126, %cst_77 {dimension_numbers = #tpu.dot_dimension_numbers<[1], [1], [0], [0], [0, 0, 1, 0], [], []>} : vector<8x32xf32>, vector<8x32xf32>, vector<8x8xf32> -> vector<8x8xf32>
    %cst_78 = arith.constant 0.353553385 : f32
    %192 = vector.broadcast %cst_78 : f32 to vector<8x8xf32>
    %193 = arith.mulf %191, %192 : vector<8x8xf32>
    %194 = arith.addf %193, %119 : vector<8x8xf32>
    %cst_79 = arith.constant dense<0xFF800000> : vector<8xf32>
    %195 = vector.multi_reduction <maximumf>, %194, %cst_79 [1] : vector<8x8xf32> to vector<8xf32>
    %196 = vector.shape_cast %195 : vector<8xf32> to vector<8x1xf32>
    %197 = vector.broadcast %196 : vector<8x1xf32> to vector<8x8xf32>
    %198 = arith.subf %194, %197 : vector<8x8xf32>
    %199 = math.exp %198 : vector<8x8xf32>
    %cst_80 = arith.constant dense<0.000000e+00> : vector<8xf32>
    %200 = vector.multi_reduction <add>, %199, %cst_80 [1] : vector<8x8xf32> to vector<8xf32>
    %201 = vector.shape_cast %200 : vector<8xf32> to vector<8x1xf32>
    %202 = vector.broadcast %201 : vector<8x1xf32> to vector<8x8xf32>
    %203 = arith.divf %199, %202 : vector<8x8xf32>
    %cst_81 = arith.constant dense<0.000000e+00> : vector<8x32xf32>
    %204 = tpu.matmul %203, %127, %cst_81 {dimension_numbers = #tpu.dot_dimension_numbers<[1], [0], [0], [1], [0, 0, 1, 1], [], []>} : vector<8x8xf32>, vector<8x32xf32>, vector<8x32xf32> -> vector<8x32xf32>
    %205 = vector.broadcast %188 : vector<1x32xf32> to vector<8x32xf32>
    %206 = arith.mulf %204, %205 : vector<8x32xf32>
    %207 = arith.addf %181, %206 : vector<8x32xf32>
    %c24_i32_82 = arith.constant 24 : i32
    %208 = vector.broadcast %c24_i32_82 : i32 to vector<1x32xi32>
    %209 = arith.cmpi sge, %128, %208 : vector<1x32xi32>
    %c32_i32 = arith.constant 32 : i32
    %210 = vector.broadcast %c32_i32 : i32 to vector<1x32xi32>
    %211 = arith.cmpi slt, %128, %210 : vector<1x32xi32>
    %212 = arith.andi %209, %211 : vector<1x32xi1>
    %213 = arith.extui %212 : vector<1x32xi1> to vector<1x32xi32>
    %214 = arith.sitofp %213 : vector<1x32xi32> to vector<1x32xf32>
    %215 = vector.broadcast %214 : vector<1x32xf32> to vector<8x32xf32>
    %216 = arith.mulf %125, %215 : vector<8x32xf32>
    %cst_83 = arith.constant dense<0.000000e+00> : vector<8x8xf32>
    %217 = tpu.matmul %216, %126, %cst_83 {dimension_numbers = #tpu.dot_dimension_numbers<[1], [1], [0], [0], [0, 0, 1, 0], [], []>} : vector<8x32xf32>, vector<8x32xf32>, vector<8x8xf32> -> vector<8x8xf32>
    %cst_84 = arith.constant 0.353553385 : f32
    %218 = vector.broadcast %cst_84 : f32 to vector<8x8xf32>
    %219 = arith.mulf %217, %218 : vector<8x8xf32>
    %220 = arith.addf %219, %119 : vector<8x8xf32>
    %cst_85 = arith.constant dense<0xFF800000> : vector<8xf32>
    %221 = vector.multi_reduction <maximumf>, %220, %cst_85 [1] : vector<8x8xf32> to vector<8xf32>
    %222 = vector.shape_cast %221 : vector<8xf32> to vector<8x1xf32>
    %223 = vector.broadcast %222 : vector<8x1xf32> to vector<8x8xf32>
    %224 = arith.subf %220, %223 : vector<8x8xf32>
    %225 = math.exp %224 : vector<8x8xf32>
    %cst_86 = arith.constant dense<0.000000e+00> : vector<8xf32>
    %226 = vector.multi_reduction <add>, %225, %cst_86 [1] : vector<8x8xf32> to vector<8xf32>
    %227 = vector.shape_cast %226 : vector<8xf32> to vector<8x1xf32>
    %228 = vector.broadcast %227 : vector<8x1xf32> to vector<8x8xf32>
    %229 = arith.divf %225, %228 : vector<8x8xf32>
    %cst_87 = arith.constant dense<0.000000e+00> : vector<8x32xf32>
    %230 = tpu.matmul %229, %127, %cst_87 {dimension_numbers = #tpu.dot_dimension_numbers<[1], [0], [0], [1], [0, 0, 1, 1], [], []>} : vector<8x8xf32>, vector<8x32xf32>, vector<8x32xf32> -> vector<8x32xf32>
    %231 = vector.broadcast %214 : vector<1x32xf32> to vector<8x32xf32>
    %232 = arith.mulf %230, %231 : vector<8x32xf32>
    %233 = arith.addf %207, %232 : vector<8x32xf32>
    %c0_88 = arith.constant 0 : index
    %c0_89 = arith.constant 0 : index
    %234 = vector.load %arg27[%c0_88, %c0_89] : memref<32x32xf32, #tpu.memory_space<vmem>>, vector<32x32xf32>
    %cst_90 = arith.constant dense<0.000000e+00> : vector<8x32xf32>
    %235 = tpu.matmul %233, %234, %cst_90 {dimension_numbers = #tpu.dot_dimension_numbers<[1], [0], [0], [1], [0, 0, 1, 1], [], []>} : vector<8x32xf32>, vector<32x32xf32>, vector<8x32xf32> -> vector<8x32xf32>
    %c0_91 = arith.constant 0 : index
    %c0_92 = arith.constant 0 : index
    %236 = vector.load %arg25[%c0_91, %c0_92] : memref<1x32xf32, #tpu.memory_space<vmem>>, vector<1x32xf32>
    %237 = vector.broadcast %236 : vector<1x32xf32> to vector<8x32xf32>
    %238 = arith.addf %235, %237 : vector<8x32xf32>
    %239 = arith.addf %113, %238 : vector<8x32xf32>
    %cst_93 = arith.constant dense<0.000000e+00> : vector<8xf32>
    %240 = vector.multi_reduction <add>, %239, %cst_93 [1] : vector<8x32xf32> to vector<8xf32>
    %241 = vector.shape_cast %240 : vector<8xf32> to vector<8x1xf32>
    %cst_94 = arith.constant 3.200000e+01 : f32
    %242 = vector.broadcast %cst_94 : f32 to vector<8x1xf32>
    %243 = arith.divf %241, %242 : vector<8x1xf32>
    %244 = vector.broadcast %243 : vector<8x1xf32> to vector<8x32xf32>
    %245 = arith.subf %239, %244 : vector<8x32xf32>
    %246 = arith.mulf %245, %245 : vector<8x32xf32>
    %cst_95 = arith.constant dense<0.000000e+00> : vector<8xf32>
    %247 = vector.multi_reduction <add>, %246, %cst_95 [1] : vector<8x32xf32> to vector<8xf32>
    %248 = vector.shape_cast %247 : vector<8xf32> to vector<8x1xf32>
    %cst_96 = arith.constant 3.200000e+01 : f32
    %249 = vector.broadcast %cst_96 : f32 to vector<8x1xf32>
    %250 = arith.divf %248, %249 : vector<8x1xf32>
    %251 = vector.broadcast %243 : vector<8x1xf32> to vector<8x32xf32>
    %252 = arith.subf %239, %251 : vector<8x32xf32>
    %cst_97 = arith.constant 9.99999974E-6 : f32
    %253 = vector.broadcast %cst_97 : f32 to vector<8x1xf32>
    %254 = arith.addf %250, %253 : vector<8x1xf32>
    %255 = math.rsqrt %254 : vector<8x1xf32>
    %256 = vector.broadcast %255 : vector<8x1xf32> to vector<8x32xf32>
    %257 = arith.mulf %252, %256 : vector<8x32xf32>
    %c0_98 = arith.constant 0 : index
    %c0_99 = arith.constant 0 : index
    %258 = vector.load %arg20[%c0_98, %c0_99] : memref<1x32xf32, #tpu.memory_space<vmem>>, vector<1x32xf32>
    %259 = vector.broadcast %258 : vector<1x32xf32> to vector<8x32xf32>
    %260 = arith.mulf %257, %259 : vector<8x32xf32>
    %c0_100 = arith.constant 0 : index
    %c0_101 = arith.constant 0 : index
    %261 = vector.load %arg19[%c0_100, %c0_101] : memref<1x32xf32, #tpu.memory_space<vmem>>, vector<1x32xf32>
    %262 = vector.broadcast %261 : vector<1x32xf32> to vector<8x32xf32>
    %263 = arith.addf %260, %262 : vector<8x32xf32>
    %c0_102 = arith.constant 0 : index
    %c0_103 = arith.constant 0 : index
    %264 = vector.load %arg13[%c0_102, %c0_103] : memref<32x32xf32, #tpu.memory_space<vmem>>, vector<32x32xf32>
    %cst_104 = arith.constant dense<0.000000e+00> : vector<8x32xf32>
    %265 = tpu.matmul %263, %264, %cst_104 {dimension_numbers = #tpu.dot_dimension_numbers<[1], [0], [0], [1], [0, 0, 1, 1], [], []>} : vector<8x32xf32>, vector<32x32xf32>, vector<8x32xf32> -> vector<8x32xf32>
    %c0_105 = arith.constant 0 : index
    %c0_106 = arith.constant 0 : index
    %266 = vector.load %arg9[%c0_105, %c0_106] : memref<1x32xf32, #tpu.memory_space<vmem>>, vector<1x32xf32>
    %267 = vector.broadcast %266 : vector<1x32xf32> to vector<8x32xf32>
    %268 = arith.addf %265, %267 : vector<8x32xf32>
    %c0_107 = arith.constant 0 : index
    %c0_108 = arith.constant 0 : index
    %269 = vector.load %arg11[%c0_107, %c0_108] : memref<16x32xf32, #tpu.memory_space<vmem>>, vector<16x32xf32>
    %cst_109 = arith.constant dense<0.000000e+00> : vector<8x32xf32>
    %270 = tpu.matmul %3, %269, %cst_109 {dimension_numbers = #tpu.dot_dimension_numbers<[1], [0], [0], [1], [0, 0, 1, 1], [], []>} : vector<8x16xf32>, vector<16x32xf32>, vector<8x32xf32> -> vector<8x32xf32>
    %c0_110 = arith.constant 0 : index
    %c0_111 = arith.constant 0 : index
    %271 = vector.load %arg7[%c0_110, %c0_111] : memref<1x32xf32, #tpu.memory_space<vmem>>, vector<1x32xf32>
    %272 = vector.broadcast %271 : vector<1x32xf32> to vector<8x32xf32>
    %273 = arith.addf %270, %272 : vector<8x32xf32>
    %c0_112 = arith.constant 0 : index
    %c0_113 = arith.constant 0 : index
    %274 = vector.load %arg14[%c0_112, %c0_113] : memref<16x32xf32, #tpu.memory_space<vmem>>, vector<16x32xf32>
    %cst_114 = arith.constant dense<0.000000e+00> : vector<8x32xf32>
    %275 = tpu.matmul %5, %274, %cst_114 {dimension_numbers = #tpu.dot_dimension_numbers<[1], [0], [0], [1], [0, 0, 1, 1], [], []>} : vector<8x16xf32>, vector<16x32xf32>, vector<8x32xf32> -> vector<8x32xf32>
    %c0_115 = arith.constant 0 : index
    %c0_116 = arith.constant 0 : index
    %276 = vector.load %arg10[%c0_115, %c0_116] : memref<1x32xf32, #tpu.memory_space<vmem>>, vector<1x32xf32>
    %277 = vector.broadcast %276 : vector<1x32xf32> to vector<8x32xf32>
    %278 = arith.addf %275, %277 : vector<8x32xf32>
    %279 = tpu.iota {dimensions = array<i32: 1>} : vector<1x32xi32>
    %cst_117 = arith.constant 0.000000e+00 : f32
    %280 = vector.broadcast %cst_117 : f32 to vector<8x32xf32>
    %cst_118 = arith.constant 0.000000e+00 : f32
    %281 = vector.broadcast %cst_118 : f32 to vector<8x8xf32>
    %c0_i32_119 = arith.constant 0 : i32
    %282 = vector.broadcast %c0_i32_119 : i32 to vector<1x32xi32>
    %283 = arith.cmpi sge, %279, %282 : vector<1x32xi32>
    %c8_i32_120 = arith.constant 8 : i32
    %284 = vector.broadcast %c8_i32_120 : i32 to vector<1x32xi32>
    %285 = arith.cmpi slt, %279, %284 : vector<1x32xi32>
    %286 = arith.andi %283, %285 : vector<1x32xi1>
    %287 = arith.extui %286 : vector<1x32xi1> to vector<1x32xi32>
    %288 = arith.sitofp %287 : vector<1x32xi32> to vector<1x32xf32>
    %289 = vector.broadcast %288 : vector<1x32xf32> to vector<8x32xf32>
    %290 = arith.mulf %268, %289 : vector<8x32xf32>
    %cst_121 = arith.constant dense<0.000000e+00> : vector<8x8xf32>
    %291 = tpu.matmul %290, %273, %cst_121 {dimension_numbers = #tpu.dot_dimension_numbers<[1], [1], [0], [0], [0, 0, 1, 0], [], []>} : vector<8x32xf32>, vector<8x32xf32>, vector<8x8xf32> -> vector<8x8xf32>
    %cst_122 = arith.constant 0.353553385 : f32
    %292 = vector.broadcast %cst_122 : f32 to vector<8x8xf32>
    %293 = arith.mulf %291, %292 : vector<8x8xf32>
    %cst_123 = arith.constant dense<0xFF800000> : vector<8xf32>
    %294 = vector.multi_reduction <maximumf>, %293, %cst_123 [1] : vector<8x8xf32> to vector<8xf32>
    %295 = vector.shape_cast %294 : vector<8xf32> to vector<8x1xf32>
    %296 = vector.broadcast %295 : vector<8x1xf32> to vector<8x8xf32>
    %297 = arith.subf %293, %296 : vector<8x8xf32>
    %298 = math.exp %297 : vector<8x8xf32>
    %cst_124 = arith.constant dense<0.000000e+00> : vector<8xf32>
    %299 = vector.multi_reduction <add>, %298, %cst_124 [1] : vector<8x8xf32> to vector<8xf32>
    %300 = vector.shape_cast %299 : vector<8xf32> to vector<8x1xf32>
    %301 = vector.broadcast %300 : vector<8x1xf32> to vector<8x8xf32>
    %302 = arith.divf %298, %301 : vector<8x8xf32>
    %cst_125 = arith.constant dense<0.000000e+00> : vector<8x32xf32>
    %303 = tpu.matmul %302, %278, %cst_125 {dimension_numbers = #tpu.dot_dimension_numbers<[1], [0], [0], [1], [0, 0, 1, 1], [], []>} : vector<8x8xf32>, vector<8x32xf32>, vector<8x32xf32> -> vector<8x32xf32>
    %304 = vector.broadcast %288 : vector<1x32xf32> to vector<8x32xf32>
    %305 = arith.mulf %303, %304 : vector<8x32xf32>
    %306 = arith.addf %280, %305 : vector<8x32xf32>
    %307 = arith.addf %281, %302 : vector<8x8xf32>
    %c8_i32_126 = arith.constant 8 : i32
    %308 = vector.broadcast %c8_i32_126 : i32 to vector<1x32xi32>
    %309 = arith.cmpi sge, %279, %308 : vector<1x32xi32>
    %c16_i32_127 = arith.constant 16 : i32
    %310 = vector.broadcast %c16_i32_127 : i32 to vector<1x32xi32>
    %311 = arith.cmpi slt, %279, %310 : vector<1x32xi32>
    %312 = arith.andi %309, %311 : vector<1x32xi1>
    %313 = arith.extui %312 : vector<1x32xi1> to vector<1x32xi32>
    %314 = arith.sitofp %313 : vector<1x32xi32> to vector<1x32xf32>
    %315 = vector.broadcast %314 : vector<1x32xf32> to vector<8x32xf32>
    %316 = arith.mulf %268, %315 : vector<8x32xf32>
    %cst_128 = arith.constant dense<0.000000e+00> : vector<8x8xf32>
    %317 = tpu.matmul %316, %273, %cst_128 {dimension_numbers = #tpu.dot_dimension_numbers<[1], [1], [0], [0], [0, 0, 1, 0], [], []>} : vector<8x32xf32>, vector<8x32xf32>, vector<8x8xf32> -> vector<8x8xf32>
    %cst_129 = arith.constant 0.353553385 : f32
    %318 = vector.broadcast %cst_129 : f32 to vector<8x8xf32>
    %319 = arith.mulf %317, %318 : vector<8x8xf32>
    %cst_130 = arith.constant dense<0xFF800000> : vector<8xf32>
    %320 = vector.multi_reduction <maximumf>, %319, %cst_130 [1] : vector<8x8xf32> to vector<8xf32>
    %321 = vector.shape_cast %320 : vector<8xf32> to vector<8x1xf32>
    %322 = vector.broadcast %321 : vector<8x1xf32> to vector<8x8xf32>
    %323 = arith.subf %319, %322 : vector<8x8xf32>
    %324 = math.exp %323 : vector<8x8xf32>
    %cst_131 = arith.constant dense<0.000000e+00> : vector<8xf32>
    %325 = vector.multi_reduction <add>, %324, %cst_131 [1] : vector<8x8xf32> to vector<8xf32>
    %326 = vector.shape_cast %325 : vector<8xf32> to vector<8x1xf32>
    %327 = vector.broadcast %326 : vector<8x1xf32> to vector<8x8xf32>
    %328 = arith.divf %324, %327 : vector<8x8xf32>
    %cst_132 = arith.constant dense<0.000000e+00> : vector<8x32xf32>
    %329 = tpu.matmul %328, %278, %cst_132 {dimension_numbers = #tpu.dot_dimension_numbers<[1], [0], [0], [1], [0, 0, 1, 1], [], []>} : vector<8x8xf32>, vector<8x32xf32>, vector<8x32xf32> -> vector<8x32xf32>
    %330 = vector.broadcast %314 : vector<1x32xf32> to vector<8x32xf32>
    %331 = arith.mulf %329, %330 : vector<8x32xf32>
    %332 = arith.addf %306, %331 : vector<8x32xf32>
    %333 = arith.addf %307, %328 : vector<8x8xf32>
    %c16_i32_133 = arith.constant 16 : i32
    %334 = vector.broadcast %c16_i32_133 : i32 to vector<1x32xi32>
    %335 = arith.cmpi sge, %279, %334 : vector<1x32xi32>
    %c24_i32_134 = arith.constant 24 : i32
    %336 = vector.broadcast %c24_i32_134 : i32 to vector<1x32xi32>
    %337 = arith.cmpi slt, %279, %336 : vector<1x32xi32>
    %338 = arith.andi %335, %337 : vector<1x32xi1>
    %339 = arith.extui %338 : vector<1x32xi1> to vector<1x32xi32>
    %340 = arith.sitofp %339 : vector<1x32xi32> to vector<1x32xf32>
    %341 = vector.broadcast %340 : vector<1x32xf32> to vector<8x32xf32>
    %342 = arith.mulf %268, %341 : vector<8x32xf32>
    %cst_135 = arith.constant dense<0.000000e+00> : vector<8x8xf32>
    %343 = tpu.matmul %342, %273, %cst_135 {dimension_numbers = #tpu.dot_dimension_numbers<[1], [1], [0], [0], [0, 0, 1, 0], [], []>} : vector<8x32xf32>, vector<8x32xf32>, vector<8x8xf32> -> vector<8x8xf32>
    %cst_136 = arith.constant 0.353553385 : f32
    %344 = vector.broadcast %cst_136 : f32 to vector<8x8xf32>
    %345 = arith.mulf %343, %344 : vector<8x8xf32>
    %cst_137 = arith.constant dense<0xFF800000> : vector<8xf32>
    %346 = vector.multi_reduction <maximumf>, %345, %cst_137 [1] : vector<8x8xf32> to vector<8xf32>
    %347 = vector.shape_cast %346 : vector<8xf32> to vector<8x1xf32>
    %348 = vector.broadcast %347 : vector<8x1xf32> to vector<8x8xf32>
    %349 = arith.subf %345, %348 : vector<8x8xf32>
    %350 = math.exp %349 : vector<8x8xf32>
    %cst_138 = arith.constant dense<0.000000e+00> : vector<8xf32>
    %351 = vector.multi_reduction <add>, %350, %cst_138 [1] : vector<8x8xf32> to vector<8xf32>
    %352 = vector.shape_cast %351 : vector<8xf32> to vector<8x1xf32>
    %353 = vector.broadcast %352 : vector<8x1xf32> to vector<8x8xf32>
    %354 = arith.divf %350, %353 : vector<8x8xf32>
    %cst_139 = arith.constant dense<0.000000e+00> : vector<8x32xf32>
    %355 = tpu.matmul %354, %278, %cst_139 {dimension_numbers = #tpu.dot_dimension_numbers<[1], [0], [0], [1], [0, 0, 1, 1], [], []>} : vector<8x8xf32>, vector<8x32xf32>, vector<8x32xf32> -> vector<8x32xf32>
    %356 = vector.broadcast %340 : vector<1x32xf32> to vector<8x32xf32>
    %357 = arith.mulf %355, %356 : vector<8x32xf32>
    %358 = arith.addf %332, %357 : vector<8x32xf32>
    %359 = arith.addf %333, %354 : vector<8x8xf32>
    %c24_i32_140 = arith.constant 24 : i32
    %360 = vector.broadcast %c24_i32_140 : i32 to vector<1x32xi32>
    %361 = arith.cmpi sge, %279, %360 : vector<1x32xi32>
    %c32_i32_141 = arith.constant 32 : i32
    %362 = vector.broadcast %c32_i32_141 : i32 to vector<1x32xi32>
    %363 = arith.cmpi slt, %279, %362 : vector<1x32xi32>
    %364 = arith.andi %361, %363 : vector<1x32xi1>
    %365 = arith.extui %364 : vector<1x32xi1> to vector<1x32xi32>
    %366 = arith.sitofp %365 : vector<1x32xi32> to vector<1x32xf32>
    %367 = vector.broadcast %366 : vector<1x32xf32> to vector<8x32xf32>
    %368 = arith.mulf %268, %367 : vector<8x32xf32>
    %cst_142 = arith.constant dense<0.000000e+00> : vector<8x8xf32>
    %369 = tpu.matmul %368, %273, %cst_142 {dimension_numbers = #tpu.dot_dimension_numbers<[1], [1], [0], [0], [0, 0, 1, 0], [], []>} : vector<8x32xf32>, vector<8x32xf32>, vector<8x8xf32> -> vector<8x8xf32>
    %cst_143 = arith.constant 0.353553385 : f32
    %370 = vector.broadcast %cst_143 : f32 to vector<8x8xf32>
    %371 = arith.mulf %369, %370 : vector<8x8xf32>
    %cst_144 = arith.constant dense<0xFF800000> : vector<8xf32>
    %372 = vector.multi_reduction <maximumf>, %371, %cst_144 [1] : vector<8x8xf32> to vector<8xf32>
    %373 = vector.shape_cast %372 : vector<8xf32> to vector<8x1xf32>
    %374 = vector.broadcast %373 : vector<8x1xf32> to vector<8x8xf32>
    %375 = arith.subf %371, %374 : vector<8x8xf32>
    %376 = math.exp %375 : vector<8x8xf32>
    %cst_145 = arith.constant dense<0.000000e+00> : vector<8xf32>
    %377 = vector.multi_reduction <add>, %376, %cst_145 [1] : vector<8x8xf32> to vector<8xf32>
    %378 = vector.shape_cast %377 : vector<8xf32> to vector<8x1xf32>
    %379 = vector.broadcast %378 : vector<8x1xf32> to vector<8x8xf32>
    %380 = arith.divf %376, %379 : vector<8x8xf32>
    %cst_146 = arith.constant dense<0.000000e+00> : vector<8x32xf32>
    %381 = tpu.matmul %380, %278, %cst_146 {dimension_numbers = #tpu.dot_dimension_numbers<[1], [0], [0], [1], [0, 0, 1, 1], [], []>} : vector<8x8xf32>, vector<8x32xf32>, vector<8x32xf32> -> vector<8x32xf32>
    %382 = vector.broadcast %366 : vector<1x32xf32> to vector<8x32xf32>
    %383 = arith.mulf %381, %382 : vector<8x32xf32>
    %384 = arith.addf %358, %383 : vector<8x32xf32>
    %385 = arith.addf %359, %380 : vector<8x8xf32>
    %cst_147 = arith.constant 2.500000e-01 : f32
    %386 = vector.broadcast %cst_147 : f32 to vector<8x8xf32>
    %387 = arith.mulf %385, %386 : vector<8x8xf32>
    %c0_148 = arith.constant 0 : index
    %c0_149 = arith.constant 0 : index
    %388 = vector.load %arg12[%c0_148, %c0_149] : memref<32x32xf32, #tpu.memory_space<vmem>>, vector<32x32xf32>
    %cst_150 = arith.constant dense<0.000000e+00> : vector<8x32xf32>
    %389 = tpu.matmul %384, %388, %cst_150 {dimension_numbers = #tpu.dot_dimension_numbers<[1], [0], [0], [1], [0, 0, 1, 1], [], []>} : vector<8x32xf32>, vector<32x32xf32>, vector<8x32xf32> -> vector<8x32xf32>
    %c0_151 = arith.constant 0 : index
    %c0_152 = arith.constant 0 : index
    %390 = vector.load %arg8[%c0_151, %c0_152] : memref<1x32xf32, #tpu.memory_space<vmem>>, vector<1x32xf32>
    %391 = vector.broadcast %390 : vector<1x32xf32> to vector<8x32xf32>
    %392 = arith.addf %389, %391 : vector<8x32xf32>
    %393 = arith.addf %263, %392 : vector<8x32xf32>
    %cst_153 = arith.constant dense<0.000000e+00> : vector<8xf32>
    %394 = vector.multi_reduction <add>, %393, %cst_153 [1] : vector<8x32xf32> to vector<8xf32>
    %395 = vector.shape_cast %394 : vector<8xf32> to vector<8x1xf32>
    %cst_154 = arith.constant 3.200000e+01 : f32
    %396 = vector.broadcast %cst_154 : f32 to vector<8x1xf32>
    %397 = arith.divf %395, %396 : vector<8x1xf32>
    %398 = vector.broadcast %397 : vector<8x1xf32> to vector<8x32xf32>
    %399 = arith.subf %393, %398 : vector<8x32xf32>
    %400 = arith.mulf %399, %399 : vector<8x32xf32>
    %cst_155 = arith.constant dense<0.000000e+00> : vector<8xf32>
    %401 = vector.multi_reduction <add>, %400, %cst_155 [1] : vector<8x32xf32> to vector<8xf32>
    %402 = vector.shape_cast %401 : vector<8xf32> to vector<8x1xf32>
    %cst_156 = arith.constant 3.200000e+01 : f32
    %403 = vector.broadcast %cst_156 : f32 to vector<8x1xf32>
    %404 = arith.divf %402, %403 : vector<8x1xf32>
    %405 = vector.broadcast %397 : vector<8x1xf32> to vector<8x32xf32>
    %406 = arith.subf %393, %405 : vector<8x32xf32>
    %cst_157 = arith.constant 9.99999974E-6 : f32
    %407 = vector.broadcast %cst_157 : f32 to vector<8x1xf32>
    %408 = arith.addf %404, %407 : vector<8x1xf32>
    %409 = math.rsqrt %408 : vector<8x1xf32>
    %410 = vector.broadcast %409 : vector<8x1xf32> to vector<8x32xf32>
    %411 = arith.mulf %406, %410 : vector<8x32xf32>
    %c0_158 = arith.constant 0 : index
    %c0_159 = arith.constant 0 : index
    %412 = vector.load %arg22[%c0_158, %c0_159] : memref<1x32xf32, #tpu.memory_space<vmem>>, vector<1x32xf32>
    %413 = vector.broadcast %412 : vector<1x32xf32> to vector<8x32xf32>
    %414 = arith.mulf %411, %413 : vector<8x32xf32>
    %c0_160 = arith.constant 0 : index
    %c0_161 = arith.constant 0 : index
    %415 = vector.load %arg21[%c0_160, %c0_161] : memref<1x32xf32, #tpu.memory_space<vmem>>, vector<1x32xf32>
    %416 = vector.broadcast %415 : vector<1x32xf32> to vector<8x32xf32>
    %417 = arith.addf %414, %416 : vector<8x32xf32>
    %c0_162 = arith.constant 0 : index
    %c0_163 = arith.constant 0 : index
    %c0_164 = arith.constant 0 : index
    %c0_165 = arith.constant 0 : index
    %418 = vector.load %arg68[%c0_162, %c0_163, %c0_164, %c0_165] : memref<1x2x8x8xf32, #tpu.memory_space<vmem>>, vector<1x1x8x8xf32>
    %419 = vector.shape_cast %418 : vector<1x1x8x8xf32> to vector<8x8xf32>
    %420 = vector.shape_cast %387 : vector<8x8xf32> to vector<1x1x8x8xf32>
    tpu.vector_store %arg68[%c0_162, %c0_163, %c0_164, %c0_165], %420 {strides = array<i32>} : memref<1x2x8x8xf32, #tpu.memory_space<vmem>>, vector<1x1x8x8xf32>,
    %c0_166 = arith.constant 0 : index
    %c0_167 = arith.constant 0 : index
    %421 = vector.load %arg17[%c0_166, %c0_167] : memref<32x64xf32, #tpu.memory_space<vmem>>, vector<32x64xf32>
    %cst_168 = arith.constant dense<0.000000e+00> : vector<8x64xf32>
    %422 = tpu.matmul %417, %421, %cst_168 {dimension_numbers = #tpu.dot_dimension_numbers<[1], [0], [0], [1], [0, 0, 1, 1], [], []>} : vector<8x32xf32>, vector<32x64xf32>, vector<8x64xf32> -> vector<8x64xf32>
    %c0_169 = arith.constant 0 : index
    %c0_170 = arith.constant 0 : index
    %423 = vector.load %arg15[%c0_169, %c0_170] : memref<1x64xf32, #tpu.memory_space<vmem>>, vector<1x64xf32>
    %424 = vector.broadcast %423 : vector<1x64xf32> to vector<8x64xf32>
    %425 = arith.addf %422, %424 : vector<8x64xf32>
    %cst_171 = arith.constant 0.000000e+00 : f32
    %426 = vector.broadcast %cst_171 : f32 to vector<8x64xf32>
    %427 = arith.maximumf %425, %426 : vector<8x64xf32>
    %c0_172 = arith.constant 0 : index
    %c0_173 = arith.constant 0 : index
    %428 = vector.load %arg18[%c0_172, %c0_173] : memref<64x32xf32, #tpu.memory_space<vmem>>, vector<64x32xf32>
    %cst_174 = arith.constant dense<0.000000e+00> : vector<8x32xf32>
    %429 = tpu.matmul %427, %428, %cst_174 {dimension_numbers = #tpu.dot_dimension_numbers<[1], [0], [0], [1], [0, 0, 1, 1], [], []>} : vector<8x64xf32>, vector<64x32xf32>, vector<8x32xf32> -> vector<8x32xf32>
    %c0_175 = arith.constant 0 : index
    %c0_176 = arith.constant 0 : index
    %430 = vector.load %arg16[%c0_175, %c0_176] : memref<1x32xf32, #tpu.memory_space<vmem>>, vector<1x32xf32>
    %431 = vector.broadcast %430 : vector<1x32xf32> to vector<8x32xf32>
    %432 = arith.addf %429, %431 : vector<8x32xf32>
    %433 = arith.addf %417, %432 : vector<8x32xf32>
    %cst_177 = arith.constant dense<0.000000e+00> : vector<8xf32>
    %434 = vector.multi_reduction <add>, %433, %cst_177 [1] : vector<8x32xf32> to vector<8xf32>
    %435 = vector.shape_cast %434 : vector<8xf32> to vector<8x1xf32>
    %cst_178 = arith.constant 3.200000e+01 : f32
    %436 = vector.broadcast %cst_178 : f32 to vector<8x1xf32>
    %437 = arith.divf %435, %436 : vector<8x1xf32>
    %438 = vector.broadcast %437 : vector<8x1xf32> to vector<8x32xf32>
    %439 = arith.subf %433, %438 : vector<8x32xf32>
    %440 = arith.mulf %439, %439 : vector<8x32xf32>
    %cst_179 = arith.constant dense<0.000000e+00> : vector<8xf32>
    %441 = vector.multi_reduction <add>, %440, %cst_179 [1] : vector<8x32xf32> to vector<8xf32>
    %442 = vector.shape_cast %441 : vector<8xf32> to vector<8x1xf32>
    %cst_180 = arith.constant 3.200000e+01 : f32
    %443 = vector.broadcast %cst_180 : f32 to vector<8x1xf32>
    %444 = arith.divf %442, %443 : vector<8x1xf32>
    %445 = vector.broadcast %437 : vector<8x1xf32> to vector<8x32xf32>
    %446 = arith.subf %433, %445 : vector<8x32xf32>
    %cst_181 = arith.constant 9.99999974E-6 : f32
    %447 = vector.broadcast %cst_181 : f32 to vector<8x1xf32>
    %448 = arith.addf %444, %447 : vector<8x1xf32>
    %449 = math.rsqrt %448 : vector<8x1xf32>
    %450 = vector.broadcast %449 : vector<8x1xf32> to vector<8x32xf32>
    %451 = arith.mulf %446, %450 : vector<8x32xf32>
    %c0_182 = arith.constant 0 : index
    %c0_183 = arith.constant 0 : index
    %452 = vector.load %arg24[%c0_182, %c0_183] : memref<1x32xf32, #tpu.memory_space<vmem>>, vector<1x32xf32>
    %453 = vector.broadcast %452 : vector<1x32xf32> to vector<8x32xf32>
    %454 = arith.mulf %451, %453 : vector<8x32xf32>
    %c0_184 = arith.constant 0 : index
    %c0_185 = arith.constant 0 : index
    %455 = vector.load %arg23[%c0_184, %c0_185] : memref<1x32xf32, #tpu.memory_space<vmem>>, vector<1x32xf32>
    %456 = vector.broadcast %455 : vector<1x32xf32> to vector<8x32xf32>
    %457 = arith.addf %454, %456 : vector<8x32xf32>
    %c0_186 = arith.constant 0 : index
    %c0_187 = arith.constant 0 : index
    %458 = vector.load %arg50[%c0_186, %c0_187] : memref<32x96xf32, #tpu.memory_space<vmem>>, vector<32x96xf32>
    %cst_188 = arith.constant dense<0.000000e+00> : vector<8x96xf32>
    %459 = tpu.matmul %457, %458, %cst_188 {dimension_numbers = #tpu.dot_dimension_numbers<[1], [0], [0], [1], [0, 0, 1, 1], [], []>} : vector<8x32xf32>, vector<32x96xf32>, vector<8x96xf32> -> vector<8x96xf32>
    %c0_189 = arith.constant 0 : index
    %c0_190 = arith.constant 0 : index
    %460 = vector.load %arg48[%c0_189, %c0_190] : memref<1x96xf32, #tpu.memory_space<vmem>>, vector<1x96xf32>
    %461 = vector.broadcast %460 : vector<1x96xf32> to vector<8x96xf32>
    %462 = arith.addf %459, %461 : vector<8x96xf32>
    %463 = vector.extract_strided_slice %462 {offsets = [0, 0], sizes = [8, 32], strides = [1, 1]} : vector<8x96xf32> to vector<8x32xf32>
    %464 = vector.extract_strided_slice %462 {offsets = [0, 32], sizes = [8, 32], strides = [1, 1]} : vector<8x96xf32> to vector<8x32xf32>
    %465 = vector.extract_strided_slice %462 {offsets = [0, 64], sizes = [8, 32], strides = [1, 1]} : vector<8x96xf32> to vector<8x32xf32>
    %466 = tpu.iota {dimensions = array<i32: 1>} : vector<1x32xi32>
    %cst_191 = arith.constant 0.000000e+00 : f32
    %467 = vector.broadcast %cst_191 : f32 to vector<8x32xf32>
    %c0_i32_192 = arith.constant 0 : i32
    %468 = vector.broadcast %c0_i32_192 : i32 to vector<1x32xi32>
    %469 = arith.cmpi sge, %466, %468 : vector<1x32xi32>
    %c8_i32_193 = arith.constant 8 : i32
    %470 = vector.broadcast %c8_i32_193 : i32 to vector<1x32xi32>
    %471 = arith.cmpi slt, %466, %470 : vector<1x32xi32>
    %472 = arith.andi %469, %471 : vector<1x32xi1>
    %473 = arith.extui %472 : vector<1x32xi1> to vector<1x32xi32>
    %474 = arith.sitofp %473 : vector<1x32xi32> to vector<1x32xf32>
    %475 = vector.broadcast %474 : vector<1x32xf32> to vector<8x32xf32>
    %476 = arith.mulf %463, %475 : vector<8x32xf32>
    %cst_194 = arith.constant dense<0.000000e+00> : vector<8x8xf32>
    %477 = tpu.matmul %476, %464, %cst_194 {dimension_numbers = #tpu.dot_dimension_numbers<[1], [1], [0], [0], [0, 0, 1, 0], [], []>} : vector<8x32xf32>, vector<8x32xf32>, vector<8x8xf32> -> vector<8x8xf32>
    %cst_195 = arith.constant 0.353553385 : f32
    %478 = vector.broadcast %cst_195 : f32 to vector<8x8xf32>
    %479 = arith.mulf %477, %478 : vector<8x8xf32>
    %480 = arith.addf %479, %119 : vector<8x8xf32>
    %cst_196 = arith.constant dense<0xFF800000> : vector<8xf32>
    %481 = vector.multi_reduction <maximumf>, %480, %cst_196 [1] : vector<8x8xf32> to vector<8xf32>
    %482 = vector.shape_cast %481 : vector<8xf32> to vector<8x1xf32>
    %483 = vector.broadcast %482 : vector<8x1xf32> to vector<8x8xf32>
    %484 = arith.subf %480, %483 : vector<8x8xf32>
    %485 = math.exp %484 : vector<8x8xf32>
    %cst_197 = arith.constant dense<0.000000e+00> : vector<8xf32>
    %486 = vector.multi_reduction <add>, %485, %cst_197 [1] : vector<8x8xf32> to vector<8xf32>
    %487 = vector.shape_cast %486 : vector<8xf32> to vector<8x1xf32>
    %488 = vector.broadcast %487 : vector<8x1xf32> to vector<8x8xf32>
    %489 = arith.divf %485, %488 : vector<8x8xf32>
    %cst_198 = arith.constant dense<0.000000e+00> : vector<8x32xf32>
    %490 = tpu.matmul %489, %465, %cst_198 {dimension_numbers = #tpu.dot_dimension_numbers<[1], [0], [0], [1], [0, 0, 1, 1], [], []>} : vector<8x8xf32>, vector<8x32xf32>, vector<8x32xf32> -> vector<8x32xf32>
    %491 = vector.broadcast %474 : vector<1x32xf32> to vector<8x32xf32>
    %492 = arith.mulf %490, %491 : vector<8x32xf32>
    %493 = arith.addf %467, %492 : vector<8x32xf32>
    %c8_i32_199 = arith.constant 8 : i32
    %494 = vector.broadcast %c8_i32_199 : i32 to vector<1x32xi32>
    %495 = arith.cmpi sge, %466, %494 : vector<1x32xi32>
    %c16_i32_200 = arith.constant 16 : i32
    %496 = vector.broadcast %c16_i32_200 : i32 to vector<1x32xi32>
    %497 = arith.cmpi slt, %466, %496 : vector<1x32xi32>
    %498 = arith.andi %495, %497 : vector<1x32xi1>
    %499 = arith.extui %498 : vector<1x32xi1> to vector<1x32xi32>
    %500 = arith.sitofp %499 : vector<1x32xi32> to vector<1x32xf32>
    %501 = vector.broadcast %500 : vector<1x32xf32> to vector<8x32xf32>
    %502 = arith.mulf %463, %501 : vector<8x32xf32>
    %cst_201 = arith.constant dense<0.000000e+00> : vector<8x8xf32>
    %503 = tpu.matmul %502, %464, %cst_201 {dimension_numbers = #tpu.dot_dimension_numbers<[1], [1], [0], [0], [0, 0, 1, 0], [], []>} : vector<8x32xf32>, vector<8x32xf32>, vector<8x8xf32> -> vector<8x8xf32>
    %cst_202 = arith.constant 0.353553385 : f32
    %504 = vector.broadcast %cst_202 : f32 to vector<8x8xf32>
    %505 = arith.mulf %503, %504 : vector<8x8xf32>
    %506 = arith.addf %505, %119 : vector<8x8xf32>
    %cst_203 = arith.constant dense<0xFF800000> : vector<8xf32>
    %507 = vector.multi_reduction <maximumf>, %506, %cst_203 [1] : vector<8x8xf32> to vector<8xf32>
    %508 = vector.shape_cast %507 : vector<8xf32> to vector<8x1xf32>
    %509 = vector.broadcast %508 : vector<8x1xf32> to vector<8x8xf32>
    %510 = arith.subf %506, %509 : vector<8x8xf32>
    %511 = math.exp %510 : vector<8x8xf32>
    %cst_204 = arith.constant dense<0.000000e+00> : vector<8xf32>
    %512 = vector.multi_reduction <add>, %511, %cst_204 [1] : vector<8x8xf32> to vector<8xf32>
    %513 = vector.shape_cast %512 : vector<8xf32> to vector<8x1xf32>
    %514 = vector.broadcast %513 : vector<8x1xf32> to vector<8x8xf32>
    %515 = arith.divf %511, %514 : vector<8x8xf32>
    %cst_205 = arith.constant dense<0.000000e+00> : vector<8x32xf32>
    %516 = tpu.matmul %515, %465, %cst_205 {dimension_numbers = #tpu.dot_dimension_numbers<[1], [0], [0], [1], [0, 0, 1, 1], [], []>} : vector<8x8xf32>, vector<8x32xf32>, vector<8x32xf32> -> vector<8x32xf32>
    %517 = vector.broadcast %500 : vector<1x32xf32> to vector<8x32xf32>
    %518 = arith.mulf %516, %517 : vector<8x32xf32>
    %519 = arith.addf %493, %518 : vector<8x32xf32>
    %c16_i32_206 = arith.constant 16 : i32
    %520 = vector.broadcast %c16_i32_206 : i32 to vector<1x32xi32>
    %521 = arith.cmpi sge, %466, %520 : vector<1x32xi32>
    %c24_i32_207 = arith.constant 24 : i32
    %522 = vector.broadcast %c24_i32_207 : i32 to vector<1x32xi32>
    %523 = arith.cmpi slt, %466, %522 : vector<1x32xi32>
    %524 = arith.andi %521, %523 : vector<1x32xi1>
    %525 = arith.extui %524 : vector<1x32xi1> to vector<1x32xi32>
    %526 = arith.sitofp %525 : vector<1x32xi32> to vector<1x32xf32>
    %527 = vector.broadcast %526 : vector<1x32xf32> to vector<8x32xf32>
    %528 = arith.mulf %463, %527 : vector<8x32xf32>
    %cst_208 = arith.constant dense<0.000000e+00> : vector<8x8xf32>
    %529 = tpu.matmul %528, %464, %cst_208 {dimension_numbers = #tpu.dot_dimension_numbers<[1], [1], [0], [0], [0, 0, 1, 0], [], []>} : vector<8x32xf32>, vector<8x32xf32>, vector<8x8xf32> -> vector<8x8xf32>
    %cst_209 = arith.constant 0.353553385 : f32
    %530 = vector.broadcast %cst_209 : f32 to vector<8x8xf32>
    %531 = arith.mulf %529, %530 : vector<8x8xf32>
    %532 = arith.addf %531, %119 : vector<8x8xf32>
    %cst_210 = arith.constant dense<0xFF800000> : vector<8xf32>
    %533 = vector.multi_reduction <maximumf>, %532, %cst_210 [1] : vector<8x8xf32> to vector<8xf32>
    %534 = vector.shape_cast %533 : vector<8xf32> to vector<8x1xf32>
    %535 = vector.broadcast %534 : vector<8x1xf32> to vector<8x8xf32>
    %536 = arith.subf %532, %535 : vector<8x8xf32>
    %537 = math.exp %536 : vector<8x8xf32>
    %cst_211 = arith.constant dense<0.000000e+00> : vector<8xf32>
    %538 = vector.multi_reduction <add>, %537, %cst_211 [1] : vector<8x8xf32> to vector<8xf32>
    %539 = vector.shape_cast %538 : vector<8xf32> to vector<8x1xf32>
    %540 = vector.broadcast %539 : vector<8x1xf32> to vector<8x8xf32>
    %541 = arith.divf %537, %540 : vector<8x8xf32>
    %cst_212 = arith.constant dense<0.000000e+00> : vector<8x32xf32>
    %542 = tpu.matmul %541, %465, %cst_212 {dimension_numbers = #tpu.dot_dimension_numbers<[1], [0], [0], [1], [0, 0, 1, 1], [], []>} : vector<8x8xf32>, vector<8x32xf32>, vector<8x32xf32> -> vector<8x32xf32>
    %543 = vector.broadcast %526 : vector<1x32xf32> to vector<8x32xf32>
    %544 = arith.mulf %542, %543 : vector<8x32xf32>
    %545 = arith.addf %519, %544 : vector<8x32xf32>
    %c24_i32_213 = arith.constant 24 : i32
    %546 = vector.broadcast %c24_i32_213 : i32 to vector<1x32xi32>
    %547 = arith.cmpi sge, %466, %546 : vector<1x32xi32>
    %c32_i32_214 = arith.constant 32 : i32
    %548 = vector.broadcast %c32_i32_214 : i32 to vector<1x32xi32>
    %549 = arith.cmpi slt, %466, %548 : vector<1x32xi32>
    %550 = arith.andi %547, %549 : vector<1x32xi1>
    %551 = arith.extui %550 : vector<1x32xi1> to vector<1x32xi32>
    %552 = arith.sitofp %551 : vector<1x32xi32> to vector<1x32xf32>
    %553 = vector.broadcast %552 : vector<1x32xf32> to vector<8x32xf32>
    %554 = arith.mulf %463, %553 : vector<8x32xf32>
    %cst_215 = arith.constant dense<0.000000e+00> : vector<8x8xf32>
    %555 = tpu.matmul %554, %464, %cst_215 {dimension_numbers = #tpu.dot_dimension_numbers<[1], [1], [0], [0], [0, 0, 1, 0], [], []>} : vector<8x32xf32>, vector<8x32xf32>, vector<8x8xf32> -> vector<8x8xf32>
    %cst_216 = arith.constant 0.353553385 : f32
    %556 = vector.broadcast %cst_216 : f32 to vector<8x8xf32>
    %557 = arith.mulf %555, %556 : vector<8x8xf32>
    %558 = arith.addf %557, %119 : vector<8x8xf32>
    %cst_217 = arith.constant dense<0xFF800000> : vector<8xf32>
    %559 = vector.multi_reduction <maximumf>, %558, %cst_217 [1] : vector<8x8xf32> to vector<8xf32>
    %560 = vector.shape_cast %559 : vector<8xf32> to vector<8x1xf32>
    %561 = vector.broadcast %560 : vector<8x1xf32> to vector<8x8xf32>
    %562 = arith.subf %558, %561 : vector<8x8xf32>
    %563 = math.exp %562 : vector<8x8xf32>
    %cst_218 = arith.constant dense<0.000000e+00> : vector<8xf32>
    %564 = vector.multi_reduction <add>, %563, %cst_218 [1] : vector<8x8xf32> to vector<8xf32>
    %565 = vector.shape_cast %564 : vector<8xf32> to vector<8x1xf32>
    %566 = vector.broadcast %565 : vector<8x1xf32> to vector<8x8xf32>
    %567 = arith.divf %563, %566 : vector<8x8xf32>
    %cst_219 = arith.constant dense<0.000000e+00> : vector<8x32xf32>
    %568 = tpu.matmul %567, %465, %cst_219 {dimension_numbers = #tpu.dot_dimension_numbers<[1], [0], [0], [1], [0, 0, 1, 1], [], []>} : vector<8x8xf32>, vector<8x32xf32>, vector<8x32xf32> -> vector<8x32xf32>
    %569 = vector.broadcast %552 : vector<1x32xf32> to vector<8x32xf32>
    %570 = arith.mulf %568, %569 : vector<8x32xf32>
    %571 = arith.addf %545, %570 : vector<8x32xf32>
    %c0_220 = arith.constant 0 : index
    %c0_221 = arith.constant 0 : index
    %572 = vector.load %arg49[%c0_220, %c0_221] : memref<32x32xf32, #tpu.memory_space<vmem>>, vector<32x32xf32>
    %cst_222 = arith.constant dense<0.000000e+00> : vector<8x32xf32>
    %573 = tpu.matmul %571, %572, %cst_222 {dimension_numbers = #tpu.dot_dimension_numbers<[1], [0], [0], [1], [0, 0, 1, 1], [], []>} : vector<8x32xf32>, vector<32x32xf32>, vector<8x32xf32> -> vector<8x32xf32>
    %c0_223 = arith.constant 0 : index
    %c0_224 = arith.constant 0 : index
    %574 = vector.load %arg47[%c0_223, %c0_224] : memref<1x32xf32, #tpu.memory_space<vmem>>, vector<1x32xf32>
    %575 = vector.broadcast %574 : vector<1x32xf32> to vector<8x32xf32>
    %576 = arith.addf %573, %575 : vector<8x32xf32>
    %577 = arith.addf %457, %576 : vector<8x32xf32>
    %cst_225 = arith.constant dense<0.000000e+00> : vector<8xf32>
    %578 = vector.multi_reduction <add>, %577, %cst_225 [1] : vector<8x32xf32> to vector<8xf32>
    %579 = vector.shape_cast %578 : vector<8xf32> to vector<8x1xf32>
    %cst_226 = arith.constant 3.200000e+01 : f32
    %580 = vector.broadcast %cst_226 : f32 to vector<8x1xf32>
    %581 = arith.divf %579, %580 : vector<8x1xf32>
    %582 = vector.broadcast %581 : vector<8x1xf32> to vector<8x32xf32>
    %583 = arith.subf %577, %582 : vector<8x32xf32>
    %584 = arith.mulf %583, %583 : vector<8x32xf32>
    %cst_227 = arith.constant dense<0.000000e+00> : vector<8xf32>
    %585 = vector.multi_reduction <add>, %584, %cst_227 [1] : vector<8x32xf32> to vector<8xf32>
    %586 = vector.shape_cast %585 : vector<8xf32> to vector<8x1xf32>
    %cst_228 = arith.constant 3.200000e+01 : f32
    %587 = vector.broadcast %cst_228 : f32 to vector<8x1xf32>
    %588 = arith.divf %586, %587 : vector<8x1xf32>
    %589 = vector.broadcast %581 : vector<8x1xf32> to vector<8x32xf32>
    %590 = arith.subf %577, %589 : vector<8x32xf32>
    %cst_229 = arith.constant 9.99999974E-6 : f32
    %591 = vector.broadcast %cst_229 : f32 to vector<8x1xf32>
    %592 = arith.addf %588, %591 : vector<8x1xf32>
    %593 = math.rsqrt %592 : vector<8x1xf32>
    %594 = vector.broadcast %593 : vector<8x1xf32> to vector<8x32xf32>
    %595 = arith.mulf %590, %594 : vector<8x32xf32>
    %c0_230 = arith.constant 0 : index
    %c0_231 = arith.constant 0 : index
    %596 = vector.load %arg42[%c0_230, %c0_231] : memref<1x32xf32, #tpu.memory_space<vmem>>, vector<1x32xf32>
    %597 = vector.broadcast %596 : vector<1x32xf32> to vector<8x32xf32>
    %598 = arith.mulf %595, %597 : vector<8x32xf32>
    %c0_232 = arith.constant 0 : index
    %c0_233 = arith.constant 0 : index
    %599 = vector.load %arg41[%c0_232, %c0_233] : memref<1x32xf32, #tpu.memory_space<vmem>>, vector<1x32xf32>
    %600 = vector.broadcast %599 : vector<1x32xf32> to vector<8x32xf32>
    %601 = arith.addf %598, %600 : vector<8x32xf32>
    %c0_234 = arith.constant 0 : index
    %c0_235 = arith.constant 0 : index
    %602 = vector.load %arg35[%c0_234, %c0_235] : memref<32x32xf32, #tpu.memory_space<vmem>>, vector<32x32xf32>
    %cst_236 = arith.constant dense<0.000000e+00> : vector<8x32xf32>
    %603 = tpu.matmul %601, %602, %cst_236 {dimension_numbers = #tpu.dot_dimension_numbers<[1], [0], [0], [1], [0, 0, 1, 1], [], []>} : vector<8x32xf32>, vector<32x32xf32>, vector<8x32xf32> -> vector<8x32xf32>
    %c0_237 = arith.constant 0 : index
    %c0_238 = arith.constant 0 : index
    %604 = vector.load %arg31[%c0_237, %c0_238] : memref<1x32xf32, #tpu.memory_space<vmem>>, vector<1x32xf32>
    %605 = vector.broadcast %604 : vector<1x32xf32> to vector<8x32xf32>
    %606 = arith.addf %603, %605 : vector<8x32xf32>
    %c0_239 = arith.constant 0 : index
    %c0_240 = arith.constant 0 : index
    %607 = vector.load %arg33[%c0_239, %c0_240] : memref<16x32xf32, #tpu.memory_space<vmem>>, vector<16x32xf32>
    %cst_241 = arith.constant dense<0.000000e+00> : vector<8x32xf32>
    %608 = tpu.matmul %3, %607, %cst_241 {dimension_numbers = #tpu.dot_dimension_numbers<[1], [0], [0], [1], [0, 0, 1, 1], [], []>} : vector<8x16xf32>, vector<16x32xf32>, vector<8x32xf32> -> vector<8x32xf32>
    %c0_242 = arith.constant 0 : index
    %c0_243 = arith.constant 0 : index
    %609 = vector.load %arg29[%c0_242, %c0_243] : memref<1x32xf32, #tpu.memory_space<vmem>>, vector<1x32xf32>
    %610 = vector.broadcast %609 : vector<1x32xf32> to vector<8x32xf32>
    %611 = arith.addf %608, %610 : vector<8x32xf32>
    %c0_244 = arith.constant 0 : index
    %c0_245 = arith.constant 0 : index
    %612 = vector.load %arg36[%c0_244, %c0_245] : memref<16x32xf32, #tpu.memory_space<vmem>>, vector<16x32xf32>
    %cst_246 = arith.constant dense<0.000000e+00> : vector<8x32xf32>
    %613 = tpu.matmul %5, %612, %cst_246 {dimension_numbers = #tpu.dot_dimension_numbers<[1], [0], [0], [1], [0, 0, 1, 1], [], []>} : vector<8x16xf32>, vector<16x32xf32>, vector<8x32xf32> -> vector<8x32xf32>
    %c0_247 = arith.constant 0 : index
    %c0_248 = arith.constant 0 : index
    %614 = vector.load %arg32[%c0_247, %c0_248] : memref<1x32xf32, #tpu.memory_space<vmem>>, vector<1x32xf32>
    %615 = vector.broadcast %614 : vector<1x32xf32> to vector<8x32xf32>
    %616 = arith.addf %613, %615 : vector<8x32xf32>
    %617 = tpu.iota {dimensions = array<i32: 1>} : vector<1x32xi32>
    %cst_249 = arith.constant 0.000000e+00 : f32
    %618 = vector.broadcast %cst_249 : f32 to vector<8x32xf32>
    %cst_250 = arith.constant 0.000000e+00 : f32
    %619 = vector.broadcast %cst_250 : f32 to vector<8x8xf32>
    %c0_i32_251 = arith.constant 0 : i32
    %620 = vector.broadcast %c0_i32_251 : i32 to vector<1x32xi32>
    %621 = arith.cmpi sge, %617, %620 : vector<1x32xi32>
    %c8_i32_252 = arith.constant 8 : i32
    %622 = vector.broadcast %c8_i32_252 : i32 to vector<1x32xi32>
    %623 = arith.cmpi slt, %617, %622 : vector<1x32xi32>
    %624 = arith.andi %621, %623 : vector<1x32xi1>
    %625 = arith.extui %624 : vector<1x32xi1> to vector<1x32xi32>
    %626 = arith.sitofp %625 : vector<1x32xi32> to vector<1x32xf32>
    %627 = vector.broadcast %626 : vector<1x32xf32> to vector<8x32xf32>
    %628 = arith.mulf %606, %627 : vector<8x32xf32>
    %cst_253 = arith.constant dense<0.000000e+00> : vector<8x8xf32>
    %629 = tpu.matmul %628, %611, %cst_253 {dimension_numbers = #tpu.dot_dimension_numbers<[1], [1], [0], [0], [0, 0, 1, 0], [], []>} : vector<8x32xf32>, vector<8x32xf32>, vector<8x8xf32> -> vector<8x8xf32>
    %cst_254 = arith.constant 0.353553385 : f32
    %630 = vector.broadcast %cst_254 : f32 to vector<8x8xf32>
    %631 = arith.mulf %629, %630 : vector<8x8xf32>
    %cst_255 = arith.constant dense<0xFF800000> : vector<8xf32>
    %632 = vector.multi_reduction <maximumf>, %631, %cst_255 [1] : vector<8x8xf32> to vector<8xf32>
    %633 = vector.shape_cast %632 : vector<8xf32> to vector<8x1xf32>
    %634 = vector.broadcast %633 : vector<8x1xf32> to vector<8x8xf32>
    %635 = arith.subf %631, %634 : vector<8x8xf32>
    %636 = math.exp %635 : vector<8x8xf32>
    %cst_256 = arith.constant dense<0.000000e+00> : vector<8xf32>
    %637 = vector.multi_reduction <add>, %636, %cst_256 [1] : vector<8x8xf32> to vector<8xf32>
    %638 = vector.shape_cast %637 : vector<8xf32> to vector<8x1xf32>
    %639 = vector.broadcast %638 : vector<8x1xf32> to vector<8x8xf32>
    %640 = arith.divf %636, %639 : vector<8x8xf32>
    %cst_257 = arith.constant dense<0.000000e+00> : vector<8x32xf32>
    %641 = tpu.matmul %640, %616, %cst_257 {dimension_numbers = #tpu.dot_dimension_numbers<[1], [0], [0], [1], [0, 0, 1, 1], [], []>} : vector<8x8xf32>, vector<8x32xf32>, vector<8x32xf32> -> vector<8x32xf32>
    %642 = vector.broadcast %626 : vector<1x32xf32> to vector<8x32xf32>
    %643 = arith.mulf %641, %642 : vector<8x32xf32>
    %644 = arith.addf %618, %643 : vector<8x32xf32>
    %645 = arith.addf %619, %640 : vector<8x8xf32>
    %c8_i32_258 = arith.constant 8 : i32
    %646 = vector.broadcast %c8_i32_258 : i32 to vector<1x32xi32>
    %647 = arith.cmpi sge, %617, %646 : vector<1x32xi32>
    %c16_i32_259 = arith.constant 16 : i32
    %648 = vector.broadcast %c16_i32_259 : i32 to vector<1x32xi32>
    %649 = arith.cmpi slt, %617, %648 : vector<1x32xi32>
    %650 = arith.andi %647, %649 : vector<1x32xi1>
    %651 = arith.extui %650 : vector<1x32xi1> to vector<1x32xi32>
    %652 = arith.sitofp %651 : vector<1x32xi32> to vector<1x32xf32>
    %653 = vector.broadcast %652 : vector<1x32xf32> to vector<8x32xf32>
    %654 = arith.mulf %606, %653 : vector<8x32xf32>
    %cst_260 = arith.constant dense<0.000000e+00> : vector<8x8xf32>
    %655 = tpu.matmul %654, %611, %cst_260 {dimension_numbers = #tpu.dot_dimension_numbers<[1], [1], [0], [0], [0, 0, 1, 0], [], []>} : vector<8x32xf32>, vector<8x32xf32>, vector<8x8xf32> -> vector<8x8xf32>
    %cst_261 = arith.constant 0.353553385 : f32
    %656 = vector.broadcast %cst_261 : f32 to vector<8x8xf32>
    %657 = arith.mulf %655, %656 : vector<8x8xf32>
    %cst_262 = arith.constant dense<0xFF800000> : vector<8xf32>
    %658 = vector.multi_reduction <maximumf>, %657, %cst_262 [1] : vector<8x8xf32> to vector<8xf32>
    %659 = vector.shape_cast %658 : vector<8xf32> to vector<8x1xf32>
    %660 = vector.broadcast %659 : vector<8x1xf32> to vector<8x8xf32>
    %661 = arith.subf %657, %660 : vector<8x8xf32>
    %662 = math.exp %661 : vector<8x8xf32>
    %cst_263 = arith.constant dense<0.000000e+00> : vector<8xf32>
    %663 = vector.multi_reduction <add>, %662, %cst_263 [1] : vector<8x8xf32> to vector<8xf32>
    %664 = vector.shape_cast %663 : vector<8xf32> to vector<8x1xf32>
    %665 = vector.broadcast %664 : vector<8x1xf32> to vector<8x8xf32>
    %666 = arith.divf %662, %665 : vector<8x8xf32>
    %cst_264 = arith.constant dense<0.000000e+00> : vector<8x32xf32>
    %667 = tpu.matmul %666, %616, %cst_264 {dimension_numbers = #tpu.dot_dimension_numbers<[1], [0], [0], [1], [0, 0, 1, 1], [], []>} : vector<8x8xf32>, vector<8x32xf32>, vector<8x32xf32> -> vector<8x32xf32>
    %668 = vector.broadcast %652 : vector<1x32xf32> to vector<8x32xf32>
    %669 = arith.mulf %667, %668 : vector<8x32xf32>
    %670 = arith.addf %644, %669 : vector<8x32xf32>
    %671 = arith.addf %645, %666 : vector<8x8xf32>
    %c16_i32_265 = arith.constant 16 : i32
    %672 = vector.broadcast %c16_i32_265 : i32 to vector<1x32xi32>
    %673 = arith.cmpi sge, %617, %672 : vector<1x32xi32>
    %c24_i32_266 = arith.constant 24 : i32
    %674 = vector.broadcast %c24_i32_266 : i32 to vector<1x32xi32>
    %675 = arith.cmpi slt, %617, %674 : vector<1x32xi32>
    %676 = arith.andi %673, %675 : vector<1x32xi1>
    %677 = arith.extui %676 : vector<1x32xi1> to vector<1x32xi32>
    %678 = arith.sitofp %677 : vector<1x32xi32> to vector<1x32xf32>
    %679 = vector.broadcast %678 : vector<1x32xf32> to vector<8x32xf32>
    %680 = arith.mulf %606, %679 : vector<8x32xf32>
    %cst_267 = arith.constant dense<0.000000e+00> : vector<8x8xf32>
    %681 = tpu.matmul %680, %611, %cst_267 {dimension_numbers = #tpu.dot_dimension_numbers<[1], [1], [0], [0], [0, 0, 1, 0], [], []>} : vector<8x32xf32>, vector<8x32xf32>, vector<8x8xf32> -> vector<8x8xf32>
    %cst_268 = arith.constant 0.353553385 : f32
    %682 = vector.broadcast %cst_268 : f32 to vector<8x8xf32>
    %683 = arith.mulf %681, %682 : vector<8x8xf32>
    %cst_269 = arith.constant dense<0xFF800000> : vector<8xf32>
    %684 = vector.multi_reduction <maximumf>, %683, %cst_269 [1] : vector<8x8xf32> to vector<8xf32>
    %685 = vector.shape_cast %684 : vector<8xf32> to vector<8x1xf32>
    %686 = vector.broadcast %685 : vector<8x1xf32> to vector<8x8xf32>
    %687 = arith.subf %683, %686 : vector<8x8xf32>
    %688 = math.exp %687 : vector<8x8xf32>
    %cst_270 = arith.constant dense<0.000000e+00> : vector<8xf32>
    %689 = vector.multi_reduction <add>, %688, %cst_270 [1] : vector<8x8xf32> to vector<8xf32>
    %690 = vector.shape_cast %689 : vector<8xf32> to vector<8x1xf32>
    %691 = vector.broadcast %690 : vector<8x1xf32> to vector<8x8xf32>
    %692 = arith.divf %688, %691 : vector<8x8xf32>
    %cst_271 = arith.constant dense<0.000000e+00> : vector<8x32xf32>
    %693 = tpu.matmul %692, %616, %cst_271 {dimension_numbers = #tpu.dot_dimension_numbers<[1], [0], [0], [1], [0, 0, 1, 1], [], []>} : vector<8x8xf32>, vector<8x32xf32>, vector<8x32xf32> -> vector<8x32xf32>
    %694 = vector.broadcast %678 : vector<1x32xf32> to vector<8x32xf32>
    %695 = arith.mulf %693, %694 : vector<8x32xf32>
    %696 = arith.addf %670, %695 : vector<8x32xf32>
    %697 = arith.addf %671, %692 : vector<8x8xf32>
    %c24_i32_272 = arith.constant 24 : i32
    %698 = vector.broadcast %c24_i32_272 : i32 to vector<1x32xi32>
    %699 = arith.cmpi sge, %617, %698 : vector<1x32xi32>
    %c32_i32_273 = arith.constant 32 : i32
    %700 = vector.broadcast %c32_i32_273 : i32 to vector<1x32xi32>
    %701 = arith.cmpi slt, %617, %700 : vector<1x32xi32>
    %702 = arith.andi %699, %701 : vector<1x32xi1>
    %703 = arith.extui %702 : vector<1x32xi1> to vector<1x32xi32>
    %704 = arith.sitofp %703 : vector<1x32xi32> to vector<1x32xf32>
    %705 = vector.broadcast %704 : vector<1x32xf32> to vector<8x32xf32>
    %706 = arith.mulf %606, %705 : vector<8x32xf32>
    %cst_274 = arith.constant dense<0.000000e+00> : vector<8x8xf32>
    %707 = tpu.matmul %706, %611, %cst_274 {dimension_numbers = #tpu.dot_dimension_numbers<[1], [1], [0], [0], [0, 0, 1, 0], [], []>} : vector<8x32xf32>, vector<8x32xf32>, vector<8x8xf32> -> vector<8x8xf32>
    %cst_275 = arith.constant 0.353553385 : f32
    %708 = vector.broadcast %cst_275 : f32 to vector<8x8xf32>
    %709 = arith.mulf %707, %708 : vector<8x8xf32>
    %cst_276 = arith.constant dense<0xFF800000> : vector<8xf32>
    %710 = vector.multi_reduction <maximumf>, %709, %cst_276 [1] : vector<8x8xf32> to vector<8xf32>
    %711 = vector.shape_cast %710 : vector<8xf32> to vector<8x1xf32>
    %712 = vector.broadcast %711 : vector<8x1xf32> to vector<8x8xf32>
    %713 = arith.subf %709, %712 : vector<8x8xf32>
    %714 = math.exp %713 : vector<8x8xf32>
    %cst_277 = arith.constant dense<0.000000e+00> : vector<8xf32>
    %715 = vector.multi_reduction <add>, %714, %cst_277 [1] : vector<8x8xf32> to vector<8xf32>
    %716 = vector.shape_cast %715 : vector<8xf32> to vector<8x1xf32>
    %717 = vector.broadcast %716 : vector<8x1xf32> to vector<8x8xf32>
    %718 = arith.divf %714, %717 : vector<8x8xf32>
    %cst_278 = arith.constant dense<0.000000e+00> : vector<8x32xf32>
    %719 = tpu.matmul %718, %616, %cst_278 {dimension_numbers = #tpu.dot_dimension_numbers<[1], [0], [0], [1], [0, 0, 1, 1], [], []>} : vector<8x8xf32>, vector<8x32xf32>, vector<8x32xf32> -> vector<8x32xf32>
    %720 = vector.broadcast %704 : vector<1x32xf32> to vector<8x32xf32>
    %721 = arith.mulf %719, %720 : vector<8x32xf32>
    %722 = arith.addf %696, %721 : vector<8x32xf32>
    %723 = arith.addf %697, %718 : vector<8x8xf32>
    %cst_279 = arith.constant 2.500000e-01 : f32
    %724 = vector.broadcast %cst_279 : f32 to vector<8x8xf32>
    %725 = arith.mulf %723, %724 : vector<8x8xf32>
    %c0_280 = arith.constant 0 : index
    %c0_281 = arith.constant 0 : index
    %726 = vector.load %arg34[%c0_280, %c0_281] : memref<32x32xf32, #tpu.memory_space<vmem>>, vector<32x32xf32>
    %cst_282 = arith.constant dense<0.000000e+00> : vector<8x32xf32>
    %727 = tpu.matmul %722, %726, %cst_282 {dimension_numbers = #tpu.dot_dimension_numbers<[1], [0], [0], [1], [0, 0, 1, 1], [], []>} : vector<8x32xf32>, vector<32x32xf32>, vector<8x32xf32> -> vector<8x32xf32>
    %c0_283 = arith.constant 0 : index
    %c0_284 = arith.constant 0 : index
    %728 = vector.load %arg30[%c0_283, %c0_284] : memref<1x32xf32, #tpu.memory_space<vmem>>, vector<1x32xf32>
    %729 = vector.broadcast %728 : vector<1x32xf32> to vector<8x32xf32>
    %730 = arith.addf %727, %729 : vector<8x32xf32>
    %731 = arith.addf %601, %730 : vector<8x32xf32>
    %cst_285 = arith.constant dense<0.000000e+00> : vector<8xf32>
    %732 = vector.multi_reduction <add>, %731, %cst_285 [1] : vector<8x32xf32> to vector<8xf32>
    %733 = vector.shape_cast %732 : vector<8xf32> to vector<8x1xf32>
    %cst_286 = arith.constant 3.200000e+01 : f32
    %734 = vector.broadcast %cst_286 : f32 to vector<8x1xf32>
    %735 = arith.divf %733, %734 : vector<8x1xf32>
    %736 = vector.broadcast %735 : vector<8x1xf32> to vector<8x32xf32>
    %737 = arith.subf %731, %736 : vector<8x32xf32>
    %738 = arith.mulf %737, %737 : vector<8x32xf32>
    %cst_287 = arith.constant dense<0.000000e+00> : vector<8xf32>
    %739 = vector.multi_reduction <add>, %738, %cst_287 [1] : vector<8x32xf32> to vector<8xf32>
    %740 = vector.shape_cast %739 : vector<8xf32> to vector<8x1xf32>
    %cst_288 = arith.constant 3.200000e+01 : f32
    %741 = vector.broadcast %cst_288 : f32 to vector<8x1xf32>
    %742 = arith.divf %740, %741 : vector<8x1xf32>
    %743 = vector.broadcast %735 : vector<8x1xf32> to vector<8x32xf32>
    %744 = arith.subf %731, %743 : vector<8x32xf32>
    %cst_289 = arith.constant 9.99999974E-6 : f32
    %745 = vector.broadcast %cst_289 : f32 to vector<8x1xf32>
    %746 = arith.addf %742, %745 : vector<8x1xf32>
    %747 = math.rsqrt %746 : vector<8x1xf32>
    %748 = vector.broadcast %747 : vector<8x1xf32> to vector<8x32xf32>
    %749 = arith.mulf %744, %748 : vector<8x32xf32>
    %c0_290 = arith.constant 0 : index
    %c0_291 = arith.constant 0 : index
    %750 = vector.load %arg44[%c0_290, %c0_291] : memref<1x32xf32, #tpu.memory_space<vmem>>, vector<1x32xf32>
    %751 = vector.broadcast %750 : vector<1x32xf32> to vector<8x32xf32>
    %752 = arith.mulf %749, %751 : vector<8x32xf32>
    %c0_292 = arith.constant 0 : index
    %c0_293 = arith.constant 0 : index
    %753 = vector.load %arg43[%c0_292, %c0_293] : memref<1x32xf32, #tpu.memory_space<vmem>>, vector<1x32xf32>
    %754 = vector.broadcast %753 : vector<1x32xf32> to vector<8x32xf32>
    %755 = arith.addf %752, %754 : vector<8x32xf32>
    %c0_294 = arith.constant 0 : index
    %c1_295 = arith.constant 1 : index
    %c0_296 = arith.constant 0 : index
    %c0_297 = arith.constant 0 : index
    %756 = vector.load %arg68[%c0_294, %c1_295, %c0_296, %c0_297] : memref<1x2x8x8xf32, #tpu.memory_space<vmem>>, vector<1x1x8x8xf32>
    %757 = vector.shape_cast %756 : vector<1x1x8x8xf32> to vector<8x8xf32>
    %758 = vector.shape_cast %725 : vector<8x8xf32> to vector<1x1x8x8xf32>
    tpu.vector_store %arg68[%c0_294, %c1_295, %c0_296, %c0_297], %758 {strides = array<i32>} : memref<1x2x8x8xf32, #tpu.memory_space<vmem>>, vector<1x1x8x8xf32>,
    %c0_298 = arith.constant 0 : index
    %c0_299 = arith.constant 0 : index
    %759 = vector.load %arg39[%c0_298, %c0_299] : memref<32x64xf32, #tpu.memory_space<vmem>>, vector<32x64xf32>
    %cst_300 = arith.constant dense<0.000000e+00> : vector<8x64xf32>
    %760 = tpu.matmul %755, %759, %cst_300 {dimension_numbers = #tpu.dot_dimension_numbers<[1], [0], [0], [1], [0, 0, 1, 1], [], []>} : vector<8x32xf32>, vector<32x64xf32>, vector<8x64xf32> -> vector<8x64xf32>
    %c0_301 = arith.constant 0 : index
    %c0_302 = arith.constant 0 : index
    %761 = vector.load %arg37[%c0_301, %c0_302] : memref<1x64xf32, #tpu.memory_space<vmem>>, vector<1x64xf32>
    %762 = vector.broadcast %761 : vector<1x64xf32> to vector<8x64xf32>
    %763 = arith.addf %760, %762 : vector<8x64xf32>
    %cst_303 = arith.constant 0.000000e+00 : f32
    %764 = vector.broadcast %cst_303 : f32 to vector<8x64xf32>
    %765 = arith.maximumf %763, %764 : vector<8x64xf32>
    %c0_304 = arith.constant 0 : index
    %c0_305 = arith.constant 0 : index
    %766 = vector.load %arg40[%c0_304, %c0_305] : memref<64x32xf32, #tpu.memory_space<vmem>>, vector<64x32xf32>
    %cst_306 = arith.constant dense<0.000000e+00> : vector<8x32xf32>
    %767 = tpu.matmul %765, %766, %cst_306 {dimension_numbers = #tpu.dot_dimension_numbers<[1], [0], [0], [1], [0, 0, 1, 1], [], []>} : vector<8x64xf32>, vector<64x32xf32>, vector<8x32xf32> -> vector<8x32xf32>
    %c0_307 = arith.constant 0 : index
    %c0_308 = arith.constant 0 : index
    %768 = vector.load %arg38[%c0_307, %c0_308] : memref<1x32xf32, #tpu.memory_space<vmem>>, vector<1x32xf32>
    %769 = vector.broadcast %768 : vector<1x32xf32> to vector<8x32xf32>
    %770 = arith.addf %767, %769 : vector<8x32xf32>
    %771 = arith.addf %755, %770 : vector<8x32xf32>
    %cst_309 = arith.constant dense<0.000000e+00> : vector<8xf32>
    %772 = vector.multi_reduction <add>, %771, %cst_309 [1] : vector<8x32xf32> to vector<8xf32>
    %773 = vector.shape_cast %772 : vector<8xf32> to vector<8x1xf32>
    %cst_310 = arith.constant 3.200000e+01 : f32
    %774 = vector.broadcast %cst_310 : f32 to vector<8x1xf32>
    %775 = arith.divf %773, %774 : vector<8x1xf32>
    %776 = vector.broadcast %775 : vector<8x1xf32> to vector<8x32xf32>
    %777 = arith.subf %771, %776 : vector<8x32xf32>
    %778 = arith.mulf %777, %777 : vector<8x32xf32>
    %cst_311 = arith.constant dense<0.000000e+00> : vector<8xf32>
    %779 = vector.multi_reduction <add>, %778, %cst_311 [1] : vector<8x32xf32> to vector<8xf32>
    %780 = vector.shape_cast %779 : vector<8xf32> to vector<8x1xf32>
    %cst_312 = arith.constant 3.200000e+01 : f32
    %781 = vector.broadcast %cst_312 : f32 to vector<8x1xf32>
    %782 = arith.divf %780, %781 : vector<8x1xf32>
    %783 = vector.broadcast %775 : vector<8x1xf32> to vector<8x32xf32>
    %784 = arith.subf %771, %783 : vector<8x32xf32>
    %cst_313 = arith.constant 9.99999974E-6 : f32
    %785 = vector.broadcast %cst_313 : f32 to vector<8x1xf32>
    %786 = arith.addf %782, %785 : vector<8x1xf32>
    %787 = math.rsqrt %786 : vector<8x1xf32>
    %788 = vector.broadcast %787 : vector<8x1xf32> to vector<8x32xf32>
    %789 = arith.mulf %784, %788 : vector<8x32xf32>
    %c0_314 = arith.constant 0 : index
    %c0_315 = arith.constant 0 : index
    %790 = vector.load %arg46[%c0_314, %c0_315] : memref<1x32xf32, #tpu.memory_space<vmem>>, vector<1x32xf32>
    %791 = vector.broadcast %790 : vector<1x32xf32> to vector<8x32xf32>
    %792 = arith.mulf %789, %791 : vector<8x32xf32>
    %c0_316 = arith.constant 0 : index
    %c0_317 = arith.constant 0 : index
    %793 = vector.load %arg45[%c0_316, %c0_317] : memref<1x32xf32, #tpu.memory_space<vmem>>, vector<1x32xf32>
    %794 = vector.broadcast %793 : vector<1x32xf32> to vector<8x32xf32>
    %795 = arith.addf %792, %794 : vector<8x32xf32>
    %796 = tpu.iota {dimensions = array<i32: 0>} : vector<8x8xi32>
    %797 = tpu.iota {dimensions = array<i32: 1>} : vector<8x8xi32>
    %c2_i32_318 = arith.constant 2 : i32
    %798 = vector.broadcast %c2_i32_318 : i32 to vector<8x8xi32>
    %799 = arith.subi %796, %798 : vector<8x8xi32>
    %800 = arith.cmpi eq, %797, %799 : vector<8x8xi32>
    %801 = arith.extui %800 : vector<8x8xi1> to vector<8x8xi32>
    %802 = arith.sitofp %801 : vector<8x8xi32> to vector<8x8xf32>
    %cst_319 = arith.constant dense<0.000000e+00> : vector<8x32xf32>
    %803 = tpu.matmul %802, %795, %cst_319 {dimension_numbers = #tpu.dot_dimension_numbers<[1], [0], [0], [1], [0, 0, 1, 1], [], []>} : vector<8x8xf32>, vector<8x32xf32>, vector<8x32xf32> -> vector<8x32xf32>
    %c0_320 = arith.constant 0 : index
    %c0_321 = arith.constant 0 : index
    %c0_322 = arith.constant 0 : index
    %804 = vector.load %arg53[%c0_320, %c0_321, %c0_322] : memref<3x32x64xf32, #tpu.memory_space<vmem>>, vector<1x32x64xf32>
    %805 = vector.shape_cast %804 : vector<1x32x64xf32> to vector<32x64xf32>
    %cst_323 = arith.constant dense<0.000000e+00> : vector<8x64xf32>
    %806 = tpu.matmul %803, %805, %cst_323 {dimension_numbers = #tpu.dot_dimension_numbers<[1], [0], [0], [1], [0, 0, 1, 1], [], []>} : vector<8x32xf32>, vector<32x64xf32>, vector<8x64xf32> -> vector<8x64xf32>
    %807 = tpu.iota {dimensions = array<i32: 0>} : vector<8x8xi32>
    %808 = tpu.iota {dimensions = array<i32: 1>} : vector<8x8xi32>
    %c1_i32_324 = arith.constant 1 : i32
    %809 = vector.broadcast %c1_i32_324 : i32 to vector<8x8xi32>
    %810 = arith.subi %807, %809 : vector<8x8xi32>
    %811 = arith.cmpi eq, %808, %810 : vector<8x8xi32>
    %812 = arith.extui %811 : vector<8x8xi1> to vector<8x8xi32>
    %813 = arith.sitofp %812 : vector<8x8xi32> to vector<8x8xf32>
    %cst_325 = arith.constant dense<0.000000e+00> : vector<8x32xf32>
    %814 = tpu.matmul %813, %795, %cst_325 {dimension_numbers = #tpu.dot_dimension_numbers<[1], [0], [0], [1], [0, 0, 1, 1], [], []>} : vector<8x8xf32>, vector<8x32xf32>, vector<8x32xf32> -> vector<8x32xf32>
    %c1_326 = arith.constant 1 : index
    %c0_327 = arith.constant 0 : index
    %c0_328 = arith.constant 0 : index
    %815 = vector.load %arg53[%c1_326, %c0_327, %c0_328] : memref<3x32x64xf32, #tpu.memory_space<vmem>>, vector<1x32x64xf32>
    %816 = vector.shape_cast %815 : vector<1x32x64xf32> to vector<32x64xf32>
    %cst_329 = arith.constant dense<0.000000e+00> : vector<8x64xf32>
    %817 = tpu.matmul %814, %816, %cst_329 {dimension_numbers = #tpu.dot_dimension_numbers<[1], [0], [0], [1], [0, 0, 1, 1], [], []>} : vector<8x32xf32>, vector<32x64xf32>, vector<8x64xf32> -> vector<8x64xf32>
    %818 = arith.addf %806, %817 : vector<8x64xf32>
    %c2_330 = arith.constant 2 : index
    %c0_331 = arith.constant 0 : index
    %c0_332 = arith.constant 0 : index
    %819 = vector.load %arg53[%c2_330, %c0_331, %c0_332] : memref<3x32x64xf32, #tpu.memory_space<vmem>>, vector<1x32x64xf32>
    %820 = vector.shape_cast %819 : vector<1x32x64xf32> to vector<32x64xf32>
    %cst_333 = arith.constant dense<0.000000e+00> : vector<8x64xf32>
    %821 = tpu.matmul %795, %820, %cst_333 {dimension_numbers = #tpu.dot_dimension_numbers<[1], [0], [0], [1], [0, 0, 1, 1], [], []>} : vector<8x32xf32>, vector<32x64xf32>, vector<8x64xf32> -> vector<8x64xf32>
    %822 = arith.addf %818, %821 : vector<8x64xf32>
    %c0_334 = arith.constant 0 : index
    %c0_335 = arith.constant 0 : index
    %823 = vector.load %arg54[%c0_334, %c0_335] : memref<1x64xf32, #tpu.memory_space<vmem>>, vector<1x64xf32>
    %824 = vector.broadcast %823 : vector<1x64xf32> to vector<8x64xf32>
    %825 = arith.addf %822, %824 : vector<8x64xf32>
    %826 = vector.extract_strided_slice %825 {offsets = [0, 0], sizes = [8, 32], strides = [1, 1]} : vector<8x64xf32> to vector<8x32xf32>
    %827 = vector.extract_strided_slice %825 {offsets = [0, 32], sizes = [8, 32], strides = [1, 1]} : vector<8x64xf32> to vector<8x32xf32>
    %828 = arith.negf %827 : vector<8x32xf32>
    %829 = math.exp %828 : vector<8x32xf32>
    %cst_336 = arith.constant 1.000000e+00 : f32
    %830 = vector.broadcast %cst_336 : f32 to vector<8x32xf32>
    %831 = arith.addf %830, %829 : vector<8x32xf32>
    %832 = arith.divf %830, %831 : vector<8x32xf32>
    %833 = arith.mulf %826, %832 : vector<8x32xf32>
    %834 = tpu.iota {dimensions = array<i32: 0>} : vector<8x8xi32>
    %835 = tpu.iota {dimensions = array<i32: 1>} : vector<8x8xi32>
    %c4_i32_337 = arith.constant 4 : i32
    %836 = vector.broadcast %c4_i32_337 : i32 to vector<8x8xi32>
    %837 = arith.subi %834, %836 : vector<8x8xi32>
    %838 = arith.cmpi eq, %835, %837 : vector<8x8xi32>
    %839 = arith.extui %838 : vector<8x8xi1> to vector<8x8xi32>
    %840 = arith.sitofp %839 : vector<8x8xi32> to vector<8x8xf32>
    %cst_338 = arith.constant dense<0.000000e+00> : vector<8x32xf32>
    %841 = tpu.matmul %840, %833, %cst_338 {dimension_numbers = #tpu.dot_dimension_numbers<[1], [0], [0], [1], [0, 0, 1, 1], [], []>} : vector<8x8xf32>, vector<8x32xf32>, vector<8x32xf32> -> vector<8x32xf32>
    %c0_339 = arith.constant 0 : index
    %c0_340 = arith.constant 0 : index
    %c0_341 = arith.constant 0 : index
    %842 = vector.load %arg55[%c0_339, %c0_340, %c0_341] : memref<3x32x64xf32, #tpu.memory_space<vmem>>, vector<1x32x64xf32>
    %843 = vector.shape_cast %842 : vector<1x32x64xf32> to vector<32x64xf32>
    %cst_342 = arith.constant dense<0.000000e+00> : vector<8x64xf32>
    %844 = tpu.matmul %841, %843, %cst_342 {dimension_numbers = #tpu.dot_dimension_numbers<[1], [0], [0], [1], [0, 0, 1, 1], [], []>} : vector<8x32xf32>, vector<32x64xf32>, vector<8x64xf32> -> vector<8x64xf32>
    %845 = tpu.iota {dimensions = array<i32: 0>} : vector<8x8xi32>
    %846 = tpu.iota {dimensions = array<i32: 1>} : vector<8x8xi32>
    %c2_i32_343 = arith.constant 2 : i32
    %847 = vector.broadcast %c2_i32_343 : i32 to vector<8x8xi32>
    %848 = arith.subi %845, %847 : vector<8x8xi32>
    %849 = arith.cmpi eq, %846, %848 : vector<8x8xi32>
    %850 = arith.extui %849 : vector<8x8xi1> to vector<8x8xi32>
    %851 = arith.sitofp %850 : vector<8x8xi32> to vector<8x8xf32>
    %cst_344 = arith.constant dense<0.000000e+00> : vector<8x32xf32>
    %852 = tpu.matmul %851, %833, %cst_344 {dimension_numbers = #tpu.dot_dimension_numbers<[1], [0], [0], [1], [0, 0, 1, 1], [], []>} : vector<8x8xf32>, vector<8x32xf32>, vector<8x32xf32> -> vector<8x32xf32>
    %c1_345 = arith.constant 1 : index
    %c0_346 = arith.constant 0 : index
    %c0_347 = arith.constant 0 : index
    %853 = vector.load %arg55[%c1_345, %c0_346, %c0_347] : memref<3x32x64xf32, #tpu.memory_space<vmem>>, vector<1x32x64xf32>
    %854 = vector.shape_cast %853 : vector<1x32x64xf32> to vector<32x64xf32>
    %cst_348 = arith.constant dense<0.000000e+00> : vector<8x64xf32>
    %855 = tpu.matmul %852, %854, %cst_348 {dimension_numbers = #tpu.dot_dimension_numbers<[1], [0], [0], [1], [0, 0, 1, 1], [], []>} : vector<8x32xf32>, vector<32x64xf32>, vector<8x64xf32> -> vector<8x64xf32>
    %856 = arith.addf %844, %855 : vector<8x64xf32>
    %c2_349 = arith.constant 2 : index
    %c0_350 = arith.constant 0 : index
    %c0_351 = arith.constant 0 : index
    %857 = vector.load %arg55[%c2_349, %c0_350, %c0_351] : memref<3x32x64xf32, #tpu.memory_space<vmem>>, vector<1x32x64xf32>
    %858 = vector.shape_cast %857 : vector<1x32x64xf32> to vector<32x64xf32>
    %cst_352 = arith.constant dense<0.000000e+00> : vector<8x64xf32>
    %859 = tpu.matmul %833, %858, %cst_352 {dimension_numbers = #tpu.dot_dimension_numbers<[1], [0], [0], [1], [0, 0, 1, 1], [], []>} : vector<8x32xf32>, vector<32x64xf32>, vector<8x64xf32> -> vector<8x64xf32>
    %860 = arith.addf %856, %859 : vector<8x64xf32>
    %c0_353 = arith.constant 0 : index
    %c0_354 = arith.constant 0 : index
    %861 = vector.load %arg56[%c0_353, %c0_354] : memref<1x64xf32, #tpu.memory_space<vmem>>, vector<1x64xf32>
    %862 = vector.broadcast %861 : vector<1x64xf32> to vector<8x64xf32>
    %863 = arith.addf %860, %862 : vector<8x64xf32>
    %864 = vector.extract_strided_slice %863 {offsets = [0, 0], sizes = [8, 32], strides = [1, 1]} : vector<8x64xf32> to vector<8x32xf32>
    %865 = vector.extract_strided_slice %863 {offsets = [0, 32], sizes = [8, 32], strides = [1, 1]} : vector<8x64xf32> to vector<8x32xf32>
    %866 = arith.negf %865 : vector<8x32xf32>
    %867 = math.exp %866 : vector<8x32xf32>
    %cst_355 = arith.constant 1.000000e+00 : f32
    %868 = vector.broadcast %cst_355 : f32 to vector<8x32xf32>
    %869 = arith.addf %868, %867 : vector<8x32xf32>
    %870 = arith.divf %868, %869 : vector<8x32xf32>
    %871 = arith.mulf %864, %870 : vector<8x32xf32>
    %872 = arith.addf %871, %795 : vector<8x32xf32>
    %c0_356 = arith.constant 0 : index
    %c0_357 = arith.constant 0 : index
    %873 = vector.load %arg52[%c0_356, %c0_357] : memref<32x8xf32, #tpu.memory_space<vmem>>, vector<32x8xf32>
    %cst_358 = arith.constant dense<0.000000e+00> : vector<8x8xf32>
    %874 = tpu.matmul %872, %873, %cst_358 {dimension_numbers = #tpu.dot_dimension_numbers<[1], [0], [0], [1], [0, 0, 1, 1], [], []>} : vector<8x32xf32>, vector<32x8xf32>, vector<8x8xf32> -> vector<8x8xf32>
    %c0_359 = arith.constant 0 : index
    %c0_360 = arith.constant 0 : index
    %875 = vector.load %arg51[%c0_359, %c0_360] : memref<1x8xf32, #tpu.memory_space<vmem>>, vector<1x8xf32>
    %876 = vector.broadcast %875 : vector<1x8xf32> to vector<8x8xf32>
    %877 = arith.addf %874, %876 : vector<8x8xf32>
    %878 = arith.negf %877 : vector<8x8xf32>
    %879 = math.exp %878 : vector<8x8xf32>
    %cst_361 = arith.constant 1.000000e+00 : f32
    %880 = vector.broadcast %cst_361 : f32 to vector<8x8xf32>
    %881 = arith.addf %880, %879 : vector<8x8xf32>
    %882 = arith.divf %880, %881 : vector<8x8xf32>
    %c0_362 = arith.constant 0 : index
    %c0_363 = arith.constant 0 : index
    %883 = vector.load %arg6[%c0_362, %c0_363] : memref<32x1xf32, #tpu.memory_space<vmem>>, vector<32x1xf32>
    %cst_364 = arith.constant dense<0.000000e+00> : vector<8x1xf32>
    %884 = tpu.matmul %872, %883, %cst_364 {dimension_numbers = #tpu.dot_dimension_numbers<[1], [0], [0], [1], [0, 0, 1, 1], [], []>} : vector<8x32xf32>, vector<32x1xf32>, vector<8x1xf32> -> vector<8x1xf32>
    %c0_365 = arith.constant 0 : index
    %c0_366 = arith.constant 0 : index
    %885 = vector.load %arg5[%c0_365, %c0_366] : memref<1x1xf32, #tpu.memory_space<vmem>>, vector<1x1xf32>
    %886 = vector.broadcast %885 : vector<1x1xf32> to vector<8x1xf32>
    %887 = arith.addf %884, %886 : vector<8x1xf32>
    %888 = arith.negf %887 : vector<8x1xf32>
    %889 = math.exp %888 : vector<8x1xf32>
    %cst_367 = arith.constant 1.000000e+00 : f32
    %890 = vector.broadcast %cst_367 : f32 to vector<8x1xf32>
    %891 = arith.addf %890, %889 : vector<8x1xf32>
    %892 = arith.divf %890, %891 : vector<8x1xf32>
    %c0_368 = arith.constant 0 : index
    %c0_369 = arith.constant 0 : index
    %c0_370 = arith.constant 0 : index
    %893 = vector.load %arg65[%c0_368, %c0_369, %c0_370] : memref<1x8x32xf32, #tpu.memory_space<vmem>>, vector<1x8x32xf32>
    %894 = vector.shape_cast %893 : vector<1x8x32xf32> to vector<8x32xf32>
    %895 = vector.shape_cast %872 : vector<8x32xf32> to vector<1x8x32xf32>
    tpu.vector_store %arg65[%c0_368, %c0_369, %c0_370], %895 {strides = array<i32>} : memref<1x8x32xf32, #tpu.memory_space<vmem>>, vector<1x8x32xf32>,
    %c0_371 = arith.constant 0 : index
    %c0_372 = arith.constant 0 : index
    %c0_373 = arith.constant 0 : index
    %896 = vector.load %arg66[%c0_371, %c0_372, %c0_373] : memref<1x8x8xf32, #tpu.memory_space<vmem>>, vector<1x8x8xf32>
    %897 = vector.shape_cast %896 : vector<1x8x8xf32> to vector<8x8xf32>
    %898 = vector.shape_cast %882 : vector<8x8xf32> to vector<1x8x8xf32>
    tpu.vector_store %arg66[%c0_371, %c0_372, %c0_373], %898 {strides = array<i32>} : memref<1x8x8xf32, #tpu.memory_space<vmem>>, vector<1x8x8xf32>,
    %c0_374 = arith.constant 0 : index
    %c0_375 = arith.constant 0 : index
    %c0_376 = arith.constant 0 : index
    %899 = vector.load %arg67[%c0_374, %c0_375, %c0_376] : memref<1x8x1xf32, #tpu.memory_space<vmem>>, vector<1x8x1xf32>
    %900 = vector.shape_cast %899 : vector<1x8x1xf32> to vector<8x1xf32>
    %901 = vector.shape_cast %892 : vector<8x1xf32> to vector<1x8x1xf32>
    tpu.vector_store %arg67[%c0_374, %c0_375, %c0_376], %901 {strides = array<i32>} : memref<1x8x1xf32, #tpu.memory_space<vmem>>, vector<1x8x1xf32>,
    return
  }
  func.func @transform_0(%arg0: i32) -> (i32, i32, i32) {
    %c0_i32 = arith.constant 0 : i32
    %c0_i32_0 = arith.constant 0 : i32
    %c0_i32_1 = arith.constant 0 : i32
    return %arg0, %c0_i32, %c0_i32_0 : i32, i32, i32
  }
  func.func @transform_1(%arg0: i32) -> (i32, i32, i32) {
    %c0_i32 = arith.constant 0 : i32
    %c0_i32_0 = arith.constant 0 : i32
    %c0_i32_1 = arith.constant 0 : i32
    return %arg0, %c0_i32, %c0_i32_0 : i32, i32, i32
  }
  func.func @transform_2(%arg0: i32) -> (i32, i32, i32) {
    %c0_i32 = arith.constant 0 : i32
    %c0_i32_0 = arith.constant 0 : i32
    %c0_i32_1 = arith.constant 0 : i32
    return %arg0, %c0_i32, %c0_i32_0 : i32, i32, i32
  }
  func.func @transform_3(%arg0: i32) -> (i32, i32) {
    %c0_i32 = arith.constant 0 : i32
    %c0_i32_0 = arith.constant 0 : i32
    %c0_i32_1 = arith.constant 0 : i32
    return %c0_i32, %c0_i32_0 : i32, i32
  }
  func.func @transform_4(%arg0: i32) -> (i32, i32) {
    %c0_i32 = arith.constant 0 : i32
    %c0_i32_0 = arith.constant 0 : i32
    %c0_i32_1 = arith.constant 0 : i32
    return %c0_i32, %c0_i32_0 : i32, i32
  }
  func.func @transform_5(%arg0: i32) -> (i32, i32) {
    %c0_i32 = arith.constant 0 : i32
    %c0_i32_0 = arith.constant 0 : i32
    %c0_i32_1 = arith.constant 0 : i32
    return %c0_i32, %c0_i32_0 : i32, i32
  }
  func.func @transform_6(%arg0: i32) -> (i32, i32) {
    %c0_i32 = arith.constant 0 : i32
    %c0_i32_0 = arith.constant 0 : i32
    %c0_i32_1 = arith.constant 0 : i32
    return %c0_i32, %c0_i32_0 : i32, i32
  }
  func.func @transform_7(%arg0: i32) -> (i32, i32) {
    %c0_i32 = arith.constant 0 : i32
    %c0_i32_0 = arith.constant 0 : i32
    %c0_i32_1 = arith.constant 0 : i32
    return %c0_i32, %c0_i32_0 : i32, i32
  }
  func.func @transform_8(%arg0: i32) -> (i32, i32) {
    %c0_i32 = arith.constant 0 : i32
    %c0_i32_0 = arith.constant 0 : i32
    %c0_i32_1 = arith.constant 0 : i32
    return %c0_i32, %c0_i32_0 : i32, i32
  }
  func.func @transform_9(%arg0: i32) -> (i32, i32) {
    %c0_i32 = arith.constant 0 : i32
    %c0_i32_0 = arith.constant 0 : i32
    %c0_i32_1 = arith.constant 0 : i32
    return %c0_i32, %c0_i32_0 : i32, i32
  }
  func.func @transform_10(%arg0: i32) -> (i32, i32) {
    %c0_i32 = arith.constant 0 : i32
    %c0_i32_0 = arith.constant 0 : i32
    %c0_i32_1 = arith.constant 0 : i32
    return %c0_i32, %c0_i32_0 : i32, i32
  }
  func.func @transform_11(%arg0: i32) -> (i32, i32) {
    %c0_i32 = arith.constant 0 : i32
    %c0_i32_0 = arith.constant 0 : i32
    %c0_i32_1 = arith.constant 0 : i32
    return %c0_i32, %c0_i32_0 : i32, i32
  }
  func.func @transform_12(%arg0: i32) -> (i32, i32) {
    %c0_i32 = arith.constant 0 : i32
    %c0_i32_0 = arith.constant 0 : i32
    %c0_i32_1 = arith.constant 0 : i32
    return %c0_i32, %c0_i32_0 : i32, i32
  }
  func.func @transform_13(%arg0: i32) -> (i32, i32) {
    %c0_i32 = arith.constant 0 : i32
    %c0_i32_0 = arith.constant 0 : i32
    %c0_i32_1 = arith.constant 0 : i32
    return %c0_i32, %c0_i32_0 : i32, i32
  }
  func.func @transform_14(%arg0: i32) -> (i32, i32) {
    %c0_i32 = arith.constant 0 : i32
    %c0_i32_0 = arith.constant 0 : i32
    %c0_i32_1 = arith.constant 0 : i32
    return %c0_i32, %c0_i32_0 : i32, i32
  }
  func.func @transform_15(%arg0: i32) -> (i32, i32) {
    %c0_i32 = arith.constant 0 : i32
    %c0_i32_0 = arith.constant 0 : i32
    %c0_i32_1 = arith.constant 0 : i32
    return %c0_i32, %c0_i32_0 : i32, i32
  }
  func.func @transform_16(%arg0: i32) -> (i32, i32) {
    %c0_i32 = arith.constant 0 : i32
    %c0_i32_0 = arith.constant 0 : i32
    %c0_i32_1 = arith.constant 0 : i32
    return %c0_i32, %c0_i32_0 : i32, i32
  }
  func.func @transform_17(%arg0: i32) -> (i32, i32) {
    %c0_i32 = arith.constant 0 : i32
    %c0_i32_0 = arith.constant 0 : i32
    %c0_i32_1 = arith.constant 0 : i32
    return %c0_i32, %c0_i32_0 : i32, i32
  }
  func.func @transform_18(%arg0: i32) -> (i32, i32) {
    %c0_i32 = arith.constant 0 : i32
    %c0_i32_0 = arith.constant 0 : i32
    %c0_i32_1 = arith.constant 0 : i32
    return %c0_i32, %c0_i32_0 : i32, i32
  }
  func.func @transform_19(%arg0: i32) -> (i32, i32) {
    %c0_i32 = arith.constant 0 : i32
    %c0_i32_0 = arith.constant 0 : i32
    %c0_i32_1 = arith.constant 0 : i32
    return %c0_i32, %c0_i32_0 : i32, i32
  }
  func.func @transform_20(%arg0: i32) -> (i32, i32) {
    %c0_i32 = arith.constant 0 : i32
    %c0_i32_0 = arith.constant 0 : i32
    %c0_i32_1 = arith.constant 0 : i32
    return %c0_i32, %c0_i32_0 : i32, i32
  }
  func.func @transform_21(%arg0: i32) -> (i32, i32) {
    %c0_i32 = arith.constant 0 : i32
    %c0_i32_0 = arith.constant 0 : i32
    %c0_i32_1 = arith.constant 0 : i32
    return %c0_i32, %c0_i32_0 : i32, i32
  }
  func.func @transform_22(%arg0: i32) -> (i32, i32) {
    %c0_i32 = arith.constant 0 : i32
    %c0_i32_0 = arith.constant 0 : i32
    %c0_i32_1 = arith.constant 0 : i32
    return %c0_i32, %c0_i32_0 : i32, i32
  }
  func.func @transform_23(%arg0: i32) -> (i32, i32) {
    %c0_i32 = arith.constant 0 : i32
    %c0_i32_0 = arith.constant 0 : i32
    %c0_i32_1 = arith.constant 0 : i32
    return %c0_i32, %c0_i32_0 : i32, i32
  }
  func.func @transform_24(%arg0: i32) -> (i32, i32) {
    %c0_i32 = arith.constant 0 : i32
    %c0_i32_0 = arith.constant 0 : i32
    %c0_i32_1 = arith.constant 0 : i32
    return %c0_i32, %c0_i32_0 : i32, i32
  }
  func.func @transform_25(%arg0: i32) -> (i32, i32) {
    %c0_i32 = arith.constant 0 : i32
    %c0_i32_0 = arith.constant 0 : i32
    %c0_i32_1 = arith.constant 0 : i32
    return %c0_i32, %c0_i32_0 : i32, i32
  }
  func.func @transform_26(%arg0: i32) -> (i32, i32) {
    %c0_i32 = arith.constant 0 : i32
    %c0_i32_0 = arith.constant 0 : i32
    %c0_i32_1 = arith.constant 0 : i32
    return %c0_i32, %c0_i32_0 : i32, i32
  }
  func.func @transform_27(%arg0: i32) -> (i32, i32) {
    %c0_i32 = arith.constant 0 : i32
    %c0_i32_0 = arith.constant 0 : i32
    %c0_i32_1 = arith.constant 0 : i32
    return %c0_i32, %c0_i32_0 : i32, i32
  }
  func.func @transform_28(%arg0: i32) -> (i32, i32) {
    %c0_i32 = arith.constant 0 : i32
    %c0_i32_0 = arith.constant 0 : i32
    %c0_i32_1 = arith.constant 0 : i32
    return %c0_i32, %c0_i32_0 : i32, i32
  }
  func.func @transform_29(%arg0: i32) -> (i32, i32) {
    %c0_i32 = arith.constant 0 : i32
    %c0_i32_0 = arith.constant 0 : i32
    %c0_i32_1 = arith.constant 0 : i32
    return %c0_i32, %c0_i32_0 : i32, i32
  }
  func.func @transform_30(%arg0: i32) -> (i32, i32) {
    %c0_i32 = arith.constant 0 : i32
    %c0_i32_0 = arith.constant 0 : i32
    %c0_i32_1 = arith.constant 0 : i32
    return %c0_i32, %c0_i32_0 : i32, i32
  }
  func.func @transform_31(%arg0: i32) -> (i32, i32) {
    %c0_i32 = arith.constant 0 : i32
    %c0_i32_0 = arith.constant 0 : i32
    %c0_i32_1 = arith.constant 0 : i32
    return %c0_i32, %c0_i32_0 : i32, i32
  }
  func.func @transform_32(%arg0: i32) -> (i32, i32) {
    %c0_i32 = arith.constant 0 : i32
    %c0_i32_0 = arith.constant 0 : i32
    %c0_i32_1 = arith.constant 0 : i32
    return %c0_i32, %c0_i32_0 : i32, i32
  }
  func.func @transform_33(%arg0: i32) -> (i32, i32) {
    %c0_i32 = arith.constant 0 : i32
    %c0_i32_0 = arith.constant 0 : i32
    %c0_i32_1 = arith.constant 0 : i32
    return %c0_i32, %c0_i32_0 : i32, i32
  }
  func.func @transform_34(%arg0: i32) -> (i32, i32) {
    %c0_i32 = arith.constant 0 : i32
    %c0_i32_0 = arith.constant 0 : i32
    %c0_i32_1 = arith.constant 0 : i32
    return %c0_i32, %c0_i32_0 : i32, i32
  }
  func.func @transform_35(%arg0: i32) -> (i32, i32) {
    %c0_i32 = arith.constant 0 : i32
    %c0_i32_0 = arith.constant 0 : i32
    %c0_i32_1 = arith.constant 0 : i32
    return %c0_i32, %c0_i32_0 : i32, i32
  }
  func.func @transform_36(%arg0: i32) -> (i32, i32) {
    %c0_i32 = arith.constant 0 : i32
    %c0_i32_0 = arith.constant 0 : i32
    %c0_i32_1 = arith.constant 0 : i32
    return %c0_i32, %c0_i32_0 : i32, i32
  }
  func.func @transform_37(%arg0: i32) -> (i32, i32) {
    %c0_i32 = arith.constant 0 : i32
    %c0_i32_0 = arith.constant 0 : i32
    %c0_i32_1 = arith.constant 0 : i32
    return %c0_i32, %c0_i32_0 : i32, i32
  }
  func.func @transform_38(%arg0: i32) -> (i32, i32) {
    %c0_i32 = arith.constant 0 : i32
    %c0_i32_0 = arith.constant 0 : i32
    %c0_i32_1 = arith.constant 0 : i32
    return %c0_i32, %c0_i32_0 : i32, i32
  }
  func.func @transform_39(%arg0: i32) -> (i32, i32) {
    %c0_i32 = arith.constant 0 : i32
    %c0_i32_0 = arith.constant 0 : i32
    %c0_i32_1 = arith.constant 0 : i32
    return %c0_i32, %c0_i32_0 : i32, i32
  }
  func.func @transform_40(%arg0: i32) -> (i32, i32) {
    %c0_i32 = arith.constant 0 : i32
    %c0_i32_0 = arith.constant 0 : i32
    %c0_i32_1 = arith.constant 0 : i32
    return %c0_i32, %c0_i32_0 : i32, i32
  }
  func.func @transform_41(%arg0: i32) -> (i32, i32) {
    %c0_i32 = arith.constant 0 : i32
    %c0_i32_0 = arith.constant 0 : i32
    %c0_i32_1 = arith.constant 0 : i32
    return %c0_i32, %c0_i32_0 : i32, i32
  }
  func.func @transform_42(%arg0: i32) -> (i32, i32) {
    %c0_i32 = arith.constant 0 : i32
    %c0_i32_0 = arith.constant 0 : i32
    %c0_i32_1 = arith.constant 0 : i32
    return %c0_i32, %c0_i32_0 : i32, i32
  }
  func.func @transform_43(%arg0: i32) -> (i32, i32) {
    %c0_i32 = arith.constant 0 : i32
    %c0_i32_0 = arith.constant 0 : i32
    %c0_i32_1 = arith.constant 0 : i32
    return %c0_i32, %c0_i32_0 : i32, i32
  }
  func.func @transform_44(%arg0: i32) -> (i32, i32) {
    %c0_i32 = arith.constant 0 : i32
    %c0_i32_0 = arith.constant 0 : i32
    %c0_i32_1 = arith.constant 0 : i32
    return %c0_i32, %c0_i32_0 : i32, i32
  }
  func.func @transform_45(%arg0: i32) -> (i32, i32) {
    %c0_i32 = arith.constant 0 : i32
    %c0_i32_0 = arith.constant 0 : i32
    %c0_i32_1 = arith.constant 0 : i32
    return %c0_i32, %c0_i32_0 : i32, i32
  }
  func.func @transform_46(%arg0: i32) -> (i32, i32) {
    %c0_i32 = arith.constant 0 : i32
    %c0_i32_0 = arith.constant 0 : i32
    %c0_i32_1 = arith.constant 0 : i32
    return %c0_i32, %c0_i32_0 : i32, i32
  }
  func.func @transform_47(%arg0: i32) -> (i32, i32) {
    %c0_i32 = arith.constant 0 : i32
    %c0_i32_0 = arith.constant 0 : i32
    %c0_i32_1 = arith.constant 0 : i32
    return %c0_i32, %c0_i32_0 : i32, i32
  }
  func.func @transform_48(%arg0: i32) -> (i32, i32) {
    %c0_i32 = arith.constant 0 : i32
    %c0_i32_0 = arith.constant 0 : i32
    %c0_i32_1 = arith.constant 0 : i32
    return %c0_i32, %c0_i32_0 : i32, i32
  }
  func.func @transform_49(%arg0: i32) -> (i32, i32) {
    %c0_i32 = arith.constant 0 : i32
    %c0_i32_0 = arith.constant 0 : i32
    %c0_i32_1 = arith.constant 0 : i32
    return %c0_i32, %c0_i32_0 : i32, i32
  }
  func.func @transform_50(%arg0: i32) -> (i32, i32) {
    %c0_i32 = arith.constant 0 : i32
    %c0_i32_0 = arith.constant 0 : i32
    %c0_i32_1 = arith.constant 0 : i32
    return %c0_i32, %c0_i32_0 : i32, i32
  }
  func.func @transform_51(%arg0: i32) -> (i32, i32) {
    %c0_i32 = arith.constant 0 : i32
    %c0_i32_0 = arith.constant 0 : i32
    %c0_i32_1 = arith.constant 0 : i32
    return %c0_i32, %c0_i32_0 : i32, i32
  }
  func.func @transform_52(%arg0: i32) -> (i32, i32, i32) {
    %c0_i32 = arith.constant 0 : i32
    %c0_i32_0 = arith.constant 0 : i32
    %c0_i32_1 = arith.constant 0 : i32
    %c0_i32_2 = arith.constant 0 : i32
    return %c0_i32, %c0_i32_0, %c0_i32_1 : i32, i32, i32
  }
  func.func @transform_53(%arg0: i32) -> (i32, i32) {
    %c0_i32 = arith.constant 0 : i32
    %c0_i32_0 = arith.constant 0 : i32
    %c0_i32_1 = arith.constant 0 : i32
    return %c0_i32, %c0_i32_0 : i32, i32
  }
  func.func @transform_54(%arg0: i32) -> (i32, i32, i32) {
    %c0_i32 = arith.constant 0 : i32
    %c0_i32_0 = arith.constant 0 : i32
    %c0_i32_1 = arith.constant 0 : i32
    %c0_i32_2 = arith.constant 0 : i32
    return %c0_i32, %c0_i32_0, %c0_i32_1 : i32, i32, i32
  }
  func.func @transform_55(%arg0: i32) -> (i32, i32) {
    %c0_i32 = arith.constant 0 : i32
    %c0_i32_0 = arith.constant 0 : i32
    %c0_i32_1 = arith.constant 0 : i32
    return %c0_i32, %c0_i32_0 : i32, i32
  }
  func.func @transform_56(%arg0: i32) -> (i32, i32, i32) {
    %c0_i32 = arith.constant 0 : i32
    %c0_i32_0 = arith.constant 0 : i32
    %c0_i32_1 = arith.constant 0 : i32
    %c0_i32_2 = arith.constant 0 : i32
    return %c0_i32, %c0_i32_0, %c0_i32_1 : i32, i32, i32
  }
  func.func @transform_57(%arg0: i32) -> (i32, i32) {
    %c0_i32 = arith.constant 0 : i32
    %c0_i32_0 = arith.constant 0 : i32
    %c0_i32_1 = arith.constant 0 : i32
    return %c0_i32, %c0_i32_0 : i32, i32
  }
  func.func @transform_58(%arg0: i32) -> (i32, i32, i32) {
    %c0_i32 = arith.constant 0 : i32
    %c0_i32_0 = arith.constant 0 : i32
    %c0_i32_1 = arith.constant 0 : i32
    %c0_i32_2 = arith.constant 0 : i32
    return %c0_i32, %c0_i32_0, %c0_i32_1 : i32, i32, i32
  }
  func.func @transform_59(%arg0: i32) -> (i32, i32) {
    %c0_i32 = arith.constant 0 : i32
    %c0_i32_0 = arith.constant 0 : i32
    %c0_i32_1 = arith.constant 0 : i32
    return %c0_i32, %c0_i32_0 : i32, i32
  }
  func.func @transform_60(%arg0: i32) -> (i32, i32, i32) {
    %c0_i32 = arith.constant 0 : i32
    %c0_i32_0 = arith.constant 0 : i32
    %c0_i32_1 = arith.constant 0 : i32
    %c0_i32_2 = arith.constant 0 : i32
    return %c0_i32, %c0_i32_0, %c0_i32_1 : i32, i32, i32
  }
  func.func @transform_61(%arg0: i32) -> (i32, i32) {
    %c0_i32 = arith.constant 0 : i32
    %c0_i32_0 = arith.constant 0 : i32
    %c0_i32_1 = arith.constant 0 : i32
    return %c0_i32, %c0_i32_0 : i32, i32
  }
  func.func @transform_62(%arg0: i32) -> (i32, i32, i32) {
    %c0_i32 = arith.constant 0 : i32
    %c0_i32_0 = arith.constant 0 : i32
    %c0_i32_1 = arith.constant 0 : i32
    %c0_i32_2 = arith.constant 0 : i32
    return %c0_i32, %c0_i32_0, %c0_i32_1 : i32, i32, i32
  }
  func.func @transform_63(%arg0: i32) -> (i32, i32) {
    %c0_i32 = arith.constant 0 : i32
    %c0_i32_0 = arith.constant 0 : i32
    %c0_i32_1 = arith.constant 0 : i32
    return %c0_i32, %c0_i32_0 : i32, i32
  }
  func.func @transform_64(%arg0: i32) -> (i32, i32, i32) {
    %c0_i32 = arith.constant 0 : i32
    %c0_i32_0 = arith.constant 0 : i32
    %c0_i32_1 = arith.constant 0 : i32
    return %arg0, %c0_i32, %c0_i32_0 : i32, i32, i32
  }
  func.func @transform_65(%arg0: i32) -> (i32, i32, i32) {
    %c0_i32 = arith.constant 0 : i32
    %c0_i32_0 = arith.constant 0 : i32
    %c0_i32_1 = arith.constant 0 : i32
    return %arg0, %c0_i32, %c0_i32_0 : i32, i32, i32
  }
  func.func @transform_66(%arg0: i32) -> (i32, i32, i32) {
    %c0_i32 = arith.constant 0 : i32
    %c0_i32_0 = arith.constant 0 : i32
    %c0_i32_1 = arith.constant 0 : i32
    return %arg0, %c0_i32, %c0_i32_0 : i32, i32, i32
  }
  func.func @transform_67(%arg0: i32) -> (i32, i32, i32, i32) {
    %c0_i32 = arith.constant 0 : i32
    %c0_i32_0 = arith.constant 0 : i32
    %c0_i32_1 = arith.constant 0 : i32
    %c0_i32_2 = arith.constant 0 : i32
    return %arg0, %c0_i32, %c0_i32_0, %c0_i32_1 : i32, i32, i32, i32
  }
}

</mosaic_0001>

<bundles_post_ra>
// kernel: transformer_decoder_forward.1
= control target key start
LH: loop header
LB: loop body
LE: loop exit
PB: predicated region body
PF: predicated region fallthrough
CT: control target
= control target key end

     0   :  { %s12648_s6 = smov 1   ;;  %s12649_s10 = smov 2   ;;  %s14390_s0 = inlined_call_operand.smem [shape: u32[68], index: -1, kind: input, shape index: {}] }
   0x1   :  { %s12781_s5 = sld [smem:[%s14390_s0]]   ;;  %s12650_s14 = smov 3  }
   0x2   :  { %s12786_s9 = sld [smem:[%s14390_s0 + %s12648_s6]]   ;;  %s12651_s18 = smov 4  }
   0x3   :  { %s12791_s13 = sld [smem:[%s14390_s0 + %s12649_s10]]   ;;  %s12652_s22 = smov 5  }
   0x4   :  { %s12796_s17 = sld [smem:[%s14390_s0 + %s12650_s14]]   ;;  %s12653_s26 = smov 6  }
   0x5   :  { %s9525_s21 = sld [smem:[%s14390_s0 + %s12651_s18]]   ;;  %s12654_s30 = smov 7  }
   0x6   :  { %s12804_s25 = sld [smem:[%s14390_s0 + %s12652_s22]]   ;;  %s12655_s4 = smov 8  }
   0x7   :  { %14424 = sst [smem:[#allocation112_spill]] %s12781_s5  ;;  %s12656_s10 = smov 9  }
   0x8   :  { %14425 = sst [smem:[#allocation113_spill]] %s12786_s9  ;;  %s12657_s15 = smov 10  }
   0x9   :  { %14426 = sst [smem:[#allocation114_spill]] %s12791_s13  ;;  %s12658_s20 = smov 11  }
   0xa   :  { %14427 = sst [smem:[#allocation115_spill]] %s12796_s17  ;;  %s12660_s1 = smov 13  }
   0xb   :  { %s12809_s29 = sld [smem:[%s14390_s0 + %s12653_s26]]   ;;  %v141_v0 = vstv %s9525_s21  ;;  %s12659_s26 = smov 12  }
   0xc   :  { %14428 = sst [smem:[#allocation116_spill]] %s12804_s25  ;;  %142 = vst [vmem:[#allocation2] sm:$0x1] %v141_v0  ;;  %s12661_s21 = smov 14  }
   0xd   :  { %s12814_s3 = sld [smem:[%s14390_s0 + %s12654_s30]]   ;;  %s12662_s12 = smov 15  }
   0xe   :  { %s12819_s8 = sld [smem:[%s14390_s0 + %s12655_s4]]   ;;  %s12664_s27 = smov 17  }
   0xf   :  { %s12824_s14 = sld [smem:[%s14390_s0 + %s12656_s10]]   ;;  %s12665_s4 = smov 18  }
  0x10   :  { %s12829_s19 = sld [smem:[%s14390_s0 + %s12657_s15]]  }
  0x11   :  { %14429 = sst [smem:[#allocation117_spill]] %s12809_s29 }
  0x12   :  { %s12834_s24 = sld [smem:[%s14390_s0 + %s12658_s20]]   ;;  %s12663_s20 = smov 16  }
  0x13   :  { %14430 = sst [smem:[#allocation118_spill]] %s12814_s3 }
  0x14   :  { %14431 = sst [smem:[#allocation119_spill]] %s12819_s8 }
  0x15   :  { %14432 = sst [smem:[#allocation120_spill]] %s12824_s14 }
  0x16   :  { %14433 = sst [smem:[#allocation121_spill]] %s12829_s19 }
  0x17   :  { %s12839_s30 = sld [smem:[%s14390_s0 + %s12659_s26]]  }
  0x18   :  { %s12844_s6 = sld [smem:[%s14390_s0 + %s12660_s1]]  }
  0x19   :  { %s12849_s11 = sld [smem:[%s14390_s0 + %s12661_s21]]  }
  0x1a   :  { %s12854_s18 = sld [smem:[%s14390_s0 + %s12662_s12]]   ;;  %s12666_s12 = smov 19  }
  0x1b   :  { %s12859_s26 = sld [smem:[%s14390_s0 + %s12663_s20]]   ;;  %s12667_s20 = smov 20  }
  0x1c   :  { %s12864_s2 = sld [smem:[%s14390_s0 + %s12664_s27]]   ;;  %s12668_s27 = smov 21  }
  0x1d   :  { %14434 = sst [smem:[#allocation122_spill]] %s12839_s30 }
  0x1e   :  { %14435 = sst [smem:[#allocation123_spill]] %s12844_s6 }
  0x1f   :  { %14436 = sst [smem:[#allocation124_spill]] %s12849_s11 }
  0x20   :  { %s12869_s10 = sld [smem:[%s14390_s0 + %s12665_s4]]   ;;  %s12669_s4 = smov 22  }
  0x21   :  { %14437 = sst [smem:[#allocation125_spill]] %s12859_s26 }
  0x22   :  { %14438 = sst [smem:[#allocation126_spill]] %s12864_s2 }
  0x23   :  { %s12874_s25 = sld [smem:[%s14390_s0 + %s12666_s12]]   ;;  %s12670_s12 = smov 23  }
  0x24   :  { %s12879_s13 = sld [smem:[%s14390_s0 + %s12667_s20]]   ;;  %s12671_s20 = smov 24  }
  0x25   :  { %s12884_s2 = sld [smem:[%s14390_s0 + %s12668_s27]]   ;;  %s12672_s27 = smov 25  }
  0x26   :  { %14439 = sst [smem:[#allocation127_spill]] %s12869_s10 }
  0x27   :  { %s12889_s17 = sld [smem:[%s14390_s0 + %s12669_s4]]   ;;  %s12673_s4 = smov 26  }
  0x28   :  { %s12894_s9 = sld [smem:[%s14390_s0 + %s12670_s12]]   ;;  %s12674_s12 = smov 27  }
  0x29   :  { %14440 = sst [smem:[#allocation128_spill]] %s12874_s25 }
  0x2a   :  { %14441 = sst [smem:[#allocation129_spill]] %s12879_s13 }
  0x2b   :  { %14442 = sst [smem:[#allocation130_spill]] %s12884_s2 }
  0x2c   :  { %s12899_s5 = sld [smem:[%s14390_s0 + %s12671_s20]]   ;;  %s12675_s20 = smov 28  }
  0x2d   :  { %s12904_s2 = sld [smem:[%s14390_s0 + %s12672_s27]]   ;;  %s12676_s27 = smov 29  }
  0x2e   :  { %14443 = sst [smem:[#allocation131_spill]] %s12894_s9 }
  0x2f   :  { %s12909_s25 = sld [smem:[%s14390_s0 + %s12673_s4]]   ;;  %s12677_s4 = smov 30  }
  0x30   :  { %s12914_s9 = sld [smem:[%s14390_s0 + %s12674_s12]]   ;;  %s12678_s12 = smov 31  }
  0x31   :  { %s12919_s26 = sld [smem:[%s14390_s0 + %s12675_s20]]   ;;  %s12679_s20 = smov 32  }
  0x32   :  { %14444 = sst [smem:[#allocation132_spill]] %s12899_s5 }
  0x33   :  { %14445 = sst [smem:[#allocation133_spill]] %s12904_s2 }
  0x34   :  { %s12924_s2 = sld [smem:[%s14390_s0 + %s12676_s27]]   ;;  %s12680_s27 = smov 33  }
  0x35   :  { %s12929_s11 = sld [smem:[%s14390_s0 + %s12677_s4]]   ;;  %s12681_s4 = smov 34  }
  0x36   :  { %14446 = sst [smem:[#allocation134_spill]] %s12914_s9 }
  0x37   :  { %s12934_s9 = sld [smem:[%s14390_s0 + %s12678_s12]]   ;;  %s12682_s12 = smov 35  }
  0x38   :  { %s12939_s30 = sld [smem:[%s14390_s0 + %s12679_s20]]   ;;  %s12683_s20 = smov 36  }
  0x39   :  { %s12949_s19 = sld [smem:[%s14390_s0 + %s12681_s4]]   ;;  %s12685_s4 = smov 38  }
  0x3a   :  { %14447 = sst [smem:[#allocation135_spill]] %s12924_s2 }
  0x3b   :  { %14448 = sst [smem:[#allocation136_spill]] %s12929_s11 }
  0x3c   :  { %s12944_s2 = sld [smem:[%s14390_s0 + %s12680_s27]]   ;;  %s12684_s27 = smov 37  }
  0x3d   :  { %14449 = sst [smem:[#allocation137_spill]] %s12934_s9 }
  0x3e   :  { %s12954_s9 = sld [smem:[%s14390_s0 + %s12682_s12]]   ;;  %s12686_s12 = smov 39  }
  0x3f   :  { %s12959_s8 = sld [smem:[%s14390_s0 + %s12683_s20]]   ;;  %s12687_s20 = smov 40  }
  0x40   :  { %s12969_s29 = sld [smem:[%s14390_s0 + %s12685_s4]]   ;;  %s12689_s4 = smov 42  }
  0x42   :  { %14450 = sst [smem:[#allocation138_spill]] %s12944_s2 }
  0x43   :  { %s12964_s2 = sld [smem:[%s14390_s0 + %s12684_s27]]   ;;  %s12688_s27 = smov 41  }
  0x44   :  { %14451 = sst [smem:[#allocation139_spill]] %s12954_s9 }
  0x45   :  { %14452 = sst [smem:[#allocation140_spill]] %s12959_s8 }
  0x46   :  { %14454 = sst [smem:[#allocation142_spill]] %s12969_s29 }
  0x47   :  { %s12974_s9 = sld [smem:[%s14390_s0 + %s12686_s12]]   ;;  %s12690_s12 = smov 43  }
  0x48   :  { %s12979_s8 = sld [smem:[%s14390_s0 + %s12687_s20]]   ;;  %s12691_s20 = smov 44  }
  0x49   :  { %14453 = sst [smem:[#allocation141_spill]] %s12964_s2 }
  0x4a   :  { %s12984_s2 = sld [smem:[%s14390_s0 + %s12688_s27]]   ;;  %s12692_s27 = smov 45  }
  0x4b   :  { %s12989_s29 = sld [smem:[%s14390_s0 + %s12689_s4]]   ;;  %s12693_s4 = smov 46  }
  0x4d   :  { %14455 = sst [smem:[#allocation143_spill]] %s12974_s9 }
  0x4e   :  { %14456 = sst [smem:[#allocation144_spill]] %s12979_s8 }
  0x4f   :  { %s12994_s9 = sld [smem:[%s14390_s0 + %s12690_s12]]   ;;  %s12694_s12 = smov 47  }
  0x50   :  { %14457 = sst [smem:[#allocation145_spill]] %s12984_s2 }
  0x51   :  { %14458 = sst [smem:[#allocation146_spill]] %s12989_s29 }
  0x52   :  { %s12999_s8 = sld [smem:[%s14390_s0 + %s12691_s20]]   ;;  %s12695_s20 = smov 48  }
  0x53   :  { %s13004_s2 = sld [smem:[%s14390_s0 + %s12692_s27]]   ;;  %s12696_s27 = smov 49  }
  0x54   :  { %s13009_s29 = sld [smem:[%s14390_s0 + %s12693_s4]]   ;;  %s12697_s4 = smov 50  }
  0x55   :  { %14459 = sst [smem:[#allocation147_spill]] %s12994_s9 }
  0x56   :  { %s13014_s9 = sld [smem:[%s14390_s0 + %s12694_s12]]   ;;  %s12698_s12 = smov 51  }
  0x58   :  { %14460 = sst [smem:[#allocation148_spill]] %s12999_s8 }
  0x59   :  { %14461 = sst [smem:[#allocation149_spill]] %s13004_s2 }
  0x5a   :  { %14462 = sst [smem:[#allocation150_spill]] %s13009_s29 }
  0x5b   :  { %s13019_s8 = sld [smem:[%s14390_s0 + %s12695_s20]]   ;;  %s12699_s20 = smov 52  }
  0x5c   :  { %14463 = sst [smem:[#allocation151_spill]] %s13014_s9 }
  0x5d   :  { %s13024_s2 = sld [smem:[%s14390_s0 + %s12696_s27]]   ;;  %s12700_s27 = smov 53  }
  0x5e   :  { %s13029_s29 = sld [smem:[%s14390_s0 + %s12697_s4]]   ;;  %s12701_s4 = smov 54  }
  0x5f   :  { %s13034_s9 = sld [smem:[%s14390_s0 + %s12698_s12]]   ;;  %s12702_s12 = smov 55  }
  0x61   :  { %14464 = sst [smem:[#allocation152_spill]] %s13019_s8 }
  0x62   :  { %s13039_s8 = sld [smem:[%s14390_s0 + %s12699_s20]]   ;;  %s12703_s20 = smov 56  }
  0x63   :  { %14465 = sst [smem:[#allocation153_spill]] %s13024_s2 }
  0x64   :  { %14466 = sst [smem:[#allocation154_spill]] %s13029_s29 }
  0x65   :  { %14467 = sst [smem:[#allocation155_spill]] %s13034_s9 }
  0x66   :  { %s13044_s2 = sld [smem:[%s14390_s0 + %s12700_s27]]   ;;  %s12704_s27 = smov 57  }
  0x67   :  { %s13049_s29 = sld [smem:[%s14390_s0 + %s12701_s4]]   ;;  %s12705_s4 = smov 58  }
  0x68   :  { %14468 = sst [smem:[#allocation156_spill]] %s13039_s8 }
  0x69   :  { %s13054_s9 = sld [smem:[%s14390_s0 + %s12702_s12]]   ;;  %s12706_s12 = smov 59  }
  0x6a   :  { %s13059_s8 = sld [smem:[%s14390_s0 + %s12703_s20]]   ;;  %s12707_s20 = smov 60  }
  0x6c   :  { %14469 = sst [smem:[#allocation157_spill]] %s13044_s2 }
  0x6d   :  { %14470 = sst [smem:[#allocation158_spill]] %s13049_s29 }
  0x6e   :  { %s13064_s2 = sld [smem:[%s14390_s0 + %s12704_s27]]   ;;  %s12708_s27 = smov 61  }
  0x6f   :  { %14471 = sst [smem:[#allocation159_spill]] %s13054_s9 }
  0x70   :  { %14472 = sst [smem:[#allocation160_spill]] %s13059_s8 }
  0x71   :  { %s13069_s29 = sld [smem:[%s14390_s0 + %s12705_s4]]   ;;  %s12709_s4 = smov 62  }
  0x72   :  { %s13074_s9 = sld [smem:[%s14390_s0 + %s12706_s12]]   ;;  %s12710_s12 = smov 63  }
  0x73   :  { %s13079_s8 = sld [smem:[%s14390_s0 + %s12707_s20]]   ;;  %s12711_s20 = smov 64  }
  0x74   :  { %14473 = sst [smem:[#allocation161_spill]] %s13064_s2 }
  0x75   :  { %s13084_s2 = sld [smem:[%s14390_s0 + %s12708_s27]]   ;;  %s12712_s27 = smov 65  }
  0x77   :  { %14474 = sst [smem:[#allocation162_spill]] %s13069_s29 }
  0x78   :  { %14475 = sst [smem:[#allocation163_spill]] %s13074_s9 }
  0x79   :  { %14476 = sst [smem:[#allocation164_spill]] %s13079_s8 }
  0x7a   :  { %s13089_s29 = sld [smem:[%s14390_s0 + %s12709_s4]]   ;;  %s12713_s4 = smov 66  }
  0x7b   :  { %14477 = sst [smem:[#allocation165_spill]] %s13084_s2 }
  0x7c   :  { %s13094_s9 = sld [smem:[%s14390_s0 + %s12710_s12]]   ;;  %s12714_s12 = smov 67  }
  0x7d   :  { %s13099_s8 = sld [smem:[%s14390_s0 + %s12711_s20]]  }
  0x7e   :  { %s13104_s2 = sld [smem:[%s14390_s0 + %s12712_s27]]  }
  0x80   :  { %14478 = sst [smem:[#allocation166_spill]] %s13089_s29 }
  0x81   :  { %s13109_s29 = sld [smem:[%s14390_s0 + %s12713_s4]]  }
  0x82   :  { %14479 = sst [smem:[#allocation167_spill]] %s13094_s9 }
  0x83   :  { %s13114_s9 = sld [smem:[%s14390_s0 + %s12714_s12]]  }
  0x84   :  { %14480 = sst [smem:[#allocation168_spill]] %s13104_s2 }
  0x87   :  { %14481 = sst [smem:[#allocation169_spill]] %s13109_s29 }
  0x89   :  { %14482 = sst [smem:[#allocation170_spill]] %s13114_s9 }
  0x8a   :  { %143 = vsyncpa [#allocation4], 0 }
  0x8b   :  { %145 = vsyncpa [#allocation4 + $0x1], 0 }
  0x8c   :  { %146 = vsyncpa [#allocation7], 0 }
  0x8d   :  { %148 = vsyncpa [#allocation7 + $0x1], 0 }
  0x8e   :  { %149 = vsyncpa [#allocation10], 0 }
  0x8f   :  { %150 = vsyncpa [#allocation13], 0 }
  0x90   :  { %151 = vsyncpa [#allocation16], 0 }
  0x91   :  { %152 = vsyncpa [#allocation19], 0 }
  0x92   :  { %153 = vsyncpa [#allocation22], 0 }
  0x93   :  { %154 = vsyncpa [#allocation25], 0 }
  0x94   :  { %155 = vsyncpa [#allocation28], 0 }
  0x95   :  { %156 = vsyncpa [#allocation31], 0 }
  0x96   :  { %157 = vsyncpa [#allocation34], 0 }
  0x97   :  { %158 = vsyncpa [#allocation37], 0 }
  0x98   :  { %159 = vsyncpa [#allocation40], 0 }
  0x99   :  { %160 = vsyncpa [#allocation43], 0 }
  0x9a   :  { %161 = vsyncpa [#allocation46], 0 }
  0x9b   :  { %162 = vsyncpa [#allocation49], 0 }
  0x9c   :  { %163 = vsyncpa [#allocation52], 0 }
  0x9d   :  { %164 = vsyncpa [#allocation55], 0 }
  0x9e   :  { %165 = vsyncpa [#allocation58], 0 }
  0x9f   :  { %166 = vsyncpa [#allocation61], 0 }
  0xa0   :  { %167 = vsyncpa [#allocation64], 0 }
  0xa1   :  { %168 = vsyncpa [#allocation67], 0 }
  0xa2   :  { %169 = vsyncpa [#allocation70], 0 }
  0xa3   :  { %170 = vsyncpa [#allocation73], 0 }
  0xa4   :  { %171 = vsyncpa [#allocation76], 0 }
  0xa5   :  { %172 = vsyncpa [#allocation79], 0 }
  0xa6   :  { %173 = vsyncpa [#allocation5], 0 }
  0xa7   :  { %175 = vsyncpa [#allocation5 + $0x1], 0 }
  0xa8   :  { %176 = vsyncpa [#allocation82], 0 }
  0xa9   :  { %178 = vsyncpa [#allocation82 + $0x1], 0  ;;  %s13116_s0 = smov 0   ;;  %s13118_s20 = smov 0  }
  0xaa   :  { %s13120_s22 = smov 0   ;;  %s13122_s23 = smov 0  }
  0xab LB: > { %14483 = sst [smem:[#allocation171_spill]] %s12634_s0  ;;  %s13137_s27 = sadd.s32 4294967295, %s12646_s23   ;;  %s12646_s23 = sphi %s13122_s23, %s14611_s23   ;;  %s12642_s22 = sphi %s13120_s22, %s14615_s22   ;;  %s12638_s20 = sphi %s13118_s20, %s14614_s20   ;;  %s12634_s0 = sphi %s13116_s0, %s14613_s0  }
  0xac   : > { %s9590_s28 = sadd.s32 4294967294, %s12646_s23   ;;  %s13141_s1 = sadd.s32 1, %s12646_s23  }
  0xad   : > { %14484 = sst [smem:[#allocation172_spill]] %s13141_s1  ;;  %s191_s4 = sadd.s32 1, %s12642_s22 }
  0xae   : > { %s188_s21 = ssub.s32 %s12646_s23, %s13141_s1  ;;  %p198_p0 = scmp.ne.s32.totalorder %s12642_s22, %s12638_s20 }
  0xaf   : > { %p189_p1 = scmp.eq.s32.totalorder %s188_s21, 0  ;;  %p199_p2 = scmp.eq.s32.totalorder %s12646_s23, 0 }
  0xb0   : > { %p204_p3 = scmp.ne.s32.totalorder %s12638_s20, %s12634_s0  ;;  %p14415_p4 = scmp.eq.s32.totalorder %s13137_s27, 0 }
  0xb1   : > { %s13153_s7 = scalar_select %p189_p1, %s12642_s22, %s191_s4  }
  0xb2   : > { %p13155_p5 = por %p199_p2, %p198_p0  ;;  %p13161_p6 = por %p14415_p4, %p204_p3 }
  0xb3   : > { %14485 = sst [smem:[#allocation173_spill]] %s13153_s7  ;;  %p1561_p7 = scmp.eq.s32.totalorder %s13137_s27, 1 }
  0xb4   : > { %s14487_s15 = scalar_select %p13161_p6, 1, 0 }
  0xb5   : > { %p1567_p8 = scmp.eq.s32.totalorder %s9590_s28, 1  ;;  %p9591_p9 = scmp.ge.s32.totalorder %s12646_s23, 1 }
  0xb6   : > { %p1652_p10 = scmp.lt.s32.totalorder %s12646_s23, 3  ;;  %p13168_p11 = por %p1561_p7, %p198_p0 }
  0xb7   : > { %p13172_p12 = por %p1567_p8, %p204_p3 }
  0xb8   : > { %s14488_s16 = scalar_select %p13168_p11, 1, 0 }
  0xb9   : > { %s14489_s4 = scalar_select %p13172_p12, 1, 0 }
  0xba   : > { %p13176_p13 = pnand %p9591_p9, %p1652_p10 }
  0xbb   : > { %14490 = sst [smem:[#allocation174_spill]] %s14489_s4  ;;  %s12715_s7 = smov (!%p13176_p13), [#allocation9]  }
  0xbc   : > { %s14491_s21 = scalar_select %p13176_p13, 1, 0 }
  0xbd   : > { %1656 = sbr.rel (%p13176_p13) target bundleno = 731 (0x2db), region = 12  ;;  %s1685_s28 = sshll.u32 (!%p13176_p13), %s12715_s7, 4  ;;  %s1686_s28 = int_to_ptr.vmem [resolvable:$true] %s1685_s28 }
  0xbe   : > { %s12716_s1 = smov (!%p13176_p13), [#allocation12]   ;;  %s11250_s2 = scalar_lea.vmem (!%p13176_p13), %s1686_s28, 16 }
  0xbf   : > { %s1707_s0 = sshll.u32 (!%p13176_p13), %s12716_s1, 4  ;;  %p11251_p0 = scmp.ne.s32.totalorder (!%p13176_p13), %s1686_s28, %s11250_s2  ;;  %s1708_s0 = int_to_ptr.vmem [resolvable:$true] %s1707_s0 }
  0xc0   : > { %s11256_s4 = scalar_lea.vmem (!%p13176_p13), %s1686_s28, 32  ;;  %p11257_p3 = scmp.lt.s32.totalorder (!%p13176_p13), %s1686_s28, %s1686_s28 }
  0xc1   : > { %p11252_p1 = pnand (!%p13176_p13), %p11251_p0, %p14415_p4  ;;  %p11258_p7 = scmp.lt.s32.totalorder (!%p13176_p13), %s11256_s4, %s11250_s2 }
  0xc3   : > { %p11253_p2 = pneg %p11252_p1  ;;  %p11259_p8 = por %p11258_p7, %p11257_p3 }
  0xc5   : > { %p11260_p9 = pnand %p11259_p8, %p11253_p2 }
  0xc7   : > { %11263 = shalt.err (!%p11260_p9)
}
  0xc8   : > { %s14492_s3 = sld [smem:[#allocation118_spill]]  ;;  %s11274_s7 = scalar_lea.vmem %s1708_s0, 16 }
  0xc9   : > { %p11275_p10 = scmp.ne.s32.totalorder %s1708_s0, %s11274_s7  ;;  %s11280_s1 = scalar_lea.vmem %s1708_s0, 32 }
  0xca   : > { %p11281_p6 = scmp.lt.s32.totalorder %s1708_s0, %s1708_s0  ;;  %p11282_p0 = scmp.lt.s32.totalorder %s11280_s1, %s11274_s7 }
  0xcb   : > { %p11276_p12 = pnand %p11275_p10, %p14415_p4 }
  0xcc   : > { %p11283_p1 = por %p11282_p0, %p11281_p6 }
  0xcd   : > { %p11277_p11 = pneg %p11276_p12 }
  0xce   : > { %10670 = dma.hbm_to_vmem [thread:$0]  (%p14415_p4), %s14492_s3, 16, %s1686_s28, [#allocation10]  }
  0xcf   : > { %p11284_p13 = pnand %p11283_p1, %p11277_p11 }
  0xd1   : > { %11287 = shalt.err (!%p11284_p13)
}
  0xd2   : > { %s14493_s14 = sld [smem:[#allocation120_spill]]  ;;  %s12717_s2 = smov [#allocation15]  }
  0xd3   : > { %s1730_s4 = sshll.u32 %s12717_s2, 4  ;;  %s12718_s29 = smov [#allocation18]   ;;  %s1731_s4 = int_to_ptr.vmem [resolvable:$true] %s1730_s4 }
  0xd4   : > { %s1756_s28 = sshll.u32 %s12718_s29, 4  ;;  %s11298_s3 = scalar_lea.vmem %s1731_s4, 512  ;;  %s1757_s28 = int_to_ptr.vmem [resolvable:$true] %s1756_s28 }
  0xd5   : > { %p11299_p2 = scmp.ne.s32.totalorder %s1731_s4, %s11298_s3  ;;  %p11305_p7 = scmp.lt.s32.totalorder %s1731_s4, %s1731_s4 }
  0xd6   : > { %p11306_p6 = scmp.lt.s32.totalorder %s11298_s3, %s11298_s3 }
  0xd7   : > { %p11300_p12 = pnand %p11299_p2, %p14415_p4 }
  0xd8   : > { %10674 = dma.hbm_to_vmem [thread:$0]  (%p14415_p4), %s14493_s14, 16, %s1708_s0, [#allocation13]  }
  0xd9   : > { %p11301_p3 = pneg %p11300_p12  ;;  %p11307_p11 = por %p11306_p6, %p11305_p7 }
  0xdb   : > { %p11308_p13 = pnand %p11307_p11, %p11301_p3 }
  0xdd   : > { %11311 = shalt.err (!%p11308_p13)
}
  0xde   : > { %s14411_s7 = smov 128   ;;  %s14413_s0 = smov 8  }
  0xdf   : > { %10678 = dma.hbm_to_vmem [thread:$0]  (%p14415_p4), %s12834_s24, 512, %s1731_s4, [#allocation16], %s14411_s7, %s14411_s7, %s14413_s0  }
  0xe0   : > { %s11322_s29 = scalar_lea.vmem %s1757_s28, 256  ;;  %p11329_p0 = scmp.lt.s32.totalorder %s1757_s28, %s1757_s28 }
  0xe1   : > { %p11323_p8 = scmp.ne.s32.totalorder %s1757_s28, %s11322_s29  ;;  %p11330_p1 = scmp.lt.s32.totalorder %s11322_s29, %s11322_s29 }
  0xe3   : > { %p11324_p9 = pnand %p11323_p8, %p14415_p4  ;;  %p11331_p2 = por %p11330_p1, %p11329_p0 }
  0xe5   : > { %p11325_p10 = pneg %p11324_p9 }
  0xe7   : > { %p11332_p12 = pnand %p11331_p2, %p11325_p10 }
  0xe9   : > { %11335 = shalt.err (!%p11332_p12)
}
  0xea   : > { %s14494_s6 = sld [smem:[#allocation123_spill]]  ;;  %s12721_s3 = smov [#allocation21]  }
  0xeb   : > { %s1781_s1 = sshll.u32 %s12721_s3, 4  ;;  %s12722_s2 = smov [#allocation24]   ;;  %s1782_s1 = int_to_ptr.vmem [resolvable:$true] %s1781_s1 }
  0xec   : > { %s1808_s4 = sshll.u32 %s12722_s2, 4  ;;  %s11346_s14 = scalar_lea.vmem %s1782_s1, 16  ;;  %s1809_s4 = int_to_ptr.vmem [resolvable:$true] %s1808_s4 }
  0xed   : > { %p11347_p3 = scmp.ne.s32.totalorder %s1782_s1, %s11346_s14  ;;  %s11352_s29 = scalar_lea.vmem %s1782_s1, 32 }
  0xee   : > { %p11353_p11 = scmp.lt.s32.totalorder %s1782_s1, %s1782_s1  ;;  %p11354_p13 = scmp.lt.s32.totalorder %s11352_s29, %s11346_s14 }
  0xef   : > { %p11348_p7 = pnand %p11347_p3, %p14415_p4 }
  0xf0   : > { %10682 = dma.hbm_to_vmem [thread:$0]  (%p14415_p4), %s14494_s6, 256, %s1757_s28, [#allocation19], %s14411_s7, %s14411_s7, %s14413_s0  }
  0xf1   : > { %p11349_p6 = pneg %p11348_p7  ;;  %p11355_p8 = por %p11354_p13, %p11353_p11 }
  0xf3   : > { %p11356_p9 = pnand %p11355_p8, %p11349_p6 }
  0xf5   : > { %11359 = shalt.err (!%p11356_p9)
}
  0xf6   : > { %10686 = dma.hbm_to_vmem [thread:$0]  (%p14415_p4), %s12854_s18, 16, %s1782_s1, [#allocation22]  }
  0xf7   : > { %s11370_s28 = scalar_lea.vmem %s1809_s4, 16  ;;  %s11376_s3 = scalar_lea.vmem %s1809_s4, 32 }
  0xf8   : > { %p11371_p10 = scmp.ne.s32.totalorder %s1809_s4, %s11370_s28  ;;  %p11377_p2 = scmp.lt.s32.totalorder %s1809_s4, %s1809_s4 }
  0xf9   : > { %p11378_p12 = scmp.lt.s32.totalorder %s11376_s3, %s11370_s28 }
  0xfa   : > { %p11372_p0 = pnand %p11371_p10, %p14415_p4 }
  0xfb   : > { %p11379_p3 = por %p11378_p12, %p11377_p2 }
  0xfc   : > { %p11373_p1 = pneg %p11372_p0 }
  0xfe   : > { %p11380_p7 = pnand %p11379_p3, %p11373_p1 }
 0x100   : > { %11383 = shalt.err (!%p11380_p7)
}
 0x101   : > { %s14495_s10 = sld [smem:[#allocation127_spill]]  ;;  %s12723_s14 = smov [#allocation27]  }
 0x102   : > { %s1830_s2 = sshll.u32 %s12723_s14, 4  ;;  %s12724_s29 = smov [#allocation30]   ;;  %s1831_s2 = int_to_ptr.vmem [resolvable:$true] %s1830_s2 }
 0x103   : > { %s1852_s1 = sshll.u32 %s12724_s29, 4  ;;  %s11394_s7 = scalar_lea.vmem %s1831_s2, 16  ;;  %s1853_s1 = int_to_ptr.vmem [resolvable:$true] %s1852_s1 }
 0x104   : > { %p11395_p6 = scmp.ne.s32.totalorder %s1831_s2, %s11394_s7  ;;  %s11400_s28 = scalar_lea.vmem %s1831_s2, 32 }
 0x105   : > { %p11401_p8 = scmp.lt.s32.totalorder %s1831_s2, %s1831_s2  ;;  %p11402_p9 = scmp.lt.s32.totalorder %s11400_s28, %s11394_s7 }
 0x106   : > { %p11396_p11 = pnand %p11395_p6, %p14415_p4 }
 0x107   : > { %10690 = dma.hbm_to_vmem [thread:$0]  (%p14415_p4), %s14495_s10, 16, %s1809_s4, [#allocation25]  }
 0x108   : > { %p11397_p13 = pneg %p11396_p11  ;;  %p11403_p10 = por %p11402_p9, %p11401_p8 }
 0x10a   : > { %p11404_p0 = pnand %p11403_p10, %p11397_p13 }
 0x10c   : > { %11407 = shalt.err (!%p11404_p0)
}
 0x10d   : > { %s14496_s13 = sld [smem:[#allocation129_spill]]  ;;  %s11418_s4 = scalar_lea.vmem %s1853_s1, 16 }
 0x10e   : > { %p11419_p1 = scmp.ne.s32.totalorder %s1853_s1, %s11418_s4  ;;  %s11424_s3 = scalar_lea.vmem %s1853_s1, 32 }
 0x10f   : > { %p11425_p3 = scmp.lt.s32.totalorder %s1853_s1, %s1853_s1  ;;  %p11426_p7 = scmp.lt.s32.totalorder %s11424_s3, %s11418_s4 }
 0x110   : > { %p11420_p2 = pnand %p11419_p1, %p14415_p4 }
 0x111   : > { %p11427_p6 = por %p11426_p7, %p11425_p3 }
 0x112   : > { %p11421_p12 = pneg %p11420_p2 }
 0x113   : > { %10694 = dma.hbm_to_vmem [thread:$0]  (%p14415_p4), %s14496_s13, 16, %s1831_s2, [#allocation28]  }
 0x114   : > { %p11428_p11 = pnand %p11427_p6, %p11421_p12 }
 0x116   : > { %11431 = shalt.err (!%p11428_p11)
}
 0x117   : > { %10698 = dma.hbm_to_vmem [thread:$0]  (%p14415_p4), %s12889_s17, 16, %s1853_s1, [#allocation31]  }
 0x118   : > { %s12725_s7 = smov [#allocation33]   ;;  %s12726_s29 = smov [#allocation36]  }
 0x119   : > { %s1874_s14 = sshll.u32 %s12725_s7, 4  ;;  %s1895_s2 = sshll.u32 %s12726_s29, 4  ;;  %s1875_s14 = int_to_ptr.vmem [resolvable:$true] %s1874_s14  ;;  %s1896_s2 = int_to_ptr.vmem [resolvable:$true] %s1895_s2 }
 0x11a   : > { %s11442_s28 = scalar_lea.vmem %s1875_s14, 16  ;;  %s11448_s4 = scalar_lea.vmem %s1875_s14, 32 }
 0x11b   : > { %p11443_p13 = scmp.ne.s32.totalorder %s1875_s14, %s11442_s28  ;;  %p11449_p10 = scmp.lt.s32.totalorder %s1875_s14, %s1875_s14 }
 0x11c   : > { %p11450_p0 = scmp.lt.s32.totalorder %s11448_s4, %s11442_s28 }
 0x11d   : > { %p11444_p8 = pnand %p11443_p13, %p14415_p4 }
 0x11e   : > { %p11451_p1 = por %p11450_p0, %p11449_p10 }
 0x11f   : > { %p11445_p9 = pneg %p11444_p8 }
 0x121   : > { %p11452_p2 = pnand %p11451_p1, %p11445_p9 }
 0x123   : > { %11455 = shalt.err (!%p11452_p2)
}
 0x124   : > { %s14497_s5 = sld [smem:[#allocation132_spill]]  ;;  %s11466_s1 = scalar_lea.vmem %s1896_s2, 512 }
 0x125   : > { %p11467_p12 = scmp.ne.s32.totalorder %s1896_s2, %s11466_s1  ;;  %p11473_p6 = scmp.lt.s32.totalorder %s1896_s2, %s1896_s2 }
 0x126   : > { %p11474_p11 = scmp.lt.s32.totalorder %s11466_s1, %s11466_s1 }
 0x127   : > { %p11468_p3 = pnand %p11467_p12, %p14415_p4 }
 0x128   : > { %p11475_p13 = por %p11474_p11, %p11473_p6 }
 0x129   : > { %p11469_p7 = pneg %p11468_p3 }
 0x12a   : > { %10702 = dma.hbm_to_vmem [thread:$0]  (%p14415_p4), %s14497_s5, 16, %s1875_s14, [#allocation34]  }
 0x12b   : > { %p11476_p8 = pnand %p11475_p13, %p11469_p7 }
 0x12d   : > { %11479 = shalt.err (!%p11476_p8)
}
 0x12e   : > { %s14498_s3 = smov 128   ;;  %s12727_s7 = smov [#allocation39]  }
 0x12f   : > { %10706 = dma.hbm_to_vmem [thread:$0]  (%p14415_p4), %s12909_s25, 512, %s1896_s2, [#allocation37], %s14498_s3, %s14498_s3, %s14413_s0  }
 0x130   : > { %s1922_s14 = sshll.u32 %s12727_s7, 4  ;;  %s12728_s29 = smov [#allocation42]   ;;  %s1923_s14 = int_to_ptr.vmem [resolvable:$true] %s1922_s14 }
 0x131   : > { %s1944_s28 = sshll.u32 %s12728_s29, 4  ;;  %s11490_s4 = scalar_lea.vmem %s1923_s14, 16  ;;  %s1945_s28 = int_to_ptr.vmem [resolvable:$true] %s1944_s28 }
 0x132   : > { %p11491_p9 = scmp.ne.s32.totalorder %s1923_s14, %s11490_s4  ;;  %s11496_s1 = scalar_lea.vmem %s1923_s14, 32 }
 0x133   : > { %p11497_p1 = scmp.lt.s32.totalorder %s1923_s14, %s1923_s14  ;;  %p11498_p2 = scmp.lt.s32.totalorder %s11496_s1, %s11490_s4 }
 0x134   : > { %p11492_p10 = pnand %p11491_p9, %p14415_p4 }
 0x135   : > { %p11499_p12 = por %p11498_p2, %p11497_p1 }
 0x136   : > { %p11493_p0 = pneg %p11492_p10 }
 0x138   : > { %p11500_p3 = pnand %p11499_p12, %p11493_p0 }
 0x13a   : > { %11503 = shalt.err (!%p11500_p3)
}
 0x13b   : > { %10710 = dma.hbm_to_vmem [thread:$0]  (%p14415_p4), %s12919_s26, 16, %s1923_s14, [#allocation40]  }
 0x13c   : > { %s11514_s2 = scalar_lea.vmem %s1945_s28, 16  ;;  %s11520_s7 = scalar_lea.vmem %s1945_s28, 32 }
 0x13d   : > { %p11515_p7 = scmp.ne.s32.totalorder %s1945_s28, %s11514_s2  ;;  %p11521_p13 = scmp.lt.s32.totalorder %s1945_s28, %s1945_s28 }
 0x13e   : > { %p11522_p8 = scmp.lt.s32.totalorder %s11520_s7, %s11514_s2 }
 0x13f   : > { %p11516_p6 = pnand %p11515_p7, %p14415_p4 }
 0x140   : > { %p11523_p9 = por %p11522_p8, %p11521_p13 }
 0x141   : > { %p11517_p11 = pneg %p11516_p6 }
 0x143   : > { %p11524_p10 = pnand %p11523_p9, %p11517_p11 }
 0x145   : > { %11527 = shalt.err (!%p11524_p10)
}
 0x146   : > { %s14499_s11 = sld [smem:[#allocation136_spill]]  ;;  %s12729_s29 = smov [#allocation45]  }
 0x147   : > { %s1965_s4 = sshll.u32 %s12729_s29, 4  ;;  %s12730_s1 = smov [#allocation48]   ;;  %s1966_s4 = int_to_ptr.vmem [resolvable:$true] %s1965_s4 }
 0x148   : > { %s1991_s14 = sshll.u32 %s12730_s1, 4  ;;  %s11538_s0 = scalar_lea.vmem %s1966_s4, 256  ;;  %s1992_s14 = int_to_ptr.vmem [resolvable:$true] %s1991_s14 }
 0x149   : > { %p11539_p0 = scmp.ne.s32.totalorder %s1966_s4, %s11538_s0  ;;  %p11545_p12 = scmp.lt.s32.totalorder %s1966_s4, %s1966_s4 }
 0x14a   : > { %p11546_p3 = scmp.lt.s32.totalorder %s11538_s0, %s11538_s0 }
 0x14b   : > { %p11540_p1 = pnand %p11539_p0, %p14415_p4 }
 0x14c   : > { %10714 = dma.hbm_to_vmem [thread:$0]  (%p14415_p4), %s14499_s11, 16, %s1945_s28, [#allocation43]  }
 0x14d   : > { %p11541_p2 = pneg %p11540_p1  ;;  %p11547_p7 = por %p11546_p3, %p11545_p12 }
 0x14f   : > { %p11548_p6 = pnand %p11547_p7, %p11541_p2 }
 0x151   : > { %11551 = shalt.err (!%p11548_p6)
}
 0x152   : > { %s14500_s2 = smov 8   ;;  %s11562_s28 = scalar_lea.vmem %s1992_s14, 512 }
 0x153   : > { %10718 = dma.hbm_to_vmem [thread:$0]  (%p14415_p4), %s12939_s30, 256, %s1966_s4, [#allocation46], %s14498_s3, %s14498_s3, %s14500_s2  }
 0x154   : > { %p11563_p11 = scmp.ne.s32.totalorder %s1992_s14, %s11562_s28  ;;  %p11569_p9 = scmp.lt.s32.totalorder %s1992_s14, %s1992_s14 }
 0x155   : > { %p11570_p10 = scmp.lt.s32.totalorder %s11562_s28, %s11562_s28 }
 0x156   : > { %p11564_p13 = pnand %p11563_p11, %p14415_p4 }
 0x157   : > { %p11571_p0 = por %p11570_p10, %p11569_p9 }
 0x158   : > { %p11565_p8 = pneg %p11564_p13 }
 0x15a   : > { %p11572_p1 = pnand %p11571_p0, %p11565_p8 }
 0x15c   : > { %11575 = shalt.err (!%p11572_p1)
}
 0x15d   : > { %10722 = dma.hbm_to_vmem [thread:$0]  (%p14415_p4), %s12949_s19, 512, %s1992_s14, [#allocation49], %s14498_s3, %s14498_s3, %s14500_s2  }
 0x15e   : > { %s12731_s0 = smov [#allocation51]   ;;  %s12732_s29 = smov [#allocation54]  }
 0x15f   : > { %s2018_s7 = sshll.u32 %s12731_s0, 4  ;;  %s2039_s4 = sshll.u32 %s12732_s29, 4  ;;  %s2019_s7 = int_to_ptr.vmem [resolvable:$true] %s2018_s7  ;;  %s2040_s4 = int_to_ptr.vmem [resolvable:$true] %s2039_s4 }
 0x160   : > { %s11586_s1 = scalar_lea.vmem %s2019_s7, 16  ;;  %s11592_s28 = scalar_lea.vmem %s2019_s7, 32 }
 0x161   : > { %p11587_p2 = scmp.ne.s32.totalorder %s2019_s7, %s11586_s1  ;;  %p11593_p7 = scmp.lt.s32.totalorder %s2019_s7, %s2019_s7 }
 0x162   : > { %p11594_p6 = scmp.lt.s32.totalorder %s11592_s28, %s11586_s1 }
 0x163   : > { %p11588_p12 = pnand %p11587_p2, %p14415_p4 }
 0x164   : > { %p11595_p11 = por %p11594_p6, %p11593_p7 }
 0x165   : > { %p11589_p3 = pneg %p11588_p12 }
 0x167   : > { %p11596_p13 = pnand %p11595_p11, %p11589_p3 }
 0x169   : > { %11599 = shalt.err (!%p11596_p13)
}
 0x16a   : > { %s14501_s14 = sld [smem:[#allocation140_spill]]  ;;  %s11610_s0 = scalar_lea.vmem %s2040_s4, 512 }
 0x16b   : > { %p11611_p8 = scmp.ne.s32.totalorder %s2040_s4, %s11610_s0  ;;  %p11617_p0 = scmp.lt.s32.totalorder %s2040_s4, %s2040_s4 }
 0x16c   : > { %p11618_p1 = scmp.lt.s32.totalorder %s11610_s0, %s11610_s0 }
 0x16d   : > { %p11612_p9 = pnand %p11611_p8, %p14415_p4 }
 0x16e   : > { %p11619_p2 = por %p11618_p1, %p11617_p0 }
 0x16f   : > { %p11613_p10 = pneg %p11612_p9 }
 0x170   : > { %10726 = dma.hbm_to_vmem [thread:$0]  (%p14415_p4), %s14501_s14, 16, %s2019_s7, [#allocation52]  }
 0x171   : > { %p11620_p12 = pnand %p11619_p2, %p11613_p10 }
 0x173   : > { %11623 = shalt.err (!%p11620_p12)
}
 0x174   : > { %s14502_s29 = sld [smem:[#allocation142_spill]]  ;;  %s12733_s1 = smov [#allocation57]  }
 0x175   : > { %s2067_s7 = sshll.u32 %s12733_s1, 4  ;;  %s12734_s28 = smov [#allocation60]   ;;  %s2068_s7 = int_to_ptr.vmem [resolvable:$true] %s2067_s7 }
 0x176   : > { %s2089_s14 = sshll.u32 %s12734_s28, 4  ;;  %s11634_s5 = scalar_lea.vmem %s2068_s7, 16  ;;  %s2090_s14 = int_to_ptr.vmem [resolvable:$true] %s2089_s14 }
 0x177   : > { %p11635_p3 = scmp.ne.s32.totalorder %s2068_s7, %s11634_s5  ;;  %s11640_s0 = scalar_lea.vmem %s2068_s7, 32 }
 0x178   : > { %p11641_p11 = scmp.lt.s32.totalorder %s2068_s7, %s2068_s7  ;;  %p11642_p13 = scmp.lt.s32.totalorder %s11640_s0, %s11634_s5 }
 0x179   : > { %p11636_p7 = pnand %p11635_p3, %p14415_p4 }
 0x17a   : > { %10730 = dma.hbm_to_vmem [thread:$0]  (%p14415_p4), %s14502_s29, 512, %s2040_s4, [#allocation55], %s14498_s3, %s14498_s3, %s14500_s2  }
 0x17b   : > { %p11637_p6 = pneg %p11636_p7  ;;  %p11643_p8 = por %p11642_p13, %p11641_p11 }
 0x17d   : > { %p11644_p9 = pnand %p11643_p8, %p11637_p6 }
 0x17f   : > { %11647 = shalt.err (!%p11644_p9)
}
 0x180   : > { %s14503_s4 = sld [smem:[#allocation145_spill]]  ;;  %s11658_s29 = scalar_lea.vmem %s2090_s14, 16 }
 0x181   : > { %p11659_p10 = scmp.ne.s32.totalorder %s2090_s14, %s11658_s29  ;;  %s11664_s1 = scalar_lea.vmem %s2090_s14, 32 }
 0x182   : > { %p11665_p2 = scmp.lt.s32.totalorder %s2090_s14, %s2090_s14  ;;  %p11666_p12 = scmp.lt.s32.totalorder %s11664_s1, %s11658_s29 }
 0x183   : > { %p11660_p0 = pnand %p11659_p10, %p14415_p4 }
 0x184   : > { %p11667_p3 = por %p11666_p12, %p11665_p2 }
 0x185   : > { %p11661_p1 = pneg %p11660_p0 }
 0x186   : > { %10734 = dma.hbm_to_vmem [thread:$0]  (%p14415_p4), %s14503_s4, 16, %s2068_s7, [#allocation58]  }
 0x187   : > { %p11668_p7 = pnand %p11667_p3, %p11661_p1 }
 0x189   : > { %11671 = shalt.err (!%p11668_p7)
}
 0x18a   : > { %s14504_s5 = sld [smem:[#allocation147_spill]]  ;;  %s12735_s28 = smov [#allocation63]  }
 0x18b   : > { %s2111_s0 = sshll.u32 %s12735_s28, 4  ;;  %s12736_s6 = smov [#allocation66]   ;;  %s2112_s0 = int_to_ptr.vmem [resolvable:$true] %s2111_s0 }
 0x18c   : > { %s2133_s7 = sshll.u32 %s12736_s6, 4  ;;  %s11682_s4 = scalar_lea.vmem %s2112_s0, 16  ;;  %s2134_s7 = int_to_ptr.vmem [resolvable:$true] %s2133_s7 }
 0x18d   : > { %p11683_p6 = scmp.ne.s32.totalorder %s2112_s0, %s11682_s4  ;;  %s11688_s29 = scalar_lea.vmem %s2112_s0, 32 }
 0x18e   : > { %p11689_p8 = scmp.lt.s32.totalorder %s2112_s0, %s2112_s0  ;;  %p11690_p9 = scmp.lt.s32.totalorder %s11688_s29, %s11682_s4 }
 0x18f   : > { %p11684_p11 = pnand %p11683_p6, %p14415_p4 }
 0x190   : > { %10738 = dma.hbm_to_vmem [thread:$0]  (%p14415_p4), %s14504_s5, 16, %s2090_s14, [#allocation61]  }
 0x191   : > { %p11685_p13 = pneg %p11684_p11  ;;  %p11691_p10 = por %p11690_p9, %p11689_p8 }
 0x193   : > { %p11692_p0 = pnand %p11691_p10, %p11685_p13 }
 0x195   : > { %11695 = shalt.err (!%p11692_p0)
}
 0x196   : > { %s14505_s14 = sld [smem:[#allocation149_spill]]  ;;  %s11706_s1 = scalar_lea.vmem %s2134_s7, 16 }
 0x197   : > { %p11707_p1 = scmp.ne.s32.totalorder %s2134_s7, %s11706_s1  ;;  %s11712_s6 = scalar_lea.vmem %s2134_s7, 32 }
 0x198   : > { %p11713_p3 = scmp.lt.s32.totalorder %s2134_s7, %s2134_s7  ;;  %p11714_p7 = scmp.lt.s32.totalorder %s11712_s6, %s11706_s1 }
 0x199   : > { %p11708_p2 = pnand %p11707_p1, %p14415_p4 }
 0x19a   : > { %p11715_p6 = por %p11714_p7, %p11713_p3 }
 0x19b   : > { %p11709_p12 = pneg %p11708_p2 }
 0x19c   : > { %10742 = dma.hbm_to_vmem [thread:$0]  (%p14415_p4), %s14505_s14, 16, %s2112_s0, [#allocation64]  }
 0x19d   : > { %p11716_p11 = pnand %p11715_p6, %p11709_p12 }
 0x19f   : > { %11719 = shalt.err (!%p11716_p11)
}
 0x1a0   : > { %s14506_s5 = sld [smem:[#allocation151_spill]]  ;;  %s12737_s28 = smov [#allocation69]  }
 0x1a1   : > { %s2160_s4 = sshll.u32 %s12737_s28, 4  ;;  %s12738_s29 = smov [#allocation72]   ;;  %s2161_s4 = int_to_ptr.vmem [resolvable:$true] %s2160_s4 }
 0x1a2   : > { %s2191_s0 = sshll.u32 %s12738_s29, 4  ;;  %s11730_s14 = scalar_lea.vmem %s2161_s4, 16  ;;  %s2192_s0 = int_to_ptr.vmem [resolvable:$true] %s2191_s0 }
 0x1a3   : > { %p11731_p13 = scmp.ne.s32.totalorder %s2161_s4, %s11730_s14  ;;  %s11736_s1 = scalar_lea.vmem %s2161_s4, 32 }
 0x1a4   : > { %p11737_p10 = scmp.lt.s32.totalorder %s2161_s4, %s2161_s4  ;;  %p11738_p0 = scmp.lt.s32.totalorder %s11736_s1, %s11730_s14 }
 0x1a5   : > { %p11732_p8 = pnand %p11731_p13, %p14415_p4 }
 0x1a6   : > { %10746 = dma.hbm_to_vmem [thread:$0]  (%p14415_p4), %s14506_s5, 16, %s2134_s7, [#allocation67]  }
 0x1a7   : > { %p11733_p9 = pneg %p11732_p8  ;;  %p11739_p1 = por %p11738_p0, %p11737_p10 }
 0x1a9   : > { %p11740_p2 = pnand %p11739_p1, %p11733_p9 }
 0x1ab   : > { %11743 = shalt.err (!%p11740_p2)
}
 0x1ac   : > { %s14507_s7 = sld [smem:[#allocation154_spill]]  ;;  %s11754_s6 = scalar_lea.vmem %s2192_s0, 16 }
 0x1ad   : > { %p11755_p12 = scmp.ne.s32.totalorder %s2192_s0, %s11754_s6  ;;  %s11760_s5 = scalar_lea.vmem %s2192_s0, 32 }
 0x1ae   : > { %p11761_p6 = scmp.lt.s32.totalorder %s2192_s0, %s2192_s0  ;;  %p11762_p11 = scmp.lt.s32.totalorder %s11760_s5, %s11754_s6 }
 0x1af   : > { %p11756_p3 = pnand %p11755_p12, %p14415_p4 }
 0x1b0   : > { %p11763_p13 = por %p11762_p11, %p11761_p6 }
 0x1b1   : > { %p11757_p7 = pneg %p11756_p3 }
 0x1b2   : > { %10750 = dma.hbm_to_vmem [thread:$0]  (%p14415_p4), %s14507_s7, 16, %s2161_s4, [#allocation70]  }
 0x1b3   : > { %p11764_p8 = pnand %p11763_p13, %p11757_p7 }
 0x1b5   : > { %11767 = shalt.err (!%p11764_p8)
}
 0x1b6   : > { %s14508_s28 = sld [smem:[#allocation159_spill]]  ;;  %s12739_s29 = smov [#allocation75]  }
 0x1b7   : > { %s2213_s14 = sshll.u32 %s12739_s29, 4  ;;  %s12740_s4 = smov [#allocation8]   ;;  %s2214_s14 = int_to_ptr.vmem [resolvable:$true] %s2213_s14 }
 0x1b8   : > { %s1674_s1 = sshll.u32 %s12740_s4, 4  ;;  %s11778_s7 = scalar_lea.vmem %s2214_s14, 16  ;;  %s1675_s1 = int_to_ptr.vmem [resolvable:$true] %s1674_s1 }
 0x1b9   : > { %p11779_p9 = scmp.ne.s32.totalorder %s2214_s14, %s11778_s7  ;;  %s11784_s10 = scalar_lea.vmem %s2214_s14, 32 }
 0x1ba   : > { %p11785_p1 = scmp.lt.s32.totalorder %s2214_s14, %s2214_s14  ;;  %p11786_p2 = scmp.lt.s32.totalorder %s11784_s10, %s11778_s7 }
 0x1bb   : > { %p11780_p10 = pnand %p11779_p9, %p14415_p4 }
 0x1bc   : > { %10754 = dma.hbm_to_vmem [thread:$0]  (%p14415_p4), %s14508_s28, 16, %s2192_s0, [#allocation73]  }
 0x1bd   : > { %p11781_p0 = pneg %p11780_p10  ;;  %p11787_p12 = por %p11786_p2, %p11785_p1 }
 0x1bf   : > { %p11788_p3 = pnand %p11787_p12, %p11781_p0 }
 0x1c1   : > { %11791 = shalt.err (!%p11788_p3)
}
 0x1c2   : > { %s14509_s6 = sld [smem:[#allocation161_spill]]  ;;  %s11802_s0 = scalar_lea.vmem %s1675_s1, 16 }
 0x1c3   : > { %p11803_p7 = scmp.ne.s32.totalorder %s1675_s1, %s11802_s0  ;;  %s11808_s5 = scalar_lea.vmem %s1675_s1, 32 }
 0x1c4   : > { %p11809_p13 = scmp.lt.s32.totalorder %s1675_s1, %s1675_s1  ;;  %p11810_p8 = scmp.lt.s32.totalorder %s11808_s5, %s11802_s0 }
 0x1c5   : > { %p11804_p6 = pnand %p11803_p7, %p14415_p4 }
 0x1c6   : > { %p11811_p9 = por %p11810_p8, %p11809_p13 }
 0x1c7   : > { %p11805_p11 = pneg %p11804_p6 }
 0x1c8   : > { %10758 = dma.hbm_to_vmem [thread:$0]  (%p14415_p4), %s14509_s6, 16, %s2214_s14, [#allocation76]  }
 0x1c9   : > { %p11812_p10 = pnand %p11811_p9, %p11805_p11 }
 0x1cb   : > { %11815 = shalt.err (!%p11812_p10)
}
 0x1cc   : > { %s14510_s10 = sld [smem:[#allocation117_spill]]  ;;  %s12741_s28 = smov [#allocation11]  }
 0x1cd   : > { %s1696_s29 = sshll.u32 %s12741_s28, 4  ;;  %s12742_s14 = smov [#allocation14]   ;;  %s1697_s29 = int_to_ptr.vmem [resolvable:$true] %s1696_s29 }
 0x1ce   : > { %s1717_s4 = sshll.u32 %s12742_s14, 4  ;;  %s11826_s7 = scalar_lea.vmem %s1697_s29, 16  ;;  %s1718_s4 = int_to_ptr.vmem [resolvable:$true] %s1717_s4 }
 0x1cf   : > { %p11827_p0 = scmp.ne.s32.totalorder %s1697_s29, %s11826_s7  ;;  %s11832_s6 = scalar_lea.vmem %s1697_s29, 32 }
 0x1d0   : > { %p11833_p12 = scmp.lt.s32.totalorder %s1697_s29, %s1697_s29  ;;  %p11834_p3 = scmp.lt.s32.totalorder %s11832_s6, %s11826_s7 }
 0x1d1   : > { %p11828_p1 = pnand %p11827_p0, %p14415_p4 }
 0x1d2   : > { %10668 = dma.hbm_to_vmem [thread:$0]  (%p14415_p4), %s14510_s10, 16, %s1675_s1, [#allocation7]  }
 0x1d3   : > { %p11829_p2 = pneg %p11828_p1  ;;  %p11835_p7 = por %p11834_p3, %p11833_p12 }
 0x1d5   : > { %p11836_p6 = pnand %p11835_p7, %p11829_p2 }
 0x1d7   : > { %11839 = shalt.err (!%p11836_p6)
}
 0x1d8   : > { %s14511_s0 = sld [smem:[#allocation119_spill]]  ;;  %s11850_s1 = scalar_lea.vmem %s1718_s4, 256 }
 0x1d9   : > { %p11851_p11 = scmp.ne.s32.totalorder %s1718_s4, %s11850_s1  ;;  %p11857_p9 = scmp.lt.s32.totalorder %s1718_s4, %s1718_s4 }
 0x1da   : > { %p11858_p10 = scmp.lt.s32.totalorder %s11850_s1, %s11850_s1 }
 0x1db   : > { %p11852_p13 = pnand %p11851_p11, %p14415_p4 }
 0x1dc   : > { %p11859_p0 = por %p11858_p10, %p11857_p9 }
 0x1dd   : > { %p11853_p8 = pneg %p11852_p13 }
 0x1de   : > { %10672 = dma.hbm_to_vmem [thread:$0]  (%p14415_p4), %s14511_s0, 16, %s1697_s29, [#allocation10]  }
 0x1df   : > { %p11860_p1 = pnand %p11859_p0, %p11853_p8 }
 0x1e1   : > { %11863 = shalt.err (!%p11860_p1)
}
 0x1e2   : > { %s14512_s5 = sld [smem:[#allocation121_spill]]  ;;  %s12743_s10 = smov [#allocation17]  }
 0x1e3   : > { %s1743_s28 = sshll.u32 %s12743_s10, 4  ;;  %s12744_s29 = smov [#allocation20]   ;;  %s1744_s28 = int_to_ptr.vmem [resolvable:$true] %s1743_s28 }
 0x1e4   : > { %s1770_s14 = sshll.u32 %s12744_s29, 4  ;;  %s11874_s7 = scalar_lea.vmem %s1744_s28, 512  ;;  %s1771_s14 = int_to_ptr.vmem [resolvable:$true] %s1770_s14 }
 0x1e5   : > { %p11875_p2 = scmp.ne.s32.totalorder %s1744_s28, %s11874_s7  ;;  %p11881_p7 = scmp.lt.s32.totalorder %s1744_s28, %s1744_s28 }
 0x1e6   : > { %p11882_p6 = scmp.lt.s32.totalorder %s11874_s7, %s11874_s7 }
 0x1e7   : > { %p11876_p12 = pnand %p11875_p2, %p14415_p4 }
 0x1e8   : > { %10676 = dma.hbm_to_vmem [thread:$0]  (%p14415_p4), %s14512_s5, 256, %s1718_s4, [#allocation13], %s14498_s3, %s14498_s3, %s14500_s2  }
 0x1e9   : > { %p11877_p3 = pneg %p11876_p12  ;;  %p11883_p11 = por %p11882_p6, %p11881_p7 }
 0x1eb   : > { %p11884_p13 = pnand %p11883_p11, %p11877_p3 }
 0x1ed   : > { %11887 = shalt.err (!%p11884_p13)
}
 0x1ee   : > { %s14513_s4 = sld [smem:[#allocation122_spill]]  ;;  %s11898_s6 = scalar_lea.vmem %s1771_s14, 16 }
 0x1ef   : > { %p11899_p8 = scmp.ne.s32.totalorder %s1771_s14, %s11898_s6  ;;  %s11904_s0 = scalar_lea.vmem %s1771_s14, 32 }
 0x1f0   : > { %p11905_p0 = scmp.lt.s32.totalorder %s1771_s14, %s1771_s14  ;;  %p11906_p1 = scmp.lt.s32.totalorder %s11904_s0, %s11898_s6 }
 0x1f1   : > { %p11900_p9 = pnand %p11899_p8, %p14415_p4 }
 0x1f2   : > { %p11907_p2 = por %p11906_p1, %p11905_p0 }
 0x1f3   : > { %p11901_p10 = pneg %p11900_p9 }
 0x1f4   : > { %10680 = dma.hbm_to_vmem [thread:$0]  (%p14415_p4), %s14513_s4, 512, %s1744_s28, [#allocation16], %s14498_s3, %s14498_s3, %s14500_s2  }
 0x1f5   : > { %p11908_p12 = pnand %p11907_p2, %p11901_p10 }
 0x1f7   : > { %11911 = shalt.err (!%p11908_p12)
}
 0x1f8   : > { %s14514_s1 = sld [smem:[#allocation124_spill]]  ;;  %s12745_s5 = smov [#allocation23]  }
 0x1f9   : > { %s1791_s10 = sshll.u32 %s12745_s5, 4  ;;  %s12746_s28 = smov [#allocation26]   ;;  %s1792_s10 = int_to_ptr.vmem [resolvable:$true] %s1791_s10 }
 0x1fa   : > { %s1819_s29 = sshll.u32 %s12746_s28, 4  ;;  %s11922_s7 = scalar_lea.vmem %s1792_s10, 512  ;;  %s1820_s29 = int_to_ptr.vmem [resolvable:$true] %s1819_s29 }
 0x1fb   : > { %p11923_p3 = scmp.ne.s32.totalorder %s1792_s10, %s11922_s7  ;;  %p11929_p11 = scmp.lt.s32.totalorder %s1792_s10, %s1792_s10 }
 0x1fc   : > { %p11930_p13 = scmp.lt.s32.totalorder %s11922_s7, %s11922_s7 }
 0x1fd   : > { %p11924_p7 = pnand %p11923_p3, %p14415_p4 }
 0x1fe   : > { %10684 = dma.hbm_to_vmem [thread:$0]  (%p14415_p4), %s14514_s1, 16, %s1771_s14, [#allocation19]  }
 0x1ff   : > { %p11925_p6 = pneg %p11924_p7  ;;  %p11931_p8 = por %p11930_p13, %p11929_p11 }
 0x201   : > { %p11932_p9 = pnand %p11931_p8, %p11925_p6 }
 0x203   : > { %11935 = shalt.err (!%p11932_p9)
}
 0x204   : > { %s14515_s14 = sld [smem:[#allocation125_spill]]  ;;  %s11946_s4 = scalar_lea.vmem %s1820_s29, 16 }
 0x205   : > { %p11947_p10 = scmp.ne.s32.totalorder %s1820_s29, %s11946_s4  ;;  %s11952_s6 = scalar_lea.vmem %s1820_s29, 32 }
 0x206   : > { %p11953_p2 = scmp.lt.s32.totalorder %s1820_s29, %s1820_s29  ;;  %p11954_p12 = scmp.lt.s32.totalorder %s11952_s6, %s11946_s4 }
 0x207   : > { %p11948_p0 = pnand %p11947_p10, %p14415_p4 }
 0x208   : > { %p11955_p3 = por %p11954_p12, %p11953_p2 }
 0x209   : > { %p11949_p1 = pneg %p11948_p0 }
 0x20a   : > { %10688 = dma.hbm_to_vmem [thread:$0]  (%p14415_p4), %s14515_s14, 512, %s1792_s10, [#allocation22], %s14498_s3, %s14498_s3, %s14500_s2  }
 0x20b   : > { %p11956_p7 = pnand %p11955_p3, %p11949_p1 }
 0x20d   : > { %11959 = shalt.err (!%p11956_p7)
}
 0x20e   : > { %s14516_s0 = sld [smem:[#allocation128_spill]]  ;;  %s12747_s1 = smov [#allocation29]  }
 0x20f   : > { %s1841_s5 = sshll.u32 %s12747_s1, 4  ;;  %s12748_s10 = smov [#allocation32]   ;;  %s1842_s5 = int_to_ptr.vmem [resolvable:$true] %s1841_s5 }
 0x210   : > { %s1863_s28 = sshll.u32 %s12748_s10, 4  ;;  %s11970_s7 = scalar_lea.vmem %s1842_s5, 16  ;;  %s1864_s28 = int_to_ptr.vmem [resolvable:$true] %s1863_s28 }
 0x211   : > { %p11971_p6 = scmp.ne.s32.totalorder %s1842_s5, %s11970_s7  ;;  %s11976_s14 = scalar_lea.vmem %s1842_s5, 32 }
 0x212   : > { %p11977_p8 = scmp.lt.s32.totalorder %s1842_s5, %s1842_s5  ;;  %p11978_p9 = scmp.lt.s32.totalorder %s11976_s14, %s11970_s7 }
 0x213   : > { %p11972_p11 = pnand %p11971_p6, %p14415_p4 }
 0x214   : > { %10692 = dma.hbm_to_vmem [thread:$0]  (%p14415_p4), %s14516_s0, 16, %s1820_s29, [#allocation25]  }
 0x215   : > { %p11973_p13 = pneg %p11972_p11  ;;  %p11979_p10 = por %p11978_p9, %p11977_p8 }
 0x217   : > { %p11980_p0 = pnand %p11979_p10, %p11973_p13 }
 0x219   : > { %11983 = shalt.err (!%p11980_p0)
}
 0x21a   : > { %s14517_s4 = sld [smem:[#allocation130_spill]]  ;;  %s11994_s29 = scalar_lea.vmem %s1864_s28, 16 }
 0x21b   : > { %p11995_p1 = scmp.ne.s32.totalorder %s1864_s28, %s11994_s29  ;;  %s12000_s6 = scalar_lea.vmem %s1864_s28, 32 }
 0x21c   : > { %p12001_p3 = scmp.lt.s32.totalorder %s1864_s28, %s1864_s28  ;;  %p12002_p7 = scmp.lt.s32.totalorder %s12000_s6, %s11994_s29 }
 0x21d   : > { %p11996_p2 = pnand %p11995_p1, %p14415_p4 }
 0x21e   : > { %p12003_p6 = por %p12002_p7, %p12001_p3 }
 0x21f   : > { %p11997_p12 = pneg %p11996_p2 }
 0x220   : > { %10696 = dma.hbm_to_vmem [thread:$0]  (%p14415_p4), %s14517_s4, 16, %s1842_s5, [#allocation28]  }
 0x221   : > { %p12004_p11 = pnand %p12003_p6, %p11997_p12 }
 0x223   : > { %12007 = shalt.err (!%p12004_p11)
}
 0x224   : > { %s14518_s0 = sld [smem:[#allocation131_spill]]  ;;  %s12749_s1 = smov [#allocation35]  }
 0x225   : > { %s1885_s10 = sshll.u32 %s12749_s1, 4  ;;  %s12750_s5 = smov [#allocation38]   ;;  %s1886_s10 = int_to_ptr.vmem [resolvable:$true] %s1885_s10 }
 0x226   : > { %s1908_s7 = sshll.u32 %s12750_s5, 4  ;;  %s12018_s14 = scalar_lea.vmem %s1886_s10, 16  ;;  %s1909_s7 = int_to_ptr.vmem [resolvable:$true] %s1908_s7 }
 0x227   : > { %p12019_p13 = scmp.ne.s32.totalorder %s1886_s10, %s12018_s14  ;;  %s12024_s4 = scalar_lea.vmem %s1886_s10, 32 }
 0x228   : > { %p12025_p10 = scmp.lt.s32.totalorder %s1886_s10, %s1886_s10  ;;  %p12026_p0 = scmp.lt.s32.totalorder %s12024_s4, %s12018_s14 }
 0x229   : > { %p12020_p8 = pnand %p12019_p13, %p14415_p4 }
 0x22a   : > { %10700 = dma.hbm_to_vmem [thread:$0]  (%p14415_p4), %s14518_s0, 16, %s1864_s28, [#allocation31]  }
 0x22b   : > { %p12021_p9 = pneg %p12020_p8  ;;  %p12027_p1 = por %p12026_p0, %p12025_p10 }
 0x22d   : > { %p12028_p2 = pnand %p12027_p1, %p12021_p9 }
 0x22f   : > { %12031 = shalt.err (!%p12028_p2)
}
 0x230   : > { %s14519_s29 = sld [smem:[#allocation133_spill]]  ;;  %s12042_s28 = scalar_lea.vmem %s1909_s7, 512 }
 0x231   : > { %p12043_p12 = scmp.ne.s32.totalorder %s1909_s7, %s12042_s28  ;;  %p12049_p6 = scmp.lt.s32.totalorder %s1909_s7, %s1909_s7 }
 0x232   : > { %p12050_p11 = scmp.lt.s32.totalorder %s12042_s28, %s12042_s28 }
 0x233   : > { %p12044_p3 = pnand %p12043_p12, %p14415_p4 }
 0x234   : > { %p12051_p13 = por %p12050_p11, %p12049_p6 }
 0x235   : > { %p12045_p7 = pneg %p12044_p3 }
 0x236   : > { %10704 = dma.hbm_to_vmem [thread:$0]  (%p14415_p4), %s14519_s29, 16, %s1886_s10, [#allocation34]  }
 0x237   : > { %p12052_p8 = pnand %p12051_p13, %p12045_p7 }
 0x239   : > { %12055 = shalt.err (!%p12052_p8)
}
 0x23a   : > { %s14520_s6 = sld [smem:[#allocation134_spill]]  ;;  %s12751_s0 = smov [#allocation41]  }
 0x23b   : > { %s1933_s1 = sshll.u32 %s12751_s0, 4  ;;  %s12752_s10 = smov [#allocation44]   ;;  %s1934_s1 = int_to_ptr.vmem [resolvable:$true] %s1933_s1 }
 0x23c   : > { %s1955_s5 = sshll.u32 %s12752_s10, 4  ;;  %s12066_s14 = scalar_lea.vmem %s1934_s1, 16  ;;  %s1956_s5 = int_to_ptr.vmem [resolvable:$true] %s1955_s5 }
 0x23d   : > { %p12067_p9 = scmp.ne.s32.totalorder %s1934_s1, %s12066_s14  ;;  %s12072_s4 = scalar_lea.vmem %s1934_s1, 32 }
 0x23e   : > { %p12073_p1 = scmp.lt.s32.totalorder %s1934_s1, %s1934_s1  ;;  %p12074_p2 = scmp.lt.s32.totalorder %s12072_s4, %s12066_s14 }
 0x23f   : > { %p12068_p10 = pnand %p12067_p9, %p14415_p4 }
 0x240   : > { %10708 = dma.hbm_to_vmem [thread:$0]  (%p14415_p4), %s14520_s6, 512, %s1909_s7, [#allocation37], %s14498_s3, %s14498_s3, %s14500_s2  }
 0x241   : > { %p12069_p0 = pneg %p12068_p10  ;;  %p12075_p12 = por %p12074_p2, %p12073_p1 }
 0x243   : > { %p12076_p3 = pnand %p12075_p12, %p12069_p0 }
 0x245   : > { %12079 = shalt.err (!%p12076_p3)
}
 0x246   : > { %s14521_s29 = sld [smem:[#allocation135_spill]]  ;;  %s12090_s7 = scalar_lea.vmem %s1956_s5, 16 }
 0x247   : > { %p12091_p7 = scmp.ne.s32.totalorder %s1956_s5, %s12090_s7  ;;  %s12096_s28 = scalar_lea.vmem %s1956_s5, 32 }
 0x248   : > { %p12097_p13 = scmp.lt.s32.totalorder %s1956_s5, %s1956_s5  ;;  %p12098_p8 = scmp.lt.s32.totalorder %s12096_s28, %s12090_s7 }
 0x249   : > { %p12092_p6 = pnand %p12091_p7, %p14415_p4 }
 0x24a   : > { %p12099_p9 = por %p12098_p8, %p12097_p13 }
 0x24b   : > { %p12093_p11 = pneg %p12092_p6 }
 0x24c   : > { %10712 = dma.hbm_to_vmem [thread:$0]  (%p14415_p4), %s14521_s29, 16, %s1934_s1, [#allocation40]  }
 0x24d   : > { %p12100_p10 = pnand %p12099_p9, %p12093_p11 }
 0x24f   : > { %12103 = shalt.err (!%p12100_p10)
}
 0x250   : > { %s14522_s6 = sld [smem:[#allocation137_spill]]  ;;  %s12753_s0 = smov [#allocation47]  }
 0x251   : > { %s1978_s10 = sshll.u32 %s12753_s0, 4  ;;  %s12754_s1 = smov [#allocation50]   ;;  %s1979_s10 = int_to_ptr.vmem [resolvable:$true] %s1978_s10 }
 0x252   : > { %s2004_s14 = sshll.u32 %s12754_s1, 4  ;;  %s12114_s4 = scalar_lea.vmem %s1979_s10, 512  ;;  %s2005_s14 = int_to_ptr.vmem [resolvable:$true] %s2004_s14 }
 0x253   : > { %p12115_p0 = scmp.ne.s32.totalorder %s1979_s10, %s12114_s4  ;;  %p12121_p12 = scmp.lt.s32.totalorder %s1979_s10, %s1979_s10 }
 0x254   : > { %p12122_p3 = scmp.lt.s32.totalorder %s12114_s4, %s12114_s4 }
 0x255   : > { %p12116_p1 = pnand %p12115_p0, %p14415_p4 }
 0x256   : > { %10716 = dma.hbm_to_vmem [thread:$0]  (%p14415_p4), %s14522_s6, 16, %s1956_s5, [#allocation43]  }
 0x257   : > { %p12117_p2 = pneg %p12116_p1  ;;  %p12123_p7 = por %p12122_p3, %p12121_p12 }
 0x259   : > { %p12124_p6 = pnand %p12123_p7, %p12117_p2 }
 0x25b   : > { %12127 = shalt.err (!%p12124_p6)
}
 0x25c   : > { %s14523_s5 = sld [smem:[#allocation138_spill]]  ;;  %s12138_s29 = scalar_lea.vmem %s2005_s14, 256 }
 0x25d   : > { %p12139_p11 = scmp.ne.s32.totalorder %s2005_s14, %s12138_s29  ;;  %p12145_p9 = scmp.lt.s32.totalorder %s2005_s14, %s2005_s14 }
 0x25e   : > { %p12146_p10 = scmp.lt.s32.totalorder %s12138_s29, %s12138_s29 }
 0x25f   : > { %p12140_p13 = pnand %p12139_p11, %p14415_p4 }
 0x260   : > { %p12147_p0 = por %p12146_p10, %p12145_p9 }
 0x261   : > { %p12141_p8 = pneg %p12140_p13 }
 0x262   : > { %10720 = dma.hbm_to_vmem [thread:$0]  (%p14415_p4), %s14523_s5, 512, %s1979_s10, [#allocation46], %s14498_s3, %s14498_s3, %s14500_s2  }
 0x263   : > { %p12148_p1 = pnand %p12147_p0, %p12141_p8 }
 0x265   : > { %12151 = shalt.err (!%p12148_p1)
}
 0x266   : > { %s14524_s7 = sld [smem:[#allocation139_spill]]  ;;  %s12755_s28 = smov [#allocation53]  }
 0x267   : > { %s2029_s6 = sshll.u32 %s12755_s28, 4  ;;  %s12756_s0 = smov [#allocation56]   ;;  %s2030_s6 = int_to_ptr.vmem [resolvable:$true] %s2029_s6 }
 0x268   : > { %s2056_s10 = sshll.u32 %s12756_s0, 4  ;;  %s12162_s1 = scalar_lea.vmem %s2030_s6, 16  ;;  %s2057_s10 = int_to_ptr.vmem [resolvable:$true] %s2056_s10 }
 0x269   : > { %p12163_p2 = scmp.ne.s32.totalorder %s2030_s6, %s12162_s1  ;;  %s12168_s4 = scalar_lea.vmem %s2030_s6, 32 }
 0x26a   : > { %p12169_p7 = scmp.lt.s32.totalorder %s2030_s6, %s2030_s6  ;;  %p12170_p6 = scmp.lt.s32.totalorder %s12168_s4, %s12162_s1 }
 0x26b   : > { %p12164_p12 = pnand %p12163_p2, %p14415_p4 }
 0x26c   : > { %10724 = dma.hbm_to_vmem [thread:$0]  (%p14415_p4), %s14524_s7, 256, %s2005_s14, [#allocation49], %s14498_s3, %s14498_s3, %s14500_s2  }
 0x26d   : > { %p12165_p3 = pneg %p12164_p12  ;;  %p12171_p11 = por %p12170_p6, %p12169_p7 }
 0x26f   : > { %p12172_p13 = pnand %p12171_p11, %p12165_p3 }
 0x271   : > { %12175 = shalt.err (!%p12172_p13)
}
 0x272   : > { %s14525_s5 = sld [smem:[#allocation141_spill]]  ;;  %s12186_s14 = scalar_lea.vmem %s2057_s10, 16 }
 0x273   : > { %p12187_p8 = scmp.ne.s32.totalorder %s2057_s10, %s12186_s14  ;;  %s12192_s29 = scalar_lea.vmem %s2057_s10, 32 }
 0x274   : > { %p12193_p0 = scmp.lt.s32.totalorder %s2057_s10, %s2057_s10  ;;  %p12194_p1 = scmp.lt.s32.totalorder %s12192_s29, %s12186_s14 }
 0x275   : > { %p12188_p9 = pnand %p12187_p8, %p14415_p4 }
 0x276   : > { %p12195_p2 = por %p12194_p1, %p12193_p0 }
 0x277   : > { %p12189_p10 = pneg %p12188_p9 }
 0x278   : > { %10728 = dma.hbm_to_vmem [thread:$0]  (%p14415_p4), %s14525_s5, 16, %s2030_s6, [#allocation52]  }
 0x279   : > { %p12196_p12 = pnand %p12195_p2, %p12189_p10 }
 0x27b   : > { %12199 = shalt.err (!%p12196_p12)
}
 0x27c   : > { %s14526_s7 = sld [smem:[#allocation144_spill]]  ;;  %s12757_s28 = smov [#allocation59]  }
 0x27d   : > { %s2078_s0 = sshll.u32 %s12757_s28, 4  ;;  %s12758_s6 = smov [#allocation62]   ;;  %s2079_s0 = int_to_ptr.vmem [resolvable:$true] %s2078_s0 }
 0x27e   : > { %s2100_s1 = sshll.u32 %s12758_s6, 4  ;;  %s12210_s4 = scalar_lea.vmem %s2079_s0, 16  ;;  %s2101_s1 = int_to_ptr.vmem [resolvable:$true] %s2100_s1 }
 0x27f   : > { %p12211_p3 = scmp.ne.s32.totalorder %s2079_s0, %s12210_s4  ;;  %s12216_s5 = scalar_lea.vmem %s2079_s0, 32 }
 0x280   : > { %p12217_p11 = scmp.lt.s32.totalorder %s2079_s0, %s2079_s0  ;;  %p12218_p13 = scmp.lt.s32.totalorder %s12216_s5, %s12210_s4 }
 0x281   : > { %p12212_p7 = pnand %p12211_p3, %p14415_p4 }
 0x282   : > { %10732 = dma.hbm_to_vmem [thread:$0]  (%p14415_p4), %s14526_s7, 16, %s2057_s10, [#allocation55]  }
 0x283   : > { %p12213_p6 = pneg %p12212_p7  ;;  %p12219_p8 = por %p12218_p13, %p12217_p11 }
 0x285   : > { %p12220_p9 = pnand %p12219_p8, %p12213_p6 }
 0x287   : > { %12223 = shalt.err (!%p12220_p9)
}
 0x288   : > { %s14527_s14 = sld [smem:[#allocation146_spill]]  ;;  %s12234_s10 = scalar_lea.vmem %s2101_s1, 16 }
 0x289   : > { %p12235_p10 = scmp.ne.s32.totalorder %s2101_s1, %s12234_s10  ;;  %s12240_s29 = scalar_lea.vmem %s2101_s1, 32 }
 0x28a   : > { %p12241_p2 = scmp.lt.s32.totalorder %s2101_s1, %s2101_s1  ;;  %p12242_p12 = scmp.lt.s32.totalorder %s12240_s29, %s12234_s10 }
 0x28b   : > { %p12236_p0 = pnand %p12235_p10, %p14415_p4 }
 0x28c   : > { %p12243_p3 = por %p12242_p12, %p12241_p2 }
 0x28d   : > { %p12237_p1 = pneg %p12236_p0 }
 0x28e   : > { %10736 = dma.hbm_to_vmem [thread:$0]  (%p14415_p4), %s14527_s14, 16, %s2079_s0, [#allocation58]  }
 0x28f   : > { %p12244_p7 = pnand %p12243_p3, %p12237_p1 }
 0x291   : > { %12247 = shalt.err (!%p12244_p7)
}
 0x292   : > { %s14528_s7 = sld [smem:[#allocation148_spill]]  ;;  %s12759_s28 = smov [#allocation65]  }
 0x293   : > { %s2122_s6 = sshll.u32 %s12759_s28, 4  ;;  %s12760_s0 = smov [#allocation68]   ;;  %s2123_s6 = int_to_ptr.vmem [resolvable:$true] %s2122_s6 }
 0x294   : > { %s2146_s4 = sshll.u32 %s12760_s0, 4  ;;  %s12258_s5 = scalar_lea.vmem %s2123_s6, 16  ;;  %s2147_s4 = int_to_ptr.vmem [resolvable:$true] %s2146_s4 }
 0x295   : > { %p12259_p6 = scmp.ne.s32.totalorder %s2123_s6, %s12258_s5  ;;  %s12264_s14 = scalar_lea.vmem %s2123_s6, 32 }
 0x296   : > { %p12265_p8 = scmp.lt.s32.totalorder %s2123_s6, %s2123_s6  ;;  %p12266_p9 = scmp.lt.s32.totalorder %s12264_s14, %s12258_s5 }
 0x297   : > { %p12260_p11 = pnand %p12259_p6, %p14415_p4 }
 0x298   : > { %10740 = dma.hbm_to_vmem [thread:$0]  (%p14415_p4), %s14528_s7, 16, %s2101_s1, [#allocation61]  }
 0x299   : > { %p12261_p13 = pneg %p12260_p11  ;;  %p12267_p10 = por %p12266_p9, %p12265_p8 }
 0x29b   : > { %p12268_p0 = pnand %p12267_p10, %p12261_p13 }
 0x29d   : > { %12271 = shalt.err (!%p12268_p0)
}
 0x29e   : > { %s14529_s10 = sld [smem:[#allocation150_spill]]  ;;  %s12282_s1 = scalar_lea.vmem %s2147_s4, 512 }
 0x29f   : > { %p12283_p1 = scmp.ne.s32.totalorder %s2147_s4, %s12282_s1  ;;  %p12289_p3 = scmp.lt.s32.totalorder %s2147_s4, %s2147_s4 }
 0x2a0   : > { %p12290_p7 = scmp.lt.s32.totalorder %s12282_s1, %s12282_s1 }
 0x2a1   : > { %p12284_p2 = pnand %p12283_p1, %p14415_p4 }
 0x2a2   : > { %p12291_p6 = por %p12290_p7, %p12289_p3 }
 0x2a3   : > { %p12285_p12 = pneg %p12284_p2 }
 0x2a4   : > { %10744 = dma.hbm_to_vmem [thread:$0]  (%p14415_p4), %s14529_s10, 16, %s2123_s6, [#allocation64]  }
 0x2a5   : > { %p12292_p11 = pnand %p12291_p6, %p12285_p12 }
 0x2a7   : > { %12295 = shalt.err (!%p12292_p11)
}
 0x2a8   : > { %s14530_s29 = sld [smem:[#allocation153_spill]]  ;;  %s12761_s7 = smov [#allocation71]  }
 0x2a9   : > { %s2177_s28 = sshll.u32 %s12761_s7, 4  ;;  %s12762_s6 = smov [#allocation74]   ;;  %s2178_s28 = int_to_ptr.vmem [resolvable:$true] %s2177_s28 }
 0x2aa   : > { %s2202_s0 = sshll.u32 %s12762_s6, 4  ;;  %s12306_s5 = scalar_lea.vmem %s2178_s28, 16  ;;  %s2203_s0 = int_to_ptr.vmem [resolvable:$true] %s2202_s0 }
 0x2ab   : > { %p12307_p13 = scmp.ne.s32.totalorder %s2178_s28, %s12306_s5  ;;  %s12312_s14 = scalar_lea.vmem %s2178_s28, 32 }
 0x2ac   : > { %p12313_p10 = scmp.lt.s32.totalorder %s2178_s28, %s2178_s28  ;;  %p12314_p0 = scmp.lt.s32.totalorder %s12312_s14, %s12306_s5 }
 0x2ad   : > { %p12308_p8 = pnand %p12307_p13, %p14415_p4 }
 0x2ae   : > { %10748 = dma.hbm_to_vmem [thread:$0]  (%p14415_p4), %s14530_s29, 512, %s2147_s4, [#allocation67], %s14498_s3, %s14498_s3, %s14500_s2  }
 0x2af   : > { %p12309_p9 = pneg %p12308_p8  ;;  %p12315_p1 = por %p12314_p0, %p12313_p10 }
 0x2b1   : > { %p12316_p2 = pnand %p12315_p1, %p12309_p9 }
 0x2b3   : > { %12319 = shalt.err (!%p12316_p2)
}
 0x2b4   : > { %s14531_s10 = sld [smem:[#allocation157_spill]]  ;;  %s12330_s3 = scalar_lea.vmem %s2203_s0, 128 }
 0x2b5   : > { %p12331_p12 = scmp.ne.s32.totalorder %s2203_s0, %s12330_s3  ;;  %p12337_p6 = scmp.lt.s32.totalorder %s2203_s0, %s2203_s0 }
 0x2b6   : > { %p12338_p11 = scmp.lt.s32.totalorder %s12330_s3, %s12330_s3 }
 0x2b7   : > { %p12332_p3 = pnand %p12331_p12, %p14415_p4 }
 0x2b8   : > { %p12339_p13 = por %p12338_p11, %p12337_p6 }
 0x2b9   : > { %p12333_p7 = pneg %p12332_p3 }
 0x2ba   : > { %10752 = dma.hbm_to_vmem [thread:$0]  (%p14415_p4), %s14531_s10, 16, %s2178_s28, [#allocation70]  }
 0x2bb   : > { %p12340_p8 = pnand %p12339_p13, %p12333_p7 }
 0x2bd   : > { %12343 = shalt.err (!%p12340_p8)
}
 0x2be   : > { %s14532_s2 = sld [smem:[#allocation160_spill]]  ;;  %s12763_s4 = smov [#allocation77]  }
 0x2bf   : > { %s2227_s1 = sshll.u32 %s12763_s4, 4  ;;  %s12764_s29 = smov [#allocation78]   ;;  %s2228_s1 = int_to_ptr.vmem [resolvable:$true] %s2227_s1 }
 0x2c0   : > { %s2247_s7 = sshll.u32 %s12764_s29, 4  ;;  %s12354_s28 = scalar_lea.vmem %s2228_s1, 16  ;;  %s2248_s7 = int_to_ptr.vmem [resolvable:$true] %s2247_s7 }
 0x2c1   : > { %p12355_p9 = scmp.ne.s32.totalorder %s2228_s1, %s12354_s28  ;;  %s12360_s6 = scalar_lea.vmem %s2228_s1, 32 }
 0x2c2   : > { %p12361_p1 = scmp.lt.s32.totalorder %s2228_s1, %s2228_s1  ;;  %p12362_p2 = scmp.lt.s32.totalorder %s12360_s6, %s12354_s28 }
 0x2c3   : > { %p12356_p10 = pnand %p12355_p9, %p14415_p4 }
 0x2c4   : > { %10756 = dma.hbm_to_vmem [thread:$0]  (%p14415_p4), %s14532_s2, 128, %s2203_s0, [#allocation73]  }
 0x2c5   : > { %p12357_p0 = pneg %p12356_p10  ;;  %p12363_p12 = por %p12362_p2, %p12361_p1 }
 0x2c7   : > { %p12364_p3 = pnand %p12363_p12, %p12357_p0 }
 0x2c9   : > { %12367 = shalt.err (!%p12364_p3)
}
 0x2ca   : > { %s14533_s5 = sld [smem:[#allocation163_spill]]  ;;  %s12378_s0 = scalar_lea.vmem %s2248_s7, 16 }
 0x2cb   : > { %p12379_p7 = scmp.ne.s32.totalorder %s2248_s7, %s12378_s0  ;;  %s12384_s14 = scalar_lea.vmem %s2248_s7, 32 }
 0x2cc   : > { %p12385_p13 = scmp.lt.s32.totalorder %s2248_s7, %s2248_s7  ;;  %p12386_p8 = scmp.lt.s32.totalorder %s12384_s14, %s12378_s0 }
 0x2cd   : > { %p12380_p6 = pnand %p12379_p7, %p14415_p4 }
 0x2ce   : > { %p12387_p9 = por %p12386_p8, %p12385_p13 }
 0x2cf   : > { %p12381_p11 = pneg %p12380_p6 }
 0x2d0   : > { %10760 = dma.hbm_to_vmem [thread:$0]  (%p14415_p4), %s14533_s5, 16, %s2228_s1, [#allocation76]  }
 0x2d1   : > { %p12388_p10 = pnand %p12387_p9, %p12381_p11 }
 0x2d3   : > { %12391 = shalt.err (!%p12388_p10)
}
 0x2d4   : > { %s14534_s10 = sld [smem:[#allocation167_spill]] }
 0x2da   : > { %10762 = dma.hbm_to_vmem [thread:$0]  (%p14415_p4), %s14534_s10, 16, %s2248_s7, [#allocation79]  }
 0x2db PF: > { %s14535_s3 = sld [smem:[#allocation112_spill]]  ;;  %p10929_p1 = scmp.lt.s32.totalorder %s12646_s23, 2 }
 0x2dc   : > { %s2258_s2 = sand.u32 1, %s12642_s22   ;;  %s9642_s4 = sshll.u32 %s12646_s23, 7 }
 0x2dd   : > { %s13465_s1 = sshll.u32 %s2258_s2, 3  ;;  %p13475_p2 = pnand %p10929_p1, %p13155_p5 }
 0x2de   : > { %s2262_s7 = scalar_lea.vmem [#allocation3], %s13465_s1  ;;  %s2259_s0 = scalar_lea.sflag [#allocation4], %s2258_s2 }
 0x2df   : > { %s2269_s28 = sshll.u32 %s2262_s7, 4  ;;  %p12394_p3 = pneg %p13475_p2  ;;  %s2270_s28 = int_to_ptr.vmem [resolvable:$true] %s2269_s28 }
 0x2e1   : > { %s13470_s29 = scalar_lea.hbm %s14535_s3, %s9642_s4  ;;  %s12397_s10 = scalar_lea.hbm %s14535_s3, 256 }
 0x2e2   : > { %s12392_s14 = scalar_lea.hbm %s13470_s29, 128  ;;  %p12398_p11 = scmp.lt.s32.totalorder %s13470_s29, %s14535_s3 }
 0x2e3   : > { %p12393_p12 = scmp.ne.s32.totalorder %s13470_s29, %s12392_s14  ;;  %p12399_p13 = scmp.lt.s32.totalorder %s12397_s10, %s12392_s14 }
 0x2e5   : > { %p12395_p7 = pnand %p12394_p3, %p12393_p12  ;;  %p12400_p5 = por %p12399_p13, %p12398_p11 }
 0x2e7   : > { %p12396_p6 = pneg %p12395_p7 }
 0x2e9   : > { %p12401_p8 = pnand %p12400_p5, %p12396_p6 }
 0x2eb   : > { %12404 = shalt.err (!%p12401_p8)
}
 0x2ec   : > { %s12405_s12 = scalar_lea.vmem %s2270_s28, 128  ;;  %s12765_s2 = smov [#allocation3]  }
 0x2ed   : > { %p12406_p9 = scmp.ne.s32.totalorder %s2270_s28, %s12405_s12  ;;  %s12410_s7 = sshll.u32 %s12765_s2, 4  ;;  %s12411_s7 = int_to_ptr.vmem [resolvable:$false] %s12410_s7 }
 0x2ee   : > { %s12412_s5 = scalar_lea.vmem %s12411_s7, 256  ;;  %p12413_p0 = scmp.lt.s32.totalorder %s2270_s28, %s12411_s7 }
 0x2ef   : > { %p12408_p10 = pnand %p12406_p9, %p12394_p3  ;;  %p12414_p12 = scmp.lt.s32.totalorder %s12412_s5, %s12405_s12 }
 0x2f1   : > { %p12409_p1 = pneg %p12408_p10  ;;  %p12415_p7 = por %p12414_p12, %p12413_p0 }
 0x2f3   : > { %p12416_p4 = pnand %p12415_p7, %p12409_p1 }
 0x2f5   : > { %12419 = shalt.err (!%p12416_p4)
}
 0x2f6   : > { %s14537_s14 = sld [smem:[#allocation113_spill]]  ;;  %s2280_s5 = scalar_lea.vmem [#allocation6], %s13465_s1 }
 0x2f7   : > { %10870 = dma.hbm_to_vmem [thread:$0]  (!%p13475_p2), %s13470_s29, 128, %s2270_s28, %s2259_s0  }
 0x2f8   : > { %s2287_s12 = sshll.u32 %s2280_s5, 4  ;;  %s14538_s2 = sand.u32 1, %s12646_s23   ;;  %s2288_s12 = int_to_ptr.vmem [resolvable:$true] %s2287_s12 }
 0x2f9   : > { %s2277_s7 = scalar_lea.sflag [#allocation7], %s14538_s2 }
 0x2fc   : > { %s13499_s10 = scalar_lea.hbm %s14537_s14, %s9642_s4  ;;  %s12425_s11 = scalar_lea.hbm %s14537_s14, 256 }
 0x2fd   : > { %s12420_s3 = scalar_lea.hbm %s13499_s10, 128  ;;  %p12426_p11 = scmp.lt.s32.totalorder %s13499_s10, %s14537_s14 }
 0x2fe   : > { %p12421_p4 = scmp.ne.s32.totalorder %s13499_s10, %s12420_s3  ;;  %p12427_p13 = scmp.lt.s32.totalorder %s12425_s11, %s12420_s3 }
 0x300   : > { %p12423_p0 = pnand %p12421_p4, %p12394_p3  ;;  %p12428_p5 = por %p12427_p13, %p12426_p11 }
 0x302   : > { %p12424_p6 = pneg %p12423_p0 }
 0x304   : > { %p12429_p8 = pnand %p12428_p5, %p12424_p6 }
 0x306   : > { %12432 = shalt.err (!%p12429_p8)
}
 0x307   : > { %s12433_s4 = scalar_lea.vmem %s2288_s12, 128  ;;  %s12766_s1 = smov [#allocation6]  }
 0x308   : > { %p12434_p9 = scmp.ne.s32.totalorder %s2288_s12, %s12433_s4  ;;  %s12438_s29 = sshll.u32 %s12766_s1, 4  ;;  %s12439_s29 = int_to_ptr.vmem [resolvable:$false] %s12438_s29 }
 0x309   : > { %s12440_s28 = scalar_lea.vmem %s12439_s29, 256  ;;  %p12441_p12 = scmp.lt.s32.totalorder %s2288_s12, %s12439_s29 }
 0x30a   : > { %p12436_p10 = pnand %p12434_p9, %p12394_p3  ;;  %p12442_p7 = scmp.lt.s32.totalorder %s12440_s28, %s12433_s4 }
 0x30c   : > { %p12437_p1 = pneg %p12436_p10  ;;  %p12443_p4 = por %p12442_p7, %p12441_p12 }
 0x30e   : > { %p12444_p0 = pnand %p12443_p4, %p12437_p1 }
 0x310   : > { %12447 = shalt.err (!%p12444_p0)
}
 0x311   : > { %10873 = dma.hbm_to_vmem [thread:$0]  (!%p13475_p2), %s13499_s10, 128, %s2288_s12, %s2277_s7  }
 0x312   : > { %p14539_p6 = scmp.ne.s32.totalorder %s14491_s21, 0 }
 0x313   : > { %s13521_s11 = sand.u32 (!%p14539_p6), 1, %s12638_s20   ;;  %p14540_p3 = scmp.ne.s32.totalorder (!%p14539_p6), %s14487_s15, 0 }
 0x314   : > { %2303 = sbr.rel (%p14539_p6) target bundleno = 11324 (0x2c3c), region = 276  ;;  %s13524_s3 = sshll.u32 (!%p14539_p6), %s13521_s11, 3 }
 0x315   : > { %s2306_s0 = scalar_lea.sflag (!%p14539_p6), [#allocation4], %s13521_s11  ;;  %s2309_s5 = scalar_lea.vmem (!%p14539_p6), [#allocation3], %s13524_s3 }
 0x319   : > { %12517 = dma.done.wait (%p14540_p3), %s2306_s0, 128  }
 0x31a   : > { %12519 = vsyncadd (%p14540_p3), %s2306_s0, 4294967168  ;;  %s2314_s21 = sand.u32 1, %s13137_s27   ;;  %s2318_s10 = scalar_lea.vmem [#allocation6], %s13524_s3 }
 0x31b   : > { %s2315_s6 = scalar_lea.sflag [#allocation7], %s2314_s21 }
 0x31c   : > { %12521 = dma.done.wait (%p14540_p3), %s2315_s6, 128  }
 0x31d   : > { %12523 = vsyncadd (%p14540_p3), %s2315_s6, 4294967168  ;;  %p14541_p2 = scmp.eq.s32.totalorder %s13137_s27, 0 }
 0x31f   : > { %12525 = dma.done.wait (%p14541_p2), [#allocation7], 16   ;;  %p14542_p11 = pmov %p14541_p2 }
 0x320   : > { %p14543_p13 = pmov %p14541_p2 }
 0x321   : > { %12527 = vsyncadd (%p14542_p11), [#allocation7], 4294967280 }
 0x322   : > { %12529 = dma.done.wait (%p14543_p13), [#allocation10], 32   ;;  %p14544_p5 = pmov %p14541_p2 }
 0x323   : > { %p14545_p8 = pmov %p14541_p2 }
 0x324   : > { %12531 = vsyncadd (%p14544_p5), [#allocation10], 4294967264 }
 0x325   : > { %12533 = dma.done.wait (%p14545_p8), [#allocation13], 272   ;;  %p14546_p9 = pmov %p14541_p2 }
 0x326   : > { %p14547_p10 = pmov %p14541_p2 }
 0x327   : > { %12535 = vsyncadd (%p14546_p9), [#allocation13], 4294967024 }
 0x328   : > { %12537 = dma.done.wait (%p14547_p10), [#allocation16], 1024   ;;  %p14548_p1 = pmov %p14541_p2 }
 0x32a   : > { %12539 = vsyncadd (%p14548_p1), [#allocation16], 4294966272  ;;  %p14549_p12 = pmov %p14548_p1 }
 0x32b   : > { %p14550_p7 = pmov %p14548_p1 }
 0x32c   : > { %12541 = dma.done.wait (%p14549_p12), [#allocation19], 272  }
 0x32d   : > { %12543 = vsyncadd (%p14550_p7), [#allocation19], 4294967024  ;;  %p14551_p4 = pmov %p14548_p1 }
 0x32e   : > { %p14552_p0 = pmov %p14548_p1 }
 0x32f   : > { %12545 = dma.done.wait (%p14551_p4), [#allocation22], 528  }
 0x330   : > { %12547 = vsyncadd (%p14552_p0), [#allocation22], 4294966768  ;;  %p14553_p6 = pmov %p14552_p0 }
 0x331   : > { %p14554_p3 = pmov %p14552_p0 }
 0x332   : > { %12549 = dma.done.wait (%p14553_p6), [#allocation25], 32  }
 0x333   : > { %12551 = vsyncadd (%p14554_p3), [#allocation25], 4294967264  ;;  %p14555_p2 = pmov %p14552_p0 }
 0x334   : > { %p14556_p11 = pmov %p14552_p0 }
 0x335   : > { %12553 = dma.done.wait (%p14555_p2), [#allocation28], 32  }
 0x336   : > { %12555 = vsyncadd (%p14556_p11), [#allocation28], 4294967264  ;;  %p14557_p13 = pmov %p14552_p0 }
 0x337   : > { %p14558_p5 = pmov %p14552_p0 }
 0x338   : > { %12557 = dma.done.wait (%p14557_p13), [#allocation31], 32  }
 0x339   : > { %12559 = vsyncadd (%p14558_p5), [#allocation31], 4294967264  ;;  %p14559_p8 = pmov %p14552_p0 }
 0x33a   : > { %p14560_p9 = pmov %p14552_p0 }
 0x33b   : > { %12561 = dma.done.wait (%p14559_p8), [#allocation34], 32  }
 0x33c   : > { %12563 = vsyncadd (%p14560_p9), [#allocation34], 4294967264  ;;  %p14561_p10 = pmov %p14552_p0 }
 0x33d   : > { %p14562_p1 = pmov %p14552_p0 }
 0x33e   : > { %12565 = dma.done.wait (%p14561_p10), [#allocation37], 1024  }
 0x33f   : > { %12567 = vsyncadd (%p14562_p1), [#allocation37], 4294966272  ;;  %p14563_p12 = pmov %p14552_p0 }
 0x340   : > { %p14564_p7 = pmov %p14552_p0 }
 0x341   : > { %12569 = dma.done.wait (%p14563_p12), [#allocation40], 32  }
 0x342   : > { %12571 = vsyncadd (%p14564_p7), [#allocation40], 4294967264  ;;  %p14565_p4 = pmov %p14552_p0 }
 0x344   : > { %12573 = dma.done.wait (%p14565_p4), [#allocation43], 32  }
 0x345   : > { %12575 = vsyncadd (%p14552_p0), [#allocation43], 4294967264  ;;  %p14566_p6 = pmov %p14552_p0 }
 0x346   : > { %p14567_p3 = pmov %p14552_p0 }
 0x347   : > { %12577 = dma.done.wait (%p14566_p6), [#allocation46], 768  }
 0x348   : > { %12579 = vsyncadd (%p14567_p3), [#allocation46], 4294966528  ;;  %p14568_p2 = pmov %p14552_p0 }
 0x349   : > { %p14569_p11 = pmov %p14552_p0 }
 0x34a   : > { %12581 = dma.done.wait (%p14568_p2), [#allocation49], 768  }
 0x34b   : > { %12583 = vsyncadd (%p14569_p11), [#allocation49], 4294966528  ;;  %p14570_p13 = pmov %p14552_p0 }
 0x34c   : > { %p14571_p5 = pmov %p14552_p0 }
 0x34d   : > { %12585 = dma.done.wait (%p14570_p13), [#allocation52], 32  }
 0x34e   : > { %12587 = vsyncadd (%p14571_p5), [#allocation52], 4294967264  ;;  %p14572_p8 = pmov %p14552_p0 }
 0x34f   : > { %p14573_p9 = pmov %p14552_p0 }
 0x350   : > { %12589 = dma.done.wait (%p14572_p8), [#allocation55], 528  }
 0x351   : > { %12591 = vsyncadd (%p14573_p9), [#allocation55], 4294966768  ;;  %p14574_p10 = pmov %p14552_p0 }
 0x352   : > { %p14575_p1 = pmov %p14552_p0 }
 0x353   : > { %12593 = dma.done.wait (%p14574_p10), [#allocation58], 32  }
 0x354   : > { %12595 = vsyncadd (%p14575_p1), [#allocation58], 4294967264  ;;  %p14576_p12 = pmov %p14552_p0 }
 0x355   : > { %p14577_p7 = pmov %p14552_p0 }
 0x356   : > { %12597 = dma.done.wait (%p14576_p12), [#allocation61], 32  }
 0x357   : > { %12599 = vsyncadd (%p14577_p7), [#allocation61], 4294967264  ;;  %p14578_p4 = pmov %p14552_p0 }
 0x359   : > { %12601 = dma.done.wait (%p14578_p4), [#allocation64], 32  }
 0x35a   : > { %12603 = vsyncadd (%p14552_p0), [#allocation64], 4294967264  ;;  %p14579_p6 = pmov %p14552_p0 }
 0x35b   : > { %p14580_p3 = pmov %p14552_p0 }
 0x35c   : > { %12605 = dma.done.wait (%p14579_p6), [#allocation67], 528  }
 0x35d   : > { %12607 = vsyncadd (%p14580_p3), [#allocation67], 4294966768  ;;  %p14581_p2 = pmov %p14552_p0 }
 0x35e   : > { %p14582_p11 = pmov %p14552_p0 }
 0x35f   : > { %12609 = dma.done.wait (%p14581_p2), [#allocation70], 32  }
 0x360   : > { %12611 = vsyncadd (%p14582_p11), [#allocation70], 4294967264  ;;  %p14583_p13 = pmov %p14552_p0 }
 0x361   : > { %p14584_p5 = pmov %p14552_p0 }
 0x362   : > { %12613 = dma.done.wait (%p14583_p13), [#allocation73], 144  }
 0x363   : > { %12615 = vsyncadd (%p14584_p5), [#allocation73], 4294967152  ;;  %p14585_p8 = pmov %p14552_p0 }
 0x364   : > { %p14586_p9 = pmov %p14552_p0 }
 0x365   : > { %12617 = dma.done.wait (%p14585_p8), [#allocation76], 32  }
 0x366   : > { %12619 = vsyncadd (%p14586_p9), [#allocation76], 4294967264  ;;  %p14587_p10 = pmov %p14552_p0 }
 0x367   : > { %p14588_p1 = pmov %p14552_p0 }
 0x368   : > { %12621 = dma.done.wait (%p14587_p10), [#allocation79], 16  }
 0x369   : > { %12623 = vsyncadd (%p14588_p1), [#allocation79], 4294967280  ;;  %v12767_v1 = vmov 0.0   ;;  %vm12768_vm0 = vmmov 0   ;;  %vm2708_vm1 = vcmask 64512   ;;  %v2700_v2 = vld [vmem:[#allocation74] sm:$0xff]  ;;  %v2793_v12 = vlaneseq }
 0x36a   : > { %10121 = vmatprep.subr.mxu0 %v12767_v1  ;;  %10123 = vmatprep.mubr.msk.f32.mxu0 %vm12768_vm0, %v12767_v1  ;;  %v2697_v3 = vld [vmem:[%s2309_s5] sm:$0xff]  ;;  %s14589_s15 = sld [smem:[#allocation162_spill]]  ;;  %s12769_s12 = smov 96   ;;  %vm2960_vm4 = vcmask 261120  }
 0x36b   : > { %10126 = vmatprep.subr.mxu1 %v12767_v1  ;;  %10128 = vmatprep.mubr.msk.f32.mxu1 %vm12768_vm0, %v12767_v1  ;;  %v9702_v4 = vld [vmem:[#allocation75] ss:$0 sm:$0xff]  ;;  %v13651_v13 = vshrl.u32 %v2793_v12, 7  ;;  %v13653_v14 = vand.u32 127, %v2793_v12  ;;  %s14590_s2 = sld [smem:[#allocation164_spill]]  ;;  %s12770_s29 = smov 64  }
 0x36c   : > { %10122 = vmatpush3.msra.mxu0 %v2700_v2  ;;  %v9722_v43 = vld [vmem:[#allocation77] ss:$0 sm:$0xff]  ;;  %s14591_s7 = sld [smem:[#allocation166_spill]]  ;;  %p2684_p12 = scmp.lt.s32.totalorder %s13137_s27, 1 }
 0x36d   : > { %10124 = vmatmul.mubr.msk.f32.vlgmr.msra.gmra.mxu0 %vm2708_vm1, %v2697_v3  ;;  %10131 = vmatprep.subr.mxu0 %v12767_v1  ;;  %v9705_v15 = vadd.s32 4294967294, %v13651_v13  ;;  %v9708_v16 = vadd.s32 4294967295, %v13651_v13  ;;  %v9724_v53 = vadd.s32 4294967292, %v13651_v13  ;;  %s14592_s4 = sld [smem:[#allocation165_spill]]  ;;  %vm3963_vm6 = vcmp.ge.s32.totalorder %v13653_v14, 8  ;;  %p14603_p4 = scmp.ne.s32.totalorder %s14488_s16, 0 }
 0x36e   : > { %10133 = vmatprep.mubr.msk.f32.mxu0 %vm12768_vm0, %v12767_v1  ;;  %s14593_s1 = sld [smem:[#allocation115_spill]]  ;;  %vm3964_vm7 = vcmp.lt.s32.totalorder %v13653_v14, 16  ;;  %vm3789_vm8 = vcmp.lt.s32.totalorder %v13653_v14, 8  ;;  %vm4130_vm10 = vcmp.ge.s32.totalorder %v13653_v14, 16  ;;  %vm4131_vm11 = vcmp.lt.s32.totalorder %v13653_v14, 24 }
 0x36f   : > { %vm2798_vm2 = vcmp.eq.s32.totalorder %v13653_v14, %v9705_v15  ;;  %vm2879_vm3 = vcmp.eq.s32.totalorder %v13653_v14, %v9708_v16  ;;  %vm3206_vm5 = vcmp.eq.s32.totalorder %v13653_v14, %v9724_v53  ;;  %vm3965_vm9 = vmand %vm3963_vm6, %vm3964_vm7  ;;  %vm4297_vm13 = vcmp.ge.s32.totalorder %v13653_v14, 24  ;;  %s14594_s28 = sld [smem:[#allocation114_spill]] }
 0x370   : > { %v13660_v19 = vsel %vm2798_vm2, 1.0, %v12767_v1  ;;  %v13663_v20 = vsel %vm2879_vm3, 1.0, %v12767_v1  ;;  %v9714_v21 = vld [vmem:[%s14589_s15 + $0x38] sm:$0xff]  ;;  %v9713_v23 = vld [vmem:[%s14589_s15 + $0x30] sm:$0xff]  ;;  %v9712_v25 = vld [vmem:[%s14589_s15 + $0x28] sm:$0xff]  ;;  %v13716_v56 = vsel %vm3206_vm5, 1.0, %v12767_v1  ;;  %vm3702_vm2 = vcmp.gt.s32.totalorder %v13653_v14, %v13651_v13 }
 0x371   : > { %v2877_v22 = vld [vmem:[%s14589_s15 + $0x18] sm:$0xff]  ;;  %v2876_v24 = vld [vmem:[%s14589_s15 + $0x10] sm:$0xff]  ;;  %v2875_v26 = vld [vmem:[%s14589_s15 + $0x8] sm:$0xff]  ;;  %v13795_v53 = vsel %vm3965_vm9, 1.0, %v12767_v1  ;;  %vm4298_vm14 = vcmp.lt.s32.totalorder %v13653_v14, 32  ;;  %vm4672_vm3 = vcmask 130048  }
 0x372   : > { %v9711_v27 = vld [vmem:[%s14589_s15 + $0x20] sm:$0xff]  ;;  %v9720_v29 = vld [vmem:[%s14589_s15 + $0x58] sm:$0xff]  ;;  %v9719_v32 = vld [vmem:[%s14589_s15 + $0x50] sm:$0xff]  ;;  %s13929_s0 = scalar_select %p2684_p12, %s13137_s27, 1  ;;  %vm5695_vm5 = vcmask 523264  }
 0x373   : > { %v2874_v28 = vld [vmem:[%s14589_s15] sm:$0xff]  ;;  %v9718_v35 = vld [vmem:[%s14589_s15 + $0x48] sm:$0xff]  ;;  %v9731_v50 = vld [vmem:[%s14590_s2 + $0x38] sm:$0xff]  ;;  %s14595_s9 = sld [smem:[#allocation170_spill]] }
 0x374   : > { %v9717_v36 = vld [vmem:[%s14589_s15 + $0x40] sm:$0xff]  ;;  %v9730_v52 = vld [vmem:[%s14590_s2 + $0x30] sm:$0xff]  ;;  %v3285_v57 = vld [vmem:[%s14590_s2 + $0x18] sm:$0xff]  ;;  %s14417_s5 = sshll.u32 %s13929_s0, 3  ;;  %s9883_s6 = sshll.u32 %s13929_s0, 4 }
 0x375   : > { %v3284_v58 = vld [vmem:[%s14590_s2 + $0x10] sm:$0xff]  ;;  %v3283_v59 = vld [vmem:[%s14590_s2 + $0x8] sm:$0xff]  ;;  %v3282_v60 = vld [vmem:[%s14590_s2] sm:$0xff]  ;;  %s2687_s21 = scalar_lea.vmem %s14594_s28, %s14417_s5  ;;  %s14599_s28 = sld [smem:[#allocation156_spill]] }
 0x376   : > { %v9729_v61 = vld [vmem:[%s14590_s2 + $0x28] sm:$0xff]  ;;  %v9728_v62 = vld [vmem:[%s14590_s2 + $0x20] sm:$0xff]  ;;  %v9737_v2 = vld [vmem:[%s14590_s2 + $0x58] sm:$0xff]  ;;  %s2663_s5 = scalar_lea.vmem [#allocation80], %s13524_s3 }
 0x377   : > { %vm4132_vm12 = vmand %vm4130_vm10, %vm4131_vm11 }
 0x378   : > { %vm4299_vm15 = vmand %vm4297_vm13, %vm4298_vm14 }
 0x42d   : > { %v2778_v5 = vpop.f32.mrf.mxu0 }
 0x42e   : > { %v2779_v6 = vadd.f32 %v9702_v4, %v2778_v5  ;;  %v9736_v4 = vld [vmem:[%s14590_s2 + $0x50] sm:$0xff] }
 0x42f   : > { %v10125_v7 = vpop.f32.mrf.mxu0 }
 0x430   : > { %v9704_v8 = vmul.f32 -1.442695, %v2779_v6  ;;  %v9734_v7 = vld [vmem:[%s14590_s2 + $0x40] sm:$0xff] }
 0x432   : > { %11132 = vpow2.f32 %v9704_v8  ;;  %v3608_v8 = vld [vmem:[%s14591_s7 + $0x18] sm:$0xff] }
 0x43f   : > { %v11133_v9 = vpop.eup %11132 }
 0x440   : > { %v2785_v10 = vadd.f32 1.0, %v11133_v9  ;;  %v3607_v9 = vld [vmem:[%s14591_s7 + $0x10] sm:$0xff] }
 0x442   : > { %11134 = vrcp.f32 %v2785_v10  ;;  %v3606_v10 = vld [vmem:[%s14591_s7 + $0x8] sm:$0xff] }
 0x44f   : > { %v11135_v11 = vpop.eup %11134 }
 0x450   : > { %2789 = vrot.lane.b32.xlu0 %v11135_v11, %s12769_s12 }
 0x4c2   : > { %v2790_v17 = vpop.permute.xlu0 %2789 }
 0x4c3   : > { %v2792_v18 = vmul.f32 %v2790_v17, %v2779_v6  ;;  %v9735_v6 = vld [vmem:[%s14590_s2 + $0x48] sm:$0xff]  ;;  %s8862_s2 = sshll.u32 %s2663_s5, 4  ;;  %s8863_s2 = int_to_ptr.vmem [resolvable:$true] %s8862_s2 }
 0x4c5   : > { %10127 = vmatpush3.msra.mxu1 %v2792_v18  ;;  %10132 = vmatpush3.msra.mxu0 %v2792_v18 }
 0x4c6   : > { %10129 = vmatmul.mubr.msk.f32.vlgmr.msra.gmra.mxu1 %vm2708_vm1, %v13660_v19  ;;  %10134 = vmatmul.mubr.msk.f32.vlgmr.msra.gmra.mxu0 %vm2708_vm1, %v13663_v20 }
 0x4c7   : > { %10136 = vmatprep.subr.mxu1 %v12767_v1  ;;  %10147 = vmatprep.subr.mxu0 %v12767_v1 }
 0x4c8   : > { %10137 = vmatpush3.msra.mxu1 %v9714_v21  ;;  %10148 = vmatpush3.msra.mxu0 %v2877_v22  ;;  %v9739_v21 = vld [vmem:[%s14592_s4] ss:$0 sm:$0xff]  ;;  %s14596_s4 = sld [smem:[#allocation126_spill]] }
 0x4c9   : > { %10138 = vmatprep.subr.mxu1 %v12767_v1  ;;  %10149 = vmatprep.subr.mxu0 %v12767_v1 }
 0x4ca   : > { %10139 = vmatpush3.msra.mxu1 %v9713_v23  ;;  %10150 = vmatpush3.msra.mxu0 %v2876_v24 }
 0x4cb   : > { %10140 = vmatprep.subr.mxu1 %v12767_v1  ;;  %10151 = vmatprep.subr.mxu0 %v12767_v1 }
 0x4cc   : > { %10141 = vmatpush3.msra.mxu1 %v9712_v25  ;;  %10152 = vmatpush3.msra.mxu0 %v2875_v26 }
 0x4cd   : > { %10142 = vmatprep.subr.mxu1 %v12767_v1  ;;  %10153 = vmatprep.subr.mxu0 %v12767_v1 }
 0x4ce   : > { %10143 = vmatpush3.msra.mxu1 %v9711_v27  ;;  %10144 = vmatprep.mubr.msk.f32.mxu1 %vm12768_vm0, %v12767_v1 }
 0x4cf   : > { %10155 = vmatprep.mubr.msk.f32.mxu0 %vm12768_vm0, %v12767_v1  ;;  %10158 = vmatprep.subr.mxu1 %v12767_v1 }
 0x4d0   : > { %10154 = vmatpush3.msra.mxu0 %v2874_v28  ;;  %v3605_v28 = vld [vmem:[%s14591_s7] sm:$0xff]  ;;  %s12448_s7 = scalar_lea.vmem %s8863_s2, 128 }
 0x4d1   : > { %10169 = vmatprep.subr.mxu0 %v12767_v1  ;;  %p12449_p7 = scmp.ne.s32.totalorder %s8863_s2, %s12448_s7 }
 0x4d3   : > { %p12450_p0 = pnand %p12449_p7, %p14603_p4 }
 0x4d5   : > { %p12451_p6 = pneg %p12450_p0 }
 0x586   : > { %v2870_v30 = vpop.f32.mrf.mxu1  ;;  %v2951_v31 = vpop.f32.mrf.mxu0 }
 0x587   : > { %10145 = vmatmul.mubr.msk.f32.vlgmr.msra.gmra.mxu1 %vm2960_vm4, %v2951_v31  ;;  %10156 = vmatmul.mubr.msk.f32.vlgmr.msra.gmra.mxu0 %vm2960_vm4, %v2870_v30 }
 0x588   : > { %10159 = vmatpush3.msra.mxu1 %v9720_v29  ;;  %v10135_v33 = vpop.f32.mrf.mxu0  ;;  %v10130_v34 = vpop.f32.mrf.mxu1  ;;  %10166 = vmatprep.mubr.msk.f32.mxu1 %vm12768_vm0, %v12767_v1 }
 0x589   : > { %10160 = vmatprep.subr.mxu1 %v12767_v1  ;;  %10171 = vmatprep.mubr.msk.f32.mxu0 %vm12768_vm0, %v12767_v1  ;;  %v3706_v33 = vld [vmem:[#allocation38 + $0x10] sm:$0xff]  ;;  %v9741_v34 = vld [vmem:[#allocation78] ss:$0 sm:$0xff] }
 0x58a   : > { %10161 = vmatpush3.msra.mxu1 %v9719_v32  ;;  %v3707_v32 = vld [vmem:[#allocation38 + $0x18] sm:$0xff] }
 0x58b   : > { %10162 = vmatprep.subr.mxu1 %v12767_v1 }
 0x58c   : > { %10163 = vmatpush3.msra.mxu1 %v9718_v35 }
 0x58d   : > { %10164 = vmatprep.subr.mxu1 %v12767_v1 }
 0x58e   : > { %10165 = vmatpush3.msra.mxu1 %v9717_v36 }
 0x58f   : > { %10167 = vmatmul.mubr.msk.f32.vlgmr.msra.gmra.mxu1 %vm2960_vm4, %v2792_v18  ;;  %10179 = vmatprep.subr.mxu1 %v12767_v1 }
 0x590   : > { %10187 = vmatprep.mubr.msk.f32.mxu1 %vm12768_vm0, %v12767_v1  ;;  %10180 = vmatpush3.msra.mxu1 %v9731_v50 }
 0x591   : > { %10181 = vmatprep.subr.mxu1 %v12767_v1 }
 0x592   : > { %10182 = vmatpush3.msra.mxu1 %v9730_v52  ;;  %v13792_v52 = vsel %vm3789_vm8, 1.0, %v12767_v1 }
 0x593   : > { %10183 = vmatprep.subr.mxu1 %v12767_v1 }
 0x594   : > { %10184 = vmatpush3.msra.mxu1 %v9729_v61 }
 0x595   : > { %10185 = vmatprep.subr.mxu1 %v12767_v1 }
 0x596   : > { %10186 = vmatpush3.msra.mxu1 %v9728_v62 }
 0x597   : > { %10201 = vmatprep.subr.mxu1 %v12767_v1 }
 0x647   : > { %v3030_v37 = vpop.f32.mrf.mxu1  ;;  %v3103_v38 = vpop.f32.mrf.mxu0 }
 0x648   : > { %v3104_v41 = vadd.f32 %v3103_v38, %v3030_v37 }
 0x649   : > { %v10146_v39 = vpop.f32.mrf.mxu1  ;;  %v10157_v40 = vpop.f32.mrf.mxu0 }
 0x64f   : > { %v3181_v42 = vpop.f32.mrf.mxu1 }
 0x650   : > { %v3185_v44 = vadd.f32 %v3181_v42, %v3104_v41  ;;  %v3705_v41 = vld [vmem:[#allocation38 + $0x8] sm:$0xff]  ;;  %v3704_v42 = vld [vmem:[#allocation38] sm:$0xff] }
 0x651   : > { %v10168_v45 = vpop.f32.mrf.mxu1 }
 0x652   : > { %v3193_v46 = vadd.f32 %v9722_v43, %v3185_v44  ;;  %v3700_v44 = vld [vmem:[%s14593_s1] sm:$0xff]  ;;  %s14597_s1 = sld [smem:[#allocation152_spill]] }
 0x654   : > { %v9723_v47 = vmul.f32 -1.442695, %v3193_v46 }
 0x656   : > { %11136 = vpow2.f32 %v9723_v47 }
 0x663   : > { %v11137_v48 = vpop.eup %11136 }
 0x664   : > { %v3197_v49 = vadd.f32 1.0, %v11137_v48  ;;  %v9744_v48 = vld [vmem:[#allocation35] ss:$0 sm:$0xff] }
 0x666   : > { %11138 = vrcp.f32 %v3197_v49 }
 0x673   : > { %v11139_v51 = vpop.eup %11138 }
 0x674   : > { %3201 = vrot.lane.b32.xlu0 %v11139_v51, %s12769_s12 }
 0x6e6   : > { %v3202_v54 = vpop.permute.xlu0 %3201 }
 0x6e7   : > { %v3204_v55 = vmul.f32 %v3202_v54, %v3193_v46 }
 0x6e9   : > { %10170 = vmatpush3.msra.mxu0 %v3204_v55 }
 0x6ea   : > { %10172 = vmatmul.mubr.msk.f32.vlgmr.msra.gmra.mxu0 %vm2708_vm1, %v13716_v56  ;;  %10174 = vmatprep.subr.mxu0 %v12767_v1 }
 0x6eb   : > { %10175 = vmatpush3.msra.mxu0 %v3204_v55  ;;  %10176 = vmatprep.mubr.msk.f32.mxu0 %vm12768_vm0, %v12767_v1 }
 0x6ec   : > { %10190 = vmatprep.subr.mxu0 %v12767_v1 }
 0x6ee   : > { %10177 = vmatmul.mubr.msk.f32.vlgmr.msra.gmra.mxu0 %vm2708_vm1, %v13660_v19 }
 0x6ef   : > { %10191 = vmatpush3.msra.mxu0 %v3285_v57  ;;  %10198 = vmatprep.mubr.msk.f32.mxu0 %vm12768_vm0, %v12767_v1 }
 0x6f0   : > { %10192 = vmatprep.subr.mxu0 %v12767_v1 }
 0x6f1   : > { %10193 = vmatpush3.msra.mxu0 %v3284_v58  ;;  %v13808_v58 = vsel %vm4132_vm12, 1.0, %v12767_v1 }
 0x6f2   : > { %10194 = vmatprep.subr.mxu0 %v12767_v1 }
 0x6f3   : > { %10195 = vmatpush3.msra.mxu0 %v3283_v59 }
 0x6f4   : > { %10196 = vmatprep.subr.mxu0 %v12767_v1 }
 0x6f5   : > { %10197 = vmatpush3.msra.mxu0 %v3282_v60  ;;  %v13821_v60 = vsel %vm4299_vm15, 1.0, %v12767_v1 }
 0x6f6   : > { %10212 = vmatprep.subr.mxu0 %v12767_v1 }
 0x7aa   : > { %v3278_v63 = vpop.f32.mrf.mxu0 }
 0x7ab   : > { %10199 = vmatmul.mubr.msk.f32.vlgmr.msra.gmra.mxu0 %vm2960_vm4, %v3278_v63 }
 0x7ac   : > { %v10173_v0 = vpop.f32.mrf.mxu0  ;;  %10220 = vmatprep.mubr.msk.f32.mxu0 %vm12768_vm0, %v12767_v1  ;;  %10213 = vmatpush3.msra.mxu0 %v3608_v8 }
 0x7ad   : > { %10214 = vmatprep.subr.mxu0 %v12767_v1  ;;  %v13836_v0 = vsel %vm3702_vm2, -1e+30, %v12767_v1 }
 0x7ae   : > { %v3352_v3 = vpop.f32.mrf.mxu0  ;;  %10215 = vmatpush3.msra.mxu0 %v3607_v9 }
 0x7af   : > { %10188 = vmatmul.mubr.msk.f32.vlgmr.msra.gmra.mxu1 %vm2960_vm4, %v3352_v3  ;;  %10216 = vmatprep.subr.mxu0 %v12767_v1 }
 0x7b0   : > { %10202 = vmatpush3.msra.mxu1 %v9737_v2  ;;  %v10178_v5 = vpop.f32.mrf.mxu0  ;;  %10209 = vmatprep.mubr.msk.f32.mxu1 %vm12768_vm0, %v12767_v1 }
 0x7b1   : > { %10203 = vmatprep.subr.mxu1 %v12767_v1  ;;  %10217 = vmatpush3.msra.mxu0 %v3606_v10 }
 0x7b2   : > { %10204 = vmatpush3.msra.mxu1 %v9736_v4  ;;  %10218 = vmatprep.subr.mxu0 %v12767_v1 }
 0x7b3   : > { %10205 = vmatprep.subr.mxu1 %v12767_v1  ;;  %10219 = vmatpush3.msra.mxu0 %v3605_v28 }
 0x7b4   : > { %10206 = vmatpush3.msra.mxu1 %v9735_v6  ;;  %10234 = vmatprep.subr.mxu0 %v12767_v1 }
 0x7b5   : > { %10207 = vmatprep.subr.mxu1 %v12767_v1 }
 0x7b6   : > { %10208 = vmatpush3.msra.mxu1 %v9734_v7 }
 0x7b7   : > { %10210 = vmatmul.mubr.msk.f32.vlgmr.msra.gmra.mxu1 %vm2960_vm4, %v3204_v55  ;;  %10223 = vmatprep.subr.mxu1 %v12767_v1 }
 0x7b8   : > { %10231 = vmatprep.mubr.msk.f32.mxu1 %vm12768_vm0, %v12767_v1  ;;  %10224 = vmatpush3.msra.mxu1 %v3707_v32 }
 0x7b9   : > { %10225 = vmatprep.subr.mxu1 %v12767_v1 }
 0x7ba   : > { %10226 = vmatpush3.msra.mxu1 %v3706_v33 }
 0x7bb   : > { %10227 = vmatprep.subr.mxu1 %v12767_v1 }
 0x7bc   : > { %10228 = vmatpush3.msra.mxu1 %v3705_v41 }
 0x7bd   : > { %10229 = vmatprep.subr.mxu1 %v12767_v1 }
 0x7be   : > { %10230 = vmatpush3.msra.mxu1 %v3704_v42 }
 0x7bf   : > { %10244 = vmatprep.subr.mxu1 %v12767_v1 }
 0x86b   : > { %v3503_v11 = vpop.f32.mrf.mxu0 }
 0x86d   : > { %v10200_v12 = vpop.f32.mrf.mxu0 }
 0x86f   : > { %v3430_v15 = vpop.f32.mrf.mxu1 }
 0x870   : > { %v3504_v17 = vadd.f32 %v3503_v11, %v3430_v15 }
 0x871   : > { %v10189_v16 = vpop.f32.mrf.mxu1 }
 0x877   : > { %v3581_v18 = vpop.f32.mrf.mxu1 }
 0x878   : > { %v3585_v22 = vadd.f32 %v3581_v18, %v3504_v17 }
 0x879   : > { %v10211_v23 = vpop.f32.mrf.mxu1 }
 0x87a   : > { %v3593_v24 = vadd.f32 %v9739_v21, %v3585_v22 }
 0x87c   : > { %v9740_v25 = vmul.f32 -1.442695, %v3593_v24 }
 0x87e   : > { %11140 = vpow2.f32 %v9740_v25 }
 0x88b   : > { %v11141_v26 = vpop.eup %11140 }
 0x88c   : > { %v3597_v27 = vadd.f32 1.0, %v11141_v26 }
 0x88e   : > { %11142 = vrcp.f32 %v3597_v27 }
 0x89b   : > { %v11143_v29 = vpop.eup %11142 }
 0x89c   : > { %3601 = vrot.lane.b32.xlu1 %v11143_v29, %s12769_s12 }
 0x90e   : > { %v3602_v30 = vpop.permute.xlu1 %3601 }
 0x90f   : > { %v3604_v31 = vmul.f32 %v3602_v30, %v3593_v24 }
 0x911   : > { %10221 = vmatmul.mubr.msk.f32.vlgmr.msra.gmra.mxu0 %vm2960_vm4, %v3604_v31 }
 0x912   : > { %10236 = vmatprep.mubr.msk.f32.mxu0 %vm12768_vm0, %v12767_v1 }
 0x9d1   : > { %v3685_v35 = vpop.f32.mrf.mxu0 }
 0x9d2   : > { %v3686_v36 = vadd.f32 %v9741_v34, %v3685_v35 }
 0x9d3   : > { %v10222_v37 = vpop.f32.mrf.mxu0 }
 0x9d4   : > { %v9743_v38 = vmul.f32 -1.442695, %v3686_v36 }
 0x9d6   : > { %11144 = vpow2.f32 %v9743_v38 }
 0x9e3   : > { %v11145_v39 = vpop.eup %11144 }
 0x9e4   : > { %v3692_v40 = vadd.f32 1.0, %v11145_v39 }
 0x9e6   : > { %11146 = vrcp.f32 %v3692_v40 }
 0x9f3   : > { %v11147_v43 = vpop.eup %11146 }
 0x9f4   : > { %3696 = vrot.lane.b32.xlu1 %v11147_v43, %s12769_s12 }
 0xa66   : > { %v3697_v45 = vpop.permute.xlu1 %3696 }
 0xa67   : > { %v3699_v46 = vmul.f32 %v3697_v45, %v3686_v36 }
 0xa69   : > { %v13776_v47 = vadd.f32 %v3700_v44, %v3699_v46 }
 0xa6b   : > { %10232 = vmatmul.mubr.msk.f32.vlgmr.msra.gmra.mxu1 %vm2960_vm4, %v13776_v47 }
 0xa6c   : > { %10246 = vmatprep.mubr.msk.f32.mxu1 %vm12768_vm0, %v12767_v1 }
 0xb2b   : > { %v3784_v49 = vpop.f32.mrf.mxu1 }
 0xb2c   : > { %v13782_v50 = vadd.f32 %v9744_v48, %v3784_v49 }
 0xb2d   : > { %v10233_v51 = vpop.f32.mrf.mxu1 }
 0xb2e   : > { %3795 = vrot.lane.b32.xlu0 %v13782_v50, %s12769_s12  ;;  %v3793_v55 = vmul.f32 %v13792_v52, %v13782_v50  ;;  %v3968_v57 = vmul.f32 %v13795_v53, %v13782_v50  ;;  %v4135_v59 = vmul.f32 %v13808_v58, %v13782_v50  ;;  %v4302_v61 = vmul.f32 %v13821_v60, %v13782_v50 }
 0xba0   : > { %v3796_v54 = vpop.permute.xlu0 %3795 }
 0xba1   : > { %10235 = vmatpush3.xpose.msk.msra.mxu0 %vm2960_vm4, %v3796_v54  ;;  %10245 = vmatpush3.xpose.msk.msra.mxu1 %vm2960_vm4, %v3796_v54 }
 0xba2   : > { %10254 = vmatprep.subr.mxu1 %v12767_v1  ;;  %10239 = vmatprep.subr.mxu0 %v12767_v1 }
 0xba4   : > { %10237 = vmatmul.mubr.msk.f32.vlgmr.msra.gmra.mxu0 %vm2960_vm4, %v3793_v55  ;;  %10247 = vmatmul.mubr.msk.f32.vlgmr.msra.gmra.mxu1 %vm2960_vm4, %v3968_v57 }
 0xba5   : > { %10255 = vmatpush3.xpose.msk.msra.mxu1 %vm2960_vm4, %v3796_v54  ;;  %10256 = vmatprep.mubr.msk.f32.mxu1 %vm12768_vm0, %v12767_v1 }
 0xba6   : > { %10264 = vmatprep.subr.mxu1 %v12767_v1  ;;  %10241 = vmatprep.mubr.msk.f32.mxu0 %vm12768_vm0, %v12767_v1 }
 0xba8   : > { %10257 = vmatmul.mubr.msk.f32.vlgmr.msra.gmra.mxu1 %vm2960_vm4, %v4135_v59 }
 0xba9   : > { %10265 = vmatpush3.xpose.msk.msra.mxu1 %vm2960_vm4, %v3796_v54  ;;  %10266 = vmatprep.mubr.msk.f32.mxu1 %vm12768_vm0, %v12767_v1 }
 0xbaa   : > { %10274 = vmatprep.subr.mxu1 %v12767_v1 }
 0xbac   : > { %10267 = vmatmul.mubr.msk.f32.vlgmr.msra.gmra.mxu1 %vm2960_vm4, %v4302_v61  ;;  %v4467_v61 = vld [vmem:[#allocation36 + $0x18] sm:$0xff] }
 0xbad   : > { %10282 = vmatprep.mubr.msk.f32.mxu1 %vm12768_vm0, %v12767_v1  ;;  %10275 = vmatpush3.msra.mxu1 %v4467_v61 }
 0xbae   : > { %10276 = vmatprep.subr.mxu1 %v12767_v1 }
 0xc64   : > { %v3868_v62 = vpop.f32.mrf.mxu0  ;;  %v4038_v63 = vpop.f32.mrf.mxu1 }
 0xc65   : > { %v3872_v2 = vmul.f32 0.35355338, %v3868_v62  ;;  %v4042_v3 = vmul.f32 0.35355338, %v4038_v63  ;;  %v4466_v62 = vld [vmem:[#allocation36 + $0x10] sm:$0xff]  ;;  %v4465_v63 = vld [vmem:[#allocation36 + $0x8] sm:$0xff] }
 0xc66   : > { %v10238_v4 = vpop.f32.mrf.mxu0  ;;  %v10248_v5 = vpop.f32.mrf.mxu1  ;;  %10277 = vmatpush3.msra.mxu1 %v4466_v62 }
 0xc67   : > { %v4043_v6 = vadd.f32 %v4042_v3, %v13836_v0  ;;  %v3873_v7 = vadd.f32 %v3872_v2, %v13836_v0  ;;  %10278 = vmatprep.subr.mxu1 %v12767_v1  ;;  %v4464_v2 = vld [vmem:[#allocation36] sm:$0xff] }
 0xc68   : > { %v4205_v8 = vpop.f32.mrf.mxu1  ;;  %10279 = vmatpush3.msra.mxu1 %v4465_v63 }
 0xc69   : > { %v4209_v9 = vmul.f32 0.35355338, %v4205_v8  ;;  %v4044_v10 = vsel %vm2708_vm1, %v4043_v6, -inf  ;;  %v3874_v11 = vsel %vm2708_vm1, %v3873_v7, -inf  ;;  %10280 = vmatprep.subr.mxu1 %v12767_v1 }
 0xc6a   : > { %4045 = vmax.xlane.f32.xlu0 %v4044_v10  ;;  %v10258_v13 = vpop.f32.mrf.mxu1  ;;  %3875 = vmax.xlane.f32.xlu1 %v3874_v11 }
 0xc6b   : > { %v4210_v14 = vadd.f32 %v4209_v9, %v13836_v0  ;;  %10281 = vmatpush3.msra.mxu1 %v4464_v2  ;;  %v4747_v2 = vld [vmem:[#allocation18 + $0x8] sm:$0xff] }
 0xc6c   : > { %v4372_v12 = vpop.f32.mrf.mxu1  ;;  %10296 = vmatprep.subr.mxu1 %v12767_v1 }
 0xc6d   : > { %v4376_v15 = vmul.f32 0.35355338, %v4372_v12  ;;  %v4211_v16 = vsel %vm2708_vm1, %v4210_v14, -inf }
 0xc6e   : > { %4212 = vmax.xlane.f32.xlu0 %v4211_v16  ;;  %v10268_v17 = vpop.f32.mrf.mxu1 }
 0xc6f   : > { %v4377_v18 = vadd.f32 %v4376_v15, %v13836_v0 }
 0xc71   : > { %v4378_v21 = vsel %vm2708_vm1, %v4377_v18, -inf }
 0xc72   : > { %4379 = vmax.xlane.f32.xlu1 %v4378_v21 }
 0xcf3   : > { %v4046_v22 = vpop.xlane.xlu0 %4045  ;;  %v3876_v23 = vpop.xlane.xlu1 %3875 }
 0xcf4   : > { %v4047_v24 = vsub.f32 %v4043_v6, %v4046_v22  ;;  %v3877_v25 = vsub.f32 %v3873_v7, %v3876_v23 }
 0xcf6   : > { %v4048_v26 = vmul.f32 1.442695, %v4047_v24  ;;  %v3878_v27 = vmul.f32 1.442695, %v3877_v25 }
 0xcf7   : > { %v4213_v28 = vpop.xlane.xlu0 %4212 }
 0xcf8   : > { %11148 = vpow2.f32 %v4048_v26  ;;  %v4214_v29 = vsub.f32 %v4210_v14, %v4213_v28 }
 0xcf9   : > { %11150 = vpow2.f32 %v3878_v27 }
 0xcfa   : > { %v4215_v30 = vmul.f32 1.442695, %v4214_v29 }
 0xcfb   : > { %v4380_v31 = vpop.xlane.xlu1 %4379 }
 0xcfc   : > { %11152 = vpow2.f32 %v4215_v30  ;;  %v4381_v32 = vsub.f32 %v4377_v18, %v4380_v31  ;;  %v9762_v18 = vld [vmem:[#allocation33] ss:$0 sm:$0xff]  ;;  %v4582_v31 = vld [vmem:[#allocation17 + $0x18] sm:$0xff] }
 0xcfe   : > { %v4382_v33 = vmul.f32 1.442695, %v4381_v32  ;;  %v4664_v32 = vld [vmem:[#allocation14 + $0x8] sm:$0xff] }
 0xd00   : > { %11154 = vpow2.f32 %v4382_v33  ;;  %v4581_v33 = vld [vmem:[#allocation17 + $0x10] sm:$0xff] }
 0xd05   : > { %v11149_v34 = vpop.eup %11148 }
 0xd06   : > { %v11151_v35 = vpop.eup %11150  ;;  %v4050_v36 = vsel %vm2708_vm1, %v11149_v34, 0.0 }
 0xd07   : > { %4051 = vadd.xlane.f32.xlu1 %v4050_v36  ;;  %v3880_v37 = vsel %vm2708_vm1, %v11151_v35, 0.0  ;;  %v4579_v36 = vld [vmem:[#allocation17] sm:$0xff] }
 0xd08   : > { %3881 = vadd.xlane.f32.xlu0 %v3880_v37 }
 0xd09   : > { %v11153_v38 = vpop.eup %11152 }
 0xd0a   : > { %v4217_v39 = vsel %vm2708_vm1, %v11153_v38, 0.0 }
 0xd0c   : > { %4218 = vadd.xlane.f32.xlu0 %v4217_v39 }
 0xd0d   : > { %v11155_v40 = vpop.eup %11154 }
 0xd0e   : > { %v4384_v41 = vsel %vm2708_vm1, %v11155_v40, 0.0 }
 0xd0f   : > { %4385 = vadd.xlane.f32.xlu1 %v4384_v41  ;;  %v9764_v41 = vld [vmem:[#allocation26] ss:$0 sm:$0xff] }
 0xd22   : > { %3885 = vrot.lane.b32.xlu0 %v13782_v50, %s12770_s29 }
 0xd90   : > { %v4052_v43 = vpop.xlane.xlu1 %4051 }
 0xd91   : > { %v3882_v42 = vpop.xlane.xlu0 %3881 }
 0xd92   : > { %11156 = vrcp.f32 %v3882_v42 }
 0xd93   : > { %11158 = vrcp.f32 %v4052_v43  ;;  %v9765_v43 = vld [vmem:[#allocation24] ss:$0 sm:$0xff] }
 0xd95   : > { %v4219_v44 = vpop.xlane.xlu0 %4218 }
 0xd96   : > { %11160 = vrcp.f32 %v4219_v44 }
 0xd98   : > { %v4386_v46 = vpop.xlane.xlu1 %4385 }
 0xd99   : > { %v3886_v45 = vpop.permute.xlu0 %3885  ;;  %11162 = vrcp.f32 %v4386_v46  ;;  %v9768_v46 = vld [vmem:[#allocation8] ss:$0 sm:$0xff] }
 0xd9a   : > { %10240 = vmatpush3.msra.mxu0 %v3886_v45 }
 0xd9b   : > { %10249 = vmatprep.subr.mxu0 %v12767_v1 }
 0xd9f   : > { %v11157_v48 = vpop.eup %11156 }
 0xda0   : > { %v3884_v49 = vmul.f32 %v11157_v48, %v11151_v35  ;;  %v11159_v51 = vpop.eup %11158  ;;  %v13885_v35 = vld [vmem:[%s2318_s10] sm:$0xff]  ;;  %s13966_s10 = scalar_lea.vmem %s14595_s9, %s9883_s6  ;;  %s14601_s6 = sld [smem:[#allocation155_spill]] }
 0xda1   : > { %v4054_v50 = vmul.f32 %v11159_v51, %v11149_v34  ;;  %v4663_v34 = vld [vmem:[#allocation14] sm:$0xff] }
 0xda2   : > { %10242 = vmatmul.mubr.msk.f32.vlgmr.msra.gmra.mxu0 %vm2708_vm1, %v3884_v49 }
 0xda3   : > { %10250 = vmatpush3.msra.mxu0 %v3886_v45  ;;  %10251 = vmatprep.mubr.msk.f32.mxu0 %vm12768_vm0, %v12767_v1  ;;  %v11161_v54 = vpop.eup %11160 }
 0xda4   : > { %10259 = vmatprep.subr.mxu0 %v12767_v1  ;;  %v4221_v55 = vmul.f32 %v11161_v54, %v11153_v38 }
 0xda6   : > { %10252 = vmatmul.mubr.msk.f32.vlgmr.msra.gmra.mxu0 %vm2708_vm1, %v4054_v50  ;;  %v11163_v57 = vpop.eup %11162  ;;  %v9766_v50 = vld [vmem:[#allocation11] ss:$0 sm:$0xff] }
 0xda7   : > { %10260 = vmatpush3.msra.mxu0 %v3886_v45  ;;  %10261 = vmatprep.mubr.msk.f32.mxu0 %vm12768_vm0, %v12767_v1  ;;  %v4388_v59 = vmul.f32 %v11163_v57, %v11155_v40 }
 0xda8   : > { %10269 = vmatprep.subr.mxu0 %v12767_v1 }
 0xdaa   : > { %10262 = vmatmul.mubr.msk.f32.vlgmr.msra.gmra.mxu0 %vm2708_vm1, %v4221_v55 }
 0xdab   : > { %10270 = vmatpush3.msra.mxu0 %v3886_v45  ;;  %10271 = vmatprep.mubr.msk.f32.mxu0 %vm12768_vm0, %v12767_v1 }
 0xdac   : > { %10285 = vmatprep.subr.mxu0 %v12767_v1 }
 0xdae   : > { %10272 = vmatmul.mubr.msk.f32.vlgmr.msra.gmra.mxu0 %vm2708_vm1, %v4388_v59 }
 0xdaf   : > { %10293 = vmatprep.mubr.msk.f32.mxu0 %vm12768_vm0, %v12767_v1  ;;  %10286 = vmatpush3.msra.mxu0 %v4582_v31 }
 0xdb0   : > { %10287 = vmatprep.subr.mxu0 %v12767_v1 }
 0xdb1   : > { %10288 = vmatpush3.msra.mxu0 %v4581_v33 }
 0xdb2   : > { %10289 = vmatprep.subr.mxu0 %v12767_v1 }
 0xe62   : > { %v3957_v3 = vpop.f32.mrf.mxu0 }
 0xe63   : > { %v3961_v9 = vmul.f32 %v13792_v52, %v3957_v3  ;;  %v4746_v3 = vld [vmem:[#allocation18] sm:$0xff] }
 0xe64   : > { %v10243_v4 = vpop.f32.mrf.mxu0 }
 0xe65   : > { %v13936_v4 = vld [vmem:[%s2687_s21] sm:$0xff]  ;;  %s14600_s21 = sld [smem:[#allocation158_spill]] }
 0xe66   : > { %v4124_v5 = vpop.f32.mrf.mxu0 }
 0xe67   : > { %v4128_v7 = vmul.f32 %v13795_v53, %v4124_v5 }
 0xe68   : > { %v10253_v6 = vpop.f32.mrf.mxu0 }
 0xe69   : > { %v4129_v13 = vadd.f32 %v4128_v7, %v3961_v9 }
 0xe6a   : > { %v4291_v8 = vpop.f32.mrf.mxu0 }
 0xe6b   : > { %v4295_v10 = vmul.f32 %v13808_v58, %v4291_v8 }
 0xe6c   : > { %v10263_v11 = vpop.f32.mrf.mxu0 }
 0xe6d   : > { %v4296_v12 = vadd.f32 %v4295_v10, %v4129_v13 }
 0xe6e   : > { %v4458_v14 = vpop.f32.mrf.mxu0 }
 0xe6f   : > { %v4462_v15 = vmul.f32 %v13821_v60, %v4458_v14 }
 0xe70   : > { %v10273_v16 = vpop.f32.mrf.mxu0 }
 0xe71   : > { %v4463_v17 = vadd.f32 %v4462_v15, %v4296_v12 }
 0xe73   : > { %10283 = vmatmul.mubr.msk.f32.vlgmr.msra.gmra.mxu1 %vm2960_vm4, %v4463_v17 }
 0xe74   : > { %10300 = vmatprep.mubr.msk.f32.mxu1 %vm12768_vm0, %v12767_v1  ;;  %10297 = vmatpush3.msra.mxu1 %v4664_v32 }
 0xe75   : > { %10298 = vmatprep.subr.mxu1 %v12767_v1 }
 0xe76   : > { %10299 = vmatpush3.msra.mxu1 %v4663_v34 }
 0xe77   : > { %10301 = vmatmul.mubr.msk.f32.vlgmr.msra.gmra.mxu1 %vm4672_vm3, %v13885_v35  ;;  %10310 = vmatprep.subr.mxu1 %v12767_v1 }
 0xe78   : > { %10312 = vmatprep.mubr.msk.f32.mxu1 %vm12768_vm0, %v12767_v1 }
 0xf33   : > { %v4544_v21 = vpop.f32.mrf.mxu1 }
 0xf34   : > { %v4545_v22 = vadd.f32 %v9762_v18, %v4544_v21 }
 0xf35   : > { %v10284_v23 = vpop.f32.mrf.mxu1 }
 0xf36   : > { %v4548_v24 = vadd.f32 %v4545_v22, %v13776_v47  ;;  %v4580_v47 = vld [vmem:[#allocation17 + $0x8] sm:$0xff] }
 0xf37   : > { %10290 = vmatpush3.msra.mxu0 %v4580_v47  ;;  %v4742_v48 = vpop.f32.mrf.mxu1 }
 0xf38   : > { %v4549_v25 = vsel %vm2960_vm4, %v4548_v24, 0.0  ;;  %10291 = vmatprep.subr.mxu0 %v12767_v1  ;;  %v4743_v49 = vadd.f32 %v9768_v46, %v4742_v48 }
 0xf39   : > { %4550 = vadd.xlane.f32.xlu1 %v4549_v25  ;;  %10292 = vmatpush3.msra.mxu0 %v4579_v36  ;;  %v10302_v51 = vpop.f32.mrf.mxu1 }
 0xf3a   : > { %10303 = vmatprep.subr.mxu0 %v12767_v1  ;;  %10311 = vmatpush3.xpose.msk.msra.mxu1 %vm2960_vm4, %v4743_v49 }
 0xf3b   : > { %10320 = vmatprep.subr.mxu1 %v12767_v1 }
 0xfc2   : > { %v4551_v26 = vpop.xlane.xlu1 %4550 }
 0xfc3   : > { %v4553_v27 = vmul.f32 0.03125, %v4551_v26 }
 0xfc5   : > { %v4554_v28 = vsub.f32 %v4548_v24, %v4553_v27 }
 0xfc7   : > { %v4555_v29 = vmul.f32 %v4554_v28, %v4554_v28 }
 0xfc9   : > { %v4556_v30 = vsel %vm2960_vm4, %v4555_v29, 0.0 }
 0xfca   : > { %4557 = vadd.xlane.f32.xlu1 %v4556_v30 }
0x1053   : > { %v4558_v37 = vpop.xlane.xlu1 %4557 }
0x1054   : > { %v4559_v38 = vmul.f32 0.03125, %v4558_v37 }
0x1056   : > { %v4560_v39 = vadd.f32 1e-05, %v4559_v38 }
0x1058   : > { %11164 = vrsqrt.f32 %v4560_v39 }
0x1065   : > { %v11165_v40 = vpop.eup %11164 }
0x1066   : > { %v4562_v42 = vmul.f32 %v11165_v40, %v4554_v28 }
0x1068   : > { %v4570_v44 = vmul.f32 %v9764_v41, %v4562_v42 }
0x106a   : > { %v13896_v45 = vadd.f32 %v9765_v43, %v4570_v44  ;;  %v9770_v43 = vld [vmem:[#allocation12] ss:$0 sm:$0xff] }
0x106c   : > { %10294 = vmatmul.mubr.msk.f32.vlgmr.msra.gmra.mxu0 %vm2960_vm4, %v13896_v45 }
0x106d   : > { %10307 = vmatprep.mubr.msk.f32.mxu0 %vm12768_vm0, %v12767_v1  ;;  %10304 = vmatpush3.msra.mxu0 %v4747_v2 }
0x106e   : > { %10305 = vmatprep.subr.mxu0 %v12767_v1 }
0x106f   : > { %10306 = vmatpush3.msra.mxu0 %v4746_v3 }
0x1070   : > { %10315 = vmatprep.subr.mxu0 %v12767_v1  ;;  %10308 = vmatmul.mubr.msk.f32.vlgmr.msra.gmra.mxu0 %vm4672_vm3, %v13936_v4 }
0x1071   : > { %10317 = vmatprep.mubr.msk.f32.mxu0 %vm12768_vm0, %v12767_v1 }
0x112c   : > { %v4659_v54 = vpop.f32.mrf.mxu0 }
0x112d   : > { %v4660_v55 = vadd.f32 %v9766_v50, %v4659_v54 }
0x112e   : > { %v10295_v57 = vpop.f32.mrf.mxu0 }
0x112f   : > { %v4828_v59 = vmul.f32 %v13792_v52, %v4660_v55  ;;  %v4993_v61 = vmul.f32 %v13795_v53, %v4660_v55  ;;  %v5155_v62 = vmul.f32 %v13808_v58, %v4660_v55  ;;  %v5317_v63 = vmul.f32 %v13821_v60, %v4660_v55 }
0x1130   : > { %v4824_v44 = vpop.f32.mrf.mxu0 }
0x1131   : > { %10313 = vmatmul.mubr.msk.f32.vlgmr.msra.gmra.mxu1 %vm2960_vm4, %v4828_v59  ;;  %v4825_v46 = vadd.f32 %v9770_v43, %v4824_v44  ;;  %v5595_v43 = vld [vmem:[#allocation23] sm:$0xff]  ;;  %v5687_v44 = vld [vmem:[%s14596_s4 + $0x38] sm:$0xff] }
0x1132   : > { %10321 = vmatpush3.xpose.msk.msra.mxu1 %vm2960_vm4, %v4743_v49  ;;  %10322 = vmatprep.mubr.msk.f32.mxu1 %vm12768_vm0, %v12767_v1  ;;  %v10309_v48 = vpop.f32.mrf.mxu0 }
0x1133   : > { %10330 = vmatprep.subr.mxu1 %v12767_v1  ;;  %10316 = vmatpush3.msra.mxu0 %v4825_v46  ;;  %v5685_v48 = vld [vmem:[%s14596_s4 + $0x28] sm:$0xff] }
0x1134   : > { %10325 = vmatprep.subr.mxu0 %v12767_v1 }
0x1135   : > { %10323 = vmatmul.mubr.msk.f32.vlgmr.msra.gmra.mxu1 %vm2960_vm4, %v4993_v61 }
0x1136   : > { %10331 = vmatpush3.xpose.msk.msra.mxu1 %vm2960_vm4, %v4743_v49  ;;  %10332 = vmatprep.mubr.msk.f32.mxu1 %vm12768_vm0, %v12767_v1 }
0x1137   : > { %10340 = vmatprep.subr.mxu1 %v12767_v1 }
0x1139   : > { %10333 = vmatmul.mubr.msk.f32.vlgmr.msra.gmra.mxu1 %vm2960_vm4, %v5155_v62 }
0x113a   : > { %10341 = vmatpush3.xpose.msk.msra.mxu1 %vm2960_vm4, %v4743_v49  ;;  %10342 = vmatprep.mubr.msk.f32.mxu1 %vm12768_vm0, %v12767_v1 }
0x113b   : > { %10350 = vmatprep.subr.mxu1 %v12767_v1 }
0x113d   : > { %10343 = vmatmul.mubr.msk.f32.vlgmr.msra.gmra.mxu1 %vm2960_vm4, %v5317_v63 }
0x113e   : > { %10358 = vmatprep.mubr.msk.f32.mxu1 %vm12768_vm0, %v12767_v1 }
0x11f1   : > { %v4901_v5 = vpop.f32.mrf.mxu1 }
0x11f2   : > { %v4905_v6 = vmul.f32 0.35355338, %v4901_v5 }
0x11f3   : > { %v10314_v7 = vpop.f32.mrf.mxu1 }
0x11f4   : > { %v4906_v8 = vsel %vm2708_vm1, %v4905_v6, -inf }
0x11f5   : > { %4907 = vmax.xlane.f32.xlu1 %v4906_v8  ;;  %v5063_v9 = vpop.f32.mrf.mxu1 }
0x11f6   : > { %v5067_v10 = vmul.f32 0.35355338, %v5063_v9  ;;  %v5483_v9 = vld [vmem:[#allocation15 + $0x18] sm:$0xff] }
0x11f7   : > { %v10324_v11 = vpop.f32.mrf.mxu1  ;;  %10351 = vmatpush3.msra.mxu1 %v5483_v9 }
0x11f8   : > { %v5068_v13 = vsel %vm2708_vm1, %v5067_v10, -inf  ;;  %10352 = vmatprep.subr.mxu1 %v12767_v1  ;;  %v5481_v11 = vld [vmem:[#allocation15 + $0x8] sm:$0xff] }
0x11f9   : > { %5069 = vmax.xlane.f32.xlu1 %v5068_v13  ;;  %v5225_v14 = vpop.f32.mrf.mxu1  ;;  %v5480_v13 = vld [vmem:[#allocation15] sm:$0xff] }
0x11fa   : > { %v5229_v12 = vmul.f32 0.35355338, %v5225_v14 }
0x11fb   : > { %v10334_v15 = vpop.f32.mrf.mxu1 }
0x11fc   : > { %v5230_v16 = vsel %vm2708_vm1, %v5229_v12, -inf }
0x11fd   : > { %5231 = vmax.xlane.f32.xlu1 %v5230_v16  ;;  %v5387_v17 = vpop.f32.mrf.mxu1 }
0x11fe   : > { %v5391_v18 = vmul.f32 0.35355338, %v5387_v17 }
0x11ff   : > { %v10344_v21 = vpop.f32.mrf.mxu1 }
0x1200   : > { %v5392_v22 = vsel %vm2708_vm1, %v5391_v18, -inf }
0x1201   : > { %5393 = vmax.xlane.f32.xlu1 %v5392_v22 }
0x127e   : > { %v4908_v23 = vpop.xlane.xlu1 %4907 }
0x127f   : > { %v4909_v24 = vsub.f32 %v4905_v6, %v4908_v23 }
0x1281   : > { %v4910_v25 = vmul.f32 1.442695, %v4909_v24 }
0x1282   : > { %v5070_v26 = vpop.xlane.xlu1 %5069 }
0x1283   : > { %11166 = vpow2.f32 %v4910_v25  ;;  %v5071_v27 = vsub.f32 %v5067_v10, %v5070_v26  ;;  %v5482_v10 = vld [vmem:[#allocation15 + $0x10] sm:$0xff] }
0x1284   : > { %10353 = vmatpush3.msra.mxu1 %v5482_v10 }
0x1285   : > { %v5072_v28 = vmul.f32 1.442695, %v5071_v27  ;;  %10354 = vmatprep.subr.mxu1 %v12767_v1 }
0x1286   : > { %v5232_v29 = vpop.xlane.xlu1 %5231  ;;  %10355 = vmatpush3.msra.mxu1 %v5481_v11 }
0x1287   : > { %11168 = vpow2.f32 %v5072_v28  ;;  %v5233_v30 = vsub.f32 %v5229_v12, %v5232_v29  ;;  %10356 = vmatprep.subr.mxu1 %v12767_v1 }
0x1288   : > { %10357 = vmatpush3.msra.mxu1 %v5480_v13  ;;  %v9790_v13 = vld [vmem:[#allocation21] ss:$0 sm:$0xff] }
0x1289   : > { %v5234_v31 = vmul.f32 1.442695, %v5233_v30  ;;  %10372 = vmatprep.subr.mxu1 %v12767_v1  ;;  %v9784_v30 = vld [vmem:[#allocation9] ss:$0 sm:$0xff] }
0x128a   : > { %v5394_v32 = vpop.xlane.xlu1 %5393 }
0x128b   : > { %11170 = vpow2.f32 %v5234_v31  ;;  %v5395_v33 = vsub.f32 %v5391_v18, %v5394_v32 }
0x128d   : > { %v5396_v34 = vmul.f32 1.442695, %v5395_v33 }
0x128f   : > { %11172 = vpow2.f32 %v5396_v34 }
0x1290   : > { %v11167_v47 = vpop.eup %11166 }
0x1291   : > { %v4912_v36 = vsel %vm2708_vm1, %v11167_v47, 0.0 }
0x1292   : > { %4913 = vadd.xlane.f32.xlu0 %v4912_v36 }
0x1294   : > { %v11169_v37 = vpop.eup %11168 }
0x1295   : > { %v5074_v38 = vsel %vm2708_vm1, %v11169_v37, 0.0 }
0x1296   : > { %5075 = vadd.xlane.f32.xlu1 %v5074_v38 }
0x1298   : > { %v11171_v39 = vpop.eup %11170 }
0x1299   : > { %v5236_v40 = vsel %vm2708_vm1, %v11171_v39, 0.0 }
0x129a   : > { %5237 = vadd.xlane.f32.xlu1 %v5236_v40 }
0x129c   : > { %v11173_v41 = vpop.eup %11172 }
0x129d   : > { %v5398_v42 = vsel %vm2708_vm1, %v11173_v41, 0.0 }
0x129e   : > { %5399 = vadd.xlane.f32.xlu1 %v5398_v42  ;;  %v5597_v42 = vld [vmem:[#allocation23 + $0x10] sm:$0xff] }
0x131b   : > { %v4914_v49 = vpop.xlane.xlu0 %4913 }
0x131c   : > { %11174 = vrcp.f32 %v4914_v49  ;;  %v5684_v49 = vld [vmem:[%s14596_s4 + $0x20] sm:$0xff] }
0x131f   : > { %v5076_v51 = vpop.xlane.xlu1 %5075 }
0x1320   : > { %11176 = vrcp.f32 %v5076_v51  ;;  %v5683_v51 = vld [vmem:[%s14596_s4 + $0x18] sm:$0xff] }
0x1323   : > { %v5238_v50 = vpop.xlane.xlu1 %5237 }
0x1324   : > { %11178 = vrcp.f32 %v5238_v50 }
0x1327   : > { %v5400_v54 = vpop.xlane.xlu1 %5399 }
0x1328   : > { %11180 = vrcp.f32 %v5400_v54 }
0x1329   : > { %v11175_v55 = vpop.eup %11174 }
0x132a   : > { %v4916_v57 = vmul.f32 %v11175_v55, %v11167_v47 }
0x132c   : > { %10318 = vmatmul.mubr.msk.f32.vlgmr.msra.gmra.mxu0 %vm2708_vm1, %v4916_v57 }
0x132d   : > { %v11177_v59 = vpop.eup %11176  ;;  %10326 = vmatpush3.msra.mxu0 %v4825_v46  ;;  %10327 = vmatprep.mubr.msk.f32.mxu0 %vm12768_vm0, %v12767_v1 }
0x132e   : > { %10335 = vmatprep.subr.mxu0 %v12767_v1  ;;  %v5078_v61 = vmul.f32 %v11177_v59, %v11169_v37  ;;  %v9786_v59 = vld [vmem:[#allocation29] ss:$0 sm:$0xff] }
0x1330   : > { %10328 = vmatmul.mubr.msk.f32.vlgmr.msra.gmra.mxu0 %vm2708_vm1, %v5078_v61  ;;  %v5154_v2 = vadd.f32 %v5078_v61, %v4916_v57 }
0x1331   : > { %v11179_v62 = vpop.eup %11178  ;;  %10336 = vmatpush3.msra.mxu0 %v4825_v46  ;;  %10337 = vmatprep.mubr.msk.f32.mxu0 %vm12768_vm0, %v12767_v1 }
0x1332   : > { %10345 = vmatprep.subr.mxu0 %v12767_v1  ;;  %v5240_v63 = vmul.f32 %v11179_v62, %v11171_v39  ;;  %v9787_v62 = vld [vmem:[#allocation27] ss:$0 sm:$0xff] }
0x1334   : > { %10338 = vmatmul.mubr.msk.f32.vlgmr.msra.gmra.mxu0 %vm2708_vm1, %v5240_v63  ;;  %v5316_v5 = vadd.f32 %v5240_v63, %v5154_v2 }
0x1335   : > { %v11181_v3 = vpop.eup %11180  ;;  %10346 = vmatpush3.msra.mxu0 %v4825_v46  ;;  %10347 = vmatprep.mubr.msk.f32.mxu0 %vm12768_vm0, %v12767_v1  ;;  %v5686_v46 = vld [vmem:[%s14596_s4 + $0x30] sm:$0xff] }
0x1336   : > { %v5402_v6 = vmul.f32 %v11181_v3, %v11173_v41  ;;  %10361 = vmatprep.subr.mxu0 %v12767_v1  ;;  %v5598_v41 = vld [vmem:[#allocation23 + $0x18] sm:$0xff]  ;;  %v5682_v3 = vld [vmem:[%s14596_s4 + $0x10] sm:$0xff] }
0x1338   : > { %10348 = vmatmul.mubr.msk.f32.vlgmr.msra.gmra.mxu0 %vm2708_vm1, %v5402_v6  ;;  %v5478_v7 = vadd.f32 %v5402_v6, %v5316_v5  ;;  %v5681_v5 = vld [vmem:[%s14596_s4 + $0x8] sm:$0xff]  ;;  %v5680_v6 = vld [vmem:[%s14596_s4] sm:$0xff] }
0x1339   : > { %10369 = vmatprep.mubr.msk.f32.mxu0 %vm12768_vm0, %v12767_v1  ;;  %10362 = vmatpush3.msra.mxu0 %v5598_v41 }
0x133a   : > { %v5479_v8 = vmul.f32 0.25, %v5478_v7  ;;  %10363 = vmatprep.subr.mxu0 %v12767_v1  ;;  %v9788_v7 = vld [vmem:[#allocation20] ss:$0 sm:$0xff] }
0x133b   : > { %10364 = vmatpush3.msra.mxu0 %v5597_v42 }
0x133c   : > { %5594 = vst.msk [vmem:[%s13966_s10] sm:$0xff] %vm2708_vm1, %v5479_v8  ;;  %10365 = vmatprep.subr.mxu0 %v12767_v1 }
0x13ec   : > { %v4986_v14 = vpop.f32.mrf.mxu0 }
0x13ed   : > { %v4990_v21 = vmul.f32 %v13792_v52, %v4986_v14 }
0x13ee   : > { %v10319_v12 = vpop.f32.mrf.mxu0 }
0x13f0   : > { %v5148_v15 = vpop.f32.mrf.mxu0 }
0x13f1   : > { %v5152_v17 = vmul.f32 %v13795_v53, %v5148_v15 }
0x13f2   : > { %v10329_v16 = vpop.f32.mrf.mxu0 }
0x13f3   : > { %v5153_v24 = vadd.f32 %v5152_v17, %v4990_v21 }
0x13f4   : > { %v5310_v18 = vpop.f32.mrf.mxu0 }
0x13f5   : > { %v5314_v22 = vmul.f32 %v13808_v58, %v5310_v18 }
0x13f6   : > { %v10339_v23 = vpop.f32.mrf.mxu0 }
0x13f7   : > { %v5315_v26 = vadd.f32 %v5314_v22, %v5153_v24 }
0x13f8   : > { %v5472_v25 = vpop.f32.mrf.mxu0 }
0x13f9   : > { %v5476_v27 = vmul.f32 %v13821_v60, %v5472_v25  ;;  %v5802_v25 = vld [vmem:[#allocation68 + $0x18] sm:$0xff] }
0x13fa   : > { %v10349_v28 = vpop.f32.mrf.mxu0 }
0x13fb   : > { %v5477_v29 = vadd.f32 %v5476_v27, %v5315_v26  ;;  %v5801_v26 = vld [vmem:[#allocation68 + $0x10] sm:$0xff]  ;;  %v5800_v27 = vld [vmem:[#allocation68 + $0x8] sm:$0xff]  ;;  %v5799_v28 = vld [vmem:[#allocation68] sm:$0xff] }
0x13fd   : > { %10359 = vmatmul.mubr.msk.f32.vlgmr.msra.gmra.mxu1 %vm2960_vm4, %v5477_v29 }
0x13fe   : > { %10388 = vmatprep.mubr.msk.f32.mxu1 %vm12768_vm0, %v12767_v1  ;;  %10373 = vmatpush3.msra.mxu1 %v5687_v44 }
0x13ff   : > { %10374 = vmatprep.subr.mxu1 %v12767_v1 }
0x1400   : > { %10375 = vmatpush3.msra.mxu1 %v5686_v46 }
0x1401   : > { %10376 = vmatprep.subr.mxu1 %v12767_v1 }
0x1402   : > { %10377 = vmatpush3.msra.mxu1 %v5685_v48 }
0x1403   : > { %10378 = vmatprep.subr.mxu1 %v12767_v1 }
0x1404   : > { %10379 = vmatpush3.msra.mxu1 %v5684_v49 }
0x1405   : > { %10380 = vmatprep.subr.mxu1 %v12767_v1 }
0x1406   : > { %10381 = vmatpush3.msra.mxu1 %v5683_v51 }
0x1407   : > { %10382 = vmatprep.subr.mxu1 %v12767_v1 }
0x1408   : > { %10383 = vmatpush3.msra.mxu1 %v5682_v3 }
0x1409   : > { %10384 = vmatprep.subr.mxu1 %v12767_v1 }
0x140a   : > { %10385 = vmatpush3.msra.mxu1 %v5681_v5 }
0x140b   : > { %10386 = vmatprep.subr.mxu1 %v12767_v1 }
0x140c   : > { %10387 = vmatpush3.msra.mxu1 %v5680_v6 }
0x140d   : > { %10412 = vmatprep.subr.mxu1 %v12767_v1 }
0x14bd   : > { %v5560_v31 = vpop.f32.mrf.mxu1 }
0x14be   : > { %v5561_v32 = vadd.f32 %v9784_v30, %v5560_v31 }
0x14bf   : > { %v10360_v33 = vpop.f32.mrf.mxu1 }
0x14c0   : > { %v5564_v34 = vadd.f32 %v5561_v32, %v13896_v45  ;;  %v5596_v45 = vld [vmem:[#allocation23 + $0x8] sm:$0xff] }
0x14c1   : > { %10366 = vmatpush3.msra.mxu0 %v5596_v45  ;;  %v9792_v33 = vld [vmem:[#allocation32] ss:$0 sm:$0xff] }
0x14c2   : > { %v5565_v47 = vsel %vm2960_vm4, %v5564_v34, 0.0  ;;  %10367 = vmatprep.subr.mxu0 %v12767_v1 }
0x14c3   : > { %5566 = vadd.xlane.f32.xlu1 %v5565_v47  ;;  %10368 = vmatpush3.msra.mxu0 %v5595_v43  ;;  %v9793_v47 = vld [vmem:[#allocation30] ss:$0 sm:$0xff] }
0x14c4   : > { %10391 = vmatprep.subr.mxu0 %v12767_v1 }
0x154c   : > { %v5567_v36 = vpop.xlane.xlu1 %5566 }
0x154d   : > { %v5568_v37 = vmul.f32 0.03125, %v5567_v36 }
0x154f   : > { %v5569_v38 = vsub.f32 %v5564_v34, %v5568_v37 }
0x1551   : > { %v5570_v39 = vmul.f32 %v5569_v38, %v5569_v38 }
0x1553   : > { %v5571_v40 = vsel %vm2960_vm4, %v5570_v39, 0.0 }
0x1554   : > { %5572 = vadd.xlane.f32.xlu1 %v5571_v40 }
0x15dd   : > { %v5573_v50 = vpop.xlane.xlu1 %5572 }
0x15de   : > { %v5574_v54 = vmul.f32 0.03125, %v5573_v50 }
0x15e0   : > { %v5575_v55 = vadd.f32 1e-05, %v5574_v54 }
0x15e2   : > { %11182 = vrsqrt.f32 %v5575_v55 }
0x15ef   : > { %v11183_v57 = vpop.eup %11182 }
0x15f0   : > { %v5577_v61 = vmul.f32 %v11183_v57, %v5569_v38  ;;  %v9794_v38 = vld [vmem:[#allocation66] ss:$0 sm:$0xff] }
0x15f2   : > { %v5585_v63 = vmul.f32 %v9786_v59, %v5577_v61 }
0x15f4   : > { %v5593_v2 = vadd.f32 %v9787_v62, %v5585_v63 }
0x15f6   : > { %10370 = vmatmul.mubr.msk.f32.vlgmr.msra.gmra.mxu0 %vm2960_vm4, %v5593_v2 }
0x15f7   : > { %10399 = vmatprep.mubr.msk.f32.mxu0 %vm12768_vm0, %v12767_v1  ;;  %10392 = vmatpush3.msra.mxu0 %v5802_v25 }
0x15f8   : > { %10393 = vmatprep.subr.mxu0 %v12767_v1 }
0x15f9   : > { %10394 = vmatpush3.msra.mxu0 %v5801_v26 }
0x15fa   : > { %10395 = vmatprep.subr.mxu0 %v12767_v1 }
0x15fb   : > { %10396 = vmatpush3.msra.mxu0 %v5800_v27 }
0x15fc   : > { %10397 = vmatprep.subr.mxu0 %v12767_v1 }
0x15fd   : > { %10398 = vmatpush3.msra.mxu0 %v5799_v28 }
0x15fe   : > { %10402 = vmatprep.subr.mxu0 %v12767_v1 }
0x16b6   : > { %v5675_v8 = vpop.f32.mrf.mxu0 }
0x16b7   : > { %v5676_v9 = vadd.f32 %v9788_v7, %v5675_v8 }
0x16b8   : > { %v10371_v10 = vpop.f32.mrf.mxu0 }
0x16b9   : > { %v5679_v11 = vmax.f32 %v5676_v9, 0.0 }
0x16bb   : > { %10389 = vmatmul.mubr.msk.f32.vlgmr.msra.gmra.mxu1 %vm5695_vm5, %v5679_v11 }
0x16bc   : > { %10414 = vmatprep.mubr.msk.f32.mxu1 %vm12768_vm0, %v12767_v1 }
0x177b   : > { %v5765_v14 = vpop.f32.mrf.mxu1 }
0x177c   : > { %v5766_v12 = vadd.f32 %v9790_v13, %v5765_v14 }
0x177d   : > { %v10390_v15 = vpop.f32.mrf.mxu1 }
0x177e   : > { %v5769_v16 = vadd.f32 %v5766_v12, %v5593_v2 }
0x1780   : > { %v5770_v17 = vsel %vm2960_vm4, %v5769_v16, 0.0 }
0x1781   : > { %5771 = vadd.xlane.f32.xlu1 %v5770_v17 }
0x180a   : > { %v5772_v18 = vpop.xlane.xlu1 %5771 }
0x180b   : > { %v5773_v21 = vmul.f32 0.03125, %v5772_v18 }
0x180d   : > { %v5774_v22 = vsub.f32 %v5769_v16, %v5773_v21 }
0x180f   : > { %v5775_v23 = vmul.f32 %v5774_v22, %v5774_v22 }
0x1811   : > { %v5776_v24 = vsel %vm2960_vm4, %v5775_v23, 0.0 }
0x1812   : > { %5777 = vadd.xlane.f32.xlu1 %v5776_v24 }
0x189b   : > { %v5778_v29 = vpop.xlane.xlu1 %5777 }
0x189c   : > { %v5779_v30 = vmul.f32 0.03125, %v5778_v29 }
0x189e   : > { %v5780_v31 = vadd.f32 1e-05, %v5779_v30 }
0x18a0   : > { %11184 = vrsqrt.f32 %v5780_v31 }
0x18ad   : > { %v11185_v32 = vpop.eup %11184 }
0x18ae   : > { %v5782_v34 = vmul.f32 %v11185_v32, %v5774_v22 }
0x18b0   : > { %v5790_v36 = vmul.f32 %v9792_v33, %v5782_v34 }
0x18b2   : > { %v14018_v37 = vadd.f32 %v9793_v47, %v5790_v36 }
0x18b4   : > { %10400 = vmatmul.mubr.msk.f32.vlgmr.msra.gmra.mxu0 %vm2960_vm4, %v14018_v37 }
0x18b5   : > { %10404 = vmatprep.mubr.msk.f32.mxu0 %vm12768_vm0, %v12767_v1 }
0x1974   : > { %v5879_v39 = vpop.f32.mrf.mxu0 }
0x1975   : > { %v14024_v40 = vadd.f32 %v9794_v38, %v5879_v39 }
0x1976   : > { %v10401_v41 = vpop.f32.mrf.mxu0 }
0x1977   : > { %5885 = vrot.lane.b32.xlu0 %v14024_v40, %s12769_s12  ;;  %v5883_v45 = vmul.f32 %v13792_v52, %v14024_v40  ;;  %v6053_v43 = vmul.f32 %v13795_v53, %v14024_v40  ;;  %v6215_v44 = vmul.f32 %v13808_v58, %v14024_v40  ;;  %v6377_v46 = vmul.f32 %v13821_v60, %v14024_v40 }
0x19e9   : > { %v5886_v42 = vpop.permute.xlu0 %5885 }
0x19ea   : > { %10403 = vmatpush3.xpose.msk.msra.mxu0 %vm2960_vm4, %v5886_v42  ;;  %10413 = vmatpush3.xpose.msk.msra.mxu1 %vm2960_vm4, %v5886_v42 }
0x19eb   : > { %10422 = vmatprep.subr.mxu1 %v12767_v1  ;;  %10407 = vmatprep.subr.mxu0 %v12767_v1 }
0x19ed   : > { %10405 = vmatmul.mubr.msk.f32.vlgmr.msra.gmra.mxu0 %vm2960_vm4, %v5883_v45  ;;  %10415 = vmatmul.mubr.msk.f32.vlgmr.msra.gmra.mxu1 %vm2960_vm4, %v6053_v43 }
0x19ee   : > { %10423 = vmatpush3.xpose.msk.msra.mxu1 %vm2960_vm4, %v5886_v42  ;;  %10424 = vmatprep.mubr.msk.f32.mxu1 %vm12768_vm0, %v12767_v1 }
0x19ef   : > { %10432 = vmatprep.subr.mxu1 %v12767_v1  ;;  %10409 = vmatprep.mubr.msk.f32.mxu0 %vm12768_vm0, %v12767_v1 }
0x19f1   : > { %10425 = vmatmul.mubr.msk.f32.vlgmr.msra.gmra.mxu1 %vm2960_vm4, %v6215_v44 }
0x19f2   : > { %10433 = vmatpush3.xpose.msk.msra.mxu1 %vm2960_vm4, %v5886_v42  ;;  %10434 = vmatprep.mubr.msk.f32.mxu1 %vm12768_vm0, %v12767_v1 }
0x19f3   : > { %10442 = vmatprep.subr.mxu1 %v12767_v1 }
0x19f5   : > { %10435 = vmatmul.mubr.msk.f32.vlgmr.msra.gmra.mxu1 %vm2960_vm4, %v6377_v46 }
0x19f6   : > { %10450 = vmatprep.mubr.msk.f32.mxu1 %vm12768_vm0, %v12767_v1 }
0x1aad   : > { %v5958_v48 = vpop.f32.mrf.mxu0  ;;  %v6123_v49 = vpop.f32.mrf.mxu1 }
0x1aae   : > { %v5962_v51 = vmul.f32 0.35355338, %v5958_v48  ;;  %v6127_v50 = vmul.f32 0.35355338, %v6123_v49  ;;  %v6542_v48 = vld [vmem:[%s14597_s1 + $0x18] sm:$0xff]  ;;  %v6541_v49 = vld [vmem:[%s14597_s1 + $0x10] sm:$0xff] }
0x1aaf   : > { %v10406_v54 = vpop.f32.mrf.mxu0  ;;  %v10416_v55 = vpop.f32.mrf.mxu1  ;;  %10443 = vmatpush3.msra.mxu1 %v6542_v48 }
0x1ab0   : > { %v5963_v57 = vadd.f32 %v5962_v51, %v13836_v0  ;;  %v6128_v63 = vadd.f32 %v6127_v50, %v13836_v0  ;;  %10444 = vmatprep.subr.mxu1 %v12767_v1  ;;  %v6540_v51 = vld [vmem:[%s14597_s1 + $0x8] sm:$0xff]  ;;  %v6539_v50 = vld [vmem:[%s14597_s1] sm:$0xff]  ;;  %s9879_s1 = sshll.u32 %s13137_s27, 7 }
0x1ab1   : > { %v6285_v59 = vpop.f32.mrf.mxu1  ;;  %10445 = vmatpush3.msra.mxu1 %v6541_v49  ;;  %s8860_s4 = scalar_lea.hbm %s13099_s8, %s9879_s1 }
0x1ab2   : > { %v6289_v61 = vmul.f32 0.35355338, %v6285_v59  ;;  %v5964_v62 = vsel %vm2708_vm1, %v5963_v57, -inf  ;;  %v6129_v6 = vsel %vm2708_vm1, %v6128_v63, -inf  ;;  %10446 = vmatprep.subr.mxu1 %v12767_v1 }
0x1ab3   : > { %v10426_v2 = vpop.f32.mrf.mxu1  ;;  %5965 = vmax.xlane.f32.xlu1 %v5964_v62  ;;  %10447 = vmatpush3.msra.mxu1 %v6540_v51  ;;  %v6817_v51 = vld [vmem:[#allocation50 + $0x8] sm:$0xff] }
0x1ab4   : > { %v6290_v7 = vadd.f32 %v6289_v61, %v13836_v0  ;;  %10448 = vmatprep.subr.mxu1 %v12767_v1 }
0x1ab5   : > { %v6447_v3 = vpop.f32.mrf.mxu1  ;;  %10449 = vmatpush3.msra.mxu1 %v6539_v50  ;;  %v6816_v50 = vld [vmem:[#allocation50] sm:$0xff] }
0x1ab6   : > { %v6451_v5 = vmul.f32 0.35355338, %v6447_v3  ;;  %v6291_v9 = vsel %vm2708_vm1, %v6290_v7, -inf  ;;  %10464 = vmatprep.subr.mxu1 %v12767_v1 }
0x1ab7   : > { %v10436_v8 = vpop.f32.mrf.mxu1  ;;  %6130 = vmax.xlane.f32.xlu1 %v6129_v6 }
0x1ab8   : > { %v6452_v10 = vadd.f32 %v6451_v5, %v13836_v0 }
0x1aba   : > { %v6453_v11 = vsel %vm2708_vm1, %v6452_v10, -inf }
0x1abb   : > { %6292 = vmax.xlane.f32.xlu1 %v6291_v9 }
0x1abf   : > { %6454 = vmax.xlane.f32.xlu1 %v6453_v11  ;;  %v9808_v11 = vld [vmem:[#allocation65] ss:$0 sm:$0xff] }
0x1b3c   : > { %v5966_v13 = vpop.xlane.xlu1 %5965 }
0x1b3d   : > { %v5967_v14 = vsub.f32 %v5963_v57, %v5966_v13 }
0x1b3f   : > { %v5968_v12 = vmul.f32 1.442695, %v5967_v14 }
0x1b40   : > { %v6131_v15 = vpop.xlane.xlu1 %6130 }
0x1b41   : > { %11186 = vpow2.f32 %v5968_v12  ;;  %v6132_v16 = vsub.f32 %v6128_v63, %v6131_v15 }
0x1b43   : > { %v6133_v17 = vmul.f32 1.442695, %v6132_v16 }
0x1b44   : > { %v6293_v18 = vpop.xlane.xlu1 %6292 }
0x1b45   : > { %11188 = vpow2.f32 %v6133_v17  ;;  %v6294_v21 = vsub.f32 %v6290_v7, %v6293_v18 }
0x1b47   : > { %v6295_v22 = vmul.f32 1.442695, %v6294_v21 }
0x1b48   : > { %v6455_v23 = vpop.xlane.xlu1 %6454 }
0x1b49   : > { %11190 = vpow2.f32 %v6295_v22  ;;  %v6456_v24 = vsub.f32 %v6452_v10, %v6455_v23 }
0x1b4b   : > { %v6457_v25 = vmul.f32 1.442695, %v6456_v24  ;;  %v6656_v24 = vld [vmem:[#allocation48 + $0x18] sm:$0xff] }
0x1b4d   : > { %11192 = vpow2.f32 %v6457_v25  ;;  %v6738_v25 = vld [vmem:[#allocation45 + $0x8] sm:$0xff] }
0x1b4e   : > { %v11187_v0 = vpop.eup %11186 }
0x1b4f   : > { %v5970_v26 = vsel %vm2708_vm1, %v11187_v0, 0.0 }
0x1b50   : > { %5971 = vadd.xlane.f32.xlu1 %v5970_v26  ;;  %v6737_v26 = vld [vmem:[#allocation45] sm:$0xff] }
0x1b52   : > { %v11189_v27 = vpop.eup %11188 }
0x1b53   : > { %v6135_v28 = vsel %vm2708_vm1, %v11189_v27, 0.0 }
0x1b54   : > { %6136 = vadd.xlane.f32.xlu1 %v6135_v28 }
0x1b56   : > { %v11191_v29 = vpop.eup %11190 }
0x1b57   : > { %v6297_v30 = vsel %vm2708_vm1, %v11191_v29, 0.0 }
0x1b58   : > { %6298 = vadd.xlane.f32.xlu0 %v6297_v30 }
0x1b5a   : > { %v11193_v31 = vpop.eup %11192 }
0x1b5b   : > { %v6459_v32 = vsel %vm2708_vm1, %v11193_v31, 0.0 }
0x1b5c   : > { %6460 = vadd.xlane.f32.xlu1 %v6459_v32  ;;  %v9810_v32 = vld [vmem:[#allocation57] ss:$0 sm:$0xff] }
0x1b6d   : > { %5975 = vrot.lane.b32.xlu1 %v14024_v40, %s12770_s29  ;;  %s14598_s29 = sld [smem:[#allocation143_spill]] }
0x1bd9   : > { %v5972_v33 = vpop.xlane.xlu1 %5971 }
0x1bda   : > { %11194 = vrcp.f32 %v5972_v33 }
0x1bdd   : > { %v6137_v34 = vpop.xlane.xlu1 %6136 }
0x1bde   : > { %11196 = vrcp.f32 %v6137_v34  ;;  %v9811_v34 = vld [vmem:[#allocation56] ss:$0 sm:$0xff] }
0x1be1   : > { %v6299_v47 = vpop.xlane.xlu0 %6298 }
0x1be2   : > { %11198 = vrcp.f32 %v6299_v47 }
0x1be5   : > { %v6461_v36 = vpop.xlane.xlu1 %6460 }
0x1be6   : > { %11200 = vrcp.f32 %v6461_v36  ;;  %v9814_v36 = vld [vmem:[#allocation39] ss:$0 sm:$0xff] }
0x1be7   : > { %v11195_v38 = vpop.eup %11194 }
0x1be8   : > { %v5974_v39 = vmul.f32 %v11195_v38, %v11187_v0  ;;  %v6655_v0 = vld [vmem:[#allocation48 + $0x10] sm:$0xff] }
0x1be9   : > { %v5976_v41 = vpop.permute.xlu1 %5975 }
0x1bea   : > { %10408 = vmatpush3.msra.mxu0 %v5976_v41 }
0x1beb   : > { %v11197_v42 = vpop.eup %11196  ;;  %10410 = vmatmul.mubr.msk.f32.vlgmr.msra.gmra.mxu0 %vm2708_vm1, %v5974_v39  ;;  %10417 = vmatprep.subr.mxu0 %v12767_v1 }
0x1bec   : > { %10418 = vmatpush3.msra.mxu0 %v5976_v41  ;;  %10419 = vmatprep.mubr.msk.f32.mxu0 %vm12768_vm0, %v12767_v1  ;;  %v6139_v40 = vmul.f32 %v11197_v42, %v11189_v27  ;;  %v6654_v27 = vld [vmem:[#allocation48 + $0x8] sm:$0xff] }
0x1bed   : > { %10427 = vmatprep.subr.mxu0 %v12767_v1  ;;  %v9812_v42 = vld [vmem:[#allocation42] ss:$0 sm:$0xff] }
0x1bef   : > { %v11199_v45 = vpop.eup %11198  ;;  %10420 = vmatmul.mubr.msk.f32.vlgmr.msra.gmra.mxu0 %vm2708_vm1, %v6139_v40 }
0x1bf0   : > { %10428 = vmatpush3.msra.mxu0 %v5976_v41  ;;  %10429 = vmatprep.mubr.msk.f32.mxu0 %vm12768_vm0, %v12767_v1  ;;  %v6301_v43 = vmul.f32 %v11199_v45, %v11191_v29 }
0x1bf1   : > { %10437 = vmatprep.subr.mxu0 %v12767_v1 }
0x1bf3   : > { %v11201_v44 = vpop.eup %11200  ;;  %10430 = vmatmul.mubr.msk.f32.vlgmr.msra.gmra.mxu0 %vm2708_vm1, %v6301_v43 }
0x1bf4   : > { %10438 = vmatpush3.msra.mxu0 %v5976_v41  ;;  %10439 = vmatprep.mubr.msk.f32.mxu0 %vm12768_vm0, %v12767_v1  ;;  %v6463_v46 = vmul.f32 %v11201_v44, %v11193_v31 }
0x1bf5   : > { %10453 = vmatprep.subr.mxu0 %v12767_v1 }
0x1bf7   : > { %10440 = vmatmul.mubr.msk.f32.vlgmr.msra.gmra.mxu0 %vm2708_vm1, %v6463_v46 }
0x1bf8   : > { %10461 = vmatprep.mubr.msk.f32.mxu0 %vm12768_vm0, %v12767_v1  ;;  %10454 = vmatpush3.msra.mxu0 %v6656_v24 }
0x1bf9   : > { %10455 = vmatprep.subr.mxu0 %v12767_v1 }
0x1bfa   : > { %10456 = vmatpush3.msra.mxu0 %v6655_v0 }
0x1bfb   : > { %10457 = vmatprep.subr.mxu0 %v12767_v1 }
0x1bfc   : > { %10458 = vmatpush3.msra.mxu0 %v6654_v27 }
0x1bfd   : > { %10459 = vmatprep.subr.mxu0 %v12767_v1 }
0x1cab   : > { %v6047_v54 = vpop.f32.mrf.mxu0 }
0x1cac   : > { %v6051_v63 = vmul.f32 %v13792_v52, %v6047_v54 }
0x1cad   : > { %v10411_v55 = vpop.f32.mrf.mxu0 }
0x1caf   : > { %v6209_v57 = vpop.f32.mrf.mxu0 }
0x1cb0   : > { %v6213_v61 = vmul.f32 %v13795_v53, %v6209_v57 }
0x1cb1   : > { %v10421_v59 = vpop.f32.mrf.mxu0 }
0x1cb2   : > { %v6214_v5 = vadd.f32 %v6213_v61, %v6051_v63 }
0x1cb3   : > { %v6371_v62 = vpop.f32.mrf.mxu0 }
0x1cb4   : > { %v6375_v2 = vmul.f32 %v13808_v58, %v6371_v62 }
0x1cb5   : > { %v10431_v3 = vpop.f32.mrf.mxu0 }
0x1cb6   : > { %v6376_v7 = vadd.f32 %v6375_v2, %v6214_v5 }
0x1cb7   : > { %v6533_v6 = vpop.f32.mrf.mxu0 }
0x1cb8   : > { %v6537_v8 = vmul.f32 %v13821_v60, %v6533_v6 }
0x1cb9   : > { %v10441_v9 = vpop.f32.mrf.mxu0 }
0x1cba   : > { %v6538_v10 = vadd.f32 %v6537_v8, %v6376_v7 }
0x1cbc   : > { %10451 = vmatmul.mubr.msk.f32.vlgmr.msra.gmra.mxu1 %vm2960_vm4, %v6538_v10 }
0x1cbd   : > { %10468 = vmatprep.mubr.msk.f32.mxu1 %vm12768_vm0, %v12767_v1  ;;  %10465 = vmatpush3.msra.mxu1 %v6738_v25 }
0x1cbe   : > { %10466 = vmatprep.subr.mxu1 %v12767_v1 }
0x1cbf   : > { %10467 = vmatpush3.msra.mxu1 %v6737_v26 }
0x1cc0   : > { %10469 = vmatmul.mubr.msk.f32.vlgmr.msra.gmra.mxu1 %vm4672_vm3, %v13885_v35  ;;  %10478 = vmatprep.subr.mxu1 %v12767_v1 }
0x1cc1   : > { %10480 = vmatprep.mubr.msk.f32.mxu1 %vm12768_vm0, %v12767_v1 }
0x1d7c   : > { %v6619_v13 = vpop.f32.mrf.mxu1 }
0x1d7d   : > { %v6620_v14 = vadd.f32 %v9808_v11, %v6619_v13 }
0x1d7e   : > { %v10452_v12 = vpop.f32.mrf.mxu1 }
0x1d7f   : > { %v6623_v15 = vadd.f32 %v6620_v14, %v14018_v37  ;;  %v6653_v37 = vld [vmem:[#allocation48] sm:$0xff] }
0x1d80   : > { %10460 = vmatpush3.msra.mxu0 %v6653_v37  ;;  %v6812_v38 = vpop.f32.mrf.mxu1 }
0x1d81   : > { %v6624_v16 = vsel %vm2960_vm4, %v6623_v15, 0.0  ;;  %10471 = vmatprep.subr.mxu0 %v12767_v1  ;;  %v6813_v39 = vadd.f32 %v9814_v36, %v6812_v38 }
0x1d82   : > { %6625 = vadd.xlane.f32.xlu1 %v6624_v16  ;;  %v10470_v41 = vpop.f32.mrf.mxu1 }
0x1d83   : > { %10479 = vmatpush3.xpose.msk.msra.mxu1 %vm2960_vm4, %v6813_v39 }
0x1d84   : > { %10488 = vmatprep.subr.mxu1 %v12767_v1 }
0x1e0b   : > { %v6626_v17 = vpop.xlane.xlu1 %6625 }
0x1e0c   : > { %v6627_v18 = vmul.f32 0.03125, %v6626_v17 }
0x1e0e   : > { %v6628_v21 = vsub.f32 %v6623_v15, %v6627_v18 }
0x1e10   : > { %v6629_v22 = vmul.f32 %v6628_v21, %v6628_v21 }
0x1e12   : > { %v6630_v23 = vsel %vm2960_vm4, %v6629_v22, 0.0 }
0x1e13   : > { %6631 = vadd.xlane.f32.xlu0 %v6630_v23 }
0x1e9c   : > { %v6632_v28 = vpop.xlane.xlu0 %6631 }
0x1e9d   : > { %v6633_v29 = vmul.f32 0.03125, %v6632_v28 }
0x1e9f   : > { %v6634_v30 = vadd.f32 1e-05, %v6633_v29 }
0x1ea1   : > { %11202 = vrsqrt.f32 %v6634_v30 }
0x1eae   : > { %v11203_v31 = vpop.eup %11202 }
0x1eaf   : > { %v6636_v33 = vmul.f32 %v11203_v31, %v6628_v21  ;;  %v9816_v31 = vld [vmem:[#allocation44] ss:$0 sm:$0xff] }
0x1eb1   : > { %v6644_v47 = vmul.f32 %v9810_v32, %v6636_v33 }
0x1eb3   : > { %v14114_v35 = vadd.f32 %v9811_v34, %v6644_v47 }
0x1eb5   : > { %10462 = vmatmul.mubr.msk.f32.vlgmr.msra.gmra.mxu0 %vm2960_vm4, %v14114_v35 }
0x1eb6   : > { %10475 = vmatprep.mubr.msk.f32.mxu0 %vm12768_vm0, %v12767_v1  ;;  %10472 = vmatpush3.msra.mxu0 %v6817_v51 }
0x1eb7   : > { %10473 = vmatprep.subr.mxu0 %v12767_v1 }
0x1eb8   : > { %10474 = vmatpush3.msra.mxu0 %v6816_v50 }
0x1eb9   : > { %10476 = vmatmul.mubr.msk.f32.vlgmr.msra.gmra.mxu0 %vm4672_vm3, %v13936_v4  ;;  %10483 = vmatprep.subr.mxu0 %v12767_v1 }
0x1eba   : > { %10485 = vmatprep.mubr.msk.f32.mxu0 %vm12768_vm0, %v12767_v1 }
0x1f75   : > { %v6733_v40 = vpop.f32.mrf.mxu0 }
0x1f76   : > { %v6734_v45 = vadd.f32 %v9812_v42, %v6733_v40 }
0x1f77   : > { %v10463_v43 = vpop.f32.mrf.mxu0 }
0x1f78   : > { %v6895_v44 = vmul.f32 %v13792_v52, %v6734_v45  ;;  %v7060_v46 = vmul.f32 %v13795_v53, %v6734_v45  ;;  %v7222_v48 = vmul.f32 %v13808_v58, %v6734_v45  ;;  %v7384_v49 = vmul.f32 %v13821_v60, %v6734_v45 }
0x1f79   : > { %v6891_v32 = vpop.f32.mrf.mxu0 }
0x1f7a   : > { %10481 = vmatmul.mubr.msk.f32.vlgmr.msra.gmra.mxu1 %vm2960_vm4, %v6895_v44  ;;  %v6892_v33 = vadd.f32 %v9816_v31, %v6891_v32 }
0x1f7b   : > { %10489 = vmatpush3.xpose.msk.msra.mxu1 %vm2960_vm4, %v6813_v39  ;;  %10490 = vmatprep.mubr.msk.f32.mxu1 %vm12768_vm0, %v12767_v1  ;;  %v10477_v34 = vpop.f32.mrf.mxu0 }
0x1f7c   : > { %10498 = vmatprep.subr.mxu1 %v12767_v1  ;;  %10484 = vmatpush3.msra.mxu0 %v6892_v33  ;;  %v9832_v34 = vld [vmem:[#allocation60] ss:$0 sm:$0xff] }
0x1f7d   : > { %10493 = vmatprep.subr.mxu0 %v12767_v1 }
0x1f7e   : > { %10491 = vmatmul.mubr.msk.f32.vlgmr.msra.gmra.mxu1 %vm2960_vm4, %v7060_v46 }
0x1f7f   : > { %10499 = vmatpush3.xpose.msk.msra.mxu1 %vm2960_vm4, %v6813_v39  ;;  %10500 = vmatprep.mubr.msk.f32.mxu1 %vm12768_vm0, %v12767_v1 }
0x1f80   : > { %10508 = vmatprep.subr.mxu1 %v12767_v1 }
0x1f82   : > { %10501 = vmatmul.mubr.msk.f32.vlgmr.msra.gmra.mxu1 %vm2960_vm4, %v7222_v48 }
0x1f83   : > { %10509 = vmatpush3.xpose.msk.msra.mxu1 %vm2960_vm4, %v6813_v39  ;;  %10510 = vmatprep.mubr.msk.f32.mxu1 %vm12768_vm0, %v12767_v1 }
0x1f84   : > { %10518 = vmatprep.subr.mxu1 %v12767_v1 }
0x1f86   : > { %10511 = vmatmul.mubr.msk.f32.vlgmr.msra.gmra.mxu1 %vm2960_vm4, %v7384_v49 }
0x1f87   : > { %10526 = vmatprep.mubr.msk.f32.mxu1 %vm12768_vm0, %v12767_v1 }
0x203a   : > { %v6968_v54 = vpop.f32.mrf.mxu1 }
0x203b   : > { %v6972_v55 = vmul.f32 0.35355338, %v6968_v54 }
0x203c   : > { %v10482_v57 = vpop.f32.mrf.mxu1 }
0x203d   : > { %v6973_v59 = vsel %vm2708_vm1, %v6972_v55, -inf  ;;  %v7549_v57 = vld [vmem:[#allocation47 + $0x10] sm:$0xff] }
0x203e   : > { %6974 = vmax.xlane.f32.xlu0 %v6973_v59  ;;  %v7130_v61 = vpop.f32.mrf.mxu1  ;;  %v7548_v59 = vld [vmem:[#allocation47 + $0x8] sm:$0xff] }
0x203f   : > { %v7134_v62 = vmul.f32 0.35355338, %v7130_v61  ;;  %v7547_v61 = vld [vmem:[#allocation47] sm:$0xff] }
0x2040   : > { %v10492_v63 = vpop.f32.mrf.mxu1 }
0x2041   : > { %v7135_v2 = vsel %vm2708_vm1, %v7134_v62, -inf }
0x2042   : > { %7136 = vmax.xlane.f32.xlu0 %v7135_v2  ;;  %v7292_v3 = vpop.f32.mrf.mxu1 }
0x2043   : > { %v7296_v5 = vmul.f32 0.35355338, %v7292_v3 }
0x2044   : > { %v10502_v4 = vpop.f32.mrf.mxu1 }
0x2045   : > { %v7297_v6 = vsel %vm2708_vm1, %v7296_v5, -inf }
0x2046   : > { %7298 = vmax.xlane.f32.xlu0 %v7297_v6  ;;  %v7454_v7 = vpop.f32.mrf.mxu1 }
0x2047   : > { %v7458_v8 = vmul.f32 0.35355338, %v7454_v7 }
0x2048   : > { %v10512_v9 = vpop.f32.mrf.mxu1 }
0x2049   : > { %v7459_v10 = vsel %vm2708_vm1, %v7458_v8, -inf }
0x204a   : > { %7460 = vmax.xlane.f32.xlu0 %v7459_v10 }
0x20c7   : > { %v6975_v11 = vpop.xlane.xlu0 %6974 }
0x20c8   : > { %v6976_v13 = vsub.f32 %v6972_v55, %v6975_v11  ;;  %v7550_v55 = vld [vmem:[#allocation47 + $0x18] sm:$0xff] }
0x20c9   : > { %10519 = vmatpush3.msra.mxu1 %v7550_v55 }
0x20ca   : > { %v6977_v14 = vmul.f32 1.442695, %v6976_v13  ;;  %10520 = vmatprep.subr.mxu1 %v12767_v1 }
0x20cb   : > { %v7137_v12 = vpop.xlane.xlu0 %7136  ;;  %10521 = vmatpush3.msra.mxu1 %v7549_v57 }
0x20cc   : > { %11204 = vpow2.f32 %v6977_v14  ;;  %v7138_v15 = vsub.f32 %v7134_v62, %v7137_v12  ;;  %10522 = vmatprep.subr.mxu1 %v12767_v1 }
0x20cd   : > { %10523 = vmatpush3.msra.mxu1 %v7548_v59 }
0x20ce   : > { %v7139_v16 = vmul.f32 1.442695, %v7138_v15  ;;  %10524 = vmatprep.subr.mxu1 %v12767_v1  ;;  %v9830_v15 = vld [vmem:[#allocation41] ss:$0 sm:$0xff] }
0x20cf   : > { %v7299_v17 = vpop.xlane.xlu0 %7298  ;;  %10525 = vmatpush3.msra.mxu1 %v7547_v61 }
0x20d0   : > { %11206 = vpow2.f32 %v7139_v16  ;;  %v7300_v18 = vsub.f32 %v7296_v5, %v7299_v17  ;;  %10540 = vmatprep.subr.mxu1 %v12767_v1 }
0x20d2   : > { %v7301_v21 = vmul.f32 1.442695, %v7300_v18 }
0x20d3   : > { %v7461_v22 = vpop.xlane.xlu0 %7460 }
0x20d4   : > { %11208 = vpow2.f32 %v7301_v21  ;;  %v7462_v23 = vsub.f32 %v7458_v8, %v7461_v22 }
0x20d6   : > { %v7463_v24 = vmul.f32 1.442695, %v7462_v23 }
0x20d8   : > { %11210 = vpow2.f32 %v7463_v24  ;;  %v7666_v24 = vld [vmem:[#allocation54 + $0x18] sm:$0xff] }
0x20d9   : > { %v11205_v25 = vpop.eup %11204 }
0x20da   : > { %v6979_v0 = vsel %vm2708_vm1, %v11205_v25, 0.0 }
0x20db   : > { %6980 = vadd.xlane.f32.xlu0 %v6979_v0  ;;  %v7663_v0 = vld [vmem:[#allocation54] sm:$0xff] }
0x20dd   : > { %v11207_v26 = vpop.eup %11206 }
0x20de   : > { %v7141_v27 = vsel %vm2708_vm1, %v11207_v26, 0.0 }
0x20df   : > { %7142 = vadd.xlane.f32.xlu0 %v7141_v27  ;;  %v7754_v27 = vld [vmem:[%s14598_s29 + $0x30] sm:$0xff] }
0x20e1   : > { %v11209_v37 = vpop.eup %11208 }
0x20e2   : > { %v7303_v28 = vsel %vm2708_vm1, %v11209_v37, 0.0 }
0x20e3   : > { %7304 = vadd.xlane.f32.xlu0 %v7303_v28  ;;  %v7752_v28 = vld [vmem:[%s14598_s29 + $0x20] sm:$0xff] }
0x20e5   : > { %v11211_v29 = vpop.eup %11210 }
0x20e6   : > { %v7465_v30 = vsel %vm2708_vm1, %v11211_v29, 0.0 }
0x20e7   : > { %7466 = vadd.xlane.f32.xlu1 %v7465_v30 }
0x2164   : > { %v6981_v47 = vpop.xlane.xlu0 %6980 }
0x2165   : > { %11212 = vrcp.f32 %v6981_v47 }
0x2168   : > { %v7143_v36 = vpop.xlane.xlu0 %7142 }
0x2169   : > { %11214 = vrcp.f32 %v7143_v36  ;;  %v9833_v36 = vld [vmem:[#allocation59] ss:$0 sm:$0xff] }
0x216c   : > { %v7305_v38 = vpop.xlane.xlu0 %7304 }
0x216d   : > { %11216 = vrcp.f32 %v7305_v38 }
0x2170   : > { %v7467_v39 = vpop.xlane.xlu1 %7466 }
0x2171   : > { %11218 = vrcp.f32 %v7467_v39 }
0x2172   : > { %v11213_v41 = vpop.eup %11212 }
0x2173   : > { %v6983_v42 = vmul.f32 %v11213_v41, %v11205_v25  ;;  %v7665_v25 = vld [vmem:[#allocation54 + $0x10] sm:$0xff]  ;;  %v7750_v41 = vld [vmem:[%s14598_s29 + $0x10] sm:$0xff] }
0x2175   : > { %10486 = vmatmul.mubr.msk.f32.vlgmr.msra.gmra.mxu0 %vm2708_vm1, %v6983_v42 }
0x2176   : > { %v11215_v40 = vpop.eup %11214  ;;  %10494 = vmatpush3.msra.mxu0 %v6892_v33  ;;  %10495 = vmatprep.mubr.msk.f32.mxu0 %vm12768_vm0, %v12767_v1 }
0x2177   : > { %10503 = vmatprep.subr.mxu0 %v12767_v1  ;;  %v7145_v45 = vmul.f32 %v11215_v40, %v11207_v26  ;;  %v7755_v26 = vld [vmem:[%s14598_s29 + $0x38] sm:$0xff]  ;;  %v7748_v40 = vld [vmem:[%s14598_s29] sm:$0xff] }
0x2179   : > { %10496 = vmatmul.mubr.msk.f32.vlgmr.msra.gmra.mxu0 %vm2708_vm1, %v7145_v45  ;;  %v7221_v46 = vadd.f32 %v7145_v45, %v6983_v42  ;;  %v7749_v42 = vld [vmem:[%s14598_s29 + $0x8] sm:$0xff]  ;;  %v9835_v45 = vld [vmem:[#allocation51] ss:$0 sm:$0xff] }
0x217a   : > { %v11217_v43 = vpop.eup %11216  ;;  %10504 = vmatpush3.msra.mxu0 %v6892_v33  ;;  %10505 = vmatprep.mubr.msk.f32.mxu0 %vm12768_vm0, %v12767_v1 }
0x217b   : > { %10513 = vmatprep.subr.mxu0 %v12767_v1  ;;  %v7307_v44 = vmul.f32 %v11217_v43, %v11209_v37  ;;  %v7753_v37 = vld [vmem:[%s14598_s29 + $0x28] sm:$0xff] }
0x217d   : > { %10506 = vmatmul.mubr.msk.f32.vlgmr.msra.gmra.mxu0 %vm2708_vm1, %v7307_v44  ;;  %v7383_v49 = vadd.f32 %v7307_v44, %v7221_v46 }
0x217e   : > { %v11219_v48 = vpop.eup %11218  ;;  %10514 = vmatpush3.msra.mxu0 %v6892_v33  ;;  %10515 = vmatprep.mubr.msk.f32.mxu0 %vm12768_vm0, %v12767_v1 }
0x217f   : > { %v7469_v51 = vmul.f32 %v11219_v48, %v11211_v29  ;;  %10529 = vmatprep.subr.mxu0 %v12767_v1  ;;  %v7751_v29 = vld [vmem:[%s14598_s29 + $0x18] sm:$0xff] }
0x2181   : > { %10516 = vmatmul.mubr.msk.f32.vlgmr.msra.gmra.mxu0 %vm2708_vm1, %v7469_v51  ;;  %v7545_v50 = vadd.f32 %v7469_v51, %v7383_v49  ;;  %v9837_v49 = vld [vmem:[#allocation53] ss:$0 sm:$0xff] }
0x2182   : > { %10537 = vmatprep.mubr.msk.f32.mxu0 %vm12768_vm0, %v12767_v1  ;;  %10530 = vmatpush3.msra.mxu0 %v7666_v24  ;;  %v9849_v24 = vld [vmem:[%s14599_s28 + $0x40] sm:$0xff] }
0x2183   : > { %v7546_v54 = vmul.f32 0.25, %v7545_v50  ;;  %10531 = vmatprep.subr.mxu0 %v12767_v1 }
0x2184   : > { %10532 = vmatpush3.msra.mxu0 %v7665_v25 }
0x2185   : > { %9834 = vst.msk [vmem:[%s13966_s10 + $0x8] sm:$0xff] %vm2708_vm1, %v7546_v54  ;;  %10533 = vmatprep.subr.mxu0 %v12767_v1  ;;  %s14602_s10 = sld [smem:[#allocation116_spill]] }
0x2235   : > { %v7053_v62 = vpop.f32.mrf.mxu0 }
0x2236   : > { %v7057_v6 = vmul.f32 %v13792_v52, %v7053_v62 }
0x2237   : > { %v10487_v63 = vpop.f32.mrf.mxu0 }
0x2239   : > { %v7215_v2 = vpop.f32.mrf.mxu0 }
0x223a   : > { %v7219_v5 = vmul.f32 %v13795_v53, %v7215_v2 }
0x223b   : > { %v10497_v3 = vpop.f32.mrf.mxu0 }
0x223c   : > { %v7220_v9 = vadd.f32 %v7219_v5, %v7057_v6  ;;  %v7939_v3 = vld [vmem:[%s14599_s28 + $0x18] sm:$0xff]  ;;  %v7938_v5 = vld [vmem:[%s14599_s28 + $0x10] sm:$0xff] }
0x223d   : > { %v7377_v4 = vpop.f32.mrf.mxu0 }
0x223e   : > { %v7381_v7 = vmul.f32 %v13808_v58, %v7377_v4  ;;  %v7937_v4 = vld [vmem:[%s14599_s28 + $0x8] sm:$0xff] }
0x223f   : > { %v10507_v8 = vpop.f32.mrf.mxu0 }
0x2240   : > { %v7382_v11 = vadd.f32 %v7381_v7, %v7220_v9 }
0x2241   : > { %v7539_v10 = vpop.f32.mrf.mxu0 }
0x2242   : > { %v7543_v13 = vmul.f32 %v13821_v60, %v7539_v10  ;;  %v9839_v10 = vld [vmem:[#allocation63] ss:$0 sm:$0xff] }
0x2243   : > { %v10517_v14 = vpop.f32.mrf.mxu0 }
0x2244   : > { %v7544_v12 = vadd.f32 %v7543_v13, %v7382_v11  ;;  %v9840_v13 = vld [vmem:[#allocation62] ss:$0 sm:$0xff] }
0x2246   : > { %10527 = vmatmul.mubr.msk.f32.vlgmr.msra.gmra.mxu1 %vm2960_vm4, %v7544_v12 }
0x2247   : > { %10556 = vmatprep.mubr.msk.f32.mxu1 %vm12768_vm0, %v12767_v1  ;;  %10541 = vmatpush3.msra.mxu1 %v7755_v26 }
0x2248   : > { %10542 = vmatprep.subr.mxu1 %v12767_v1 }
0x2249   : > { %10543 = vmatpush3.msra.mxu1 %v7754_v27 }
0x224a   : > { %10544 = vmatprep.subr.mxu1 %v12767_v1 }
0x224b   : > { %10545 = vmatpush3.msra.mxu1 %v7753_v37 }
0x224c   : > { %10546 = vmatprep.subr.mxu1 %v12767_v1 }
0x224d   : > { %10547 = vmatpush3.msra.mxu1 %v7752_v28  ;;  %v9854_v28 = vld [vmem:[#allocation71] ss:$0 sm:$0xff] }
0x224e   : > { %10548 = vmatprep.subr.mxu1 %v12767_v1 }
0x224f   : > { %10549 = vmatpush3.msra.mxu1 %v7751_v29 }
0x2250   : > { %10550 = vmatprep.subr.mxu1 %v12767_v1 }
0x2251   : > { %10551 = vmatpush3.msra.mxu1 %v7750_v41  ;;  %v8332_v41 = vld [vmem:[%s14600_s21 + $0x18] sm:$0xff] }
0x2252   : > { %10552 = vmatprep.subr.mxu1 %v12767_v1 }
0x2253   : > { %10553 = vmatpush3.msra.mxu1 %v7749_v42  ;;  %v9860_v42 = vld [vmem:[%s14600_s21 + $0x30] sm:$0xff] }
0x2254   : > { %10554 = vmatprep.subr.mxu1 %v12767_v1 }
0x2255   : > { %10555 = vmatpush3.msra.mxu1 %v7748_v40  ;;  %v8331_v40 = vld [vmem:[%s14600_s21 + $0x10] sm:$0xff] }
0x2256   : > { %10580 = vmatprep.subr.mxu1 %v12767_v1 }
0x2306   : > { %v7627_v53 = vpop.f32.mrf.mxu1 }
0x2307   : > { %v7628_v16 = vadd.f32 %v9830_v15, %v7627_v53  ;;  %v9846_v15 = vld [vmem:[%s14599_s28 + $0x38] sm:$0xff]  ;;  %v9845_v53 = vld [vmem:[%s14599_s28 + $0x30] sm:$0xff] }
0x2308   : > { %v10528_v17 = vpop.f32.mrf.mxu1 }
0x2309   : > { %v7631_v52 = vadd.f32 %v7628_v16, %v14114_v35  ;;  %v7664_v35 = vld [vmem:[#allocation54 + $0x8] sm:$0xff]  ;;  %v7936_v16 = vld [vmem:[%s14599_s28] sm:$0xff]  ;;  %v9844_v17 = vld [vmem:[%s14599_s28 + $0x28] sm:$0xff] }
0x230a   : > { %10534 = vmatpush3.msra.mxu0 %v7664_v35 }
0x230b   : > { %v7632_v58 = vsel %vm2960_vm4, %v7631_v52, 0.0  ;;  %10535 = vmatprep.subr.mxu0 %v12767_v1 }
0x230c   : > { %7633 = vadd.xlane.f32.xlu0 %v7632_v58  ;;  %10536 = vmatpush3.msra.mxu0 %v7663_v0 }
0x230d   : > { %10559 = vmatprep.subr.mxu0 %v12767_v1 }
0x2395   : > { %v7634_v18 = vpop.xlane.xlu0 %7633 }
0x2396   : > { %v7635_v21 = vmul.f32 0.03125, %v7634_v18  ;;  %v9852_v18 = vld [vmem:[%s14599_s28 + $0x58] sm:$0xff] }
0x2398   : > { %v7636_v60 = vsub.f32 %v7631_v52, %v7635_v21  ;;  %v9843_v52 = vld [vmem:[%s14599_s28 + $0x20] sm:$0xff] }
0x239a   : > { %v7637_v22 = vmul.f32 %v7636_v60, %v7636_v60 }
0x239c   : > { %v7638_v23 = vsel %vm2960_vm4, %v7637_v22, 0.0 }
0x239d   : > { %7639 = vadd.xlane.f32.xlu1 %v7638_v23  ;;  %v9850_v23 = vld [vmem:[%s14599_s28 + $0x48] sm:$0xff] }
0x2426   : > { %v7640_v30 = vpop.xlane.xlu1 %7639 }
0x2427   : > { %v7641_v31 = vmul.f32 0.03125, %v7640_v30 }
0x2429   : > { %v7642_v32 = vadd.f32 1e-05, %v7641_v31 }
0x242b   : > { %11220 = vrsqrt.f32 %v7642_v32 }
0x2438   : > { %v11221_v33 = vpop.eup %11220 }
0x2439   : > { %v7644_v47 = vmul.f32 %v11221_v33, %v7636_v60  ;;  %v9851_v60 = vld [vmem:[%s14599_s28 + $0x50] sm:$0xff] }
0x243b   : > { %v7652_v38 = vmul.f32 %v9832_v34, %v7644_v47 }
0x243d   : > { %v7660_v39 = vadd.f32 %v9833_v36, %v7652_v38 }
0x243f   : > { %10538 = vmatmul.mubr.msk.f32.vlgmr.msra.gmra.mxu0 %vm2960_vm4, %v7660_v39 }
0x2440   : > { %10561 = vmatprep.mubr.msk.f32.mxu0 %vm12768_vm0, %v12767_v1 }
0x24ff   : > { %v7743_v43 = vpop.f32.mrf.mxu0 }
0x2500   : > { %v7744_v44 = vadd.f32 %v9835_v45, %v7743_v43  ;;  %v9859_v45 = vld [vmem:[%s14600_s21 + $0x28] sm:$0xff]  ;;  %v8329_v43 = vld [vmem:[%s14600_s21] sm:$0xff] }
0x2501   : > { %v10539_v46 = vpop.f32.mrf.mxu0 }
0x2502   : > { %v7747_v48 = vmax.f32 %v7744_v44, 0.0  ;;  %v9867_v44 = vld [vmem:[%s14600_s21 + $0x58] sm:$0xff] }
0x2504   : > { %10557 = vmatmul.mubr.msk.f32.vlgmr.msra.gmra.mxu1 %vm5695_vm5, %v7747_v48 }
0x2505   : > { %10588 = vmatprep.mubr.msk.f32.mxu1 %vm12768_vm0, %v12767_v1  ;;  %10581 = vmatpush3.msra.mxu1 %v7939_v3 }
0x2506   : > { %10582 = vmatprep.subr.mxu1 %v12767_v1 }
0x2507   : > { %10583 = vmatpush3.msra.mxu1 %v7938_v5 }
0x2508   : > { %10584 = vmatprep.subr.mxu1 %v12767_v1 }
0x2509   : > { %10585 = vmatpush3.msra.mxu1 %v7937_v4 }
0x250a   : > { %10586 = vmatprep.subr.mxu1 %v12767_v1 }
0x250b   : > { %10587 = vmatpush3.msra.mxu1 %v7936_v16  ;;  %v8653_v16 = vld [vmem:[%s14601_s6] sm:$0xff] }
0x250c   : > { %10602 = vmatprep.subr.mxu1 %v12767_v1 }
0x25c4   : > { %v7832_v51 = vpop.f32.mrf.mxu1 }
0x25c5   : > { %v7833_v50 = vadd.f32 %v9837_v49, %v7832_v51  ;;  %v9866_v49 = vld [vmem:[%s14600_s21 + $0x50] sm:$0xff] }
0x25c6   : > { %v10558_v54 = vpop.f32.mrf.mxu1 }
0x25c7   : > { %v7836_v55 = vadd.f32 %v7833_v50, %v7660_v39  ;;  %v9861_v39 = vld [vmem:[%s14600_s21 + $0x38] sm:$0xff]  ;;  %v9865_v54 = vld [vmem:[%s14600_s21 + $0x48] sm:$0xff] }
0x25c9   : > { %v7837_v57 = vsel %vm2960_vm4, %v7836_v55, 0.0 }
0x25ca   : > { %7838 = vadd.xlane.f32.xlu0 %v7837_v57  ;;  %v8656_v57 = vld [vmem:[%s14601_s6 + $0x18] sm:$0xff] }
0x2653   : > { %v7839_v59 = vpop.xlane.xlu0 %7838 }
0x2654   : > { %v7840_v61 = vmul.f32 0.03125, %v7839_v59  ;;  %v8746_v59 = vld [vmem:[%s14602_s10 + $0x18] sm:$0xff] }
0x2656   : > { %v7841_v62 = vsub.f32 %v7836_v55, %v7840_v61  ;;  %v9864_v55 = vld [vmem:[%s14600_s21 + $0x40] sm:$0xff]  ;;  %v8655_v61 = vld [vmem:[%s14601_s6 + $0x10] sm:$0xff] }
0x2658   : > { %v7842_v63 = vmul.f32 %v7841_v62, %v7841_v62 }
0x265a   : > { %v7843_v2 = vsel %vm2960_vm4, %v7842_v63, 0.0 }
0x265b   : > { %7844 = vadd.xlane.f32.xlu1 %v7843_v2 }
0x26e4   : > { %v7845_v6 = vpop.xlane.xlu1 %7844 }
0x26e5   : > { %v7846_v7 = vmul.f32 0.03125, %v7845_v6 }
0x26e7   : > { %v7847_v8 = vadd.f32 1e-05, %v7846_v7  ;;  %v9869_v7 = vld [vmem:[#allocation72] ss:$0 sm:$0xff] }
0x26e9   : > { %11222 = vrsqrt.f32 %v7847_v8 }
0x26f6   : > { %v11223_v9 = vpop.eup %11222 }
0x26f7   : > { %v7849_v11 = vmul.f32 %v11223_v9, %v7841_v62  ;;  %v8745_v62 = vld [vmem:[%s14602_s10 + $0x10] sm:$0xff] }
0x26f9   : > { %v7857_v14 = vmul.f32 %v9839_v10, %v7849_v11 }
0x26fb   : > { %v14224_v12 = vadd.f32 %v9840_v13, %v7857_v14 }
0x26fd   : > { %10560 = vmatpush3.msra.mxu0 %v14224_v12 }
0x26fe   : > { %10562 = vmatmul.mubr.msk.f32.vlgmr.msra.gmra.mxu0 %vm2708_vm1, %v13660_v19  ;;  %10564 = vmatprep.subr.mxu0 %v12767_v1 }
0x26ff   : > { %10565 = vmatpush3.msra.mxu0 %v14224_v12  ;;  %10566 = vmatprep.mubr.msk.f32.mxu0 %vm12768_vm0, %v12767_v1 }
0x2700   : > { %10569 = vmatprep.subr.mxu0 %v12767_v1 }
0x2702   : > { %10567 = vmatmul.mubr.msk.f32.vlgmr.msra.gmra.mxu0 %vm2708_vm1, %v13663_v20 }
0x2703   : > { %10570 = vmatpush3.msra.mxu0 %v9846_v15  ;;  %10577 = vmatprep.mubr.msk.f32.mxu0 %vm12768_vm0, %v12767_v1  ;;  %v8654_v15 = vld [vmem:[%s14601_s6 + $0x8] sm:$0xff]  ;;  %s8835_s6 = scalar_lea.sflag [#allocation5], %s13521_s11 }
0x2704   : > { %10571 = vmatprep.subr.mxu0 %v12767_v1 }
0x2705   : > { %10572 = vmatpush3.msra.mxu0 %v9845_v53  ;;  %v8744_v53 = vld [vmem:[%s14602_s10 + $0x8] sm:$0xff] }
0x2706   : > { %10573 = vmatprep.subr.mxu0 %v12767_v1 }
0x2707   : > { %10574 = vmatpush3.msra.mxu0 %v9844_v17  ;;  %v8743_v17 = vld [vmem:[%s14602_s10] sm:$0xff] }
0x2708   : > { %10575 = vmatprep.subr.mxu0 %v12767_v1 }
0x2709   : > { %10576 = vmatpush3.msra.mxu0 %v9843_v52 }
0x270a   : > { %10591 = vmatprep.subr.mxu0 %v12767_v1 }
0x27be   : > { %v7932_v20 = vpop.f32.mrf.mxu0 }
0x27bf   : > { %10589 = vmatmul.mubr.msk.f32.vlgmr.msra.gmra.mxu1 %vm2960_vm4, %v7932_v20 }
0x27c0   : > { %v10563_v58 = vpop.f32.mrf.mxu0  ;;  %10604 = vmatprep.mubr.msk.f32.mxu1 %vm12768_vm0, %v12767_v1 }
0x27c2   : > { %v8006_v21 = vpop.f32.mrf.mxu0 }
0x27c3   : > { %10578 = vmatmul.mubr.msk.f32.vlgmr.msra.gmra.mxu0 %vm2960_vm4, %v8006_v21 }
0x27c4   : > { %10592 = vmatpush3.msra.mxu0 %v9852_v18  ;;  %v10568_v22 = vpop.f32.mrf.mxu0  ;;  %10599 = vmatprep.mubr.msk.f32.mxu0 %vm12768_vm0, %v12767_v1 }
0x27c5   : > { %10593 = vmatprep.subr.mxu0 %v12767_v1 }
0x27c6   : > { %10594 = vmatpush3.msra.mxu0 %v9851_v60 }
0x27c7   : > { %10595 = vmatprep.subr.mxu0 %v12767_v1 }
0x27c8   : > { %10596 = vmatpush3.msra.mxu0 %v9850_v23 }
0x27c9   : > { %10597 = vmatprep.subr.mxu0 %v12767_v1 }
0x27ca   : > { %10598 = vmatpush3.msra.mxu0 %v9849_v24 }
0x27cb   : > { %10600 = vmatmul.mubr.msk.f32.vlgmr.msra.gmra.mxu0 %vm2960_vm4, %v14224_v12  ;;  %10607 = vmatprep.subr.mxu0 %v12767_v1 }
0x27cc   : > { %10609 = vmatprep.mubr.msk.f32.mxu0 %vm12768_vm0, %v12767_v1 }
0x287f   : > { %v8157_v25 = vpop.f32.mrf.mxu1 }
0x2881   : > { %v10590_v35 = vpop.f32.mrf.mxu1 }
0x2883   : > { %v8084_v0 = vpop.f32.mrf.mxu0 }
0x2884   : > { %v8158_v27 = vadd.f32 %v8157_v25, %v8084_v0 }
0x2885   : > { %v10579_v26 = vpop.f32.mrf.mxu0 }
0x288b   : > { %v8235_v37 = vpop.f32.mrf.mxu0 }
0x288c   : > { %v8239_v29 = vadd.f32 %v8235_v37, %v8158_v27 }
0x288d   : > { %v10601_v30 = vpop.f32.mrf.mxu0 }
0x288e   : > { %v8247_v31 = vadd.f32 %v9854_v28, %v8239_v29 }
0x2890   : > { %v9855_v32 = vmul.f32 -1.442695, %v8247_v31 }
0x2892   : > { %11224 = vpow2.f32 %v9855_v32 }
0x289f   : > { %v11225_v33 = vpop.eup %11224 }
0x28a0   : > { %v8251_v34 = vadd.f32 1.0, %v11225_v33 }
0x28a2   : > { %11226 = vrcp.f32 %v8251_v34 }
0x28af   : > { %v11227_v47 = vpop.eup %11226 }
0x28b0   : > { %8255 = vrot.lane.b32.xlu0 %v11227_v47, %s12769_s12 }
0x2922   : > { %v8256_v36 = vpop.permute.xlu0 %8255 }
0x2923   : > { %v8258_v38 = vmul.f32 %v8256_v36, %v8247_v31 }
0x2925   : > { %10603 = vmatpush3.msra.mxu1 %v8258_v38  ;;  %10608 = vmatpush3.msra.mxu0 %v8258_v38 }
0x2926   : > { %10610 = vmatmul.mubr.msk.f32.vlgmr.msra.gmra.mxu0 %vm2708_vm1, %v13660_v19  ;;  %10605 = vmatmul.mubr.msk.f32.vlgmr.msra.gmra.mxu1 %vm2708_vm1, %v13716_v56  ;;  %v9858_v19 = vld [vmem:[%s14600_s21 + $0x20] sm:$0xff]  ;;  %v8330_v56 = vld [vmem:[%s14600_s21 + $0x8] sm:$0xff] }
0x2927   : > { %10612 = vmatprep.subr.mxu1 %v12767_v1  ;;  %10623 = vmatprep.subr.mxu0 %v12767_v1 }
0x2928   : > { %10613 = vmatpush3.msra.mxu1 %v9861_v39  ;;  %10624 = vmatpush3.msra.mxu0 %v8332_v41 }
0x2929   : > { %10614 = vmatprep.subr.mxu1 %v12767_v1  ;;  %10625 = vmatprep.subr.mxu0 %v12767_v1 }
0x292a   : > { %10615 = vmatpush3.msra.mxu1 %v9860_v42  ;;  %10626 = vmatpush3.msra.mxu0 %v8331_v40 }
0x292b   : > { %10616 = vmatprep.subr.mxu1 %v12767_v1  ;;  %10620 = vmatprep.mubr.msk.f32.mxu1 %vm12768_vm0, %v12767_v1 }
0x292c   : > { %10617 = vmatpush3.msra.mxu1 %v9859_v45  ;;  %10627 = vmatprep.subr.mxu0 %v12767_v1 }
0x292d   : > { %10618 = vmatprep.subr.mxu1 %v12767_v1  ;;  %10631 = vmatprep.mubr.msk.f32.mxu0 %vm12768_vm0, %v12767_v1 }
0x292e   : > { %10619 = vmatpush3.msra.mxu1 %v9858_v19  ;;  %10628 = vmatpush3.msra.mxu0 %v8330_v56 }
0x292f   : > { %10634 = vmatprep.subr.mxu1 %v12767_v1  ;;  %10629 = vmatprep.subr.mxu0 %v12767_v1 }
0x2930   : > { %10630 = vmatpush3.msra.mxu0 %v8329_v43 }
0x2931   : > { %10645 = vmatprep.subr.mxu0 %v12767_v1 }
0x29e6   : > { %v8399_v46 = vpop.f32.mrf.mxu0  ;;  %v8325_v48 = vpop.f32.mrf.mxu1 }
0x29e7   : > { %10621 = vmatmul.mubr.msk.f32.vlgmr.msra.gmra.mxu1 %vm2960_vm4, %v8399_v46  ;;  %10632 = vmatmul.mubr.msk.f32.vlgmr.msra.gmra.mxu0 %vm2960_vm4, %v8325_v48 }
0x29e8   : > { %10635 = vmatpush3.msra.mxu1 %v9867_v44  ;;  %v10611_v51 = vpop.f32.mrf.mxu0  ;;  %10642 = vmatprep.mubr.msk.f32.mxu1 %vm12768_vm0, %v12767_v1  ;;  %v10606_v50 = vpop.f32.mrf.mxu1 }
0x29e9   : > { %10636 = vmatprep.subr.mxu1 %v12767_v1  ;;  %10653 = vmatprep.mubr.msk.f32.mxu0 %vm12768_vm0, %v12767_v1 }
0x29ea   : > { %10637 = vmatpush3.msra.mxu1 %v9866_v49  ;;  %10646 = vmatpush3.msra.mxu0 %v8656_v57 }
0x29eb   : > { %10638 = vmatprep.subr.mxu1 %v12767_v1  ;;  %10647 = vmatprep.subr.mxu0 %v12767_v1 }
0x29ec   : > { %10639 = vmatpush3.msra.mxu1 %v9865_v54  ;;  %10648 = vmatpush3.msra.mxu0 %v8655_v61 }
0x29ed   : > { %10640 = vmatprep.subr.mxu1 %v12767_v1  ;;  %10649 = vmatprep.subr.mxu0 %v12767_v1 }
0x29ee   : > { %10641 = vmatpush3.msra.mxu1 %v9864_v55  ;;  %10650 = vmatpush3.msra.mxu0 %v8654_v15 }
0x29ef   : > { %10643 = vmatmul.mubr.msk.f32.vlgmr.msra.gmra.mxu1 %vm2960_vm4, %v8258_v38  ;;  %10656 = vmatprep.subr.mxu1 %v12767_v1 }
0x29f0   : > { %10664 = vmatprep.mubr.msk.f32.mxu1 %vm12768_vm0, %v12767_v1  ;;  %10657 = vmatpush3.msra.mxu1 %v8746_v59 }
0x29f1   : > { %10658 = vmatprep.subr.mxu1 %v12767_v1  ;;  %10651 = vmatprep.subr.mxu0 %v12767_v1 }
0x29f2   : > { %10659 = vmatpush3.msra.mxu1 %v8745_v62  ;;  %10652 = vmatpush3.msra.mxu0 %v8653_v16 }
0x29f3   : > { %10660 = vmatprep.subr.mxu1 %v12767_v1 }
0x29f4   : > { %10661 = vmatpush3.msra.mxu1 %v8744_v53 }
0x29f5   : > { %10662 = vmatprep.subr.mxu1 %v12767_v1 }
0x29f6   : > { %10663 = vmatpush3.msra.mxu1 %v8743_v17 }
0x2aa7   : > { %v8477_v63 = vpop.f32.mrf.mxu1  ;;  %v8550_v2 = vpop.f32.mrf.mxu0 }
0x2aa8   : > { %v8551_v4 = vadd.f32 %v8550_v2, %v8477_v63 }
0x2aa9   : > { %v10622_v3 = vpop.f32.mrf.mxu1  ;;  %v10633_v5 = vpop.f32.mrf.mxu0 }
0x2aaf   : > { %v8628_v6 = vpop.f32.mrf.mxu1 }
0x2ab0   : > { %v8632_v8 = vadd.f32 %v8628_v6, %v8551_v4 }
0x2ab1   : > { %v10644_v9 = vpop.f32.mrf.mxu1 }
0x2ab2   : > { %v8640_v10 = vadd.f32 %v9869_v7, %v8632_v8 }
0x2ab4   : > { %v9870_v11 = vmul.f32 -1.442695, %v8640_v10 }
0x2ab6   : > { %11228 = vpow2.f32 %v9870_v11 }
0x2ac3   : > { %v11229_v13 = vpop.eup %11228 }
0x2ac4   : > { %v8644_v14 = vadd.f32 1.0, %v11229_v13 }
0x2ac6   : > { %11230 = vrcp.f32 %v8644_v14 }
0x2ad3   : > { %v11231_v52 = vpop.eup %11230 }
0x2ad4   : > { %8648 = vrot.lane.b32.xlu1 %v11231_v52, %s12769_s12  ;;  %s12771_s12 = smov [#allocation80]  }
0x2ad5   : > { %s12452_s9 = sshll.u32 %s12771_s12, 4  ;;  %s12453_s9 = int_to_ptr.vmem [resolvable:$false] %s12452_s9 }
0x2ad6   : > { %s12454_s10 = scalar_lea.vmem %s12453_s9, 256  ;;  %p12455_p3 = scmp.lt.s32.totalorder %s8863_s2, %s12453_s9 }
0x2ad7   : > { %p12456_p2 = scmp.lt.s32.totalorder %s12454_s10, %s12448_s7 }
0x2ad9   : > { %p12457_p11 = por %p12456_p2, %p12455_p3 }
0x2adb   : > { %p12458_p13 = pnand %p12457_p11, %p12451_p6 }
0x2b46   : > { %v8649_v20 = vpop.permute.xlu1 %8648 }
0x2b47   : > { %v8651_v58 = vmul.f32 %v8649_v20, %v8640_v10 }
0x2b49   : > { %v8652_v18 = vadd.f32 %v8651_v58, %v14224_v12 }
0x2b4b   : > { %10654 = vmatmul.mubr.msk.f32.vlgmr.msra.gmra.mxu0 %vm2960_vm4, %v8652_v18  ;;  %10665 = vmatmul.mubr.msk.f32.vlgmr.msra.gmra.mxu1 %vm2960_vm4, %v8652_v18  ;;  %8830 = vst.msk [vmem:[%s2663_s5] sm:$0xff] %vm2960_vm4, %v8652_v18 }
0x2b4c   : > { %12461 = shalt.err (!%p12458_p13)
}
0x2b4d   : > { %s12462_s13 = scalar_lea.hbm %s8860_s4, 128  ;;  %s12466_s5 = scalar_lea.hbm %s13099_s8, 256 }
0x2b4e   : > { %p12463_p5 = scmp.ne.s32.totalorder %s8860_s4, %s12462_s13  ;;  %p12467_p10 = scmp.lt.s32.totalorder %s8860_s4, %s13099_s8 }
0x2b4f   : > { %p12468_p1 = scmp.lt.s32.totalorder %s12466_s5, %s12462_s13 }
0x2b50   : > { %p12464_p8 = pnand %p12463_p5, %p14603_p4 }
0x2b51   : > { %p12469_p12 = por %p12468_p1, %p12467_p10 }
0x2b52   : > { %p12465_p9 = pneg %p12464_p8 }
0x2b54   : > { %p12470_p7 = pnand %p12469_p12, %p12465_p9 }
0x2b56   : > { %12473 = shalt.err (!%p12470_p7)
}
0x2b57   : > { %10863 = dma.vmem_to_hbm [thread:$0]  (%p14603_p4), %s8863_s2, 128, %s8860_s4, %s8835_s6   ;;  %v9871_v1 = vld [vmem:[#allocation69] ss:$0 sm:$0xff]  ;;  %v9874_v12 = vld [vmem:[#allocation2] ss:$0 sm:$0xff]  ;;  %vm8832_vm0 = vcmask 7168  }
0x2b58   : > { %s14604_s9 = sld [smem:[#allocation169_spill]]  ;;  %s2670_s13 = scalar_lea.vmem [#allocation81], %s13524_s3 }
0x2b59   : > { %s14605_s7 = sld [smem:[#allocation168_spill]]  ;;  %s8875_s2 = sshll.u32 %s2670_s13, 4  ;;  %s14352_s2 = int_to_ptr.vmem [resolvable:$true] %s8875_s2 }
0x2b5a   : > { %s14606_s4 = sshll.u32 %s13929_s0, 3  ;;  %s8840_s12 = scalar_lea.sflag [#allocation82], %s13521_s11 }
0x2b5b   : > { %s12474_s5 = scalar_lea.vmem %s14352_s2, 128  ;;  %s12772_s3 = smov [#allocation81]  }
0x2b5c   : > { %p12475_p0 = scmp.ne.s32.totalorder %s14352_s2, %s12474_s5  ;;  %s12478_s27 = sshll.u32 %s12772_s3, 4  ;;  %s12479_s27 = int_to_ptr.vmem [resolvable:$false] %s12478_s27 }
0x2b5d   : > { %s12480_s0 = scalar_lea.vmem %s12479_s27, 256  ;;  %p12481_p2 = scmp.lt.s32.totalorder %s14352_s2, %s12479_s27 }
0x2b5e   : > { %s2691_s6 = scalar_lea.vmem %s14604_s9, %s14606_s4  ;;  %p12476_p6 = pnand %p12475_p0, %p14603_p4 }
0x2b5f   : > { %s14350_s10 = scalar_lea.hbm %s14605_s7, %s9879_s1  ;;  %p12482_p11 = scmp.lt.s32.totalorder %s12480_s0, %s12474_s5 }
0x2b60   : > { %p12477_p3 = pneg %p12476_p6 }
0x2b61   : > { %p12483_p13 = por %p12482_p11, %p12481_p2 }
0x2b63   : > { %p12484_p5 = pnand %p12483_p13, %p12477_p3 }
0x2c0b   : > { %v8733_v21 = vpop.f32.mrf.mxu0  ;;  %v8820_v60 = vpop.f32.mrf.mxu1 }
0x2c0c   : > { %v8734_v22 = vadd.f32 %v9871_v1, %v8733_v21  ;;  %v8821_v23 = vadd.f32 %v9874_v12, %v8820_v60 }
0x2c0d   : > { %v10655_v24 = vpop.f32.mrf.mxu0  ;;  %v10666_v25 = vpop.f32.mrf.mxu1 }
0x2c0e   : > { %v9873_v35 = vmul.f32 -1.442695, %v8734_v22  ;;  %v9876_v0 = vmul.f32 -1.442695, %v8821_v23 }
0x2c10   : > { %11232 = vpow2.f32 %v9873_v35 }
0x2c11   : > { %11234 = vpow2.f32 %v9876_v0 }
0x2c1d   : > { %v11233_v26 = vpop.eup %11232 }
0x2c1e   : > { %v11235_v27 = vpop.eup %11234  ;;  %v8740_v37 = vadd.f32 1.0, %v11233_v26 }
0x2c1f   : > { %v8827_v28 = vadd.f32 1.0, %v11235_v27 }
0x2c20   : > { %11236 = vrcp.f32 %v8740_v37 }
0x2c21   : > { %11238 = vrcp.f32 %v8827_v28 }
0x2c2d   : > { %v11237_v29 = vpop.eup %11236 }
0x2c2e   : > { %v11239_v30 = vpop.eup %11238  ;;  %8831 = vst.msk [vmem:[%s2670_s13] sm:$0xff] %vm2708_vm1, %v11237_v29 }
0x2c2f   : > { %8833 = vst.msk [vmem:[%s2691_s6] sm:$0xff] %vm8832_vm0, %v11239_v30 }
0x2c30   : > { %12487 = shalt.err (!%p12484_p5)
}
0x2c31   : > { %s12488_s11 = scalar_lea.hbm %s14350_s10, 128  ;;  %s12492_s1 = scalar_lea.hbm %s14605_s7, 256 }
0x2c32   : > { %p12489_p8 = scmp.ne.s32.totalorder %s14350_s10, %s12488_s11  ;;  %p12493_p1 = scmp.lt.s32.totalorder %s14350_s10, %s14605_s7 }
0x2c33   : > { %p12494_p12 = scmp.lt.s32.totalorder %s12492_s1, %s12488_s11 }
0x2c34   : > { %p12490_p9 = pnand %p12489_p8, %p14603_p4 }
0x2c35   : > { %p12495_p7 = por %p12494_p12, %p12493_p1 }
0x2c36   : > { %p12491_p10 = pneg %p12490_p9 }
0x2c38   : > { %p12496_p0 = pnand %p12495_p7, %p12491_p10 }
0x2c3a   : > { %12499 = shalt.err (!%p12496_p0)
}
0x2c3b   : > { %10864 = dma.vmem_to_hbm [thread:$0]  (%p14603_p4), %s14352_s2, 128, %s14350_s10, %s8840_s12  }
0x2c3c PF: > { %s14607_s9 = sld [smem:[#allocation171_spill]]  ;;  %p14610_p3 = scmp.ge.s32.totalorder %s12646_s23, 2 }
0x2c3d   : > { %s14608_s13 = sld [smem:[#allocation174_spill]] }
0x2c42   : > { %s8893_s4 = sand.u32 1, %s14607_s9  }
0x2c43   : > { %p14609_p6 = scmp.ne.s32.totalorder %s14608_s13, 0  ;;  %s8894_s6 = scalar_lea.sflag [#allocation5], %s8893_s4 }
0x2c45   : > { %p10875_p2 = pnand %p14610_p3, %p14609_p6 }
0x2c47   : > { %p10876_p11 = pneg %p10875_p2 }
0x2c49   : > { %12625 = dma.done.wait (%p10876_p11), %s8894_s6, 128  }
0x2c4a   : > { %12627 = vsyncadd (%p10876_p11), %s8894_s6, 4294967168  ;;  %s8903_s5 = scalar_lea.sflag [#allocation82], %s8893_s4 }
0x2c4b   : > { %12629 = dma.done.wait (%p10876_p11), %s8903_s5, 128  }
0x2c4c   : > { %12631 = vsyncadd (%p10876_p11), %s8903_s5, 4294967168  ;;  %s14611_s23 = sld [smem:[#allocation172_spill]]  ;;  %s14613_s0 = smov %s12638_s20 }
0x2c4d   : > { %s14612_s16 = sld [smem:[#allocation173_spill]]  ;;  %s14614_s20 = smov %s12642_s22 }
0x2c52   : > { %p181_p4 = scmp.ge.s32.totalorder %s14611_s23, 4  }
0x2c53   : > { %s14615_s22 = smov %s14612_s16 }
0x2c54   :  { %183 = sbr.rel (!%p181_p4) target bundleno = 171 (0xab), region = 646 }
0x2c59   :  { %8923 = vsyncpa [#allocation4], 1 }
0x2c5a   :  { %8925 = vsyncpa [#allocation4 + $0x1], 1 }
0x2c5b   :  { %8926 = vsyncpa [#allocation7], 1 }
0x2c5c   :  { %8928 = vsyncpa [#allocation7 + $0x1], 1 }
0x2c5d   :  { %8929 = vsyncpa [#allocation10], 1 }
0x2c5e   :  { %8930 = vsyncpa [#allocation13], 1 }
0x2c5f   :  { %8931 = vsyncpa [#allocation16], 1 }
0x2c60   :  { %8932 = vsyncpa [#allocation19], 1 }
0x2c61   :  { %8933 = vsyncpa [#allocation22], 1 }
0x2c62   :  { %8934 = vsyncpa [#allocation25], 1 }
0x2c63   :  { %8935 = vsyncpa [#allocation28], 1 }
0x2c64   :  { %8936 = vsyncpa [#allocation31], 1 }
0x2c65   :  { %8937 = vsyncpa [#allocation34], 1 }
0x2c66   :  { %8938 = vsyncpa [#allocation37], 1 }
0x2c67   :  { %8939 = vsyncpa [#allocation40], 1 }
0x2c68   :  { %8940 = vsyncpa [#allocation43], 1 }
0x2c69   :  { %8941 = vsyncpa [#allocation46], 1 }
0x2c6a   :  { %8942 = vsyncpa [#allocation49], 1 }
0x2c6b   :  { %8943 = vsyncpa [#allocation52], 1 }
0x2c6c   :  { %8944 = vsyncpa [#allocation55], 1 }
0x2c6d   :  { %8945 = vsyncpa [#allocation58], 1 }
0x2c6e   :  { %8946 = vsyncpa [#allocation61], 1 }
0x2c6f   :  { %8947 = vsyncpa [#allocation64], 1 }
0x2c70   :  { %8948 = vsyncpa [#allocation67], 1 }
0x2c71   :  { %8949 = vsyncpa [#allocation70], 1 }
0x2c72   :  { %8950 = vsyncpa [#allocation73], 1 }
0x2c73   :  { %8951 = vsyncpa [#allocation76], 1 }
0x2c74   :  { %8952 = vsyncpa [#allocation79], 1 }
0x2c75   :  { %8953 = vsyncpa [#allocation5], 1 }
0x2c76   :  { %8955 = vsyncpa [#allocation5 + $0x1], 1 }
0x2c77   :  { %8956 = vsyncpa [#allocation82], 1 }
0x2c78   :  { %8958 = vsyncpa [#allocation82 + $0x1], 1 }

</bundles_post_ra>
